<compile_context>
chip_gen: v6e
topology: v6e:2x2x1
jax: 0.10.0
libtpu: 0.0.40
codegen_flags: <defaults>
</compile_context>

<pallas_src>
import jax
import jax.numpy as jnp
from jax.experimental import pallas as pl
from jax.experimental.pallas import tpu as pltpu

EPS = 1e-5        # nn.BatchNorm2d default eps
CPAD = 128        # all layer outputs padded to 128 lanes (lane-dense stores)
TM_CAP = 512      # max rows per M tile

# Sub-pixel decomposition of ConvTranspose2d(k=3, s=2, p=1, output_padding=1):
# output parity -> tuple of (forward-kernel index, input shift) along one axis.
_TAPS = {0: ((1, 0),), 1: ((0, 0), (2, 1))}


# ------------------------------ Pallas kernel --------------------------------

def _conv_mm_kernel(a_ref, w_ref, b_ref, o_ref, stats_ref):
    """out = relu(A @ W + bias); epilogue emits per-tile BN partial stats.

    a: (tm, K) bf16   w: (K, 128) bf16 (resident)   bias: (1, 128) f32
    o: (tm, 128) f32  stats: (8, 128) f32, row0 = sum, row1 = sum of squares.
    """
    acc = jnp.dot(a_ref[...], w_ref[...], preferred_element_type=jnp.float32)
    acc = jnp.maximum(acc + b_ref[...], 0.0)
    o_ref[...] = acc
    s = jnp.sum(acc, axis=0, keepdims=True)
    sq = jnp.sum(acc * acc, axis=0, keepdims=True)
    rows = jax.lax.broadcasted_iota(jnp.int32, (8, CPAD), 0)
    stats_ref[...] = jnp.where(
        rows == 0, jnp.broadcast_to(s, (8, CPAD)),
        jnp.where(rows == 1, jnp.broadcast_to(sq, (8, CPAD)), 0.0))


def _conv_call(a, w, bias, cout):
    """Tiled matmul + bias + ReLU (+ BN partial stats).

    a: (M, K) bf16, w: (K, 128) bf16, bias: (1, 128) f32.
    Returns (act (M, cout) f32, channel sums (cout,), channel sumsq (cout,)).
    """
    m, k = a.shape
    if m <= TM_CAP:
        tm, mp = m, m
    else:
        tm = TM_CAP
        mp = ((m + tm - 1) // tm) * tm          # pad rows to a 512 multiple
    pad = mp - m
    if pad:
        a = jnp.pad(a, ((0, pad), (0, 0)))
    grid_m = mp // tm

    out, stats = pl.pallas_call(
        _conv_mm_kernel,
        grid=(grid_m,),
        in_specs=[
            pl.BlockSpec((tm, k), lambda i: (i, 0)),       # stream A tiles
            pl.BlockSpec((k, CPAD), lambda i: (0, 0)),     # resident weights
            pl.BlockSpec((1, CPAD), lambda i: (0, 0)),     # resident bias
        ],
        out_specs=[
            pl.BlockSpec((tm, CPAD), lambda i: (i, 0)),
            pl.BlockSpec((8, CPAD), lambda i: (i, 0)),
        ],
        out_shape=[
            jax.ShapeDtypeStruct((mp, CPAD), jnp.float32),
            jax.ShapeDtypeStruct((grid_m * 8, CPAD), jnp.float32),
        ],
        compiler_params=pltpu.CompilerParams(
            dimension_semantics=("parallel",),             # megacore / 2x TC
            vmem_limit_bytes=32 * 1024 * 1024,
        ),
    )(a, w, bias)

    st = stats.reshape(grid_m, 8, CPAD)
    sums = jnp.sum(st[:, 0, :cout], axis=0)
    sqs = jnp.sum(st[:, 1, :cout], axis=0)
    if pad:
        # Padded (all-zero) A rows contribute exactly relu(bias) per row.
        z = jnp.maximum(bias[0, :cout], 0.0)
        sums = sums - pad * z
        sqs = sqs - pad * z * z
    return out[:m, :cout], sums, sqs


# ------------------------------- JAX glue ------------------------------------

def _shift_down(x, axis):
    """y[..., j, ...] = x[..., j+1, ...], zero-filled at the trailing edge."""
    pads = [(0, 0)] * x.ndim
    pads[axis] = (0, 1)
    return jax.lax.slice_in_dim(jnp.pad(x, pads), 1, x.shape[axis] + 1, axis=axis)


def _bn_scale_shift(sums, sumsqs, count, gamma, beta):
    """Training-mode BN: per-channel affine (y = x*scale + shift)."""
    mean = sums / count
    var = jnp.maximum(sumsqs / count - mean * mean, 0.0)   # biased variance
    inv = jax.lax.rsqrt(var + EPS)
    scale = gamma * inv
    shift = beta - mean * scale
    return scale, shift


def _apply_s1(x, w, bias, cout, scale=None, shift=None):
    """ConvTranspose2d(k=3, s=1, p=1) + ReLU, with the previous layer's BN
    affine folded into the input prep (applied before zero padding)."""
    if scale is not None:
        x = x * scale + shift
    n, h, ww, cin = x.shape
    xp = jnp.pad(x.astype(jnp.bfloat16), ((0, 0), (1, 1), (1, 1), (0, 0)))
    cols = [xp[:, kh:kh + h, kw:kw + ww, :] for kh in range(3) for kw in range(3)]
    a = jnp.concatenate(cols, axis=-1).reshape(n * h * ww, 9 * cin)
    out, s, q = _conv_call(a, w, bias, cout)
    return out.reshape(n, h, ww, cout), s, q


def _apply_s2(x, w_phases, bias, cout, scale=None, shift=None):
    """ConvTranspose2d(k=3, s=2, p=1, output_padding=1) + ReLU via a 4-phase
    sub-pixel decomposition (no zero-dilated input -> ~4x fewer MACs/bytes)."""
    if scale is not None:
        x = x * scale + shift
    n, h, ww, _ = x.shape
    xb = x.astype(jnp.bfloat16)
    outs = {}
    tot_s = None
    tot_q = None
    idx = 0
    for py in (0, 1):
        for px in (0, 1):
            pieces = []
            for _, sy in _TAPS[py]:
                xh = _shift_down(xb, 1) if sy else xb
                for _, sx in _TAPS[px]:
                    pieces.append(_shift_down(xh, 2) if sx else xh)
            a = jnp.concatenate(pieces, axis=-1).reshape(n * h * ww, -1)
            o, s, q = _conv_call(a, w_phases[idx], bias, cout)
            outs[(py, px)] = o.reshape(n, h, ww, cout)
            tot_s = s if tot_s is None else tot_s + s
            tot_q = q if tot_q is None else tot_q + q
            idx += 1
    top = jnp.stack([outs[(0, 0)], outs[(0, 1)]], axis=3)   # (n, h, w, 2, c)
    bot = jnp.stack([outs[(1, 0)], outs[(1, 1)]], axis=3)
    full = jnp.stack([top, bot], axis=2)                    # (n, h, 2, w, 2, c)
    out = full.reshape(n, 2 * h, 2 * ww, cout)
    return out, tot_s, tot_q


# ------------------------- one-time weight preparation ------------------------

def _prep_s1(w_t, b):
    cin, cout = w_t.shape[0], w_t.shape[1]
    wf = jnp.flip(w_t, axis=(2, 3)).transpose(2, 3, 0, 1).reshape(9 * cin, cout)
    w = jnp.pad(wf, ((0, 0), (0, CPAD - cout))).astype(jnp.bfloat16)
    bias = jnp.pad(b, (0, CPAD - cout)).astype(jnp.float32).reshape(1, CPAD)
    return {"w": w, "b": bias}


def _prep_s2(w_t, b):
    cout = w_t.shape[1]
    wf = jnp.flip(w_t, axis=(2, 3)).transpose(2, 3, 0, 1)   # (kh, kw, cin, cout)
    phases = []
    for py in (0, 1):
        for px in (0, 1):
            rows = [wf[kh, kw] for kh, _ in _TAPS[py] for kw, _ in _TAPS[px]]
            wp = jnp.concatenate(rows, axis=0)              # (ntaps*cin, cout)
            phases.append(jnp.pad(wp, ((0, 0), (0, CPAD - cout))).astype(jnp.bfloat16))
    bias = jnp.pad(b, (0, CPAD - cout)).astype(jnp.float32).reshape(1, CPAD)
    return {"w": tuple(phases), "b": bias}


def prepare_decoder_params(p):
    """Flip -> forward-conv layout, pad Cout to 128 lanes, cast to bf16 — once."""
    return {
        "c1": _prep_s2(p["w1"], p["b1"]),
        "c2": _prep_s1(p["w2"], p["b2"]),
        "c3": _prep_s1(p["w3"], p["b3"]),
        "c4": _prep_s2(p["w4"], p["b4"]),
        "g1": p["g1"], "be1": p["be1"],
        "g2": p["g2"], "be2": p["be2"],
        "g3": p["g3"], "be3": p["be3"],
    }


# -------------------------------- forward ------------------------------------

def decoder_forward(prep, x):
    n = x.shape[0]
    h = x.reshape(n, 256, 7, 7).transpose(0, 2, 3, 1)          # NCHW view -> NHWC
    # layer1: ConvT(256->128, s=2)+ReLU, BN(128)               7x7 -> 14x14
    a1, s1, q1 = _apply_s2(h, prep["c1"]["w"], prep["c1"]["b"], 128)
    sc1, sh1 = _bn_scale_shift(s1, q1, a1.shape[0] * a1.shape[1] * a1.shape[2],
                               prep["g1"], prep["be1"])
    #         ConvT(128->64, s=1)+ReLU, BN(64)   (BN1 affine folded into input)
    a2, s2, q2 = _apply_s1(a1, prep["c2"]["w"], prep["c2"]["b"], 64, sc1, sh1)
    sc2, sh2 = _bn_scale_shift(s2, q2, a2.shape[0] * a2.shape[1] * a2.shape[2],
                               prep["g2"], prep["be2"])
    # layer2: ConvT(64->16, s=1)+ReLU, BN(16)
    a3, s3, q3 = _apply_s1(a2, prep["c3"]["w"], prep["c3"]["b"], 16, sc2, sh2)
    sc3, sh3 = _bn_scale_shift(s3, q3, a3.shape[0] * a3.shape[1] * a3.shape[2],
                               prep["g3"], prep["be3"])
    #         ConvT(16->1, s=2)+ReLU                           14x14 -> 28x28
    a4, _, _ = _apply_s2(a3, prep["c4"]["w"], prep["c4"]["b"], 1, sc3, sh3)
    return a4.transpose(0, 3, 1, 2)                            # (n, 1, 28, 28)


# ----------------------- independent JAX reference ---------------------------

def _ref_conv_transpose_relu(x, w_t, b, stride):
    cin, cout, k, _ = w_t.shape
    if stride == 2:
        n, h, w, c = x.shape
        xd = jnp.zeros((n, 2 * h - 1, 2 * w - 1, c), x.dtype)
        xd = xd.at[:, ::2, ::2, :].set(x)
        lo, hi = 1, 2               # k-1-p, k-1-p+output_padding
    else:
        xd, lo, hi = x, 1, 1
    xp = jnp.pad(xd, ((0, 0), (lo, hi), (lo, hi), (0, 0)))
    n, hp, wp, c = xp.shape
    oh, ow = hp - k + 1, wp - k + 1
    cols = [xp[:, i:i + oh, j:j + ow, :] for i in range(k) for j in range(k)]
    a = jnp.concatenate(cols, axis=-1).reshape(n * oh * ow, k * k * c)
    wf = jnp.flip(w_t, axis=(2, 3)).transpose(2, 3, 0, 1).reshape(k * k * cin, cout)
    out = jnp.dot(a.astype(jnp.bfloat16), wf.astype(jnp.bfloat16),
                  preferred_element_type=jnp.float32) + b.reshape(1, cout)
    return jnp.maximum(out, 0.0).reshape(n, oh, ow, cout)


def _ref_batchnorm(x, gamma, beta):
    mean = jnp.mean(x, axis=(0, 1, 2), keepdims=True)
    var = jnp.mean(jnp.square(x - mean), axis=(0, 1, 2), keepdims=True)
    return (x - mean) * jax.lax.rsqrt(var + EPS) * gamma + beta


def decoder_reference(params, x):
    n = x.shape[0]
    h = x.reshape(n, 256, 7, 7).transpose(0, 2, 3, 1)
    h = _ref_conv_transpose_relu(h, params["w1"], params["b1"], 2)
    h = _ref_batchnorm(h, params["g1"], params["be1"])
    h = _ref_conv_transpose_relu(h, params["w2"], params["b2"], 1)
    h = _ref_batchnorm(h, params["g2"], params["be2"])
    h = _ref_conv_transpose_relu(h, params["w3"], params["b3"], 1)
    h = _ref_batchnorm(h, params["g3"], params["be3"])
    h = _ref_conv_transpose_relu(h, params["w4"], params["b4"], 2)
    return h.transpose(0, 3, 1, 2)


# --------------------------------- setup -------------------------------------

def init_params(key):
    ks = jax.random.split(key, 14)

    def nrm(k, shape, scale=0.05):
        return scale * jax.random.normal(k, shape, jnp.float32)

    return {
        # ConvTranspose2d weights in PyTorch layout (Cin, Cout, kH, kW)
        "w1": nrm(ks[0], (256, 128, 3, 3)), "b1": nrm(ks[1], (128,)),
        "w2": nrm(ks[2], (128, 64, 3, 3)),  "b2": nrm(ks[3], (64,)),
        "w3": nrm(ks[4], (64, 16, 3, 3)),   "b3": nrm(ks[5], (16,)),
        "w4": nrm(ks[6], (16, 1, 3, 3)),    "b4": nrm(ks[7], (1,)),
        # BatchNorm affine params
        "g1": 1.0 + nrm(ks[8], (128,), 0.1),  "be1": nrm(ks[9], (128,), 0.1),
        "g2": 1.0 + nrm(ks[10], (64,), 0.1),  "be2": nrm(ks[11], (64,), 0.1),
        "g3": 1.0 + nrm(ks[12], (16,), 0.1),  "be3": nrm(ks[13], (16,), 0.1),
    }


if __name__ == "__main__":
    batch = 4   # small test batch (module hardcodes 100); code is shape-generic
    key = jax.random.PRNGKey(0)
    kp, kx = jax.random.split(key)
    params = init_params(kp)
    x = jax.random.normal(kx, (batch, 256 * 7 * 7), jnp.float32)

    prep = prepare_decoder_params(params)        # one-time weight preparation
    fwd = jax.jit(decoder_forward)
    out = jax.block_until_ready(fwd(prep, x))

    assert out.shape == (batch, 1, 28, 28), out.shape
    assert bool(jnp.all(jnp.isfinite(out)))
    ref = decoder_reference(params, x)
    err = float(jnp.max(jnp.abs(out - ref)))
    assert jnp.allclose(out, ref, atol=2e-2, rtol=2e-2), (
        f"mismatch vs reference, max abs err {err}")
    print("KERNEL_OK")
</pallas_src>

<mosaic_0001>
module attributes {stable_mosaic.version = 11 : i64} {
  func.func @_conv_mm_kernel(%arg0: i32, %arg1: memref<196x1024xbf16, #tpu.memory_space<vmem>>, %arg2: memref<1024x128xbf16, #tpu.memory_space<vmem>>, %arg3: memref<1x128xf32, #tpu.memory_space<vmem>>, %arg4: memref<196x128xf32, #tpu.memory_space<vmem>>, %arg5: memref<8x128xf32, #tpu.memory_space<vmem>>) attributes {dimension_semantics = [#tpu.dimension_semantics<parallel>], iteration_bounds = array<i64: 1>, scalar_prefetch = 0 : i64, scratch_operands = 0 : i64, tpu.core_type = #tpu.core_type<tc>, window_params = [{transform_indices = @transform_0, window_bounds = array<i64: 196, 1024>}, {pipeline_mode = #tpu.pipeline_mode<synchronous>, transform_indices = @transform_1, window_bounds = array<i64: 1024, 128>}, {pipeline_mode = #tpu.pipeline_mode<synchronous>, transform_indices = @transform_2, window_bounds = array<i64: 1, 128>}, {transform_indices = @transform_3, window_bounds = array<i64: 196, 128>}, {transform_indices = @transform_4, window_bounds = array<i64: 8, 128>}]} {
    %c0 = arith.constant 0 : index
    %c0_0 = arith.constant 0 : index
    %0 = vector.load %arg1[%c0, %c0_0] : memref<196x1024xbf16, #tpu.memory_space<vmem>>, vector<196x1024xbf16>
    %c0_1 = arith.constant 0 : index
    %c0_2 = arith.constant 0 : index
    %1 = vector.load %arg2[%c0_1, %c0_2] : memref<1024x128xbf16, #tpu.memory_space<vmem>>, vector<1024x128xbf16>
    %cst = arith.constant dense<0.000000e+00> : vector<196x128xf32>
    %2 = tpu.matmul %0, %1, %cst {dimension_numbers = #tpu.dot_dimension_numbers<[1], [0], [0], [1], [0, 0, 1, 1], [], []>} : vector<196x1024xbf16>, vector<1024x128xbf16>, vector<196x128xf32> -> vector<196x128xf32>
    %c0_3 = arith.constant 0 : index
    %c0_4 = arith.constant 0 : index
    %3 = vector.load %arg3[%c0_3, %c0_4] : memref<1x128xf32, #tpu.memory_space<vmem>>, vector<1x128xf32>
    %4 = vector.broadcast %3 : vector<1x128xf32> to vector<196x128xf32>
    %5 = arith.addf %2, %4 : vector<196x128xf32>
    %cst_5 = arith.constant 0.000000e+00 : f32
    %6 = vector.broadcast %cst_5 : f32 to vector<196x128xf32>
    %7 = arith.maximumf %5, %6 : vector<196x128xf32>
    %c0_6 = arith.constant 0 : index
    %c0_7 = arith.constant 0 : index
    %8 = vector.load %arg4[%c0_6, %c0_7] : memref<196x128xf32, #tpu.memory_space<vmem>>, vector<196x128xf32>
    tpu.vector_store %arg4[%c0_6, %c0_7], %7 {strides = array<i32>} : memref<196x128xf32, #tpu.memory_space<vmem>>, vector<196x128xf32>,
    %cst_8 = arith.constant dense<0.000000e+00> : vector<128xf32>
    %9 = vector.multi_reduction <add>, %7, %cst_8 [0] : vector<196x128xf32> to vector<128xf32>
    %10 = vector.shape_cast %9 : vector<128xf32> to vector<1x128xf32>
    %11 = arith.mulf %7, %7 : vector<196x128xf32>
    %cst_9 = arith.constant dense<0.000000e+00> : vector<128xf32>
    %12 = vector.multi_reduction <add>, %11, %cst_9 [0] : vector<196x128xf32> to vector<128xf32>
    %13 = vector.shape_cast %12 : vector<128xf32> to vector<1x128xf32>
    %14 = tpu.iota {dimensions = array<i32: 0>} : vector<8x128xi32>
    %c0_i32 = arith.constant 0 : i32
    %15 = vector.broadcast %c0_i32 : i32 to vector<8x128xi32>
    %16 = arith.cmpi eq, %14, %15 : vector<8x128xi32>
    %17 = vector.shape_cast %10 : vector<1x128xf32> to vector<1x128xf32>
    %18 = vector.broadcast %17 : vector<1x128xf32> to vector<8x128xf32>
    %c1_i32 = arith.constant 1 : i32
    %19 = vector.broadcast %c1_i32 : i32 to vector<8x128xi32>
    %20 = arith.cmpi eq, %14, %19 : vector<8x128xi32>
    %21 = vector.shape_cast %13 : vector<1x128xf32> to vector<1x128xf32>
    %22 = vector.broadcast %21 : vector<1x128xf32> to vector<8x128xf32>
    %cst_10 = arith.constant 0.000000e+00 : f32
    %23 = vector.broadcast %cst_10 : f32 to vector<8x128xf32>
    %24 = arith.select %20, %22, %23 : vector<8x128xi1>, vector<8x128xf32>
    %25 = arith.select %16, %18, %24 : vector<8x128xi1>, vector<8x128xf32>
    %c0_11 = arith.constant 0 : index
    %c0_12 = arith.constant 0 : index
    %26 = vector.load %arg5[%c0_11, %c0_12] : memref<8x128xf32, #tpu.memory_space<vmem>>, vector<8x128xf32>
    tpu.vector_store %arg5[%c0_11, %c0_12], %25 {strides = array<i32>} : memref<8x128xf32, #tpu.memory_space<vmem>>, vector<8x128xf32>,
    return
  }
  func.func @transform_0(%arg0: i32) -> (i32, i32) {
    %c0_i32 = arith.constant 0 : i32
    %c0_i32_0 = arith.constant 0 : i32
    return %arg0, %c0_i32 : i32, i32
  }
  func.func @transform_1(%arg0: i32) -> (i32, i32) {
    %c0_i32 = arith.constant 0 : i32
    %c0_i32_0 = arith.constant 0 : i32
    %c0_i32_1 = arith.constant 0 : i32
    return %c0_i32, %c0_i32_0 : i32, i32
  }
  func.func @transform_2(%arg0: i32) -> (i32, i32) {
    %c0_i32 = arith.constant 0 : i32
    %c0_i32_0 = arith.constant 0 : i32
    %c0_i32_1 = arith.constant 0 : i32
    return %c0_i32, %c0_i32_0 : i32, i32
  }
  func.func @transform_3(%arg0: i32) -> (i32, i32) {
    %c0_i32 = arith.constant 0 : i32
    %c0_i32_0 = arith.constant 0 : i32
    return %arg0, %c0_i32 : i32, i32
  }
  func.func @transform_4(%arg0: i32) -> (i32, i32) {
    %c0_i32 = arith.constant 0 : i32
    %c0_i32_0 = arith.constant 0 : i32
    return %arg0, %c0_i32 : i32, i32
  }
}

module attributes {stable_mosaic.version = 11 : i64} {
  func.func @_conv_mm_kernel(%arg0: i32, %arg1: memref<196x512xbf16, #tpu.memory_space<vmem>>, %arg2: memref<512x128xbf16, #tpu.memory_space<vmem>>, %arg3: memref<1x128xf32, #tpu.memory_space<vmem>>, %arg4: memref<196x128xf32, #tpu.memory_space<vmem>>, %arg5: memref<8x128xf32, #tpu.memory_space<vmem>>) attributes {dimension_semantics = [#tpu.dimension_semantics<parallel>], iteration_bounds = array<i64: 1>, scalar_prefetch = 0 : i64, scratch_operands = 0 : i64, tpu.core_type = #tpu.core_type<tc>, window_params = [{transform_indices = @transform_0, window_bounds = array<i64: 196, 512>}, {pipeline_mode = #tpu.pipeline_mode<synchronous>, transform_indices = @transform_1, window_bounds = array<i64: 512, 128>}, {pipeline_mode = #tpu.pipeline_mode<synchronous>, transform_indices = @transform_2, window_bounds = array<i64: 1, 128>}, {transform_indices = @transform_3, window_bounds = array<i64: 196, 128>}, {transform_indices = @transform_4, window_bounds = array<i64: 8, 128>}]} {
    %c0 = arith.constant 0 : index
    %c0_0 = arith.constant 0 : index
    %0 = vector.load %arg1[%c0, %c0_0] : memref<196x512xbf16, #tpu.memory_space<vmem>>, vector<196x512xbf16>
    %c0_1 = arith.constant 0 : index
    %c0_2 = arith.constant 0 : index
    %1 = vector.load %arg2[%c0_1, %c0_2] : memref<512x128xbf16, #tpu.memory_space<vmem>>, vector<512x128xbf16>
    %cst = arith.constant dense<0.000000e+00> : vector<196x128xf32>
    %2 = tpu.matmul %0, %1, %cst {dimension_numbers = #tpu.dot_dimension_numbers<[1], [0], [0], [1], [0, 0, 1, 1], [], []>} : vector<196x512xbf16>, vector<512x128xbf16>, vector<196x128xf32> -> vector<196x128xf32>
    %c0_3 = arith.constant 0 : index
    %c0_4 = arith.constant 0 : index
    %3 = vector.load %arg3[%c0_3, %c0_4] : memref<1x128xf32, #tpu.memory_space<vmem>>, vector<1x128xf32>
    %4 = vector.broadcast %3 : vector<1x128xf32> to vector<196x128xf32>
    %5 = arith.addf %2, %4 : vector<196x128xf32>
    %cst_5 = arith.constant 0.000000e+00 : f32
    %6 = vector.broadcast %cst_5 : f32 to vector<196x128xf32>
    %7 = arith.maximumf %5, %6 : vector<196x128xf32>
    %c0_6 = arith.constant 0 : index
    %c0_7 = arith.constant 0 : index
    %8 = vector.load %arg4[%c0_6, %c0_7] : memref<196x128xf32, #tpu.memory_space<vmem>>, vector<196x128xf32>
    tpu.vector_store %arg4[%c0_6, %c0_7], %7 {strides = array<i32>} : memref<196x128xf32, #tpu.memory_space<vmem>>, vector<196x128xf32>,
    %cst_8 = arith.constant dense<0.000000e+00> : vector<128xf32>
    %9 = vector.multi_reduction <add>, %7, %cst_8 [0] : vector<196x128xf32> to vector<128xf32>
    %10 = vector.shape_cast %9 : vector<128xf32> to vector<1x128xf32>
    %11 = arith.mulf %7, %7 : vector<196x128xf32>
    %cst_9 = arith.constant dense<0.000000e+00> : vector<128xf32>
    %12 = vector.multi_reduction <add>, %11, %cst_9 [0] : vector<196x128xf32> to vector<128xf32>
    %13 = vector.shape_cast %12 : vector<128xf32> to vector<1x128xf32>
    %14 = tpu.iota {dimensions = array<i32: 0>} : vector<8x128xi32>
    %c0_i32 = arith.constant 0 : i32
    %15 = vector.broadcast %c0_i32 : i32 to vector<8x128xi32>
    %16 = arith.cmpi eq, %14, %15 : vector<8x128xi32>
    %17 = vector.shape_cast %10 : vector<1x128xf32> to vector<1x128xf32>
    %18 = vector.broadcast %17 : vector<1x128xf32> to vector<8x128xf32>
    %c1_i32 = arith.constant 1 : i32
    %19 = vector.broadcast %c1_i32 : i32 to vector<8x128xi32>
    %20 = arith.cmpi eq, %14, %19 : vector<8x128xi32>
    %21 = vector.shape_cast %13 : vector<1x128xf32> to vector<1x128xf32>
    %22 = vector.broadcast %21 : vector<1x128xf32> to vector<8x128xf32>
    %cst_10 = arith.constant 0.000000e+00 : f32
    %23 = vector.broadcast %cst_10 : f32 to vector<8x128xf32>
    %24 = arith.select %20, %22, %23 : vector<8x128xi1>, vector<8x128xf32>
    %25 = arith.select %16, %18, %24 : vector<8x128xi1>, vector<8x128xf32>
    %c0_11 = arith.constant 0 : index
    %c0_12 = arith.constant 0 : index
    %26 = vector.load %arg5[%c0_11, %c0_12] : memref<8x128xf32, #tpu.memory_space<vmem>>, vector<8x128xf32>
    tpu.vector_store %arg5[%c0_11, %c0_12], %25 {strides = array<i32>} : memref<8x128xf32, #tpu.memory_space<vmem>>, vector<8x128xf32>,
    return
  }
  func.func @transform_0(%arg0: i32) -> (i32, i32) {
    %c0_i32 = arith.constant 0 : i32
    %c0_i32_0 = arith.constant 0 : i32
    return %arg0, %c0_i32 : i32, i32
  }
  func.func @transform_1(%arg0: i32) -> (i32, i32) {
    %c0_i32 = arith.constant 0 : i32
    %c0_i32_0 = arith.constant 0 : i32
    %c0_i32_1 = arith.constant 0 : i32
    return %c0_i32, %c0_i32_0 : i32, i32
  }
  func.func @transform_2(%arg0: i32) -> (i32, i32) {
    %c0_i32 = arith.constant 0 : i32
    %c0_i32_0 = arith.constant 0 : i32
    %c0_i32_1 = arith.constant 0 : i32
    return %c0_i32, %c0_i32_0 : i32, i32
  }
  func.func @transform_3(%arg0: i32) -> (i32, i32) {
    %c0_i32 = arith.constant 0 : i32
    %c0_i32_0 = arith.constant 0 : i32
    return %arg0, %c0_i32 : i32, i32
  }
  func.func @transform_4(%arg0: i32) -> (i32, i32) {
    %c0_i32 = arith.constant 0 : i32
    %c0_i32_0 = arith.constant 0 : i32
    return %arg0, %c0_i32 : i32, i32
  }
}

module attributes {stable_mosaic.version = 11 : i64} {
  func.func @_conv_mm_kernel(%arg0: i32, %arg1: memref<196x256xbf16, #tpu.memory_space<vmem>>, %arg2: memref<256x128xbf16, #tpu.memory_space<vmem>>, %arg3: memref<1x128xf32, #tpu.memory_space<vmem>>, %arg4: memref<196x128xf32, #tpu.memory_space<vmem>>, %arg5: memref<8x128xf32, #tpu.memory_space<vmem>>) attributes {dimension_semantics = [#tpu.dimension_semantics<parallel>], iteration_bounds = array<i64: 1>, scalar_prefetch = 0 : i64, scratch_operands = 0 : i64, tpu.core_type = #tpu.core_type<tc>, window_params = [{transform_indices = @transform_0, window_bounds = array<i64: 196, 256>}, {pipeline_mode = #tpu.pipeline_mode<synchronous>, transform_indices = @transform_1, window_bounds = array<i64: 256, 128>}, {pipeline_mode = #tpu.pipeline_mode<synchronous>, transform_indices = @transform_2, window_bounds = array<i64: 1, 128>}, {transform_indices = @transform_3, window_bounds = array<i64: 196, 128>}, {transform_indices = @transform_4, window_bounds = array<i64: 8, 128>}]} {
    %c0 = arith.constant 0 : index
    %c0_0 = arith.constant 0 : index
    %0 = vector.load %arg1[%c0, %c0_0] : memref<196x256xbf16, #tpu.memory_space<vmem>>, vector<196x256xbf16>
    %c0_1 = arith.constant 0 : index
    %c0_2 = arith.constant 0 : index
    %1 = vector.load %arg2[%c0_1, %c0_2] : memref<256x128xbf16, #tpu.memory_space<vmem>>, vector<256x128xbf16>
    %cst = arith.constant dense<0.000000e+00> : vector<196x128xf32>
    %2 = tpu.matmul %0, %1, %cst {dimension_numbers = #tpu.dot_dimension_numbers<[1], [0], [0], [1], [0, 0, 1, 1], [], []>} : vector<196x256xbf16>, vector<256x128xbf16>, vector<196x128xf32> -> vector<196x128xf32>
    %c0_3 = arith.constant 0 : index
    %c0_4 = arith.constant 0 : index
    %3 = vector.load %arg3[%c0_3, %c0_4] : memref<1x128xf32, #tpu.memory_space<vmem>>, vector<1x128xf32>
    %4 = vector.broadcast %3 : vector<1x128xf32> to vector<196x128xf32>
    %5 = arith.addf %2, %4 : vector<196x128xf32>
    %cst_5 = arith.constant 0.000000e+00 : f32
    %6 = vector.broadcast %cst_5 : f32 to vector<196x128xf32>
    %7 = arith.maximumf %5, %6 : vector<196x128xf32>
    %c0_6 = arith.constant 0 : index
    %c0_7 = arith.constant 0 : index
    %8 = vector.load %arg4[%c0_6, %c0_7] : memref<196x128xf32, #tpu.memory_space<vmem>>, vector<196x128xf32>
    tpu.vector_store %arg4[%c0_6, %c0_7], %7 {strides = array<i32>} : memref<196x128xf32, #tpu.memory_space<vmem>>, vector<196x128xf32>,
    %cst_8 = arith.constant dense<0.000000e+00> : vector<128xf32>
    %9 = vector.multi_reduction <add>, %7, %cst_8 [0] : vector<196x128xf32> to vector<128xf32>
    %10 = vector.shape_cast %9 : vector<128xf32> to vector<1x128xf32>
    %11 = arith.mulf %7, %7 : vector<196x128xf32>
    %cst_9 = arith.constant dense<0.000000e+00> : vector<128xf32>
    %12 = vector.multi_reduction <add>, %11, %cst_9 [0] : vector<196x128xf32> to vector<128xf32>
    %13 = vector.shape_cast %12 : vector<128xf32> to vector<1x128xf32>
    %14 = tpu.iota {dimensions = array<i32: 0>} : vector<8x128xi32>
    %c0_i32 = arith.constant 0 : i32
    %15 = vector.broadcast %c0_i32 : i32 to vector<8x128xi32>
    %16 = arith.cmpi eq, %14, %15 : vector<8x128xi32>
    %17 = vector.shape_cast %10 : vector<1x128xf32> to vector<1x128xf32>
    %18 = vector.broadcast %17 : vector<1x128xf32> to vector<8x128xf32>
    %c1_i32 = arith.constant 1 : i32
    %19 = vector.broadcast %c1_i32 : i32 to vector<8x128xi32>
    %20 = arith.cmpi eq, %14, %19 : vector<8x128xi32>
    %21 = vector.shape_cast %13 : vector<1x128xf32> to vector<1x128xf32>
    %22 = vector.broadcast %21 : vector<1x128xf32> to vector<8x128xf32>
    %cst_10 = arith.constant 0.000000e+00 : f32
    %23 = vector.broadcast %cst_10 : f32 to vector<8x128xf32>
    %24 = arith.select %20, %22, %23 : vector<8x128xi1>, vector<8x128xf32>
    %25 = arith.select %16, %18, %24 : vector<8x128xi1>, vector<8x128xf32>
    %c0_11 = arith.constant 0 : index
    %c0_12 = arith.constant 0 : index
    %26 = vector.load %arg5[%c0_11, %c0_12] : memref<8x128xf32, #tpu.memory_space<vmem>>, vector<8x128xf32>
    tpu.vector_store %arg5[%c0_11, %c0_12], %25 {strides = array<i32>} : memref<8x128xf32, #tpu.memory_space<vmem>>, vector<8x128xf32>,
    return
  }
  func.func @transform_0(%arg0: i32) -> (i32, i32) {
    %c0_i32 = arith.constant 0 : i32
    %c0_i32_0 = arith.constant 0 : i32
    return %arg0, %c0_i32 : i32, i32
  }
  func.func @transform_1(%arg0: i32) -> (i32, i32) {
    %c0_i32 = arith.constant 0 : i32
    %c0_i32_0 = arith.constant 0 : i32
    %c0_i32_1 = arith.constant 0 : i32
    return %c0_i32, %c0_i32_0 : i32, i32
  }
  func.func @transform_2(%arg0: i32) -> (i32, i32) {
    %c0_i32 = arith.constant 0 : i32
    %c0_i32_0 = arith.constant 0 : i32
    %c0_i32_1 = arith.constant 0 : i32
    return %c0_i32, %c0_i32_0 : i32, i32
  }
  func.func @transform_3(%arg0: i32) -> (i32, i32) {
    %c0_i32 = arith.constant 0 : i32
    %c0_i32_0 = arith.constant 0 : i32
    return %arg0, %c0_i32 : i32, i32
  }
  func.func @transform_4(%arg0: i32) -> (i32, i32) {
    %c0_i32 = arith.constant 0 : i32
    %c0_i32_0 = arith.constant 0 : i32
    return %arg0, %c0_i32 : i32, i32
  }
}

module attributes {stable_mosaic.version = 11 : i64} {
  func.func @_conv_mm_kernel(%arg0: i32, %arg1: memref<512x1152xbf16, #tpu.memory_space<vmem>>, %arg2: memref<1152x128xbf16, #tpu.memory_space<vmem>>, %arg3: memref<1x128xf32, #tpu.memory_space<vmem>>, %arg4: memref<512x128xf32, #tpu.memory_space<vmem>>, %arg5: memref<8x128xf32, #tpu.memory_space<vmem>>) attributes {dimension_semantics = [#tpu.dimension_semantics<parallel>], iteration_bounds = array<i64: 2>, scalar_prefetch = 0 : i64, scratch_operands = 0 : i64, tpu.core_type = #tpu.core_type<tc>, window_params = [{transform_indices = @transform_0, window_bounds = array<i64: 512, 1152>}, {pipeline_mode = #tpu.pipeline_mode<synchronous>, transform_indices = @transform_1, window_bounds = array<i64: 1152, 128>}, {pipeline_mode = #tpu.pipeline_mode<synchronous>, transform_indices = @transform_2, window_bounds = array<i64: 1, 128>}, {transform_indices = @transform_3, window_bounds = array<i64: 512, 128>}, {transform_indices = @transform_4, window_bounds = array<i64: 8, 128>}]} {
    %c0 = arith.constant 0 : index
    %c0_0 = arith.constant 0 : index
    %0 = vector.load %arg1[%c0, %c0_0] : memref<512x1152xbf16, #tpu.memory_space<vmem>>, vector<512x1152xbf16>
    %c0_1 = arith.constant 0 : index
    %c0_2 = arith.constant 0 : index
    %1 = vector.load %arg2[%c0_1, %c0_2] : memref<1152x128xbf16, #tpu.memory_space<vmem>>, vector<1152x128xbf16>
    %cst = arith.constant dense<0.000000e+00> : vector<512x128xf32>
    %2 = tpu.matmul %0, %1, %cst {dimension_numbers = #tpu.dot_dimension_numbers<[1], [0], [0], [1], [0, 0, 1, 1], [], []>} : vector<512x1152xbf16>, vector<1152x128xbf16>, vector<512x128xf32> -> vector<512x128xf32>
    %c0_3 = arith.constant 0 : index
    %c0_4 = arith.constant 0 : index
    %3 = vector.load %arg3[%c0_3, %c0_4] : memref<1x128xf32, #tpu.memory_space<vmem>>, vector<1x128xf32>
    %4 = vector.broadcast %3 : vector<1x128xf32> to vector<512x128xf32>
    %5 = arith.addf %2, %4 : vector<512x128xf32>
    %cst_5 = arith.constant 0.000000e+00 : f32
    %6 = vector.broadcast %cst_5 : f32 to vector<512x128xf32>
    %7 = arith.maximumf %5, %6 : vector<512x128xf32>
    %c0_6 = arith.constant 0 : index
    %c0_7 = arith.constant 0 : index
    %8 = vector.load %arg4[%c0_6, %c0_7] : memref<512x128xf32, #tpu.memory_space<vmem>>, vector<512x128xf32>
    tpu.vector_store %arg4[%c0_6, %c0_7], %7 {strides = array<i32>} : memref<512x128xf32, #tpu.memory_space<vmem>>, vector<512x128xf32>,
    %cst_8 = arith.constant dense<0.000000e+00> : vector<128xf32>
    %9 = vector.multi_reduction <add>, %7, %cst_8 [0] : vector<512x128xf32> to vector<128xf32>
    %10 = vector.shape_cast %9 : vector<128xf32> to vector<1x128xf32>
    %11 = arith.mulf %7, %7 : vector<512x128xf32>
    %cst_9 = arith.constant dense<0.000000e+00> : vector<128xf32>
    %12 = vector.multi_reduction <add>, %11, %cst_9 [0] : vector<512x128xf32> to vector<128xf32>
    %13 = vector.shape_cast %12 : vector<128xf32> to vector<1x128xf32>
    %14 = tpu.iota {dimensions = array<i32: 0>} : vector<8x128xi32>
    %c0_i32 = arith.constant 0 : i32
    %15 = vector.broadcast %c0_i32 : i32 to vector<8x128xi32>
    %16 = arith.cmpi eq, %14, %15 : vector<8x128xi32>
    %17 = vector.shape_cast %10 : vector<1x128xf32> to vector<1x128xf32>
    %18 = vector.broadcast %17 : vector<1x128xf32> to vector<8x128xf32>
    %c1_i32 = arith.constant 1 : i32
    %19 = vector.broadcast %c1_i32 : i32 to vector<8x128xi32>
    %20 = arith.cmpi eq, %14, %19 : vector<8x128xi32>
    %21 = vector.shape_cast %13 : vector<1x128xf32> to vector<1x128xf32>
    %22 = vector.broadcast %21 : vector<1x128xf32> to vector<8x128xf32>
    %cst_10 = arith.constant 0.000000e+00 : f32
    %23 = vector.broadcast %cst_10 : f32 to vector<8x128xf32>
    %24 = arith.select %20, %22, %23 : vector<8x128xi1>, vector<8x128xf32>
    %25 = arith.select %16, %18, %24 : vector<8x128xi1>, vector<8x128xf32>
    %c0_11 = arith.constant 0 : index
    %c0_12 = arith.constant 0 : index
    %26 = vector.load %arg5[%c0_11, %c0_12] : memref<8x128xf32, #tpu.memory_space<vmem>>, vector<8x128xf32>
    tpu.vector_store %arg5[%c0_11, %c0_12], %25 {strides = array<i32>} : memref<8x128xf32, #tpu.memory_space<vmem>>, vector<8x128xf32>,
    return
  }
  func.func @transform_0(%arg0: i32) -> (i32, i32) {
    %c0_i32 = arith.constant 0 : i32
    %c0_i32_0 = arith.constant 0 : i32
    return %arg0, %c0_i32 : i32, i32
  }
  func.func @transform_1(%arg0: i32) -> (i32, i32) {
    %c0_i32 = arith.constant 0 : i32
    %c0_i32_0 = arith.constant 0 : i32
    %c0_i32_1 = arith.constant 0 : i32
    return %c0_i32, %c0_i32_0 : i32, i32
  }
  func.func @transform_2(%arg0: i32) -> (i32, i32) {
    %c0_i32 = arith.constant 0 : i32
    %c0_i32_0 = arith.constant 0 : i32
    %c0_i32_1 = arith.constant 0 : i32
    return %c0_i32, %c0_i32_0 : i32, i32
  }
  func.func @transform_3(%arg0: i32) -> (i32, i32) {
    %c0_i32 = arith.constant 0 : i32
    %c0_i32_0 = arith.constant 0 : i32
    return %arg0, %c0_i32 : i32, i32
  }
  func.func @transform_4(%arg0: i32) -> (i32, i32) {
    %c0_i32 = arith.constant 0 : i32
    %c0_i32_0 = arith.constant 0 : i32
    return %arg0, %c0_i32 : i32, i32
  }
}

module attributes {stable_mosaic.version = 11 : i64} {
  func.func @_conv_mm_kernel(%arg0: i32, %arg1: memref<512x576xbf16, #tpu.memory_space<vmem>>, %arg2: memref<576x128xbf16, #tpu.memory_space<vmem>>, %arg3: memref<1x128xf32, #tpu.memory_space<vmem>>, %arg4: memref<512x128xf32, #tpu.memory_space<vmem>>, %arg5: memref<8x128xf32, #tpu.memory_space<vmem>>) attributes {dimension_semantics = [#tpu.dimension_semantics<parallel>], iteration_bounds = array<i64: 2>, scalar_prefetch = 0 : i64, scratch_operands = 0 : i64, tpu.core_type = #tpu.core_type<tc>, window_params = [{transform_indices = @transform_0, window_bounds = array<i64: 512, 576>}, {pipeline_mode = #tpu.pipeline_mode<synchronous>, transform_indices = @transform_1, window_bounds = array<i64: 576, 128>}, {pipeline_mode = #tpu.pipeline_mode<synchronous>, transform_indices = @transform_2, window_bounds = array<i64: 1, 128>}, {transform_indices = @transform_3, window_bounds = array<i64: 512, 128>}, {transform_indices = @transform_4, window_bounds = array<i64: 8, 128>}]} {
    %c0 = arith.constant 0 : index
    %c0_0 = arith.constant 0 : index
    %0 = vector.load %arg1[%c0, %c0_0] : memref<512x576xbf16, #tpu.memory_space<vmem>>, vector<512x576xbf16>
    %c0_1 = arith.constant 0 : index
    %c0_2 = arith.constant 0 : index
    %1 = vector.load %arg2[%c0_1, %c0_2] : memref<576x128xbf16, #tpu.memory_space<vmem>>, vector<576x128xbf16>
    %cst = arith.constant dense<0.000000e+00> : vector<512x128xf32>
    %2 = tpu.matmul %0, %1, %cst {dimension_numbers = #tpu.dot_dimension_numbers<[1], [0], [0], [1], [0, 0, 1, 1], [], []>} : vector<512x576xbf16>, vector<576x128xbf16>, vector<512x128xf32> -> vector<512x128xf32>
    %c0_3 = arith.constant 0 : index
    %c0_4 = arith.constant 0 : index
    %3 = vector.load %arg3[%c0_3, %c0_4] : memref<1x128xf32, #tpu.memory_space<vmem>>, vector<1x128xf32>
    %4 = vector.broadcast %3 : vector<1x128xf32> to vector<512x128xf32>
    %5 = arith.addf %2, %4 : vector<512x128xf32>
    %cst_5 = arith.constant 0.000000e+00 : f32
    %6 = vector.broadcast %cst_5 : f32 to vector<512x128xf32>
    %7 = arith.maximumf %5, %6 : vector<512x128xf32>
    %c0_6 = arith.constant 0 : index
    %c0_7 = arith.constant 0 : index
    %8 = vector.load %arg4[%c0_6, %c0_7] : memref<512x128xf32, #tpu.memory_space<vmem>>, vector<512x128xf32>
    tpu.vector_store %arg4[%c0_6, %c0_7], %7 {strides = array<i32>} : memref<512x128xf32, #tpu.memory_space<vmem>>, vector<512x128xf32>,
    %cst_8 = arith.constant dense<0.000000e+00> : vector<128xf32>
    %9 = vector.multi_reduction <add>, %7, %cst_8 [0] : vector<512x128xf32> to vector<128xf32>
    %10 = vector.shape_cast %9 : vector<128xf32> to vector<1x128xf32>
    %11 = arith.mulf %7, %7 : vector<512x128xf32>
    %cst_9 = arith.constant dense<0.000000e+00> : vector<128xf32>
    %12 = vector.multi_reduction <add>, %11, %cst_9 [0] : vector<512x128xf32> to vector<128xf32>
    %13 = vector.shape_cast %12 : vector<128xf32> to vector<1x128xf32>
    %14 = tpu.iota {dimensions = array<i32: 0>} : vector<8x128xi32>
    %c0_i32 = arith.constant 0 : i32
    %15 = vector.broadcast %c0_i32 : i32 to vector<8x128xi32>
    %16 = arith.cmpi eq, %14, %15 : vector<8x128xi32>
    %17 = vector.shape_cast %10 : vector<1x128xf32> to vector<1x128xf32>
    %18 = vector.broadcast %17 : vector<1x128xf32> to vector<8x128xf32>
    %c1_i32 = arith.constant 1 : i32
    %19 = vector.broadcast %c1_i32 : i32 to vector<8x128xi32>
    %20 = arith.cmpi eq, %14, %19 : vector<8x128xi32>
    %21 = vector.shape_cast %13 : vector<1x128xf32> to vector<1x128xf32>
    %22 = vector.broadcast %21 : vector<1x128xf32> to vector<8x128xf32>
    %cst_10 = arith.constant 0.000000e+00 : f32
    %23 = vector.broadcast %cst_10 : f32 to vector<8x128xf32>
    %24 = arith.select %20, %22, %23 : vector<8x128xi1>, vector<8x128xf32>
    %25 = arith.select %16, %18, %24 : vector<8x128xi1>, vector<8x128xf32>
    %c0_11 = arith.constant 0 : index
    %c0_12 = arith.constant 0 : index
    %26 = vector.load %arg5[%c0_11, %c0_12] : memref<8x128xf32, #tpu.memory_space<vmem>>, vector<8x128xf32>
    tpu.vector_store %arg5[%c0_11, %c0_12], %25 {strides = array<i32>} : memref<8x128xf32, #tpu.memory_space<vmem>>, vector<8x128xf32>,
    return
  }
  func.func @transform_0(%arg0: i32) -> (i32, i32) {
    %c0_i32 = arith.constant 0 : i32
    %c0_i32_0 = arith.constant 0 : i32
    return %arg0, %c0_i32 : i32, i32
  }
  func.func @transform_1(%arg0: i32) -> (i32, i32) {
    %c0_i32 = arith.constant 0 : i32
    %c0_i32_0 = arith.constant 0 : i32
    %c0_i32_1 = arith.constant 0 : i32
    return %c0_i32, %c0_i32_0 : i32, i32
  }
  func.func @transform_2(%arg0: i32) -> (i32, i32) {
    %c0_i32 = arith.constant 0 : i32
    %c0_i32_0 = arith.constant 0 : i32
    %c0_i32_1 = arith.constant 0 : i32
    return %c0_i32, %c0_i32_0 : i32, i32
  }
  func.func @transform_3(%arg0: i32) -> (i32, i32) {
    %c0_i32 = arith.constant 0 : i32
    %c0_i32_0 = arith.constant 0 : i32
    return %arg0, %c0_i32 : i32, i32
  }
  func.func @transform_4(%arg0: i32) -> (i32, i32) {
    %c0_i32 = arith.constant 0 : i32
    %c0_i32_0 = arith.constant 0 : i32
    return %arg0, %c0_i32 : i32, i32
  }
}

module attributes {stable_mosaic.version = 11 : i64} {
  func.func @_conv_mm_kernel(%arg0: i32, %arg1: memref<512x32xbf16, #tpu.memory_space<vmem>>, %arg2: memref<32x128xbf16, #tpu.memory_space<vmem>>, %arg3: memref<1x128xf32, #tpu.memory_space<vmem>>, %arg4: memref<512x128xf32, #tpu.memory_space<vmem>>, %arg5: memref<8x128xf32, #tpu.memory_space<vmem>>) attributes {dimension_semantics = [#tpu.dimension_semantics<parallel>], iteration_bounds = array<i64: 2>, scalar_prefetch = 0 : i64, scratch_operands = 0 : i64, tpu.core_type = #tpu.core_type<tc>, window_params = [{transform_indices = @transform_0, window_bounds = array<i64: 512, 32>}, {pipeline_mode = #tpu.pipeline_mode<synchronous>, transform_indices = @transform_1, window_bounds = array<i64: 32, 128>}, {pipeline_mode = #tpu.pipeline_mode<synchronous>, transform_indices = @transform_2, window_bounds = array<i64: 1, 128>}, {transform_indices = @transform_3, window_bounds = array<i64: 512, 128>}, {transform_indices = @transform_4, window_bounds = array<i64: 8, 128>}]} {
    %c0 = arith.constant 0 : index
    %c0_0 = arith.constant 0 : index
    %0 = vector.load %arg1[%c0, %c0_0] : memref<512x32xbf16, #tpu.memory_space<vmem>>, vector<512x32xbf16>
    %c0_1 = arith.constant 0 : index
    %c0_2 = arith.constant 0 : index
    %1 = vector.load %arg2[%c0_1, %c0_2] : memref<32x128xbf16, #tpu.memory_space<vmem>>, vector<32x128xbf16>
    %cst = arith.constant dense<0.000000e+00> : vector<512x128xf32>
    %2 = tpu.matmul %0, %1, %cst {dimension_numbers = #tpu.dot_dimension_numbers<[1], [0], [0], [1], [0, 0, 1, 1], [], []>} : vector<512x32xbf16>, vector<32x128xbf16>, vector<512x128xf32> -> vector<512x128xf32>
    %c0_3 = arith.constant 0 : index
    %c0_4 = arith.constant 0 : index
    %3 = vector.load %arg3[%c0_3, %c0_4] : memref<1x128xf32, #tpu.memory_space<vmem>>, vector<1x128xf32>
    %4 = vector.broadcast %3 : vector<1x128xf32> to vector<512x128xf32>
    %5 = arith.addf %2, %4 : vector<512x128xf32>
    %cst_5 = arith.constant 0.000000e+00 : f32
    %6 = vector.broadcast %cst_5 : f32 to vector<512x128xf32>
    %7 = arith.maximumf %5, %6 : vector<512x128xf32>
    %c0_6 = arith.constant 0 : index
    %c0_7 = arith.constant 0 : index
    %8 = vector.load %arg4[%c0_6, %c0_7] : memref<512x128xf32, #tpu.memory_space<vmem>>, vector<512x128xf32>
    tpu.vector_store %arg4[%c0_6, %c0_7], %7 {strides = array<i32>} : memref<512x128xf32, #tpu.memory_space<vmem>>, vector<512x128xf32>,
    %cst_8 = arith.constant dense<0.000000e+00> : vector<128xf32>
    %9 = vector.multi_reduction <add>, %7, %cst_8 [0] : vector<512x128xf32> to vector<128xf32>
    %10 = vector.shape_cast %9 : vector<128xf32> to vector<1x128xf32>
    %11 = arith.mulf %7, %7 : vector<512x128xf32>
    %cst_9 = arith.constant dense<0.000000e+00> : vector<128xf32>
    %12 = vector.multi_reduction <add>, %11, %cst_9 [0] : vector<512x128xf32> to vector<128xf32>
    %13 = vector.shape_cast %12 : vector<128xf32> to vector<1x128xf32>
    %14 = tpu.iota {dimensions = array<i32: 0>} : vector<8x128xi32>
    %c0_i32 = arith.constant 0 : i32
    %15 = vector.broadcast %c0_i32 : i32 to vector<8x128xi32>
    %16 = arith.cmpi eq, %14, %15 : vector<8x128xi32>
    %17 = vector.shape_cast %10 : vector<1x128xf32> to vector<1x128xf32>
    %18 = vector.broadcast %17 : vector<1x128xf32> to vector<8x128xf32>
    %c1_i32 = arith.constant 1 : i32
    %19 = vector.broadcast %c1_i32 : i32 to vector<8x128xi32>
    %20 = arith.cmpi eq, %14, %19 : vector<8x128xi32>
    %21 = vector.shape_cast %13 : vector<1x128xf32> to vector<1x128xf32>
    %22 = vector.broadcast %21 : vector<1x128xf32> to vector<8x128xf32>
    %cst_10 = arith.constant 0.000000e+00 : f32
    %23 = vector.broadcast %cst_10 : f32 to vector<8x128xf32>
    %24 = arith.select %20, %22, %23 : vector<8x128xi1>, vector<8x128xf32>
    %25 = arith.select %16, %18, %24 : vector<8x128xi1>, vector<8x128xf32>
    %c0_11 = arith.constant 0 : index
    %c0_12 = arith.constant 0 : index
    %26 = vector.load %arg5[%c0_11, %c0_12] : memref<8x128xf32, #tpu.memory_space<vmem>>, vector<8x128xf32>
    tpu.vector_store %arg5[%c0_11, %c0_12], %25 {strides = array<i32>} : memref<8x128xf32, #tpu.memory_space<vmem>>, vector<8x128xf32>,
    return
  }
  func.func @transform_0(%arg0: i32) -> (i32, i32) {
    %c0_i32 = arith.constant 0 : i32
    %c0_i32_0 = arith.constant 0 : i32
    return %arg0, %c0_i32 : i32, i32
  }
  func.func @transform_1(%arg0: i32) -> (i32, i32) {
    %c0_i32 = arith.constant 0 : i32
    %c0_i32_0 = arith.constant 0 : i32
    %c0_i32_1 = arith.constant 0 : i32
    return %c0_i32, %c0_i32_0 : i32, i32
  }
  func.func @transform_2(%arg0: i32) -> (i32, i32) {
    %c0_i32 = arith.constant 0 : i32
    %c0_i32_0 = arith.constant 0 : i32
    %c0_i32_1 = arith.constant 0 : i32
    return %c0_i32, %c0_i32_0 : i32, i32
  }
  func.func @transform_3(%arg0: i32) -> (i32, i32) {
    %c0_i32 = arith.constant 0 : i32
    %c0_i32_0 = arith.constant 0 : i32
    return %arg0, %c0_i32 : i32, i32
  }
  func.func @transform_4(%arg0: i32) -> (i32, i32) {
    %c0_i32 = arith.constant 0 : i32
    %c0_i32_0 = arith.constant 0 : i32
    return %arg0, %c0_i32 : i32, i32
  }
}

module attributes {stable_mosaic.version = 11 : i64} {
  func.func @_conv_mm_kernel(%arg0: i32, %arg1: memref<512x16xbf16, #tpu.memory_space<vmem>>, %arg2: memref<16x128xbf16, #tpu.memory_space<vmem>>, %arg3: memref<1x128xf32, #tpu.memory_space<vmem>>, %arg4: memref<512x128xf32, #tpu.memory_space<vmem>>, %arg5: memref<8x128xf32, #tpu.memory_space<vmem>>) attributes {dimension_semantics = [#tpu.dimension_semantics<parallel>], iteration_bounds = array<i64: 2>, scalar_prefetch = 0 : i64, scratch_operands = 0 : i64, tpu.core_type = #tpu.core_type<tc>, window_params = [{transform_indices = @transform_0, window_bounds = array<i64: 512, 16>}, {pipeline_mode = #tpu.pipeline_mode<synchronous>, transform_indices = @transform_1, window_bounds = array<i64: 16, 128>}, {pipeline_mode = #tpu.pipeline_mode<synchronous>, transform_indices = @transform_2, window_bounds = array<i64: 1, 128>}, {transform_indices = @transform_3, window_bounds = array<i64: 512, 128>}, {transform_indices = @transform_4, window_bounds = array<i64: 8, 128>}]} {
    %c0 = arith.constant 0 : index
    %c0_0 = arith.constant 0 : index
    %0 = vector.load %arg1[%c0, %c0_0] : memref<512x16xbf16, #tpu.memory_space<vmem>>, vector<512x16xbf16>
    %c0_1 = arith.constant 0 : index
    %c0_2 = arith.constant 0 : index
    %1 = vector.load %arg2[%c0_1, %c0_2] : memref<16x128xbf16, #tpu.memory_space<vmem>>, vector<16x128xbf16>
    %cst = arith.constant dense<0.000000e+00> : vector<512x128xf32>
    %2 = tpu.matmul %0, %1, %cst {dimension_numbers = #tpu.dot_dimension_numbers<[1], [0], [0], [1], [0, 0, 1, 1], [], []>} : vector<512x16xbf16>, vector<16x128xbf16>, vector<512x128xf32> -> vector<512x128xf32>
    %c0_3 = arith.constant 0 : index
    %c0_4 = arith.constant 0 : index
    %3 = vector.load %arg3[%c0_3, %c0_4] : memref<1x128xf32, #tpu.memory_space<vmem>>, vector<1x128xf32>
    %4 = vector.broadcast %3 : vector<1x128xf32> to vector<512x128xf32>
    %5 = arith.addf %2, %4 : vector<512x128xf32>
    %cst_5 = arith.constant 0.000000e+00 : f32
    %6 = vector.broadcast %cst_5 : f32 to vector<512x128xf32>
    %7 = arith.maximumf %5, %6 : vector<512x128xf32>
    %c0_6 = arith.constant 0 : index
    %c0_7 = arith.constant 0 : index
    %8 = vector.load %arg4[%c0_6, %c0_7] : memref<512x128xf32, #tpu.memory_space<vmem>>, vector<512x128xf32>
    tpu.vector_store %arg4[%c0_6, %c0_7], %7 {strides = array<i32>} : memref<512x128xf32, #tpu.memory_space<vmem>>, vector<512x128xf32>,
    %cst_8 = arith.constant dense<0.000000e+00> : vector<128xf32>
    %9 = vector.multi_reduction <add>, %7, %cst_8 [0] : vector<512x128xf32> to vector<128xf32>
    %10 = vector.shape_cast %9 : vector<128xf32> to vector<1x128xf32>
    %11 = arith.mulf %7, %7 : vector<512x128xf32>
    %cst_9 = arith.constant dense<0.000000e+00> : vector<128xf32>
    %12 = vector.multi_reduction <add>, %11, %cst_9 [0] : vector<512x128xf32> to vector<128xf32>
    %13 = vector.shape_cast %12 : vector<128xf32> to vector<1x128xf32>
    %14 = tpu.iota {dimensions = array<i32: 0>} : vector<8x128xi32>
    %c0_i32 = arith.constant 0 : i32
    %15 = vector.broadcast %c0_i32 : i32 to vector<8x128xi32>
    %16 = arith.cmpi eq, %14, %15 : vector<8x128xi32>
    %17 = vector.shape_cast %10 : vector<1x128xf32> to vector<1x128xf32>
    %18 = vector.broadcast %17 : vector<1x128xf32> to vector<8x128xf32>
    %c1_i32 = arith.constant 1 : i32
    %19 = vector.broadcast %c1_i32 : i32 to vector<8x128xi32>
    %20 = arith.cmpi eq, %14, %19 : vector<8x128xi32>
    %21 = vector.shape_cast %13 : vector<1x128xf32> to vector<1x128xf32>
    %22 = vector.broadcast %21 : vector<1x128xf32> to vector<8x128xf32>
    %cst_10 = arith.constant 0.000000e+00 : f32
    %23 = vector.broadcast %cst_10 : f32 to vector<8x128xf32>
    %24 = arith.select %20, %22, %23 : vector<8x128xi1>, vector<8x128xf32>
    %25 = arith.select %16, %18, %24 : vector<8x128xi1>, vector<8x128xf32>
    %c0_11 = arith.constant 0 : index
    %c0_12 = arith.constant 0 : index
    %26 = vector.load %arg5[%c0_11, %c0_12] : memref<8x128xf32, #tpu.memory_space<vmem>>, vector<8x128xf32>
    tpu.vector_store %arg5[%c0_11, %c0_12], %25 {strides = array<i32>} : memref<8x128xf32, #tpu.memory_space<vmem>>, vector<8x128xf32>,
    return
  }
  func.func @transform_0(%arg0: i32) -> (i32, i32) {
    %c0_i32 = arith.constant 0 : i32
    %c0_i32_0 = arith.constant 0 : i32
    return %arg0, %c0_i32 : i32, i32
  }
  func.func @transform_1(%arg0: i32) -> (i32, i32) {
    %c0_i32 = arith.constant 0 : i32
    %c0_i32_0 = arith.constant 0 : i32
    %c0_i32_1 = arith.constant 0 : i32
    return %c0_i32, %c0_i32_0 : i32, i32
  }
  func.func @transform_2(%arg0: i32) -> (i32, i32) {
    %c0_i32 = arith.constant 0 : i32
    %c0_i32_0 = arith.constant 0 : i32
    %c0_i32_1 = arith.constant 0 : i32
    return %c0_i32, %c0_i32_0 : i32, i32
  }
  func.func @transform_3(%arg0: i32) -> (i32, i32) {
    %c0_i32 = arith.constant 0 : i32
    %c0_i32_0 = arith.constant 0 : i32
    return %arg0, %c0_i32 : i32, i32
  }
  func.func @transform_4(%arg0: i32) -> (i32, i32) {
    %c0_i32 = arith.constant 0 : i32
    %c0_i32_0 = arith.constant 0 : i32
    return %arg0, %c0_i32 : i32, i32
  }
}

module attributes {stable_mosaic.version = 11 : i64} {
  func.func @_conv_mm_kernel(%arg0: i32, %arg1: memref<512x64xbf16, #tpu.memory_space<vmem>>, %arg2: memref<64x128xbf16, #tpu.memory_space<vmem>>, %arg3: memref<1x128xf32, #tpu.memory_space<vmem>>, %arg4: memref<512x128xf32, #tpu.memory_space<vmem>>, %arg5: memref<8x128xf32, #tpu.memory_space<vmem>>) attributes {dimension_semantics = [#tpu.dimension_semantics<parallel>], iteration_bounds = array<i64: 2>, scalar_prefetch = 0 : i64, scratch_operands = 0 : i64, tpu.core_type = #tpu.core_type<tc>, window_params = [{transform_indices = @transform_0, window_bounds = array<i64: 512, 64>}, {pipeline_mode = #tpu.pipeline_mode<synchronous>, transform_indices = @transform_1, window_bounds = array<i64: 64, 128>}, {pipeline_mode = #tpu.pipeline_mode<synchronous>, transform_indices = @transform_2, window_bounds = array<i64: 1, 128>}, {transform_indices = @transform_3, window_bounds = array<i64: 512, 128>}, {transform_indices = @transform_4, window_bounds = array<i64: 8, 128>}]} {
    %c0 = arith.constant 0 : index
    %c0_0 = arith.constant 0 : index
    %0 = vector.load %arg1[%c0, %c0_0] : memref<512x64xbf16, #tpu.memory_space<vmem>>, vector<512x64xbf16>
    %c0_1 = arith.constant 0 : index
    %c0_2 = arith.constant 0 : index
    %1 = vector.load %arg2[%c0_1, %c0_2] : memref<64x128xbf16, #tpu.memory_space<vmem>>, vector<64x128xbf16>
    %cst = arith.constant dense<0.000000e+00> : vector<512x128xf32>
    %2 = tpu.matmul %0, %1, %cst {dimension_numbers = #tpu.dot_dimension_numbers<[1], [0], [0], [1], [0, 0, 1, 1], [], []>} : vector<512x64xbf16>, vector<64x128xbf16>, vector<512x128xf32> -> vector<512x128xf32>
    %c0_3 = arith.constant 0 : index
    %c0_4 = arith.constant 0 : index
    %3 = vector.load %arg3[%c0_3, %c0_4] : memref<1x128xf32, #tpu.memory_space<vmem>>, vector<1x128xf32>
    %4 = vector.broadcast %3 : vector<1x128xf32> to vector<512x128xf32>
    %5 = arith.addf %2, %4 : vector<512x128xf32>
    %cst_5 = arith.constant 0.000000e+00 : f32
    %6 = vector.broadcast %cst_5 : f32 to vector<512x128xf32>
    %7 = arith.maximumf %5, %6 : vector<512x128xf32>
    %c0_6 = arith.constant 0 : index
    %c0_7 = arith.constant 0 : index
    %8 = vector.load %arg4[%c0_6, %c0_7] : memref<512x128xf32, #tpu.memory_space<vmem>>, vector<512x128xf32>
    tpu.vector_store %arg4[%c0_6, %c0_7], %7 {strides = array<i32>} : memref<512x128xf32, #tpu.memory_space<vmem>>, vector<512x128xf32>,
    %cst_8 = arith.constant dense<0.000000e+00> : vector<128xf32>
    %9 = vector.multi_reduction <add>, %7, %cst_8 [0] : vector<512x128xf32> to vector<128xf32>
    %10 = vector.shape_cast %9 : vector<128xf32> to vector<1x128xf32>
    %11 = arith.mulf %7, %7 : vector<512x128xf32>
    %cst_9 = arith.constant dense<0.000000e+00> : vector<128xf32>
    %12 = vector.multi_reduction <add>, %11, %cst_9 [0] : vector<512x128xf32> to vector<128xf32>
    %13 = vector.shape_cast %12 : vector<128xf32> to vector<1x128xf32>
    %14 = tpu.iota {dimensions = array<i32: 0>} : vector<8x128xi32>
    %c0_i32 = arith.constant 0 : i32
    %15 = vector.broadcast %c0_i32 : i32 to vector<8x128xi32>
    %16 = arith.cmpi eq, %14, %15 : vector<8x128xi32>
    %17 = vector.shape_cast %10 : vector<1x128xf32> to vector<1x128xf32>
    %18 = vector.broadcast %17 : vector<1x128xf32> to vector<8x128xf32>
    %c1_i32 = arith.constant 1 : i32
    %19 = vector.broadcast %c1_i32 : i32 to vector<8x128xi32>
    %20 = arith.cmpi eq, %14, %19 : vector<8x128xi32>
    %21 = vector.shape_cast %13 : vector<1x128xf32> to vector<1x128xf32>
    %22 = vector.broadcast %21 : vector<1x128xf32> to vector<8x128xf32>
    %cst_10 = arith.constant 0.000000e+00 : f32
    %23 = vector.broadcast %cst_10 : f32 to vector<8x128xf32>
    %24 = arith.select %20, %22, %23 : vector<8x128xi1>, vector<8x128xf32>
    %25 = arith.select %16, %18, %24 : vector<8x128xi1>, vector<8x128xf32>
    %c0_11 = arith.constant 0 : index
    %c0_12 = arith.constant 0 : index
    %26 = vector.load %arg5[%c0_11, %c0_12] : memref<8x128xf32, #tpu.memory_space<vmem>>, vector<8x128xf32>
    tpu.vector_store %arg5[%c0_11, %c0_12], %25 {strides = array<i32>} : memref<8x128xf32, #tpu.memory_space<vmem>>, vector<8x128xf32>,
    return
  }
  func.func @transform_0(%arg0: i32) -> (i32, i32) {
    %c0_i32 = arith.constant 0 : i32
    %c0_i32_0 = arith.constant 0 : i32
    return %arg0, %c0_i32 : i32, i32
  }
  func.func @transform_1(%arg0: i32) -> (i32, i32) {
    %c0_i32 = arith.constant 0 : i32
    %c0_i32_0 = arith.constant 0 : i32
    %c0_i32_1 = arith.constant 0 : i32
    return %c0_i32, %c0_i32_0 : i32, i32
  }
  func.func @transform_2(%arg0: i32) -> (i32, i32) {
    %c0_i32 = arith.constant 0 : i32
    %c0_i32_0 = arith.constant 0 : i32
    %c0_i32_1 = arith.constant 0 : i32
    return %c0_i32, %c0_i32_0 : i32, i32
  }
  func.func @transform_3(%arg0: i32) -> (i32, i32) {
    %c0_i32 = arith.constant 0 : i32
    %c0_i32_0 = arith.constant 0 : i32
    return %arg0, %c0_i32 : i32, i32
  }
  func.func @transform_4(%arg0: i32) -> (i32, i32) {
    %c0_i32 = arith.constant 0 : i32
    %c0_i32_0 = arith.constant 0 : i32
    return %arg0, %c0_i32 : i32, i32
  }
}

</mosaic_0001>

<bundles_post_ra>
// kernel: decoder_forward.13
= control target key start
LH: loop header
LB: loop body
LE: loop exit
PB: predicated region body
PF: predicated region fallthrough
CT: control target
= control target key end

     0   :  { %vm1761_vm0 = vcmask 1043456   ;;  %s3158_s1 = inlined_call_operand.vmem [shape: bf16[1024,128], index: 1, kind: input, shape index: {}]   ;;  %s3159_s0 = inlined_call_operand.vmem [shape: bf16[196,1024], index: 0, kind: input, shape index: {}]   ;;  %s3160_s2 = inlined_call_operand.vmem [shape: f32[1,128], index: 2, kind: input, shape index: {}]   ;;  %s3161_s3 = inlined_call_operand.vmem [shape: f32[196,128], index: 3, kind: output, shape index: {0}]   ;;  %s3162_s4 = inlined_call_operand.vmem [shape: f32[8,128], index: 4, kind: output, shape index: {1}]  }
   0x1   :  { %v2386_v0 = vld [vmem:[%s3158_s1 + $0x78] sm:$0xff]   ;;  %v2390_v4 = vld [vmem:[%s3158_s1 + $0x70] sm:$0xff]   ;;  %v2394_v8 = vld [vmem:[%s3158_s1 + $0x68] sm:$0xff]  }
   0x2   :  { %v2387_v1 = vld [vmem:[%s3158_s1 + $0xf8] sm:$0xff]   ;;  %2010 = vmatprep.subr.bf16.mxu0 %v2386_v0  ;;  %v2391_v5 = vld [vmem:[%s3158_s1 + $0xf0] sm:$0xff]   ;;  %v2395_v9 = vld [vmem:[%s3158_s1 + $0xe8] sm:$0xff]  }
   0x3   :  { %v2388_v2 = vld [vmem:[%s3158_s1 + $0x38] sm:$0xff]   ;;  %2104 = vmatprep.subr.bf16.mxu1 %v2387_v1  ;;  %v2392_v6 = vld [vmem:[%s3158_s1 + $0x30] sm:$0xff]   ;;  %v2396_v10 = vld [vmem:[%s3158_s1 + $0x28] sm:$0xff]  }
   0x4   :  { %v2389_v3 = vld [vmem:[%s3158_s1 + $0xb8] sm:$0xff]   ;;  %2011 = vmatpush3.bf16.msra.mxu0 %v2388_v2  ;;  %v2393_v7 = vld [vmem:[%s3158_s1 + $0xb0] sm:$0xff]   ;;  %v2397_v11 = vld [vmem:[%s3158_s1 + $0xa8] sm:$0xff]  }
   0x5   :  { %2105 = vmatpush3.bf16.msra.mxu1 %v2389_v3  ;;  %2012 = vmatprep.subr.bf16.mxu0 %v2390_v4  ;;  %v2398_v12 = vld [vmem:[%s3158_s1 + $0x60] sm:$0xff]   ;;  %v2402_v16 = vld [vmem:[%s3158_s1 + $0x58] sm:$0xff]   ;;  %v2406_v20 = vld [vmem:[%s3158_s1 + $0x50] sm:$0xff]  }
   0x6   :  { %2106 = vmatprep.subr.bf16.mxu1 %v2391_v5  ;;  %v2399_v13 = vld [vmem:[%s3158_s1 + $0xe0] sm:$0xff]   ;;  %v2403_v17 = vld [vmem:[%s3158_s1 + $0xd8] sm:$0xff]   ;;  %v2407_v21 = vld [vmem:[%s3158_s1 + $0xd0] sm:$0xff]  }
   0x7   :  { %v2400_v14 = vld [vmem:[%s3158_s1 + $0x20] sm:$0xff]   ;;  %v2404_v18 = vld [vmem:[%s3158_s1 + $0x18] sm:$0xff]   ;;  %v2408_v22 = vld [vmem:[%s3158_s1 + $0x10] sm:$0xff]  }
   0x8   :  { %2013 = vmatpush3.bf16.msra.mxu0 %v2392_v6  ;;  %v2401_v15 = vld [vmem:[%s3158_s1 + $0xa0] sm:$0xff]   ;;  %v2405_v19 = vld [vmem:[%s3158_s1 + $0x98] sm:$0xff]   ;;  %v2409_v23 = vld [vmem:[%s3158_s1 + $0x90] sm:$0xff]  }
   0x9   :  { %2107 = vmatpush3.bf16.msra.mxu1 %v2393_v7  ;;  %2014 = vmatprep.subr.bf16.mxu0 %v2394_v8  ;;  %v2410_v24 = vld [vmem:[%s3158_s1 + $0x48] sm:$0xff]   ;;  %v2414_v28 = vld [vmem:[%s3158_s1 + $0x40] sm:$0xff]   ;;  %v2418_v40 = vld [vmem:[%s3158_s1 + $0x178] sm:$0xff]  }
   0xa   :  { %2108 = vmatprep.subr.bf16.mxu1 %v2395_v9  ;;  %v2411_v25 = vld [vmem:[%s3158_s1 + $0xc8] sm:$0xff]   ;;  %v2415_v29 = vld [vmem:[%s3158_s1 + $0xc0] sm:$0xff]   ;;  %v2419_v41 = vld [vmem:[%s3158_s1 + $0x138] sm:$0xff]  }
   0xb   :  { %v2412_v26 = vld [vmem:[%s3158_s1 + $0x8] sm:$0xff]   ;;  %v2416_v30 = vld [vmem:[%s3158_s1] sm:$0xff]   ;;  %v2420_v42 = vld [vmem:[%s3158_s1 + $0x1f8] sm:$0xff]  }
   0xc   :  { %2015 = vmatpush3.bf16.msra.mxu0 %v2396_v10  ;;  %v2413_v27 = vld [vmem:[%s3158_s1 + $0x88] sm:$0xff]   ;;  %v2417_v31 = vld [vmem:[%s3158_s1 + $0x80] sm:$0xff]   ;;  %v2421_v43 = vld [vmem:[%s3158_s1 + $0x1b8] sm:$0xff]  }
   0xd   :  { %2109 = vmatpush3.bf16.msra.mxu1 %v2397_v11  ;;  %2016 = vmatprep.subr.bf16.mxu0 %v2398_v12  ;;  %v17_v32 = vld [vmem:[%s3159_s0] sm:$0xff]  ;;  %v18_v34 = vld [vmem:[%s3159_s0 + $0x8] sm:$0xff]  ;;  %v2422_v50 = vld [vmem:[%s3158_s1 + $0x170] sm:$0xff]  }
   0xe   :  { %2110 = vmatprep.subr.bf16.mxu1 %v2399_v13  ;;  %v21_v33 = vld [vmem:[%s3159_s0 + $0x20] sm:$0xff]  ;;  %v22_v37 = vld [vmem:[%s3159_s0 + $0x28] sm:$0xff]  ;;  %v2423_v52 = vld [vmem:[%s3158_s1 + $0x130] sm:$0xff]  }
   0xf   :  { %v1842_v35 = vcombine.low %v17_v32, %v21_v33  ;;  %v1843_v36 = vcombine.high %v17_v32, %v21_v33  ;;  %v1844_v38 = vcombine.low %v18_v34, %v22_v37  ;;  %v1845_v39 = vcombine.high %v18_v34, %v22_v37  ;;  %v25_v44 = vld [vmem:[%s3159_s0 + $0x40] sm:$0xff]  ;;  %v26_v47 = vld [vmem:[%s3159_s0 + $0x48] sm:$0xff]  ;;  %v2424_v60 = vld [vmem:[%s3158_s1 + $0x1f0] sm:$0xff]  }
  0x10   :  { %2017 = vmatpush3.bf16.msra.mxu0 %v2400_v14  ;;  %v29_v45 = vld [vmem:[%s3159_s0 + $0x60] sm:$0xff]  ;;  %v30_v48 = vld [vmem:[%s3159_s0 + $0x68] sm:$0xff]  ;;  %v2425_v61 = vld [vmem:[%s3158_s1 + $0x1b0] sm:$0xff]  }
  0x11   :  { %2111 = vmatpush3.bf16.msra.mxu1 %v2401_v15  ;;  %2018 = vmatprep.subr.bf16.mxu0 %v2402_v16  ;;  %v1851_v46 = vcombine.high %v25_v44, %v29_v45  ;;  %v1853_v49 = vcombine.high %v26_v47, %v30_v48  ;;  %v1850_v51 = vcombine.low %v25_v44, %v29_v45  ;;  %v33_v53 = vld [vmem:[%s3159_s0 + $0x80] sm:$0xff]  ;;  %v34_v56 = vld [vmem:[%s3159_s0 + $0x88] sm:$0xff]  ;;  %v2439_v34 = vld [vmem:[%s3158_s1 + $0x110] sm:$0xff]  }
  0x12   :  { %2112 = vmatprep.subr.bf16.mxu1 %v2403_v17  ;;  %1176 = vmatprep.mubr.bf16.mxu0 %v1843_v36  ;;  %v1852_v54 = vcombine.low %v26_v47, %v30_v48  ;;  %v37_v55 = vld [vmem:[%s3159_s0 + $0xa0] sm:$0xff]  ;;  %v38_v57 = vld [vmem:[%s3159_s0 + $0xa8] sm:$0xff]  ;;  %v2440_v36 = vld [vmem:[%s3158_s1 + $0x1d0] sm:$0xff]  }
  0x13   :  { %1312 = vmatprep.mubr.bf16.mxu1 %v1845_v39  ;;  %v1859_v58 = vcombine.high %v33_v53, %v37_v55  ;;  %v1861_v59 = vcombine.high %v34_v56, %v38_v57  ;;  %v41_v62 = vld [vmem:[%s3159_s0 + $0xc0] sm:$0xff]  ;;  %v42_v0 = vld [vmem:[%s3159_s0 + $0xc8] sm:$0xff]  ;;  %v1858_v4 = vcombine.low %v33_v53, %v37_v55  ;;  %v1860_v6 = vcombine.low %v34_v56, %v38_v57  ;;  %v2441_v37 = vld [vmem:[%s3158_s1 + $0x190] sm:$0xff]  }
  0x14   :  { %2019 = vmatpush3.bf16.msra.mxu0 %v2404_v18  ;;  %v45_v63 = vld [vmem:[%s3159_s0 + $0xe0] sm:$0xff]  ;;  %v46_v1 = vld [vmem:[%s3159_s0 + $0xe8] sm:$0xff] }
  0x15   :  { %2113 = vmatpush3.bf16.msra.mxu1 %v2405_v19  ;;  %2020 = vmatprep.subr.bf16.mxu0 %v2406_v20  ;;  %v2426_v2 = vld [vmem:[%s3158_s1 + $0x168] sm:$0xff]   ;;  %v1867_v7 = vcombine.high %v41_v62, %v45_v63  ;;  %v1869_v9 = vcombine.high %v42_v0, %v46_v1  ;;  %v49_v10 = vld [vmem:[%s3159_s0 + $0x100] sm:$0xff]  ;;  %v1866_v18 = vcombine.low %v41_v62, %v45_v63 }
  0x16   :  { %2114 = vmatprep.subr.bf16.mxu1 %v2407_v21  ;;  %v2427_v3 = vld [vmem:[%s3158_s1 + $0x128] sm:$0xff]   ;;  %v53_v11 = vld [vmem:[%s3159_s0 + $0x120] sm:$0xff]  ;;  %v1868_v19 = vcombine.low %v42_v0, %v46_v1 }
  0x17   :  { %v2428_v5 = vld [vmem:[%s3158_s1 + $0x1e8] sm:$0xff]   ;;  %v2430_v12 = vld [vmem:[%s3158_s1 + $0x160] sm:$0xff]   ;;  %v1875_v20 = vcombine.high %v49_v10, %v53_v11 }
  0x18   :  { %2021 = vmatpush3.bf16.msra.mxu0 %v2408_v22  ;;  %v2429_v8 = vld [vmem:[%s3158_s1 + $0x1a8] sm:$0xff]   ;;  %v2431_v15 = vld [vmem:[%s3158_s1 + $0x120] sm:$0xff]   ;;  %v2434_v22 = vld [vmem:[%s3158_s1 + $0x158] sm:$0xff]  }
  0x19   :  { %2115 = vmatpush3.bf16.msra.mxu1 %v2409_v23  ;;  %2022 = vmatprep.subr.bf16.mxu0 %v2410_v24  ;;  %v50_v13 = vld [vmem:[%s3159_s0 + $0x108] sm:$0xff]  ;;  %v2432_v16 = vld [vmem:[%s3158_s1 + $0x1e0] sm:$0xff]   ;;  %v2435_v23 = vld [vmem:[%s3158_s1 + $0x118] sm:$0xff]  }
  0x1a   :  { %2116 = vmatprep.subr.bf16.mxu1 %v2411_v25  ;;  %v54_v14 = vld [vmem:[%s3159_s0 + $0x128] sm:$0xff]  ;;  %v2433_v17 = vld [vmem:[%s3158_s1 + $0x1a0] sm:$0xff]   ;;  %v2436_v24 = vld [vmem:[%s3158_s1 + $0x1d8] sm:$0xff]  }
  0x1b   :  { %v1877_v21 = vcombine.high %v50_v13, %v54_v14  ;;  %v57_v25 = vld [vmem:[%s3159_s0 + $0x140] sm:$0xff]  ;;  %v1876_v32 = vcombine.low %v50_v13, %v54_v14  ;;  %v2443_v44 = vld [vmem:[%s3158_s1 + $0x108] sm:$0xff]  }
  0x1c   :  { %2023 = vmatpush3.bf16.msra.mxu0 %v2412_v26  ;;  %v61_v26 = vld [vmem:[%s3159_s0 + $0x160] sm:$0xff]  ;;  %v2444_v47 = vld [vmem:[%s3158_s1 + $0x1c8] sm:$0xff]  }
  0x1d   :  { %2117 = vmatpush3.bf16.msra.mxu1 %v2413_v27  ;;  %2024 = vmatprep.subr.bf16.mxu0 %v2414_v28  ;;  %v2437_v27 = vld [vmem:[%s3158_s1 + $0x198] sm:$0xff]   ;;  %v58_v28 = vld [vmem:[%s3159_s0 + $0x148] sm:$0xff]  ;;  %v1883_v33 = vcombine.high %v57_v25, %v61_v26  ;;  %v69_v39 = vld [vmem:[%s3159_s0 + $0x1a0] sm:$0xff] }
  0x1e   :  { %2118 = vmatprep.subr.bf16.mxu1 %v2415_v29  ;;  %v62_v29 = vld [vmem:[%s3159_s0 + $0x168] sm:$0xff]  ;;  %v2447_v55 = vld [vmem:[%s3158_s1 + $0x100] sm:$0xff]  }
  0x1f   :  { %v1884_v45 = vcombine.low %v58_v28, %v62_v29  ;;  %v74_v53 = vld [vmem:[%s3159_s0 + $0x1c8] sm:$0xff]  ;;  %v2448_v56 = vld [vmem:[%s3158_s1 + $0x1c0] sm:$0xff]  }
  0x20   :  { %2025 = vmatpush3.bf16.msra.mxu0 %v2416_v30  ;;  %v1874_v30 = vcombine.low %v49_v10, %v53_v11  ;;  %v2449_v57 = vld [vmem:[%s3158_s1 + $0x180] sm:$0xff]   ;;  %v82_v0 = vld [vmem:[%s3159_s0 + $0x208] sm:$0xff] }
  0x21   :  { %2119 = vmatpush3.bf16.msra.mxu1 %v2417_v31  ;;  %2198 = vmatprep.subr.bf16.mxu0 %v2418_v40  ;;  %v2438_v31 = vld [vmem:[%s3158_s1 + $0x150] sm:$0xff]   ;;  %v2442_v40 = vld [vmem:[%s3158_s1 + $0x148] sm:$0xff]   ;;  %v81_v62 = vld [vmem:[%s3159_s0 + $0x200] sm:$0xff] }
  0x22   :  { %2292 = vmatprep.subr.bf16.mxu1 %v2420_v42  ;;  %v70_v42 = vld [vmem:[%s3159_s0 + $0x1a8] sm:$0xff]  ;;  %v85_v63 = vld [vmem:[%s3159_s0 + $0x220] sm:$0xff] }
  0x23   :  { %1177 = vmatmul.mubr.bf16.vlgmr.msra.gmra.mxu0 %v1842_v35  ;;  %v1885_v35 = vcombine.high %v58_v28, %v62_v29  ;;  %v86_v1 = vld [vmem:[%s3159_s0 + $0x228] sm:$0xff]  ;;  %v1906_v10 = vcombine.low %v81_v62, %v85_v63  ;;  %v97_v14 = vld [vmem:[%s3159_s0 + $0x280] sm:$0xff] }
  0x24   :  { %1313 = vmatmul.mubr.bf16.vlgmr.msra.gmra.mxu1 %v1844_v38  ;;  %2199 = vmatpush3.bf16.msra.mxu0 %v2419_v41  ;;  %v65_v38 = vld [vmem:[%s3159_s0 + $0x180] sm:$0xff]  ;;  %v66_v41 = vld [vmem:[%s3159_s0 + $0x188] sm:$0xff]  ;;  %v1908_v11 = vcombine.low %v82_v0, %v86_v1 }
  0x25   :  { %2293 = vmatpush3.bf16.msra.mxu1 %v2421_v43  ;;  %1184 = vmatprep.mubr.bf16.mxu0 %v1851_v46  ;;  %v1882_v43 = vcombine.low %v57_v25, %v61_v26  ;;  %v1891_v46 = vcombine.high %v65_v38, %v69_v39  ;;  %v1893_v48 = vcombine.high %v66_v41, %v70_v42  ;;  %v110_v25 = vld [vmem:[%s3159_s0 + $0x2e8] sm:$0xff] }
  0x26   :  { %1320 = vmatprep.mubr.bf16.mxu1 %v1853_v49  ;;  %2200 = vmatprep.subr.bf16.mxu0 %v2422_v50  ;;  %v2445_v49 = vld [vmem:[%s3158_s1 + $0x188] sm:$0xff]   ;;  %v73_v50 = vld [vmem:[%s3159_s0 + $0x1c0] sm:$0xff] }
  0x27   :  { %2294 = vmatprep.subr.bf16.mxu1 %v2424_v60 }
  0x28   :  { %2201 = vmatpush3.bf16.msra.mxu0 %v2423_v52  ;;  %v2446_v52 = vld [vmem:[%s3158_s1 + $0x140] sm:$0xff]  }
  0x29   :  { %2295 = vmatpush3.bf16.msra.mxu1 %v2425_v61  ;;  %2202 = vmatprep.subr.bf16.mxu0 %v2426_v2 }
  0x2a   :  { %2296 = vmatprep.subr.bf16.mxu1 %v2428_v5  ;;  %v1909_v5 = vcombine.high %v82_v0, %v86_v1 }
  0x2b   :  { %1185 = vmatmul.mubr.bf16.gmra.mxu0 %v1850_v51  ;;  %v77_v51 = vld [vmem:[%s3159_s0 + $0x1e0] sm:$0xff] }
  0x2c   :  { %1321 = vmatmul.mubr.bf16.gmra.mxu1 %v1852_v54  ;;  %1192 = vmatprep.mubr.bf16.mxu0 %v1859_v58  ;;  %v78_v54 = vld [vmem:[%s3159_s0 + $0x1e8] sm:$0xff]  ;;  %v1890_v58 = vcombine.low %v65_v38, %v69_v39  ;;  %v1899_v60 = vcombine.high %v73_v50, %v77_v51  ;;  %v1898_v2 = vcombine.low %v73_v50, %v77_v51  ;;  %v20_v38 = vld [vmem:[%s3159_s0 + $0x18] sm:$0xff] }
  0x2d   :  { %1328 = vmatprep.mubr.bf16.mxu1 %v1861_v59  ;;  %2203 = vmatpush3.bf16.msra.mxu0 %v2427_v3  ;;  %v1892_v59 = vcombine.low %v66_v41, %v70_v42  ;;  %v1901_v61 = vcombine.high %v74_v53, %v78_v54  ;;  %v1900_v3 = vcombine.low %v74_v53, %v78_v54  ;;  %v24_v39 = vld [vmem:[%s3159_s0 + $0x38] sm:$0xff]  ;;  %v39_v53 = vld [vmem:[%s3159_s0 + $0xb0] sm:$0xff] }
  0x2e   :  { %2297 = vmatpush3.bf16.msra.mxu1 %v2429_v8  ;;  %2204 = vmatprep.subr.bf16.mxu0 %v2430_v12  ;;  %v90_v8 = vld [vmem:[%s3159_s0 + $0x248] sm:$0xff]  ;;  %v36_v54 = vld [vmem:[%s3159_s0 + $0x98] sm:$0xff] }
  0x2f   :  { %2298 = vmatprep.subr.bf16.mxu1 %v2432_v16  ;;  %v98_v16 = vld [vmem:[%s3159_s0 + $0x288] sm:$0xff] }
  0x31   :  { %2205 = vmatpush3.bf16.msra.mxu0 %v2431_v15  ;;  %v101_v15 = vld [vmem:[%s3159_s0 + $0x2a0] sm:$0xff] }
  0x32   :  { %2299 = vmatpush3.bf16.msra.mxu1 %v2433_v17  ;;  %2206 = vmatprep.subr.bf16.mxu0 %v2434_v22  ;;  %v102_v17 = vld [vmem:[%s3159_s0 + $0x2a8] sm:$0xff]  ;;  %v105_v22 = vld [vmem:[%s3159_s0 + $0x2c0] sm:$0xff]  ;;  %v1922_v26 = vcombine.low %v97_v14, %v101_v15 }
  0x33   :  { %1193 = vmatmul.mubr.bf16.gmra.mxu0 %v1858_v4  ;;  %2300 = vmatprep.subr.bf16.mxu1 %v2436_v24  ;;  %v1907_v4 = vcombine.high %v81_v62, %v85_v63  ;;  %v106_v24 = vld [vmem:[%s3159_s0 + $0x2c8] sm:$0xff]  ;;  %v44_v62 = vld [vmem:[%s3159_s0 + $0xd8] sm:$0xff] }
  0x34   :  { %1329 = vmatmul.mubr.bf16.gmra.mxu1 %v1860_v6  ;;  %1200 = vmatprep.mubr.bf16.mxu0 %v1867_v7  ;;  %v89_v6 = vld [vmem:[%s3159_s0 + $0x240] sm:$0xff]  ;;  %v1933_v29 = vcombine.high %v106_v24, %v110_v25  ;;  %v48_v63 = vld [vmem:[%s3159_s0 + $0xf8] sm:$0xff] }
  0x35   :  { %1336 = vmatprep.mubr.bf16.mxu1 %v1869_v9  ;;  %2207 = vmatpush3.bf16.msra.mxu0 %v2435_v23  ;;  %v93_v7 = vld [vmem:[%s3159_s0 + $0x260] sm:$0xff]  ;;  %v94_v9 = vld [vmem:[%s3159_s0 + $0x268] sm:$0xff] }
  0x36   :  { %2301 = vmatpush3.bf16.msra.mxu1 %v2437_v27  ;;  %2208 = vmatprep.subr.bf16.mxu0 %v2438_v31  ;;  %v1915_v12 = vcombine.high %v89_v6, %v93_v7  ;;  %v1917_v13 = vcombine.high %v90_v8, %v94_v9  ;;  %v109_v23 = vld [vmem:[%s3159_s0 + $0x2e0] sm:$0xff]  ;;  %v1924_v27 = vcombine.low %v98_v16, %v102_v17  ;;  %v114_v31 = vld [vmem:[%s3159_s0 + $0x308] sm:$0x33] }
  0x37   :  { %2302 = vmatprep.subr.bf16.mxu1 %v2440_v36  ;;  %v1931_v28 = vcombine.high %v105_v22, %v109_v23  ;;  %v19_v36 = vld [vmem:[%s3159_s0 + $0x10] sm:$0xff]  ;;  %v1940_v41 = vcombine.low %v114_v31, %v114_v31 }
  0x39   :  { %2209 = vmatpush3.bf16.msra.mxu0 %v2439_v34 }
  0x3a   :  { %2303 = vmatpush3.bf16.msra.mxu1 %v2441_v37  ;;  %2210 = vmatprep.subr.bf16.mxu0 %v2442_v40  ;;  %v23_v37 = vld [vmem:[%s3159_s0 + $0x30] sm:$0xff] }
  0x3b   :  { %1201 = vmatmul.mubr.bf16.gmra.mxu0 %v1866_v18  ;;  %2304 = vmatprep.subr.bf16.mxu1 %v2444_v47  ;;  %v1914_v18 = vcombine.low %v89_v6, %v93_v7  ;;  %v1847_v42 = vcombine.high %v19_v36, %v23_v37  ;;  %v32_v47 = vld [vmem:[%s3159_s0 + $0x78] sm:$0xff] }
  0x3c   :  { %1337 = vmatmul.mubr.bf16.gmra.mxu1 %v1868_v19  ;;  %1208 = vmatprep.mubr.bf16.mxu0 %v1875_v20  ;;  %v1916_v19 = vcombine.low %v90_v8, %v94_v9  ;;  %v1923_v20 = vcombine.high %v97_v14, %v101_v15  ;;  %v52_v6 = vld [vmem:[%s3159_s0 + $0x118] sm:$0xff]  ;;  %v1872_v9 = vcombine.low %v44_v62, %v48_v63 }
  0x3d   :  { %1344 = vmatprep.mubr.bf16.mxu1 %v1877_v21  ;;  %2211 = vmatpush3.bf16.msra.mxu0 %v2443_v44  ;;  %v1925_v21 = vcombine.high %v98_v16, %v102_v17  ;;  %v27_v44 = vld [vmem:[%s3159_s0 + $0x50] sm:$0xff]  ;;  %v56_v7 = vld [vmem:[%s3159_s0 + $0x138] sm:$0xff] }
  0x3e   :  { %2305 = vmatpush3.bf16.msra.mxu1 %v2445_v49  ;;  %2212 = vmatprep.subr.bf16.mxu0 %v2446_v52  ;;  %v1848_v49 = vcombine.low %v20_v38, %v24_v39  ;;  %v35_v52 = vld [vmem:[%s3159_s0 + $0x90] sm:$0xff]  ;;  %v60_v14 = vld [vmem:[%s3159_s0 + $0x158] sm:$0xff]  ;;  %v1880_v17 = vcombine.low %v52_v6, %v56_v7 }
  0x3f   :  { %2306 = vmatprep.subr.bf16.mxu1 %v2448_v56  ;;  %v1862_v0 = vcombine.low %v35_v52, %v39_v53  ;;  %v64_v15 = vld [vmem:[%s3159_s0 + $0x178] sm:$0xff] }
  0x41   :  { %2213 = vmatpush3.bf16.msra.mxu0 %v2447_v55  ;;  %v40_v55 = vld [vmem:[%s3159_s0 + $0xb8] sm:$0xff] }
  0x42   :  { %2307 = vmatpush3.bf16.msra.mxu1 %v2449_v57  ;;  %v1864_v1 = vcombine.low %v36_v54, %v40_v55 }
  0x43   :  { %1209 = vmatmul.mubr.bf16.gmra.mxu0 %v1874_v30  ;;  %v113_v30 = vld [vmem:[%s3159_s0 + $0x300] sm:$0x33] }
  0x44   :  { %1345 = vmatmul.mubr.bf16.gmra.mxu1 %v1876_v32  ;;  %1216 = vmatprep.mubr.bf16.mxu0 %v1883_v33  ;;  %v1930_v32 = vcombine.low %v105_v22, %v109_v23  ;;  %v1932_v33 = vcombine.low %v106_v24, %v110_v25  ;;  %v1939_v34 = vcombine.high %v113_v30, %v113_v30  ;;  %v68_v22 = vld [vmem:[%s3159_s0 + $0x198] sm:$0xff] }
  0x45   :  { %1352 = vmatprep.mubr.bf16.mxu1 %v1885_v35  ;;  %v1941_v35 = vcombine.high %v114_v31, %v114_v31  ;;  %v1938_v40 = vcombine.low %v113_v30, %v113_v30  ;;  %v72_v23 = vld [vmem:[%s3159_s0 + $0x1b8] sm:$0xff]  ;;  %v1888_v25 = vcombine.low %v60_v14, %v64_v15 }
  0x46   :  { %v76_v30 = vld [vmem:[%s3159_s0 + $0x1d8] sm:$0xff] }
  0x47   :  { %v80_v31 = vld [vmem:[%s3159_s0 + $0x1f8] sm:$0xff] }
  0x4b   :  { %1217 = vmatmul.mubr.bf16.gmra.mxu0 %v1882_v43  ;;  %v1849_v43 = vcombine.high %v20_v38, %v24_v39  ;;  %v84_v38 = vld [vmem:[%s3159_s0 + $0x218] sm:$0xff] }
  0x4c   :  { %1353 = vmatmul.mubr.bf16.gmra.mxu1 %v1884_v45  ;;  %1224 = vmatprep.mubr.bf16.mxu0 %v1891_v46  ;;  %v31_v45 = vld [vmem:[%s3159_s0 + $0x70] sm:$0xff]  ;;  %v28_v46 = vld [vmem:[%s3159_s0 + $0x58] sm:$0xff] }
  0x4d   :  { %1360 = vmatprep.mubr.bf16.mxu1 %v1893_v48  ;;  %v1846_v48 = vcombine.low %v19_v36, %v23_v37  ;;  %v1855_v50 = vcombine.high %v27_v44, %v31_v45  ;;  %v1857_v51 = vcombine.high %v28_v46, %v32_v47  ;;  %v1854_v56 = vcombine.low %v27_v44, %v31_v45  ;;  %v83_v36 = vld [vmem:[%s3159_s0 + $0x210] sm:$0xff]  ;;  %v88_v39 = vld [vmem:[%s3159_s0 + $0x238] sm:$0xff] }
  0x4e   :  { %v1856_v57 = vcombine.low %v28_v46, %v32_v47  ;;  %v87_v37 = vld [vmem:[%s3159_s0 + $0x230] sm:$0xff]  ;;  %v92_v46 = vld [vmem:[%s3159_s0 + $0x258] sm:$0xff] }
  0x4f   :  { %v91_v44 = vld [vmem:[%s3159_s0 + $0x250] sm:$0xff]  ;;  %v96_v47 = vld [vmem:[%s3159_s0 + $0x278] sm:$0xff] }
  0x50   :  { %v95_v45 = vld [vmem:[%s3159_s0 + $0x270] sm:$0xff] }
  0x53   :  { %1225 = vmatmul.mubr.bf16.gmra.mxu0 %v1890_v58  ;;  %v1863_v58 = vcombine.high %v35_v52, %v39_v53  ;;  %v99_v52 = vld [vmem:[%s3159_s0 + $0x290] sm:$0xff] }
  0x54   :  { %1361 = vmatmul.mubr.bf16.gmra.mxu1 %v1892_v59  ;;  %1232 = vmatprep.mubr.bf16.mxu0 %v1899_v60  ;;  %v1865_v59 = vcombine.high %v36_v54, %v40_v55  ;;  %v43_v60 = vld [vmem:[%s3159_s0 + $0xd0] sm:$0xff]  ;;  %v100_v54 = vld [vmem:[%s3159_s0 + $0x298] sm:$0xff] }
  0x55   :  { %1368 = vmatprep.mubr.bf16.mxu1 %v1901_v61  ;;  %v47_v61 = vld [vmem:[%s3159_s0 + $0xf0] sm:$0xff]  ;;  %v104_v55 = vld [vmem:[%s3159_s0 + $0x2b8] sm:$0xff] }
  0x56   :  { %v1870_v8 = vcombine.low %v43_v60, %v47_v61  ;;  %v103_v53 = vld [vmem:[%s3159_s0 + $0x2b0] sm:$0xff] }
  0x5b   :  { %1233 = vmatmul.mubr.bf16.gmra.mxu0 %v1898_v2  ;;  %v1871_v2 = vcombine.high %v43_v60, %v47_v61  ;;  %v107_v60 = vld [vmem:[%s3159_s0 + $0x2d0] sm:$0xff] }
  0x5c   :  { %1369 = vmatmul.mubr.bf16.gmra.mxu1 %v1900_v3  ;;  %1240 = vmatprep.mubr.bf16.mxu0 %v1907_v4  ;;  %v1873_v3 = vcombine.high %v44_v62, %v48_v63  ;;  %v51_v4 = vld [vmem:[%s3159_s0 + $0x110] sm:$0xff]  ;;  %v108_v62 = vld [vmem:[%s3159_s0 + $0x2d8] sm:$0xff] }
  0x5d   :  { %1376 = vmatprep.mubr.bf16.mxu1 %v1909_v5  ;;  %v55_v5 = vld [vmem:[%s3159_s0 + $0x130] sm:$0xff]  ;;  %v112_v63 = vld [vmem:[%s3159_s0 + $0x2f8] sm:$0xff] }
  0x5e   :  { %v1878_v16 = vcombine.low %v51_v4, %v55_v5  ;;  %v111_v61 = vld [vmem:[%s3159_s0 + $0x2f0] sm:$0xff] }
  0x63   :  { %1241 = vmatmul.mubr.bf16.gmra.mxu0 %v1906_v10  ;;  %v1879_v10 = vcombine.high %v51_v4, %v55_v5  ;;  %v115_v4 = vld [vmem:[%s3159_s0 + $0x310] sm:$0x33]  ;;  %v116_v5 = vld [vmem:[%s3159_s0 + $0x318] sm:$0x33] }
  0x64   :  { %1377 = vmatmul.mubr.bf16.gmra.mxu1 %v1908_v11  ;;  %1248 = vmatprep.mubr.bf16.mxu0 %v1915_v12  ;;  %v1881_v11 = vcombine.high %v52_v6, %v56_v7  ;;  %v59_v12 = vld [vmem:[%s3159_s0 + $0x150] sm:$0xff]  ;;  %v1934_v6 = vcombine.low %v107_v60, %v111_v61  ;;  %v1936_v7 = vcombine.low %v108_v62, %v112_v63 }
  0x65   :  { %1384 = vmatprep.mubr.bf16.mxu1 %v1917_v13  ;;  %v63_v13 = vld [vmem:[%s3159_s0 + $0x170] sm:$0xff] }
  0x66   :  { %v1886_v24 = vcombine.low %v59_v12, %v63_v13 }
  0x6b   :  { %1249 = vmatmul.mubr.bf16.gmra.mxu0 %v1914_v18  ;;  %v1887_v18 = vcombine.high %v59_v12, %v63_v13  ;;  %v2978_v12 = vld [vmem:[%s3160_s2] ss:$0 sm:$0xff] }
  0x6c   :  { %1385 = vmatmul.mubr.bf16.gmra.mxu1 %v1916_v19  ;;  %1256 = vmatprep.mubr.bf16.mxu0 %v1923_v20  ;;  %v1889_v19 = vcombine.high %v60_v14, %v64_v15  ;;  %v67_v20 = vld [vmem:[%s3159_s0 + $0x190] sm:$0xff] }
  0x6d   :  { %1392 = vmatprep.mubr.bf16.mxu1 %v1925_v21  ;;  %v71_v21 = vld [vmem:[%s3159_s0 + $0x1b0] sm:$0xff] }
  0x73   :  { %1257 = vmatmul.mubr.bf16.gmra.mxu0 %v1922_v26  ;;  %v1895_v26 = vcombine.high %v67_v20, %v71_v21 }
  0x74   :  { %1393 = vmatmul.mubr.bf16.gmra.mxu1 %v1924_v27  ;;  %1264 = vmatprep.mubr.bf16.mxu0 %v1931_v28  ;;  %v1897_v27 = vcombine.high %v68_v22, %v72_v23  ;;  %v75_v28 = vld [vmem:[%s3159_s0 + $0x1d0] sm:$0xff] }
  0x75   :  { %1400 = vmatprep.mubr.bf16.mxu1 %v1933_v29  ;;  %v79_v29 = vld [vmem:[%s3159_s0 + $0x1f0] sm:$0xff] }
  0x7b   :  { %1265 = vmatmul.mubr.bf16.gmra.mxu0 %v1930_v32  ;;  %v1894_v32 = vcombine.low %v67_v20, %v71_v21  ;;  %v1944_v21 = vcombine.low %v116_v5, %v116_v5 }
  0x7c   :  { %1401 = vmatmul.mubr.bf16.gmra.mxu1 %v1932_v33  ;;  %1272 = vmatprep.mubr.bf16.mxu0 %v1939_v34  ;;  %v1896_v33 = vcombine.low %v68_v22, %v72_v23  ;;  %v1903_v34 = vcombine.high %v75_v28, %v79_v29 }
  0x7d   :  { %1408 = vmatprep.mubr.bf16.mxu1 %v1941_v35  ;;  %v1905_v35 = vcombine.high %v76_v30, %v80_v31 }
  0x83   :  { %1273 = vmatmul.mubr.bf16.gmra.mxu0 %v1938_v40  ;;  %v1902_v40 = vcombine.low %v75_v28, %v79_v29 }
  0x84   :  { %1409 = vmatmul.mubr.bf16.gmra.mxu1 %v1940_v41  ;;  %1448 = vmatprep.mubr.bf16.mxu0 %v1847_v42  ;;  %v1904_v41 = vcombine.low %v76_v30, %v80_v31  ;;  %v1911_v42 = vcombine.high %v83_v36, %v87_v37 }
  0x85   :  { %1584 = vmatprep.mubr.bf16.mxu1 %v1849_v43  ;;  %v1913_v43 = vcombine.high %v84_v38, %v88_v39 }
  0x8b   :  { %1449 = vmatmul.mubr.bf16.vlgmr.msra.gmra.mxu0 %v1846_v48  ;;  %v1910_v48 = vcombine.low %v83_v36, %v87_v37 }
  0x8c   :  { %1585 = vmatmul.mubr.bf16.vlgmr.msra.gmra.mxu1 %v1848_v49  ;;  %1456 = vmatprep.mubr.bf16.mxu0 %v1855_v50  ;;  %v1912_v49 = vcombine.low %v84_v38, %v88_v39  ;;  %v1919_v50 = vcombine.high %v91_v44, %v95_v45 }
  0x8d   :  { %1592 = vmatprep.mubr.bf16.mxu1 %v1857_v51  ;;  %v1921_v51 = vcombine.high %v92_v46, %v96_v47 }
  0x93   :  { %1457 = vmatmul.mubr.bf16.gmra.mxu0 %v1854_v56  ;;  %v1918_v56 = vcombine.low %v91_v44, %v95_v45 }
  0x94   :  { %1593 = vmatmul.mubr.bf16.gmra.mxu1 %v1856_v57  ;;  %1464 = vmatprep.mubr.bf16.mxu0 %v1863_v58  ;;  %v1920_v57 = vcombine.low %v92_v46, %v96_v47  ;;  %v1927_v58 = vcombine.high %v99_v52, %v103_v53 }
  0x95   :  { %1600 = vmatprep.mubr.bf16.mxu1 %v1865_v59  ;;  %v1929_v59 = vcombine.high %v100_v54, %v104_v55 }
  0x9b   :  { %1465 = vmatmul.mubr.bf16.gmra.mxu0 %v1862_v0  ;;  %v1926_v0 = vcombine.low %v99_v52, %v103_v53 }
  0x9c   :  { %1601 = vmatmul.mubr.bf16.gmra.mxu1 %v1864_v1  ;;  %1472 = vmatprep.mubr.bf16.mxu0 %v1871_v2  ;;  %v1928_v1 = vcombine.low %v100_v54, %v104_v55  ;;  %v1935_v2 = vcombine.high %v107_v60, %v111_v61 }
  0x9d   :  { %1608 = vmatprep.mubr.bf16.mxu1 %v1873_v3  ;;  %v1937_v3 = vcombine.high %v108_v62, %v112_v63 }
  0xa3   :  { %1473 = vmatmul.mubr.bf16.gmra.mxu0 %v1870_v8  ;;  %v1943_v8 = vcombine.high %v115_v4, %v115_v4 }
  0xa4   :  { %1609 = vmatmul.mubr.bf16.gmra.mxu1 %v1872_v9  ;;  %1480 = vmatprep.mubr.bf16.mxu0 %v1879_v10  ;;  %v1945_v9 = vcombine.high %v116_v5, %v116_v5 }
  0xa5   :  { %1616 = vmatprep.mubr.bf16.mxu1 %v1881_v11 }
  0xab   :  { %1481 = vmatmul.mubr.bf16.gmra.mxu0 %v1878_v16 }
  0xac   :  { %1617 = vmatmul.mubr.bf16.gmra.mxu1 %v1880_v17  ;;  %1488 = vmatprep.mubr.bf16.mxu0 %v1887_v18  ;;  %v1942_v18 = vcombine.low %v115_v4, %v115_v4 }
  0xad   :  { %1624 = vmatprep.mubr.bf16.mxu1 %v1889_v19 }
  0xb3   :  { %1489 = vmatmul.mubr.bf16.gmra.mxu0 %v1886_v24 }
  0xb4   :  { %1625 = vmatmul.mubr.bf16.gmra.mxu1 %v1888_v25  ;;  %1496 = vmatprep.mubr.bf16.mxu0 %v1895_v26 }
  0xb5   :  { %1632 = vmatprep.mubr.bf16.mxu1 %v1897_v27 }
  0xbb   :  { %1497 = vmatmul.mubr.bf16.gmra.mxu0 %v1894_v32 }
  0xbc   :  { %1633 = vmatmul.mubr.bf16.gmra.mxu1 %v1896_v33  ;;  %1504 = vmatprep.mubr.bf16.mxu0 %v1903_v34 }
  0xbd   :  { %1640 = vmatprep.mubr.bf16.mxu1 %v1905_v35 }
  0xc3   :  { %1505 = vmatmul.mubr.bf16.gmra.mxu0 %v1902_v40 }
  0xc4   :  { %1641 = vmatmul.mubr.bf16.gmra.mxu1 %v1904_v41  ;;  %1512 = vmatprep.mubr.bf16.mxu0 %v1911_v42 }
  0xc5   :  { %1648 = vmatprep.mubr.bf16.mxu1 %v1913_v43 }
  0xcb   :  { %1513 = vmatmul.mubr.bf16.gmra.mxu0 %v1910_v48 }
  0xcc   :  { %1649 = vmatmul.mubr.bf16.gmra.mxu1 %v1912_v49  ;;  %1520 = vmatprep.mubr.bf16.mxu0 %v1919_v50 }
  0xcd   :  { %1656 = vmatprep.mubr.bf16.mxu1 %v1921_v51 }
  0xd3   :  { %1521 = vmatmul.mubr.bf16.gmra.mxu0 %v1918_v56 }
  0xd4   :  { %1657 = vmatmul.mubr.bf16.gmra.mxu1 %v1920_v57  ;;  %1528 = vmatprep.mubr.bf16.mxu0 %v1927_v58 }
  0xd5   :  { %1664 = vmatprep.mubr.bf16.mxu1 %v1929_v59 }
  0xdb   :  { %1529 = vmatmul.mubr.bf16.gmra.mxu0 %v1926_v0 }
  0xdc   :  { %1665 = vmatmul.mubr.bf16.gmra.mxu1 %v1928_v1  ;;  %1536 = vmatprep.mubr.bf16.mxu0 %v1935_v2 }
  0xdd   :  { %1672 = vmatprep.mubr.bf16.mxu1 %v1937_v3 }
  0xe3   :  { %v2026_v10 = vpop.f32.mrf.mxu0  ;;  %1537 = vmatmul.mubr.bf16.gmra.mxu0 %v1934_v6 }
  0xe4   :  { %v2120_v11 = vpop.f32.mrf.mxu1  ;;  %1673 = vmatmul.mubr.bf16.gmra.mxu1 %v1936_v7  ;;  %1544 = vmatprep.mubr.bf16.mxu0 %v1943_v8 }
  0xe5   :  { %v2027_v13 = vpop.f32.mrf.mxu0  ;;  %1680 = vmatprep.mubr.bf16.mxu1 %v1945_v9 }
  0xe6   :  { %v2028_v14 = vadd.f32 %v2027_v13, %v2026_v10  ;;  %v2121_v15 = vpop.f32.mrf.mxu1 }
  0xe7   :  { %v2122_v16 = vadd.f32 %v2121_v15, %v2120_v11  ;;  %v2029_v17 = vpop.f32.mrf.mxu0 }
  0xe8   :  { %v1179_v19 = vadd.f32 %v2028_v14, %v2978_v12  ;;  %v2123_v20 = vpop.f32.mrf.mxu1 }
  0xe9   :  { %v2030_v22 = vpop.f32.mrf.mxu0 }
  0xea   :  { %v2981_v23 = vadd.f32 %v2122_v16, %v1179_v19  ;;  %v2031_v24 = vadd.f32 %v2030_v22, %v2029_v17  ;;  %v2124_v25 = vpop.f32.mrf.mxu1 }
  0xeb   :  { %v2125_v26 = vadd.f32 %v2124_v25, %v2123_v20  ;;  %v2032_v27 = vpop.f32.mrf.mxu0  ;;  %1545 = vmatmul.mubr.bf16.gmra.mxu0 %v1942_v18 }
  0xec   :  { %v1182_v28 = vadd.f32 %v2031_v24, %v2978_v12  ;;  %v2126_v29 = vpop.f32.mrf.mxu1  ;;  %1681 = vmatmul.mubr.bf16.gmra.mxu1 %v1944_v21 }
  0xed   :  { %v2033_v30 = vpop.f32.mrf.mxu0 }
  0xee   :  { %v2984_v31 = vadd.f32 %v2125_v26, %v1182_v28  ;;  %v2034_v32 = vadd.f32 %v2033_v30, %v2032_v27  ;;  %v2127_v33 = vpop.f32.mrf.mxu1 }
  0xef   :  { %v2128_v34 = vadd.f32 %v2127_v33, %v2126_v29  ;;  %v2035_v35 = vpop.f32.mrf.mxu0 }
  0xf0   :  { %v1187_v36 = vadd.f32 %v2034_v32, %v2978_v12  ;;  %v2129_v37 = vpop.f32.mrf.mxu1 }
  0xf1   :  { %v2036_v38 = vpop.f32.mrf.mxu0 }
  0xf2   :  { %v2987_v39 = vadd.f32 %v2128_v34, %v1187_v36  ;;  %v2037_v40 = vadd.f32 %v2036_v38, %v2035_v35  ;;  %v2130_v41 = vpop.f32.mrf.mxu1 }
  0xf3   :  { %v2131_v42 = vadd.f32 %v2130_v41, %v2129_v37  ;;  %v2038_v43 = vpop.f32.mrf.mxu0 }
  0xf4   :  { %v1190_v44 = vadd.f32 %v2037_v40, %v2978_v12  ;;  %v2132_v45 = vpop.f32.mrf.mxu1 }
  0xf5   :  { %v2039_v46 = vpop.f32.mrf.mxu0 }
  0xf6   :  { %v2990_v47 = vadd.f32 %v2131_v42, %v1190_v44  ;;  %v2040_v48 = vadd.f32 %v2039_v46, %v2038_v43  ;;  %v2133_v49 = vpop.f32.mrf.mxu1 }
  0xf7   :  { %v2134_v50 = vadd.f32 %v2133_v49, %v2132_v45  ;;  %v2041_v51 = vpop.f32.mrf.mxu0 }
  0xf8   :  { %v1195_v52 = vadd.f32 %v2040_v48, %v2978_v12  ;;  %v2135_v53 = vpop.f32.mrf.mxu1 }
  0xf9   :  { %v2042_v54 = vpop.f32.mrf.mxu0 }
  0xfa   :  { %v2993_v55 = vadd.f32 %v2134_v50, %v1195_v52  ;;  %v2043_v56 = vadd.f32 %v2042_v54, %v2041_v51  ;;  %v2136_v57 = vpop.f32.mrf.mxu1 }
  0xfb   :  { %v2137_v58 = vadd.f32 %v2136_v57, %v2135_v53  ;;  %v2044_v59 = vpop.f32.mrf.mxu0 }
  0xfc   :  { %v1198_v60 = vadd.f32 %v2043_v56, %v2978_v12  ;;  %v2138_v61 = vpop.f32.mrf.mxu1 }
  0xfd   :  { %v2045_v62 = vpop.f32.mrf.mxu0 }
  0xfe   :  { %v2996_v63 = vadd.f32 %v2137_v58, %v1198_v60  ;;  %v2046_v0 = vadd.f32 %v2045_v62, %v2044_v59  ;;  %v2139_v1 = vpop.f32.mrf.mxu1 }
  0xff   :  { %v2140_v2 = vadd.f32 %v2139_v1, %v2138_v61  ;;  %v2047_v3 = vpop.f32.mrf.mxu0 }
 0x100   :  { %v1203_v4 = vadd.f32 %v2046_v0, %v2978_v12  ;;  %v2141_v5 = vpop.f32.mrf.mxu1 }
 0x101   :  { %v2048_v6 = vpop.f32.mrf.mxu0 }
 0x102   :  { %v2999_v7 = vadd.f32 %v2140_v2, %v1203_v4  ;;  %v2049_v8 = vadd.f32 %v2048_v6, %v2047_v3  ;;  %v2142_v9 = vpop.f32.mrf.mxu1 }
 0x103   :  { %v2143_v10 = vadd.f32 %v2142_v9, %v2141_v5  ;;  %v2050_v11 = vpop.f32.mrf.mxu0 }
 0x104   :  { %v1206_v13 = vadd.f32 %v2049_v8, %v2978_v12  ;;  %v2144_v14 = vpop.f32.mrf.mxu1 }
 0x105   :  { %v2051_v15 = vpop.f32.mrf.mxu0 }
 0x106   :  { %v3002_v16 = vadd.f32 %v2143_v10, %v1206_v13  ;;  %v2052_v17 = vadd.f32 %v2051_v15, %v2050_v11  ;;  %v2145_v18 = vpop.f32.mrf.mxu1 }
 0x107   :  { %v2146_v19 = vadd.f32 %v2145_v18, %v2144_v14  ;;  %v2053_v20 = vpop.f32.mrf.mxu0 }
 0x108   :  { %v1211_v21 = vadd.f32 %v2052_v17, %v2978_v12  ;;  %v2147_v22 = vpop.f32.mrf.mxu1 }
 0x109   :  { %v2054_v24 = vpop.f32.mrf.mxu0 }
 0x10a   :  { %v3005_v25 = vadd.f32 %v2146_v19, %v1211_v21  ;;  %v2055_v26 = vadd.f32 %v2054_v24, %v2053_v20  ;;  %v2148_v27 = vpop.f32.mrf.mxu1 }
 0x10b   :  { %v2149_v28 = vadd.f32 %v2148_v27, %v2147_v22  ;;  %v2056_v29 = vpop.f32.mrf.mxu0 }
 0x10c   :  { %v1214_v30 = vadd.f32 %v2055_v26, %v2978_v12  ;;  %v2150_v32 = vpop.f32.mrf.mxu1 }
 0x10d   :  { %v2057_v33 = vpop.f32.mrf.mxu0 }
 0x10e   :  { %v3008_v34 = vadd.f32 %v2149_v28, %v1214_v30  ;;  %v2058_v35 = vadd.f32 %v2057_v33, %v2056_v29  ;;  %v2151_v36 = vpop.f32.mrf.mxu1 }
 0x10f   :  { %v2152_v37 = vadd.f32 %v2151_v36, %v2150_v32  ;;  %v2059_v38 = vpop.f32.mrf.mxu0 }
 0x110   :  { %v1219_v40 = vadd.f32 %v2058_v35, %v2978_v12  ;;  %v2153_v41 = vpop.f32.mrf.mxu1 }
 0x111   :  { %v2060_v42 = vpop.f32.mrf.mxu0 }
 0x112   :  { %v3011_v43 = vadd.f32 %v2152_v37, %v1219_v40  ;;  %v2061_v44 = vadd.f32 %v2060_v42, %v2059_v38  ;;  %v2154_v45 = vpop.f32.mrf.mxu1 }
 0x113   :  { %v2155_v46 = vadd.f32 %v2154_v45, %v2153_v41  ;;  %v2062_v48 = vpop.f32.mrf.mxu0 }
 0x114   :  { %v1222_v49 = vadd.f32 %v2061_v44, %v2978_v12  ;;  %v2156_v50 = vpop.f32.mrf.mxu1 }
 0x115   :  { %v2063_v51 = vpop.f32.mrf.mxu0 }
 0x116   :  { %v3014_v52 = vadd.f32 %v2155_v46, %v1222_v49  ;;  %v2064_v53 = vadd.f32 %v2063_v51, %v2062_v48  ;;  %v2157_v54 = vpop.f32.mrf.mxu1 }
 0x117   :  { %v2158_v56 = vadd.f32 %v2157_v54, %v2156_v50  ;;  %v2065_v57 = vpop.f32.mrf.mxu0 }
 0x118   :  { %v1227_v58 = vadd.f32 %v2064_v53, %v2978_v12  ;;  %v2159_v59 = vpop.f32.mrf.mxu1 }
 0x119   :  { %v2066_v60 = vpop.f32.mrf.mxu0 }
 0x11a   :  { %v3017_v61 = vadd.f32 %v2158_v56, %v1227_v58  ;;  %v2067_v62 = vadd.f32 %v2066_v60, %v2065_v57  ;;  %v2160_v0 = vpop.f32.mrf.mxu1 }
 0x11b   :  { %v2161_v1 = vadd.f32 %v2160_v0, %v2159_v59  ;;  %v2068_v2 = vpop.f32.mrf.mxu0 }
 0x11c   :  { %v1230_v3 = vadd.f32 %v2067_v62, %v2978_v12  ;;  %v2162_v4 = vpop.f32.mrf.mxu1 }
 0x11d   :  { %v2069_v5 = vpop.f32.mrf.mxu0 }
 0x11e   :  { %v3020_v6 = vadd.f32 %v2161_v1, %v1230_v3  ;;  %v2070_v8 = vadd.f32 %v2069_v5, %v2068_v2  ;;  %v2163_v9 = vpop.f32.mrf.mxu1 }
 0x11f   :  { %v2164_v10 = vadd.f32 %v2163_v9, %v2162_v4  ;;  %v2071_v11 = vpop.f32.mrf.mxu0 }
 0x120   :  { %v1235_v13 = vadd.f32 %v2070_v8, %v2978_v12  ;;  %v2165_v14 = vpop.f32.mrf.mxu1 }
 0x121   :  { %v2072_v15 = vpop.f32.mrf.mxu0 }
 0x122   :  { %v3023_v17 = vadd.f32 %v2164_v10, %v1235_v13  ;;  %v2073_v18 = vadd.f32 %v2072_v15, %v2071_v11  ;;  %v2166_v19 = vpop.f32.mrf.mxu1 }
 0x123   :  { %v2167_v20 = vadd.f32 %v2166_v19, %v2165_v14  ;;  %v2074_v21 = vpop.f32.mrf.mxu0 }
 0x124   :  { %v1238_v22 = vadd.f32 %v2073_v18, %v2978_v12  ;;  %v2168_v24 = vpop.f32.mrf.mxu1 }
 0x125   :  { %v2075_v26 = vpop.f32.mrf.mxu0 }
 0x126   :  { %v3026_v27 = vadd.f32 %v2167_v20, %v1238_v22  ;;  %v2076_v28 = vadd.f32 %v2075_v26, %v2074_v21  ;;  %v2169_v29 = vpop.f32.mrf.mxu1 }
 0x127   :  { %v2170_v30 = vadd.f32 %v2169_v29, %v2168_v24  ;;  %v2077_v32 = vpop.f32.mrf.mxu0 }
 0x128   :  { %v1243_v33 = vadd.f32 %v2076_v28, %v2978_v12  ;;  %v2171_v35 = vpop.f32.mrf.mxu1 }
 0x129   :  { %v2078_v36 = vpop.f32.mrf.mxu0 }
 0x12a   :  { %v3029_v37 = vadd.f32 %v2170_v30, %v1243_v33  ;;  %v2079_v38 = vadd.f32 %v2078_v36, %v2077_v32  ;;  %v2172_v40 = vpop.f32.mrf.mxu1 }
 0x12b   :  { %v2173_v41 = vadd.f32 %v2172_v40, %v2171_v35  ;;  %v2080_v42 = vpop.f32.mrf.mxu0 }
 0x12c   :  { %v1246_v44 = vadd.f32 %v2079_v38, %v2978_v12  ;;  %v2174_v45 = vpop.f32.mrf.mxu1 }
 0x12d   :  { %v2081_v46 = vpop.f32.mrf.mxu0 }
 0x12e   :  { %v3032_v48 = vadd.f32 %v2173_v41, %v1246_v44  ;;  %v2082_v49 = vadd.f32 %v2081_v46, %v2080_v42  ;;  %v2175_v50 = vpop.f32.mrf.mxu1 }
 0x12f   :  { %v2176_v51 = vadd.f32 %v2175_v50, %v2174_v45  ;;  %v2083_v53 = vpop.f32.mrf.mxu0 }
 0x130   :  { %v1251_v54 = vadd.f32 %v2082_v49, %v2978_v12  ;;  %v2177_v56 = vpop.f32.mrf.mxu1 }
 0x131   :  { %v2084_v57 = vpop.f32.mrf.mxu0 }
 0x132   :  { %v3035_v58 = vadd.f32 %v2176_v51, %v1251_v54  ;;  %v2085_v59 = vadd.f32 %v2084_v57, %v2083_v53  ;;  %v2178_v60 = vpop.f32.mrf.mxu1 }
 0x133   :  { %v2179_v62 = vadd.f32 %v2178_v60, %v2177_v56  ;;  %v2086_v0 = vpop.f32.mrf.mxu0 }
 0x134   :  { %v1254_v1 = vadd.f32 %v2085_v59, %v2978_v12  ;;  %v2180_v2 = vpop.f32.mrf.mxu1 }
 0x135   :  { %v2087_v3 = vpop.f32.mrf.mxu0 }
 0x136   :  { %v3038_v4 = vadd.f32 %v2179_v62, %v1254_v1  ;;  %v2088_v5 = vadd.f32 %v2087_v3, %v2086_v0  ;;  %v2181_v8 = vpop.f32.mrf.mxu1 }
 0x137   :  { %v2182_v9 = vadd.f32 %v2181_v8, %v2180_v2  ;;  %v2089_v10 = vpop.f32.mrf.mxu0 }
 0x138   :  { %v1259_v11 = vadd.f32 %v2088_v5, %v2978_v12  ;;  %v2183_v13 = vpop.f32.mrf.mxu1 }
 0x139   :  { %v2090_v14 = vpop.f32.mrf.mxu0 }
 0x13a   :  { %v3041_v15 = vadd.f32 %v2182_v9, %v1259_v11  ;;  %v2091_v18 = vadd.f32 %v2090_v14, %v2089_v10  ;;  %v2184_v19 = vpop.f32.mrf.mxu1 }
 0x13b   :  { %v2185_v20 = vadd.f32 %v2184_v19, %v2183_v13  ;;  %v2092_v21 = vpop.f32.mrf.mxu0 }
 0x13c   :  { %v1262_v22 = vadd.f32 %v2091_v18, %v2978_v12  ;;  %v2186_v24 = vpop.f32.mrf.mxu1 }
 0x13d   :  { %v2093_v26 = vpop.f32.mrf.mxu0 }
 0x13e   :  { %v3044_v28 = vadd.f32 %v2185_v20, %v1262_v22  ;;  %v2094_v29 = vadd.f32 %v2093_v26, %v2092_v21  ;;  %v2187_v30 = vpop.f32.mrf.mxu1 }
 0x13f   :  { %v2188_v32 = vadd.f32 %v2187_v30, %v2186_v24  ;;  %v2095_v33 = vpop.f32.mrf.mxu0 }
 0x140   :  { %v1267_v35 = vadd.f32 %v2094_v29, %v2978_v12  ;;  %v2189_v36 = vpop.f32.mrf.mxu1 }
 0x141   :  { %v2096_v38 = vpop.f32.mrf.mxu0 }
 0x142   :  { %v3047_v40 = vadd.f32 %v2188_v32, %v1267_v35  ;;  %v2097_v41 = vadd.f32 %v2096_v38, %v2095_v33  ;;  %v2190_v42 = vpop.f32.mrf.mxu1 }
 0x143   :  { %v2191_v44 = vadd.f32 %v2190_v42, %v2189_v36  ;;  %v2098_v45 = vpop.f32.mrf.mxu0 }
 0x144   :  { %v1270_v46 = vadd.f32 %v2097_v41, %v2978_v12  ;;  %v2192_v49 = vpop.f32.mrf.mxu1 }
 0x145   :  { %v2099_v50 = vpop.f32.mrf.mxu0 }
 0x146   :  { %v3050_v51 = vadd.f32 %v2191_v44, %v1270_v46  ;;  %v2100_v53 = vadd.f32 %v2099_v50, %v2098_v45  ;;  %v2193_v54 = vpop.f32.mrf.mxu1 }
 0x147   :  { %v2194_v56 = vadd.f32 %v2193_v54, %v2192_v49  ;;  %v2101_v57 = vpop.f32.mrf.mxu0 }
 0x148   :  { %v1275_v59 = vadd.f32 %v2100_v53, %v2978_v12  ;;  %v2195_v60 = vpop.f32.mrf.mxu1 }
 0x149   :  { %v2102_v62 = vpop.f32.mrf.mxu0 }
 0x14a   :  { %v3053_v0 = vadd.f32 %v2194_v56, %v1275_v59  ;;  %v2196_v1 = vpop.f32.mrf.mxu1 }
 0x14b   :  { %v2214_v2 = vpop.f32.mrf.mxu0 }
 0x14c   :  { %v2308_v3 = vpop.f32.mrf.mxu1 }
 0x14d   :  { %v2215_v5 = vpop.f32.mrf.mxu0 }
 0x14e   :  { %v2216_v8 = vadd.f32 %v2215_v5, %v2214_v2  ;;  %v2309_v9 = vpop.f32.mrf.mxu1 }
 0x14f   :  { %v2217_v10 = vpop.f32.mrf.mxu0  ;;  %v2310_v13 = vadd.f32 %v2309_v9, %v2308_v3 }
 0x150   :  { %v1451_v11 = vadd.f32 %v2216_v8, %v2981_v23  ;;  %v2311_v14 = vpop.f32.mrf.mxu1 }
 0x151   :  { %v2218_v18 = vpop.f32.mrf.mxu0 }
 0x152   :  { %v1587_v19 = vadd.f32 %v2310_v13, %v1451_v11  ;;  %v2219_v20 = vadd.f32 %v2218_v18, %v2217_v10  ;;  %v2312_v21 = vpop.f32.mrf.mxu1 }
 0x153   :  { %v2220_v12 = vpop.f32.mrf.mxu0  ;;  %v2313_v26 = vadd.f32 %v2312_v21, %v2311_v14 }
 0x154   :  { %v1688_v22 = vmax.f32 %v1587_v19, 0.0  ;;  %v1454_v24 = vadd.f32 %v2219_v20, %v2984_v31  ;;  %v2314_v29 = vpop.f32.mrf.mxu1 }
 0x155   :  { %v2221_v30 = vpop.f32.mrf.mxu0 }
 0x156   :  { %1713 = vst [vmem:[%s3161_s3] sm:$0xff] %v1688_v22  ;;  %v1590_v32 = vadd.f32 %v2313_v26, %v1454_v24  ;;  %v2222_v33 = vadd.f32 %v2221_v30, %v2220_v12  ;;  %v2315_v23 = vpop.f32.mrf.mxu1  ;;  %v1770_v44 = vmul.f32 %v1688_v22, %v1688_v22 }
 0x157   :  { %v2223_v35 = vpop.f32.mrf.mxu0  ;;  %v2316_v41 = vadd.f32 %v2315_v23, %v2314_v29 }
 0x158   :  { %v1689_v36 = vmax.f32 %v1590_v32, 0.0  ;;  %v1459_v38 = vadd.f32 %v2222_v33, %v2987_v39  ;;  %v2317_v42 = vpop.f32.mrf.mxu1 }
 0x159   :  { %v2224_v45 = vpop.f32.mrf.mxu0 }
 0x15a   :  { %1714 = vst [vmem:[%s3161_s3 + $0x8] sm:$0xff] %v1689_v36  ;;  %v1738_v31 = vadd.f32 %v1689_v36, %v1688_v22  ;;  %v1771_v46 = vmul.f32 %v1689_v36, %v1689_v36  ;;  %v1595_v49 = vadd.f32 %v2316_v41, %v1459_v38  ;;  %v2225_v50 = vadd.f32 %v2224_v45, %v2223_v35  ;;  %v2318_v53 = vpop.f32.mrf.mxu1 }
 0x15b   :  { %v2226_v54 = vpop.f32.mrf.mxu0  ;;  %v2319_v60 = vadd.f32 %v2318_v53, %v2317_v42 }
 0x15c   :  { %v1795_v56 = vadd.f32 %v1771_v46, %v1770_v44  ;;  %v1690_v57 = vmax.f32 %v1595_v49, 0.0  ;;  %v1462_v59 = vadd.f32 %v2225_v50, %v2990_v47  ;;  %v2320_v39 = vpop.f32.mrf.mxu1 }
 0x15d   :  { %v2227_v62 = vpop.f32.mrf.mxu0 }
 0x15e   :  { %1715 = vst [vmem:[%s3161_s3 + $0x10] sm:$0xff] %v1690_v57  ;;  %v1739_v1 = vadd.f32 %v1738_v31, %v1690_v57  ;;  %v1772_v2 = vmul.f32 %v1690_v57, %v1690_v57  ;;  %v1598_v3 = vadd.f32 %v2319_v60, %v1462_v59  ;;  %v2228_v5 = vadd.f32 %v2227_v62, %v2226_v54  ;;  %v2321_v8 = vpop.f32.mrf.mxu1 }
 0x15f   :  { %v2229_v9 = vpop.f32.mrf.mxu0  ;;  %v2322_v14 = vadd.f32 %v2321_v8, %v2320_v39 }
 0x160   :  { %v1796_v10 = vadd.f32 %v1795_v56, %v1772_v2  ;;  %v1691_v11 = vmax.f32 %v1598_v3, 0.0  ;;  %v1467_v13 = vadd.f32 %v2228_v5, %v2993_v55  ;;  %v2323_v18 = vpop.f32.mrf.mxu1 }
 0x161   :  { %v2230_v47 = vpop.f32.mrf.mxu0 }
 0x162   :  { %1716 = vst [vmem:[%s3161_s3 + $0x18] sm:$0xff] %v1691_v11  ;;  %v1740_v19 = vadd.f32 %v1739_v1, %v1691_v11  ;;  %v1773_v20 = vmul.f32 %v1691_v11, %v1691_v11  ;;  %v1603_v21 = vadd.f32 %v2322_v14, %v1467_v13  ;;  %v2231_v12 = vadd.f32 %v2230_v47, %v2229_v9  ;;  %v2324_v22 = vpop.f32.mrf.mxu1 }
 0x163   :  { %v2232_v24 = vpop.f32.mrf.mxu0  ;;  %v2325_v32 = vadd.f32 %v2324_v22, %v2323_v18 }
 0x164   :  { %v1797_v26 = vadd.f32 %v1796_v10, %v1773_v20  ;;  %v1692_v29 = vmax.f32 %v1603_v21, 0.0  ;;  %v1470_v30 = vadd.f32 %v2231_v12, %v2996_v63  ;;  %v2326_v33 = vpop.f32.mrf.mxu1 }
 0x165   :  { %v2233_v55 = vpop.f32.mrf.mxu0 }
 0x166   :  { %1717 = vst [vmem:[%s3161_s3 + $0x20] sm:$0xff] %v1692_v29  ;;  %v1741_v23 = vadd.f32 %v1740_v19, %v1692_v29  ;;  %v1774_v35 = vmul.f32 %v1692_v29, %v1692_v29  ;;  %v1606_v36 = vadd.f32 %v2325_v32, %v1470_v30  ;;  %v2234_v38 = vadd.f32 %v2233_v55, %v2232_v24  ;;  %v2327_v41 = vpop.f32.mrf.mxu1 }
 0x167   :  { %v2235_v42 = vpop.f32.mrf.mxu0  ;;  %v2328_v46 = vadd.f32 %v2327_v41, %v2326_v33 }
 0x168   :  { %v1798_v44 = vadd.f32 %v1797_v26, %v1774_v35  ;;  %v1693_v45 = vmax.f32 %v1606_v36, 0.0  ;;  %v1475_v31 = vadd.f32 %v2234_v38, %v2999_v7  ;;  %v2329_v49 = vpop.f32.mrf.mxu1 }
 0x169   :  { %v2236_v63 = vpop.f32.mrf.mxu0 }
 0x16a   :  { %1718 = vst [vmem:[%s3161_s3 + $0x28] sm:$0xff] %v1693_v45  ;;  %v1742_v50 = vadd.f32 %v1741_v23, %v1693_v45  ;;  %v1775_v53 = vmul.f32 %v1693_v45, %v1693_v45  ;;  %v1611_v54 = vadd.f32 %v2328_v46, %v1475_v31  ;;  %v2237_v56 = vadd.f32 %v2236_v63, %v2235_v42  ;;  %v2330_v57 = vpop.f32.mrf.mxu1 }
 0x16b   :  { %v2238_v59 = vpop.f32.mrf.mxu0  ;;  %v2331_v1 = vadd.f32 %v2330_v57, %v2329_v49 }
 0x16c   :  { %v1799_v60 = vadd.f32 %v1798_v44, %v1775_v53  ;;  %v1694_v39 = vmax.f32 %v1611_v54, 0.0  ;;  %v1478_v62 = vadd.f32 %v2237_v56, %v3002_v16  ;;  %v2332_v2 = vpop.f32.mrf.mxu1 }
 0x16d   :  { %v2239_v7 = vpop.f32.mrf.mxu0 }
 0x16e   :  { %1719 = vst [vmem:[%s3161_s3 + $0x30] sm:$0xff] %v1694_v39  ;;  %v1743_v3 = vadd.f32 %v1742_v50, %v1694_v39  ;;  %v1776_v5 = vmul.f32 %v1694_v39, %v1694_v39  ;;  %v1614_v8 = vadd.f32 %v2331_v1, %v1478_v62  ;;  %v2240_v9 = vadd.f32 %v2239_v7, %v2238_v59  ;;  %v2333_v10 = vpop.f32.mrf.mxu1 }
 0x16f   :  { %v2241_v11 = vpop.f32.mrf.mxu0  ;;  %v2334_v47 = vadd.f32 %v2333_v10, %v2332_v2 }
 0x170   :  { %v1800_v13 = vadd.f32 %v1799_v60, %v1776_v5  ;;  %v1695_v14 = vmax.f32 %v1614_v8, 0.0  ;;  %v1483_v18 = vadd.f32 %v2240_v9, %v3005_v25  ;;  %v2335_v19 = vpop.f32.mrf.mxu1 }
 0x171   :  { %v2242_v16 = vpop.f32.mrf.mxu0 }
 0x172   :  { %1720 = vst [vmem:[%s3161_s3 + $0x38] sm:$0xff] %v1695_v14  ;;  %v1744_v20 = vadd.f32 %v1743_v3, %v1695_v14  ;;  %v1777_v21 = vmul.f32 %v1695_v14, %v1695_v14  ;;  %v1619_v12 = vadd.f32 %v2334_v47, %v1483_v18  ;;  %v2243_v22 = vadd.f32 %v2242_v16, %v2241_v11  ;;  %v2336_v24 = vpop.f32.mrf.mxu1 }
 0x173   :  { %v2244_v26 = vpop.f32.mrf.mxu0  ;;  %v2337_v33 = vadd.f32 %v2336_v24, %v2335_v19 }
 0x174   :  { %v1801_v29 = vadd.f32 %v1800_v13, %v1777_v21  ;;  %v1696_v30 = vmax.f32 %v1619_v12, 0.0  ;;  %v1486_v32 = vadd.f32 %v2243_v22, %v3008_v34  ;;  %v2338_v55 = vpop.f32.mrf.mxu1 }
 0x175   :  { %v2245_v25 = vpop.f32.mrf.mxu0 }
 0x176   :  { %1721 = vst [vmem:[%s3161_s3 + $0x40] sm:$0xff] %v1696_v30  ;;  %v1745_v23 = vadd.f32 %v1744_v20, %v1696_v30  ;;  %v1778_v35 = vmul.f32 %v1696_v30, %v1696_v30  ;;  %v1622_v36 = vadd.f32 %v2337_v33, %v1486_v32  ;;  %v2246_v38 = vadd.f32 %v2245_v25, %v2244_v26  ;;  %v2339_v41 = vpop.f32.mrf.mxu1 }
 0x177   :  { %v2247_v42 = vpop.f32.mrf.mxu0  ;;  %v2340_v46 = vadd.f32 %v2339_v41, %v2338_v55 }
 0x178   :  { %v1802_v44 = vadd.f32 %v1801_v29, %v1778_v35  ;;  %v1697_v45 = vmax.f32 %v1622_v36, 0.0  ;;  %v1491_v31 = vadd.f32 %v2246_v38, %v3011_v43  ;;  %v2341_v49 = vpop.f32.mrf.mxu1 }
 0x179   :  { %v2248_v34 = vpop.f32.mrf.mxu0 }
 0x17a   :  { %1722 = vst [vmem:[%s3161_s3 + $0x48] sm:$0xff] %v1697_v45  ;;  %v1746_v63 = vadd.f32 %v1745_v23, %v1697_v45  ;;  %v1779_v50 = vmul.f32 %v1697_v45, %v1697_v45  ;;  %v1627_v53 = vadd.f32 %v2340_v46, %v1491_v31  ;;  %v2249_v54 = vadd.f32 %v2248_v34, %v2247_v42  ;;  %v2342_v56 = vpop.f32.mrf.mxu1 }
 0x17b   :  { %v2250_v57 = vpop.f32.mrf.mxu0  ;;  %v2343_v62 = vadd.f32 %v2342_v56, %v2341_v49 }
 0x17c   :  { %v1803_v59 = vadd.f32 %v1802_v44, %v1779_v50  ;;  %v1698_v60 = vmax.f32 %v1627_v53, 0.0  ;;  %v1494_v39 = vadd.f32 %v2249_v54, %v3014_v52  ;;  %v2344_v1 = vpop.f32.mrf.mxu1 }
 0x17d   :  { %v2251_v43 = vpop.f32.mrf.mxu0 }
 0x17e   :  { %1723 = vst [vmem:[%s3161_s3 + $0x50] sm:$0xff] %v1698_v60  ;;  %v1747_v2 = vadd.f32 %v1746_v63, %v1698_v60  ;;  %v1780_v7 = vmul.f32 %v1698_v60, %v1698_v60  ;;  %v1630_v3 = vadd.f32 %v2343_v62, %v1494_v39  ;;  %v2252_v5 = vadd.f32 %v2251_v43, %v2250_v57  ;;  %v2345_v8 = vpop.f32.mrf.mxu1 }
 0x17f   :  { %v2253_v9 = vpop.f32.mrf.mxu0  ;;  %v2346_v14 = vadd.f32 %v2345_v8, %v2344_v1 }
 0x180   :  { %v1804_v10 = vadd.f32 %v1803_v59, %v1780_v7  ;;  %v1699_v11 = vmax.f32 %v1630_v3, 0.0  ;;  %v1499_v13 = vadd.f32 %v2252_v5, %v3017_v61  ;;  %v2347_v18 = vpop.f32.mrf.mxu1 }
 0x181   :  { %v2254_v52 = vpop.f32.mrf.mxu0 }
 0x182   :  { %1724 = vst [vmem:[%s3161_s3 + $0x58] sm:$0xff] %v1699_v11  ;;  %v1748_v47 = vadd.f32 %v1747_v2, %v1699_v11  ;;  %v1781_v19 = vmul.f32 %v1699_v11, %v1699_v11  ;;  %v1635_v16 = vadd.f32 %v2346_v14, %v1499_v13  ;;  %v2255_v20 = vadd.f32 %v2254_v52, %v2253_v9  ;;  %v2348_v21 = vpop.f32.mrf.mxu1 }
 0x183   :  { %v2256_v12 = vpop.f32.mrf.mxu0  ;;  %v2349_v29 = vadd.f32 %v2348_v21, %v2347_v18 }
 0x184   :  { %v1805_v22 = vadd.f32 %v1804_v10, %v1781_v19  ;;  %v1700_v24 = vmax.f32 %v1635_v16, 0.0  ;;  %v1502_v26 = vadd.f32 %v2255_v20, %v3020_v6  ;;  %v2350_v30 = vpop.f32.mrf.mxu1 }
 0x185   :  { %v2257_v61 = vpop.f32.mrf.mxu0 }
 0x186   :  { %1725 = vst [vmem:[%s3161_s3 + $0x60] sm:$0xff] %v1700_v24  ;;  %v1749_v32 = vadd.f32 %v1748_v47, %v1700_v24  ;;  %v1782_v33 = vmul.f32 %v1700_v24, %v1700_v24  ;;  %v1638_v55 = vadd.f32 %v2349_v29, %v1502_v26  ;;  %v2258_v25 = vadd.f32 %v2257_v61, %v2256_v12  ;;  %v2351_v23 = vpop.f32.mrf.mxu1 }
 0x187   :  { %v2259_v35 = vpop.f32.mrf.mxu0  ;;  %v2352_v42 = vadd.f32 %v2351_v23, %v2350_v30 }
 0x188   :  { %v1806_v36 = vadd.f32 %v1805_v22, %v1782_v33  ;;  %v1701_v38 = vmax.f32 %v1638_v55, 0.0  ;;  %v1507_v41 = vadd.f32 %v2258_v25, %v3023_v17  ;;  %v2353_v44 = vpop.f32.mrf.mxu1 }
 0x189   :  { %v2260_v6 = vpop.f32.mrf.mxu0 }
 0x18a   :  { %1726 = vst [vmem:[%s3161_s3 + $0x68] sm:$0xff] %v1701_v38  ;;  %v1750_v45 = vadd.f32 %v1749_v32, %v1701_v38  ;;  %v1783_v31 = vmul.f32 %v1701_v38, %v1701_v38  ;;  %v1643_v46 = vadd.f32 %v2352_v42, %v1507_v41  ;;  %v2261_v49 = vadd.f32 %v2260_v6, %v2259_v35  ;;  %v2354_v34 = vpop.f32.mrf.mxu1 }
 0x18b   :  { %v2262_v63 = vpop.f32.mrf.mxu0  ;;  %v2355_v56 = vadd.f32 %v2354_v34, %v2353_v44 }
 0x18c   :  { %v1807_v50 = vadd.f32 %v1806_v36, %v1783_v31  ;;  %v1702_v53 = vmax.f32 %v1643_v46, 0.0  ;;  %v1510_v54 = vadd.f32 %v2261_v49, %v3026_v27  ;;  %v2356_v57 = vpop.f32.mrf.mxu1 }
 0x18d   :  { %v2263_v17 = vpop.f32.mrf.mxu0 }
 0x18e   :  { %1727 = vst [vmem:[%s3161_s3 + $0x70] sm:$0xff] %v1702_v53  ;;  %v1751_v59 = vadd.f32 %v1750_v45, %v1702_v53  ;;  %v1784_v60 = vmul.f32 %v1702_v53, %v1702_v53  ;;  %v1646_v39 = vadd.f32 %v2355_v56, %v1510_v54  ;;  %v2264_v62 = vadd.f32 %v2263_v17, %v2262_v63  ;;  %v2357_v1 = vpop.f32.mrf.mxu1 }
 0x18f   :  { %v2265_v43 = vpop.f32.mrf.mxu0  ;;  %v2358_v5 = vadd.f32 %v2357_v1, %v2356_v57 }
 0x190   :  { %v1808_v2 = vadd.f32 %v1807_v50, %v1784_v60  ;;  %v1703_v7 = vmax.f32 %v1646_v39, 0.0  ;;  %v1515_v3 = vadd.f32 %v2264_v62, %v3029_v37  ;;  %v2359_v8 = vpop.f32.mrf.mxu1 }
 0x191   :  { %v2266_v27 = vpop.f32.mrf.mxu0 }
 0x192   :  { %1728 = vst [vmem:[%s3161_s3 + $0x78] sm:$0xff] %v1703_v7  ;;  %v1752_v9 = vadd.f32 %v1751_v59, %v1703_v7  ;;  %v1785_v10 = vmul.f32 %v1703_v7, %v1703_v7  ;;  %v1651_v11 = vadd.f32 %v2358_v5, %v1515_v3  ;;  %v2267_v13 = vadd.f32 %v2266_v27, %v2265_v43  ;;  %v2360_v14 = vpop.f32.mrf.mxu1 }
 0x193   :  { %v2268_v18 = vpop.f32.mrf.mxu0  ;;  %v2361_v16 = vadd.f32 %v2360_v14, %v2359_v8 }
 0x194   :  { %v1809_v52 = vadd.f32 %v1808_v2, %v1785_v10  ;;  %v1704_v47 = vmax.f32 %v1651_v11, 0.0  ;;  %v1518_v19 = vadd.f32 %v2267_v13, %v3032_v48  ;;  %v2362_v20 = vpop.f32.mrf.mxu1 }
 0x195   :  { %v2269_v37 = vpop.f32.mrf.mxu0 }
 0x196   :  { %1729 = vst [vmem:[%s3161_s3 + $0x80] sm:$0xff] %v1704_v47  ;;  %v1753_v21 = vadd.f32 %v1752_v9, %v1704_v47  ;;  %v1786_v12 = vmul.f32 %v1704_v47, %v1704_v47  ;;  %v1654_v22 = vadd.f32 %v2361_v16, %v1518_v19  ;;  %v2270_v24 = vadd.f32 %v2269_v37, %v2268_v18  ;;  %v2363_v26 = vpop.f32.mrf.mxu1 }
 0x197   :  { %v2271_v29 = vpop.f32.mrf.mxu0  ;;  %v2364_v33 = vadd.f32 %v2363_v26, %v2362_v20 }
 0x198   :  { %v1810_v30 = vadd.f32 %v1809_v52, %v1786_v12  ;;  %v1705_v61 = vmax.f32 %v1654_v22, 0.0  ;;  %v1523_v32 = vadd.f32 %v2270_v24, %v3035_v58  ;;  %v2365_v55 = vpop.f32.mrf.mxu1 }
 0x199   :  { %v2272_v48 = vpop.f32.mrf.mxu0 }
 0x19a   :  { %1730 = vst [vmem:[%s3161_s3 + $0x88] sm:$0xff] %v1705_v61  ;;  %v1754_v25 = vadd.f32 %v1753_v21, %v1705_v61  ;;  %v1787_v23 = vmul.f32 %v1705_v61, %v1705_v61  ;;  %v1659_v35 = vadd.f32 %v2364_v33, %v1523_v32  ;;  %v2273_v36 = vadd.f32 %v2272_v48, %v2271_v29  ;;  %v2366_v38 = vpop.f32.mrf.mxu1 }
 0x19b   :  { %v2274_v41 = vpop.f32.mrf.mxu0  ;;  %v2367_v45 = vadd.f32 %v2366_v38, %v2365_v55 }
 0x19c   :  { %v1811_v42 = vadd.f32 %v1810_v30, %v1787_v23  ;;  %v1706_v44 = vmax.f32 %v1659_v35, 0.0  ;;  %v1526_v6 = vadd.f32 %v2273_v36, %v3038_v4  ;;  %v2368_v31 = vpop.f32.mrf.mxu1 }
 0x19d   :  { %v2275_v58 = vpop.f32.mrf.mxu0 }
 0x19e   :  { %1731 = vst [vmem:[%s3161_s3 + $0x90] sm:$0xff] %v1706_v44  ;;  %v1755_v46 = vadd.f32 %v1754_v25, %v1706_v44  ;;  %v1788_v49 = vmul.f32 %v1706_v44, %v1706_v44  ;;  %v1662_v34 = vadd.f32 %v2367_v45, %v1526_v6  ;;  %v2276_v63 = vadd.f32 %v2275_v58, %v2274_v41  ;;  %v2369_v50 = vpop.f32.mrf.mxu1 }
 0x19f   :  { %v2277_v53 = vpop.f32.mrf.mxu0  ;;  %v2370_v17 = vadd.f32 %v2369_v50, %v2368_v31 }
 0x1a0   :  { %v1812_v54 = vadd.f32 %v1811_v42, %v1788_v49  ;;  %v1707_v56 = vmax.f32 %v1662_v34, 0.0  ;;  %v1531_v57 = vadd.f32 %v2276_v63, %v3041_v15  ;;  %v2371_v59 = vpop.f32.mrf.mxu1 }
 0x1a1   :  { %v2278_v4 = vpop.f32.mrf.mxu0 }
 0x1a2   :  { %1732 = vst [vmem:[%s3161_s3 + $0x98] sm:$0xff] %v1707_v56  ;;  %v1756_v60 = vadd.f32 %v1755_v46, %v1707_v56  ;;  %v1789_v39 = vmul.f32 %v1707_v56, %v1707_v56  ;;  %v1667_v62 = vadd.f32 %v2370_v17, %v1531_v57  ;;  %v2279_v1 = vadd.f32 %v2278_v4, %v2277_v53  ;;  %v2372_v43 = vpop.f32.mrf.mxu1 }
 0x1a3   :  { %v2280_v2 = vpop.f32.mrf.mxu0  ;;  %v2373_v8 = vadd.f32 %v2372_v43, %v2371_v59  ;;  %v1826_v59 = vlaneseq }
 0x1a4   :  { %v1813_v7 = vadd.f32 %v1812_v54, %v1789_v39  ;;  %v1708_v3 = vmax.f32 %v1667_v62, 0.0  ;;  %v1534_v5 = vadd.f32 %v2279_v1, %v3044_v28  ;;  %v2374_v27 = vpop.f32.mrf.mxu1 }
 0x1a5   :  { %v2281_v15 = vpop.f32.mrf.mxu0  ;;  %v1827_v1 = vshrl.u32 %v1826_v59, 7 }
 0x1a6   :  { %1733 = vst [vmem:[%s3161_s3 + $0xa0] sm:$0xff] %v1708_v3  ;;  %v1757_v9 = vadd.f32 %v1756_v60, %v1708_v3  ;;  %v1790_v10 = vmul.f32 %v1708_v3, %v1708_v3  ;;  %v1670_v11 = vadd.f32 %v2373_v8, %v1534_v5  ;;  %v2282_v13 = vadd.f32 %v2281_v15, %v2280_v2  ;;  %v2375_v14 = vpop.f32.mrf.mxu1 }
 0x1a7   :  { %v2283_v18 = vpop.f32.mrf.mxu0  ;;  %v2376_v16 = vadd.f32 %v2375_v14, %v2374_v27  ;;  %vm1829_vm1 = vcmp.eq.s32.totalorder %v1827_v1, 1  ;;  %vm1828_vm2 = vcmp.eq.s32.totalorder %v1827_v1, 0 }
 0x1a8   :  { %v1814_v52 = vadd.f32 %v1813_v7, %v1790_v10  ;;  %v1709_v47 = vmax.f32 %v1670_v11, 0.0  ;;  %v1539_v19 = vadd.f32 %v2282_v13, %v3047_v40  ;;  %v2377_v20 = vpop.f32.mrf.mxu1 }
 0x1a9   :  { %v2284_v28 = vpop.f32.mrf.mxu0 }
 0x1aa   :  { %1734 = vst [vmem:[%s3161_s3 + $0xa8] sm:$0xff] %v1709_v47  ;;  %v1758_v37 = vadd.f32 %v1757_v9, %v1709_v47  ;;  %v1791_v21 = vmul.f32 %v1709_v47, %v1709_v47  ;;  %v1675_v12 = vadd.f32 %v2376_v16, %v1539_v19  ;;  %v2285_v22 = vadd.f32 %v2284_v28, %v2283_v18  ;;  %v2378_v24 = vpop.f32.mrf.mxu1 }
 0x1ab   :  { %v2286_v26 = vpop.f32.mrf.mxu0  ;;  %v2379_v32 = vadd.f32 %v2378_v24, %v2377_v20 }
 0x1ac   :  { %v1815_v29 = vadd.f32 %v1814_v52, %v1791_v21  ;;  %v1710_v30 = vmax.f32 %v1675_v12, 0.0  ;;  %v1542_v61 = vadd.f32 %v2285_v22, %v3050_v51  ;;  %v2380_v33 = vpop.f32.mrf.mxu1 }
 0x1ad   :  { %v2287_v40 = vpop.f32.mrf.mxu0 }
 0x1ae   :  { %1735 = vst [vmem:[%s3161_s3 + $0xb0] sm:$0xff] %v1710_v30  ;;  %v1759_v55 = vadd.f32 %v1758_v37, %v1710_v30  ;;  %v1792_v48 = vmul.f32 %v1710_v30, %v1710_v30  ;;  %v1678_v25 = vadd.f32 %v2379_v32, %v1542_v61  ;;  %v2288_v23 = vadd.f32 %v2287_v40, %v2286_v26  ;;  %v2381_v35 = vpop.f32.mrf.mxu1 }
 0x1af   :  { %v2289_v36 = vpop.f32.mrf.mxu0  ;;  %v2382_v44 = vadd.f32 %v2381_v35, %v2380_v33 }
 0x1b0   :  { %v1816_v38 = vadd.f32 %v1815_v29, %v1792_v48  ;;  %v1711_v41 = vmax.f32 %v1678_v25, 0.0  ;;  %v1547_v42 = vadd.f32 %v2288_v23, %v3053_v0  ;;  %v2383_v6 = vpop.f32.mrf.mxu1 }
 0x1b1   :  { %v2290_v51 = vpop.f32.mrf.mxu0 }
 0x1b2   :  { %1736 = vst [vmem:[%s3161_s3 + $0xb8] sm:$0xff] %v1711_v41  ;;  %v1760_v45 = vadd.f32 %v1759_v55, %v1711_v41  ;;  %v1793_v31 = vmul.f32 %v1711_v41, %v1711_v41  ;;  %v1683_v58 = vadd.f32 %v2382_v44, %v1547_v42  ;;  %v2384_v46 = vpop.f32.mrf.mxu1 }
 0x1b4   :  { %v1817_v49 = vadd.f32 %v1816_v38, %v1793_v31  ;;  %v1712_v34 = vmax.f32 %v1683_v58, 0.0 }
 0x1b6   :  { %1737 = vst [vmem:[%s3161_s3 + $0xc0] sm:$0xf] %v1712_v34  ;;  %v1762_v63 = vsel %vm1761_vm0, %v1712_v34, 0.0  ;;  %v1794_v0 = vmul.f32 %v1712_v34, %v1712_v34 }
 0x1b7   :  { %v1763_v50 = vadd.f32 %v1762_v63, %v1760_v45 }
 0x1b8   :  { %v1818_v53 = vsel %vm1761_vm0, %v1794_v0, 0.0 }
 0x1b9   :  { %v1764_v54 = vrot.slane %v1763_v50, 4  ;;  %v1819_v56 = vadd.f32 %v1818_v53, %v1817_v49 }
 0x1bb   :  { %v1765_v57 = vadd.f32 %v1764_v54, %v1763_v50  ;;  %v1820_v17 = vrot.slane %v1819_v56, 4 }
 0x1bd   :  { %v1766_v4 = vrot.slane %v1765_v57, 2  ;;  %v1821_v60 = vadd.f32 %v1820_v17, %v1819_v56 }
 0x1bf   :  { %v1767_v39 = vadd.f32 %v1766_v4, %v1765_v57  ;;  %v1822_v62 = vrot.slane %v1821_v60, 2 }
 0x1c1   :  { %v1823_v43 = vadd.f32 %v1822_v62, %v1821_v60  ;;  %v1768_v2 = vrot.slane %v1767_v39, 1 }
 0x1c3   :  { %v1824_v7 = vrot.slane %v1823_v43, 1  ;;  %v1769_v5 = vadd.f32 %v1768_v2, %v1767_v39 }
 0x1c5   :  { %v1825_v3 = vadd.f32 %v1824_v7, %v1823_v43 }
 0x1c7   :  { %v1830_v8 = vsel %vm1829_vm1, %v1825_v3, 0.0 }
 0x1c8   :  { %v1831_v27 = vsel %vm1828_vm2, %v1769_v5, %v1830_v8 }
 0x1c9   :  { %1832 = vst [vmem:[%s3162_s4] sm:$0xff] %v1831_v27 }

// kernel: decoder_forward.11
= control target key start
LH: loop header
LB: loop body
LE: loop exit
PB: predicated region body
PF: predicated region fallthrough
CT: control target
= control target key end

     0   :  { %vm929_vm0 = vcmask 1043456   ;;  %s1877_s1 = inlined_call_operand.vmem [shape: bf16[512,128], index: 1, kind: input, shape index: {}]   ;;  %s1878_s0 = inlined_call_operand.vmem [shape: bf16[196,512], index: 0, kind: input, shape index: {}]   ;;  %s1879_s2 = inlined_call_operand.vmem [shape: f32[1,128], index: 2, kind: input, shape index: {}]   ;;  %s1880_s3 = inlined_call_operand.vmem [shape: f32[196,128], index: 3, kind: output, shape index: {0}]   ;;  %s1881_s4 = inlined_call_operand.vmem [shape: f32[8,128], index: 4, kind: output, shape index: {1}]  }
   0x1   :  { %v1282_v0 = vld [vmem:[%s1877_s1 + $0x78] sm:$0xff]   ;;  %v1286_v4 = vld [vmem:[%s1877_s1 + $0x70] sm:$0xff]   ;;  %v1290_v8 = vld [vmem:[%s1877_s1 + $0x68] sm:$0xff]  }
   0x2   :  { %v1283_v1 = vld [vmem:[%s1877_s1 + $0xf8] sm:$0xff]   ;;  %1094 = vmatprep.subr.bf16.mxu0 %v1282_v0  ;;  %v1287_v5 = vld [vmem:[%s1877_s1 + $0xf0] sm:$0xff]   ;;  %v1291_v9 = vld [vmem:[%s1877_s1 + $0xe8] sm:$0xff]  }
   0x3   :  { %v1284_v2 = vld [vmem:[%s1877_s1 + $0x38] sm:$0xff]   ;;  %1188 = vmatprep.subr.bf16.mxu1 %v1283_v1  ;;  %v1288_v6 = vld [vmem:[%s1877_s1 + $0x30] sm:$0xff]   ;;  %v1292_v10 = vld [vmem:[%s1877_s1 + $0x28] sm:$0xff]  }
   0x4   :  { %v1285_v3 = vld [vmem:[%s1877_s1 + $0xb8] sm:$0xff]   ;;  %1095 = vmatpush3.bf16.msra.mxu0 %v1284_v2  ;;  %v1289_v7 = vld [vmem:[%s1877_s1 + $0xb0] sm:$0xff]   ;;  %v1293_v11 = vld [vmem:[%s1877_s1 + $0xa8] sm:$0xff]  }
   0x5   :  { %1189 = vmatpush3.bf16.msra.mxu1 %v1285_v3  ;;  %1096 = vmatprep.subr.bf16.mxu0 %v1286_v4  ;;  %v1294_v12 = vld [vmem:[%s1877_s1 + $0x60] sm:$0xff]   ;;  %v1298_v16 = vld [vmem:[%s1877_s1 + $0x58] sm:$0xff]   ;;  %v1302_v20 = vld [vmem:[%s1877_s1 + $0x50] sm:$0xff]  }
   0x6   :  { %1190 = vmatprep.subr.bf16.mxu1 %v1287_v5  ;;  %v1295_v13 = vld [vmem:[%s1877_s1 + $0xe0] sm:$0xff]   ;;  %v1299_v17 = vld [vmem:[%s1877_s1 + $0xd8] sm:$0xff]   ;;  %v1303_v21 = vld [vmem:[%s1877_s1 + $0xd0] sm:$0xff]  }
   0x7   :  { %v1296_v14 = vld [vmem:[%s1877_s1 + $0x20] sm:$0xff]   ;;  %v1300_v18 = vld [vmem:[%s1877_s1 + $0x18] sm:$0xff]   ;;  %v1304_v22 = vld [vmem:[%s1877_s1 + $0x10] sm:$0xff]  }
   0x8   :  { %1097 = vmatpush3.bf16.msra.mxu0 %v1288_v6  ;;  %v1297_v15 = vld [vmem:[%s1877_s1 + $0xa0] sm:$0xff]   ;;  %v1301_v19 = vld [vmem:[%s1877_s1 + $0x98] sm:$0xff]   ;;  %v1305_v23 = vld [vmem:[%s1877_s1 + $0x90] sm:$0xff]  }
   0x9   :  { %1191 = vmatpush3.bf16.msra.mxu1 %v1289_v7  ;;  %1098 = vmatprep.subr.bf16.mxu0 %v1290_v8  ;;  %v1306_v24 = vld [vmem:[%s1877_s1 + $0x48] sm:$0xff]   ;;  %v1310_v28 = vld [vmem:[%s1877_s1 + $0x40] sm:$0xff]  }
   0xa   :  { %1192 = vmatprep.subr.bf16.mxu1 %v1291_v9  ;;  %v1307_v25 = vld [vmem:[%s1877_s1 + $0xc8] sm:$0xff]   ;;  %v1311_v29 = vld [vmem:[%s1877_s1 + $0xc0] sm:$0xff]  }
   0xb   :  { %v1308_v26 = vld [vmem:[%s1877_s1 + $0x8] sm:$0xff]   ;;  %v1312_v30 = vld [vmem:[%s1877_s1] sm:$0xff]  }
   0xc   :  { %1099 = vmatpush3.bf16.msra.mxu0 %v1292_v10  ;;  %v1309_v27 = vld [vmem:[%s1877_s1 + $0x88] sm:$0xff]   ;;  %v1313_v31 = vld [vmem:[%s1877_s1 + $0x80] sm:$0xff]  }
   0xd   :  { %1193 = vmatpush3.bf16.msra.mxu1 %v1293_v11  ;;  %1100 = vmatprep.subr.bf16.mxu0 %v1294_v12  ;;  %v1314_v32 = vld [vmem:[%s1878_s0] ss:$16 sps:$4 sm:$0xff]   ;;  %v1316_v33 = vld [vmem:[%s1878_s0 + $0x4] ss:$16 sps:$4 sm:$0xff]   ;;  %v1317_v34 = vld [vmem:[%s1878_s0 + $0x8] ss:$16 sps:$4 sm:$0xff]  }
   0xe   :  { %1194 = vmatprep.subr.bf16.mxu1 %v1295_v13  ;;  %v1319_v35 = vld [vmem:[%s1878_s0 + $0xc] ss:$16 sps:$4 sm:$0xff]   ;;  %616 = vmatprep.mubr.bf16.mxu0 %v1316_v33  ;;  %v1320_v36 = vld [vmem:[%s1878_s0 + $0x24] ss:$16 sps:$4 sm:$0xff]   ;;  %v1324_v38 = vld [vmem:[%s1878_s0 + $0x20] ss:$16 sps:$4 sm:$0xff]  }
   0xf   :  { %752 = vmatprep.mubr.bf16.mxu1 %v1319_v35  ;;  %v1322_v37 = vld [vmem:[%s1878_s0 + $0x2c] ss:$16 sps:$4 sm:$0xff]   ;;  %v1325_v39 = vld [vmem:[%s1878_s0 + $0x28] ss:$16 sps:$4 sm:$0xff]   ;;  %v1326_v40 = vld [vmem:[%s1878_s0 + $0x44] ss:$16 sps:$4 sm:$0xff]  }
  0x10   :  { %1101 = vmatpush3.bf16.msra.mxu0 %v1296_v14  ;;  %v1328_v41 = vld [vmem:[%s1878_s0 + $0x4c] ss:$16 sps:$4 sm:$0xff]   ;;  %v1330_v42 = vld [vmem:[%s1878_s0 + $0x40] ss:$16 sps:$4 sm:$0xff]   ;;  %v1331_v43 = vld [vmem:[%s1878_s0 + $0x48] ss:$16 sps:$4 sm:$0xff]  }
  0x11   :  { %1195 = vmatpush3.bf16.msra.mxu1 %v1297_v15  ;;  %1102 = vmatprep.subr.bf16.mxu0 %v1298_v16  ;;  %v1332_v44 = vld [vmem:[%s1878_s0 + $0x64] ss:$16 sps:$4 sm:$0xff]   ;;  %v1334_v45 = vld [vmem:[%s1878_s0 + $0x6c] ss:$16 sps:$4 sm:$0xff]   ;;  %v1336_v46 = vld [vmem:[%s1878_s0 + $0x60] ss:$16 sps:$4 sm:$0xff]  }
  0x12   :  { %1196 = vmatprep.subr.bf16.mxu1 %v1299_v17  ;;  %v1337_v47 = vld [vmem:[%s1878_s0 + $0x68] ss:$16 sps:$4 sm:$0xff]   ;;  %v1338_v48 = vld [vmem:[%s1878_s0 + $0x84] ss:$16 sps:$4 sm:$0xff]   ;;  %v1340_v49 = vld [vmem:[%s1878_s0 + $0x8c] ss:$16 sps:$4 sm:$0xff]  }
  0x13   :  { %v1342_v50 = vld [vmem:[%s1878_s0 + $0x80] ss:$16 sps:$4 sm:$0xff]   ;;  %v1343_v51 = vld [vmem:[%s1878_s0 + $0x88] ss:$16 sps:$4 sm:$0xff]   ;;  %v1344_v52 = vld [vmem:[%s1878_s0 + $0xa4] ss:$16 sps:$4 sm:$0xff]  }
  0x14   :  { %1103 = vmatpush3.bf16.msra.mxu0 %v1300_v18  ;;  %v1346_v53 = vld [vmem:[%s1878_s0 + $0xac] ss:$16 sps:$4 sm:$0xff]   ;;  %v1348_v54 = vld [vmem:[%s1878_s0 + $0xa0] ss:$16 sps:$4 sm:$0xff]   ;;  %v1349_v55 = vld [vmem:[%s1878_s0 + $0xa8] ss:$16 sps:$4 sm:$0xff]  }
  0x15   :  { %1197 = vmatpush3.bf16.msra.mxu1 %v1301_v19  ;;  %1104 = vmatprep.subr.bf16.mxu0 %v1302_v20  ;;  %v1350_v56 = vld [vmem:[%s1878_s0 + $0xc4] ss:$16 sps:$4 sm:$0xff]   ;;  %v1352_v57 = vld [vmem:[%s1878_s0 + $0xcc] ss:$16 sps:$4 sm:$0xff]   ;;  %v1354_v58 = vld [vmem:[%s1878_s0 + $0xc0] ss:$16 sps:$4 sm:$0xff]  }
  0x16   :  { %1198 = vmatprep.subr.bf16.mxu1 %v1303_v21  ;;  %v1355_v59 = vld [vmem:[%s1878_s0 + $0xc8] ss:$16 sps:$4 sm:$0xff]   ;;  %v1356_v60 = vld [vmem:[%s1878_s0 + $0xe4] ss:$16 sps:$4 sm:$0xff]   ;;  %v1358_v61 = vld [vmem:[%s1878_s0 + $0xec] ss:$16 sps:$4 sm:$0xff]  }
  0x17   :  { %v1360_v62 = vld [vmem:[%s1878_s0 + $0xe0] ss:$16 sps:$4 sm:$0xff]   ;;  %v1361_v63 = vld [vmem:[%s1878_s0 + $0xe8] ss:$16 sps:$4 sm:$0xff]   ;;  %v1362_v0 = vld [vmem:[%s1878_s0 + $0x104] ss:$16 sps:$4 sm:$0xff]  }
  0x18   :  { %1105 = vmatpush3.bf16.msra.mxu0 %v1304_v22  ;;  %v1364_v1 = vld [vmem:[%s1878_s0 + $0x10c] ss:$16 sps:$4 sm:$0xff]   ;;  %v1366_v2 = vld [vmem:[%s1878_s0 + $0x100] ss:$16 sps:$4 sm:$0xff]   ;;  %v1367_v3 = vld [vmem:[%s1878_s0 + $0x108] ss:$16 sps:$4 sm:$0xff]  }
  0x19   :  { %1199 = vmatpush3.bf16.msra.mxu1 %v1305_v23  ;;  %1106 = vmatprep.subr.bf16.mxu0 %v1306_v24  ;;  %v1368_v4 = vld [vmem:[%s1878_s0 + $0x124] ss:$16 sps:$4 sm:$0xff]   ;;  %v1370_v5 = vld [vmem:[%s1878_s0 + $0x12c] ss:$16 sps:$4 sm:$0xff]   ;;  %v1372_v6 = vld [vmem:[%s1878_s0 + $0x120] ss:$16 sps:$4 sm:$0xff]  }
  0x1a   :  { %1200 = vmatprep.subr.bf16.mxu1 %v1307_v25  ;;  %v1373_v7 = vld [vmem:[%s1878_s0 + $0x128] ss:$16 sps:$4 sm:$0xff]   ;;  %v1374_v8 = vld [vmem:[%s1878_s0 + $0x144] ss:$16 sps:$4 sm:$0xff]   ;;  %v1376_v9 = vld [vmem:[%s1878_s0 + $0x14c] ss:$16 sps:$4 sm:$0xff]  }
  0x1b   :  { %v1378_v10 = vld [vmem:[%s1878_s0 + $0x140] ss:$16 sps:$4 sm:$0xff]   ;;  %v1379_v11 = vld [vmem:[%s1878_s0 + $0x148] ss:$16 sps:$4 sm:$0xff]   ;;  %v1380_v12 = vld [vmem:[%s1878_s0 + $0x164] ss:$16 sps:$4 sm:$0xff]  }
  0x1c   :  { %1107 = vmatpush3.bf16.msra.mxu0 %v1308_v26  ;;  %v1382_v13 = vld [vmem:[%s1878_s0 + $0x16c] ss:$16 sps:$4 sm:$0xff]   ;;  %v65_v14 = vld [vmem:[%s1878_s0 + $0x180] sm:$0x33]  ;;  %v1385_v17 = vld [vmem:[%s1878_s0 + $0x168] ss:$16 sps:$4 sm:$0xff]  }
  0x1d   :  { %1201 = vmatpush3.bf16.msra.mxu1 %v1309_v27  ;;  %1108 = vmatprep.subr.bf16.mxu0 %v1310_v28  ;;  %v66_v15 = vld [vmem:[%s1878_s0 + $0x188] sm:$0x33]  ;;  %v1384_v16 = vld [vmem:[%s1878_s0 + $0x160] ss:$16 sps:$4 sm:$0xff]   ;;  %v1059_v18 = vcombine.high %v65_v14, %v65_v14  ;;  %v1058_v20 = vcombine.low %v65_v14, %v65_v14 }
  0x1e   :  { %1202 = vmatprep.subr.bf16.mxu1 %v1311_v29  ;;  %v1061_v19 = vcombine.high %v66_v15, %v66_v15  ;;  %v1060_v21 = vcombine.low %v66_v15, %v66_v15  ;;  %v1664_v24 = vld [vmem:[%s1879_s2] ss:$0 sm:$0xff] }
  0x20   :  { %1109 = vmatpush3.bf16.msra.mxu0 %v1312_v30 }
  0x21   :  { %1203 = vmatpush3.bf16.msra.mxu1 %v1313_v31 }
  0x23   :  { %617 = vmatmul.mubr.bf16.vlgmr.msra.gmra.mxu0 %v1314_v32 }
  0x24   :  { %753 = vmatmul.mubr.bf16.vlgmr.msra.gmra.mxu1 %v1317_v34  ;;  %624 = vmatprep.mubr.bf16.mxu0 %v1320_v36 }
  0x25   :  { %760 = vmatprep.mubr.bf16.mxu1 %v1322_v37 }
  0x2b   :  { %625 = vmatmul.mubr.bf16.gmra.mxu0 %v1324_v38 }
  0x2c   :  { %761 = vmatmul.mubr.bf16.gmra.mxu1 %v1325_v39  ;;  %632 = vmatprep.mubr.bf16.mxu0 %v1326_v40 }
  0x2d   :  { %768 = vmatprep.mubr.bf16.mxu1 %v1328_v41 }
  0x33   :  { %633 = vmatmul.mubr.bf16.gmra.mxu0 %v1330_v42 }
  0x34   :  { %769 = vmatmul.mubr.bf16.gmra.mxu1 %v1331_v43  ;;  %640 = vmatprep.mubr.bf16.mxu0 %v1332_v44 }
  0x35   :  { %776 = vmatprep.mubr.bf16.mxu1 %v1334_v45 }
  0x3b   :  { %641 = vmatmul.mubr.bf16.gmra.mxu0 %v1336_v46 }
  0x3c   :  { %777 = vmatmul.mubr.bf16.gmra.mxu1 %v1337_v47  ;;  %648 = vmatprep.mubr.bf16.mxu0 %v1338_v48 }
  0x3d   :  { %784 = vmatprep.mubr.bf16.mxu1 %v1340_v49 }
  0x43   :  { %649 = vmatmul.mubr.bf16.gmra.mxu0 %v1342_v50 }
  0x44   :  { %785 = vmatmul.mubr.bf16.gmra.mxu1 %v1343_v51  ;;  %656 = vmatprep.mubr.bf16.mxu0 %v1344_v52 }
  0x45   :  { %792 = vmatprep.mubr.bf16.mxu1 %v1346_v53 }
  0x4b   :  { %657 = vmatmul.mubr.bf16.gmra.mxu0 %v1348_v54 }
  0x4c   :  { %793 = vmatmul.mubr.bf16.gmra.mxu1 %v1349_v55  ;;  %664 = vmatprep.mubr.bf16.mxu0 %v1350_v56 }
  0x4d   :  { %800 = vmatprep.mubr.bf16.mxu1 %v1352_v57 }
  0x53   :  { %665 = vmatmul.mubr.bf16.gmra.mxu0 %v1354_v58 }
  0x54   :  { %801 = vmatmul.mubr.bf16.gmra.mxu1 %v1355_v59  ;;  %672 = vmatprep.mubr.bf16.mxu0 %v1356_v60 }
  0x55   :  { %808 = vmatprep.mubr.bf16.mxu1 %v1358_v61 }
  0x5b   :  { %673 = vmatmul.mubr.bf16.gmra.mxu0 %v1360_v62 }
  0x5c   :  { %809 = vmatmul.mubr.bf16.gmra.mxu1 %v1361_v63  ;;  %680 = vmatprep.mubr.bf16.mxu0 %v1362_v0 }
  0x5d   :  { %816 = vmatprep.mubr.bf16.mxu1 %v1364_v1 }
  0x63   :  { %681 = vmatmul.mubr.bf16.gmra.mxu0 %v1366_v2 }
  0x64   :  { %817 = vmatmul.mubr.bf16.gmra.mxu1 %v1367_v3  ;;  %688 = vmatprep.mubr.bf16.mxu0 %v1368_v4 }
  0x65   :  { %824 = vmatprep.mubr.bf16.mxu1 %v1370_v5 }
  0x6b   :  { %689 = vmatmul.mubr.bf16.gmra.mxu0 %v1372_v6 }
  0x6c   :  { %825 = vmatmul.mubr.bf16.gmra.mxu1 %v1373_v7  ;;  %696 = vmatprep.mubr.bf16.mxu0 %v1374_v8 }
  0x6d   :  { %832 = vmatprep.mubr.bf16.mxu1 %v1376_v9 }
  0x73   :  { %697 = vmatmul.mubr.bf16.gmra.mxu0 %v1378_v10 }
  0x74   :  { %833 = vmatmul.mubr.bf16.gmra.mxu1 %v1379_v11  ;;  %704 = vmatprep.mubr.bf16.mxu0 %v1380_v12 }
  0x75   :  { %840 = vmatprep.mubr.bf16.mxu1 %v1382_v13 }
  0x7b   :  { %705 = vmatmul.mubr.bf16.gmra.mxu0 %v1384_v16 }
  0x7c   :  { %841 = vmatmul.mubr.bf16.gmra.mxu1 %v1385_v17  ;;  %712 = vmatprep.mubr.bf16.mxu0 %v1059_v18 }
  0x7d   :  { %848 = vmatprep.mubr.bf16.mxu1 %v1061_v19 }
  0x83   :  { %713 = vmatmul.mubr.bf16.gmra.mxu0 %v1058_v20 }
  0x84   :  { %849 = vmatmul.mubr.bf16.gmra.mxu1 %v1060_v21 }
  0xe3   :  { %v1110_v22 = vpop.f32.mrf.mxu0 }
  0xe4   :  { %v1204_v23 = vpop.f32.mrf.mxu1 }
  0xe5   :  { %v1111_v25 = vpop.f32.mrf.mxu0 }
  0xe6   :  { %v1112_v26 = vadd.f32 %v1111_v25, %v1110_v22  ;;  %v1205_v27 = vpop.f32.mrf.mxu1 }
  0xe7   :  { %v1113_v28 = vpop.f32.mrf.mxu0  ;;  %v1206_v30 = vadd.f32 %v1205_v27, %v1204_v23 }
  0xe8   :  { %v619_v29 = vadd.f32 %v1112_v26, %v1664_v24  ;;  %v1207_v31 = vpop.f32.mrf.mxu1 }
  0xe9   :  { %v1114_v32 = vpop.f32.mrf.mxu0 }
  0xea   :  { %v755_v33 = vadd.f32 %v1206_v30, %v619_v29  ;;  %v1115_v34 = vadd.f32 %v1114_v32, %v1113_v28  ;;  %v1208_v35 = vpop.f32.mrf.mxu1 }
  0xeb   :  { %v1116_v36 = vpop.f32.mrf.mxu0  ;;  %v1209_v39 = vadd.f32 %v1208_v35, %v1207_v31 }
  0xec   :  { %v1667_v37 = vmax.f32 %v755_v33, 0.0  ;;  %v622_v38 = vadd.f32 %v1115_v34, %v1664_v24  ;;  %v1210_v40 = vpop.f32.mrf.mxu1 }
  0xed   :  { %v1117_v41 = vpop.f32.mrf.mxu0 }
  0xee   :  { %881 = vst [vmem:[%s1880_s3] sm:$0xff] %v1667_v37  ;;  %v758_v42 = vadd.f32 %v1209_v39, %v622_v38  ;;  %v1118_v43 = vadd.f32 %v1117_v41, %v1116_v36  ;;  %v1211_v44 = vpop.f32.mrf.mxu1 }
  0xef   :  { %v1119_v45 = vpop.f32.mrf.mxu0  ;;  %v1212_v48 = vadd.f32 %v1211_v44, %v1210_v40 }
  0xf0   :  { %v1674_v46 = vmax.f32 %v758_v42, 0.0  ;;  %v627_v47 = vadd.f32 %v1118_v43, %v1664_v24  ;;  %v1213_v49 = vpop.f32.mrf.mxu1 }
  0xf1   :  { %v1120_v50 = vpop.f32.mrf.mxu0 }
  0xf2   :  { %882 = vst [vmem:[%s1880_s3 + $0x8] sm:$0xff] %v1674_v46  ;;  %v763_v51 = vadd.f32 %v1212_v48, %v627_v47  ;;  %v1121_v52 = vadd.f32 %v1120_v50, %v1119_v45  ;;  %v1214_v53 = vpop.f32.mrf.mxu1 }
  0xf3   :  { %v1122_v54 = vpop.f32.mrf.mxu0  ;;  %v1215_v57 = vadd.f32 %v1214_v53, %v1213_v49 }
  0xf4   :  { %v1681_v55 = vmax.f32 %v763_v51, 0.0  ;;  %v630_v56 = vadd.f32 %v1121_v52, %v1664_v24  ;;  %v1216_v58 = vpop.f32.mrf.mxu1 }
  0xf5   :  { %v1123_v59 = vpop.f32.mrf.mxu0 }
  0xf6   :  { %883 = vst [vmem:[%s1880_s3 + $0x10] sm:$0xff] %v1681_v55  ;;  %v766_v60 = vadd.f32 %v1215_v57, %v630_v56  ;;  %v1124_v61 = vadd.f32 %v1123_v59, %v1122_v54  ;;  %v1217_v62 = vpop.f32.mrf.mxu1 }
  0xf7   :  { %v1125_v63 = vpop.f32.mrf.mxu0  ;;  %v1218_v2 = vadd.f32 %v1217_v62, %v1216_v58 }
  0xf8   :  { %v1688_v0 = vmax.f32 %v766_v60, 0.0  ;;  %v635_v1 = vadd.f32 %v1124_v61, %v1664_v24  ;;  %v1219_v3 = vpop.f32.mrf.mxu1 }
  0xf9   :  { %v1126_v4 = vpop.f32.mrf.mxu0 }
  0xfa   :  { %884 = vst [vmem:[%s1880_s3 + $0x18] sm:$0xff] %v1688_v0  ;;  %v771_v5 = vadd.f32 %v1218_v2, %v635_v1  ;;  %v1127_v6 = vadd.f32 %v1126_v4, %v1125_v63  ;;  %v1220_v7 = vpop.f32.mrf.mxu1 }
  0xfb   :  { %v1128_v8 = vpop.f32.mrf.mxu0  ;;  %v1221_v11 = vadd.f32 %v1220_v7, %v1219_v3 }
  0xfc   :  { %v1695_v9 = vmax.f32 %v771_v5, 0.0  ;;  %v638_v10 = vadd.f32 %v1127_v6, %v1664_v24  ;;  %v1222_v12 = vpop.f32.mrf.mxu1 }
  0xfd   :  { %v1129_v13 = vpop.f32.mrf.mxu0 }
  0xfe   :  { %885 = vst [vmem:[%s1880_s3 + $0x20] sm:$0xff] %v1695_v9  ;;  %v774_v14 = vadd.f32 %v1221_v11, %v638_v10  ;;  %v1130_v15 = vadd.f32 %v1129_v13, %v1128_v8  ;;  %v1223_v16 = vpop.f32.mrf.mxu1 }
  0xff   :  { %v1131_v17 = vpop.f32.mrf.mxu0  ;;  %v1224_v20 = vadd.f32 %v1223_v16, %v1222_v12 }
 0x100   :  { %v1702_v18 = vmax.f32 %v774_v14, 0.0  ;;  %v643_v19 = vadd.f32 %v1130_v15, %v1664_v24  ;;  %v1225_v21 = vpop.f32.mrf.mxu1 }
 0x101   :  { %v1132_v22 = vpop.f32.mrf.mxu0 }
 0x102   :  { %886 = vst [vmem:[%s1880_s3 + $0x28] sm:$0xff] %v1702_v18  ;;  %v779_v23 = vadd.f32 %v1224_v20, %v643_v19  ;;  %v1133_v25 = vadd.f32 %v1132_v22, %v1131_v17  ;;  %v1226_v26 = vpop.f32.mrf.mxu1 }
 0x103   :  { %v1134_v27 = vpop.f32.mrf.mxu0  ;;  %v1227_v30 = vadd.f32 %v1226_v26, %v1225_v21 }
 0x104   :  { %v1709_v28 = vmax.f32 %v779_v23, 0.0  ;;  %v646_v29 = vadd.f32 %v1133_v25, %v1664_v24  ;;  %v1228_v31 = vpop.f32.mrf.mxu1 }
 0x105   :  { %v1135_v32 = vpop.f32.mrf.mxu0 }
 0x106   :  { %887 = vst [vmem:[%s1880_s3 + $0x30] sm:$0xff] %v1709_v28  ;;  %v782_v33 = vadd.f32 %v1227_v30, %v646_v29  ;;  %v1136_v34 = vadd.f32 %v1135_v32, %v1134_v27  ;;  %v1229_v35 = vpop.f32.mrf.mxu1 }
 0x107   :  { %v1137_v36 = vpop.f32.mrf.mxu0  ;;  %v1230_v40 = vadd.f32 %v1229_v35, %v1228_v31 }
 0x108   :  { %v1716_v38 = vmax.f32 %v782_v33, 0.0  ;;  %v651_v39 = vadd.f32 %v1136_v34, %v1664_v24  ;;  %v1231_v41 = vpop.f32.mrf.mxu1  ;;  %v939_v34 = vmul.f32 %v1674_v46, %v1674_v46 }
 0x109   :  { %v1138_v42 = vpop.f32.mrf.mxu0 }
 0x10a   :  { %888 = vst [vmem:[%s1880_s3 + $0x38] sm:$0xff] %v1716_v38  ;;  %v787_v43 = vadd.f32 %v1230_v40, %v651_v39  ;;  %v1139_v44 = vadd.f32 %v1138_v42, %v1137_v36  ;;  %v1232_v45 = vpop.f32.mrf.mxu1  ;;  %v938_v42 = vmul.f32 %v1667_v37, %v1667_v37 }
 0x10b   :  { %v1140_v47 = vpop.f32.mrf.mxu0  ;;  %v1233_v50 = vadd.f32 %v1232_v45, %v1231_v41 }
 0x10c   :  { %v1723_v48 = vmax.f32 %v787_v43, 0.0  ;;  %v654_v49 = vadd.f32 %v1139_v44, %v1664_v24  ;;  %v1234_v51 = vpop.f32.mrf.mxu1  ;;  %v906_v43 = vadd.f32 %v1674_v46, %v1667_v37  ;;  %v940_v44 = vmul.f32 %v1681_v55, %v1681_v55 }
 0x10d   :  { %v1141_v52 = vpop.f32.mrf.mxu0 }
 0x10e   :  { %889 = vst [vmem:[%s1880_s3 + $0x40] sm:$0xff] %v1723_v48  ;;  %v790_v53 = vadd.f32 %v1233_v50, %v654_v49  ;;  %v1142_v54 = vadd.f32 %v1141_v52, %v1140_v47  ;;  %v1235_v56 = vpop.f32.mrf.mxu1  ;;  %v907_v52 = vadd.f32 %v906_v43, %v1681_v55 }
 0x10f   :  { %v1143_v57 = vpop.f32.mrf.mxu0  ;;  %v1236_v60 = vadd.f32 %v1235_v56, %v1234_v51  ;;  %v963_v51 = vadd.f32 %v939_v34, %v938_v42 }
 0x110   :  { %v1730_v58 = vmax.f32 %v790_v53, 0.0  ;;  %v659_v59 = vadd.f32 %v1142_v54, %v1664_v24  ;;  %v1237_v61 = vpop.f32.mrf.mxu1  ;;  %v941_v53 = vmul.f32 %v1688_v0, %v1688_v0 }
 0x111   :  { %v1144_v62 = vpop.f32.mrf.mxu0 }
 0x112   :  { %890 = vst [vmem:[%s1880_s3 + $0x48] sm:$0xff] %v1730_v58  ;;  %v795_v63 = vadd.f32 %v1236_v60, %v659_v59  ;;  %v1145_v1 = vadd.f32 %v1144_v62, %v1143_v57  ;;  %v1238_v2 = vpop.f32.mrf.mxu1  ;;  %v964_v59 = vadd.f32 %v963_v51, %v940_v44  ;;  %v908_v60 = vadd.f32 %v907_v52, %v1688_v0 }
 0x113   :  { %v1146_v3 = vpop.f32.mrf.mxu0  ;;  %v1239_v6 = vadd.f32 %v1238_v2, %v1237_v61  ;;  %v942_v61 = vmul.f32 %v1695_v9, %v1695_v9 }
 0x114   :  { %v1737_v4 = vmax.f32 %v795_v63, 0.0  ;;  %v662_v5 = vadd.f32 %v1145_v1, %v1664_v24  ;;  %v1240_v7 = vpop.f32.mrf.mxu1  ;;  %v965_v2 = vadd.f32 %v964_v59, %v941_v53 }
 0x115   :  { %v1147_v8 = vpop.f32.mrf.mxu0 }
 0x116   :  { %891 = vst [vmem:[%s1880_s3 + $0x50] sm:$0xff] %v1737_v4  ;;  %v798_v10 = vadd.f32 %v1239_v6, %v662_v5  ;;  %v1148_v11 = vadd.f32 %v1147_v8, %v1146_v3  ;;  %v1241_v12 = vpop.f32.mrf.mxu1  ;;  %v909_v3 = vadd.f32 %v908_v60, %v1695_v9  ;;  %v943_v5 = vmul.f32 %v1702_v18, %v1702_v18 }
 0x117   :  { %v1149_v13 = vpop.f32.mrf.mxu0  ;;  %v1242_v16 = vadd.f32 %v1241_v12, %v1240_v7 }
 0x118   :  { %v1744_v14 = vmax.f32 %v798_v10, 0.0  ;;  %v667_v15 = vadd.f32 %v1148_v11, %v1664_v24  ;;  %v1243_v17 = vpop.f32.mrf.mxu1  ;;  %v966_v11 = vadd.f32 %v965_v2, %v942_v61  ;;  %v910_v12 = vadd.f32 %v909_v3, %v1702_v18 }
 0x119   :  { %v1150_v19 = vpop.f32.mrf.mxu0 }
 0x11a   :  { %892 = vst [vmem:[%s1880_s3 + $0x58] sm:$0xff] %v1744_v14  ;;  %v803_v20 = vadd.f32 %v1242_v16, %v667_v15  ;;  %v1151_v21 = vadd.f32 %v1150_v19, %v1149_v13  ;;  %v1244_v22 = vpop.f32.mrf.mxu1  ;;  %v944_v13 = vmul.f32 %v1709_v28, %v1709_v28  ;;  %v967_v19 = vadd.f32 %v966_v11, %v943_v5 }
 0x11b   :  { %v1152_v23 = vpop.f32.mrf.mxu0  ;;  %v1245_v27 = vadd.f32 %v1244_v22, %v1243_v17 }
 0x11c   :  { %v1751_v25 = vmax.f32 %v803_v20, 0.0  ;;  %v670_v26 = vadd.f32 %v1151_v21, %v1664_v24  ;;  %v1246_v29 = vpop.f32.mrf.mxu1  ;;  %v911_v20 = vadd.f32 %v910_v12, %v1709_v28  ;;  %v945_v21 = vmul.f32 %v1716_v38, %v1716_v38 }
 0x11d   :  { %v1153_v30 = vpop.f32.mrf.mxu0 }
 0x11e   :  { %893 = vst [vmem:[%s1880_s3 + $0x60] sm:$0xff] %v1751_v25  ;;  %v806_v31 = vadd.f32 %v1245_v27, %v670_v26  ;;  %v1154_v32 = vadd.f32 %v1153_v30, %v1152_v23  ;;  %v1247_v33 = vpop.f32.mrf.mxu1  ;;  %v912_v30 = vadd.f32 %v911_v20, %v1716_v38 }
 0x11f   :  { %v1155_v35 = vpop.f32.mrf.mxu0  ;;  %v1248_v40 = vadd.f32 %v1247_v33, %v1246_v29  ;;  %v968_v29 = vadd.f32 %v967_v19, %v944_v13 }
 0x120   :  { %v1760_v36 = vmax.f32 %v806_v31, 0.0  ;;  %v675_v39 = vadd.f32 %v1154_v32, %v1664_v24  ;;  %v1249_v41 = vpop.f32.mrf.mxu1  ;;  %v946_v31 = vmul.f32 %v1723_v48, %v1723_v48 }
 0x121   :  { %v1156_v45 = vpop.f32.mrf.mxu0 }
 0x122   :  { %894 = vst [vmem:[%s1880_s3 + $0x68] sm:$0xff] %v1760_v36  ;;  %v811_v47 = vadd.f32 %v1248_v40, %v675_v39  ;;  %v1157_v49 = vadd.f32 %v1156_v45, %v1155_v35  ;;  %v1250_v50 = vpop.f32.mrf.mxu1  ;;  %v969_v35 = vadd.f32 %v968_v29, %v945_v21  ;;  %v913_v39 = vadd.f32 %v912_v30, %v1723_v48 }
 0x123   :  { %v1158_v54 = vpop.f32.mrf.mxu0  ;;  %v1251_v56 = vadd.f32 %v1250_v50, %v1249_v41  ;;  %v947_v40 = vmul.f32 %v1730_v58, %v1730_v58 }
 0x124   :  { %v1776_v37 = vmax.f32 %v811_v47, 0.0  ;;  %v678_v46 = vadd.f32 %v1157_v49, %v1664_v24  ;;  %v1252_v57 = vpop.f32.mrf.mxu1  ;;  %v970_v45 = vadd.f32 %v969_v35, %v946_v31  ;;  %v914_v47 = vadd.f32 %v913_v39, %v1730_v58 }
 0x125   :  { %v1159_v62 = vpop.f32.mrf.mxu0  ;;  %v948_v49 = vmul.f32 %v1737_v4, %v1737_v4 }
 0x126   :  { %895 = vst [vmem:[%s1880_s3 + $0x70] sm:$0xff] %v1776_v37  ;;  %v814_v55 = vadd.f32 %v1251_v56, %v678_v46  ;;  %v1160_v63 = vadd.f32 %v1159_v62, %v1158_v54  ;;  %v1253_v1 = vpop.f32.mrf.mxu1  ;;  %v971_v53 = vadd.f32 %v970_v45, %v947_v40  ;;  %v915_v54 = vadd.f32 %v914_v47, %v1737_v4 }
 0x127   :  { %v1161_v6 = vpop.f32.mrf.mxu0  ;;  %v1254_v8 = vadd.f32 %v1253_v1, %v1252_v57  ;;  %v949_v46 = vmul.f32 %v1744_v14, %v1744_v14 }
 0x128   :  { %v1789_v0 = vmax.f32 %v814_v55, 0.0  ;;  %v683_v7 = vadd.f32 %v1160_v63, %v1664_v24  ;;  %v1255_v10 = vpop.f32.mrf.mxu1  ;;  %v972_v61 = vadd.f32 %v971_v53, %v948_v49  ;;  %v916_v62 = vadd.f32 %v915_v54, %v1744_v14 }
 0x129   :  { %v1162_v15 = vpop.f32.mrf.mxu0  ;;  %v950_v55 = vmul.f32 %v1751_v25, %v1751_v25 }
 0x12a   :  { %896 = vst [vmem:[%s1880_s3 + $0x78] sm:$0xff] %v1789_v0  ;;  %v819_v9 = vadd.f32 %v1254_v8, %v683_v7  ;;  %v1163_v16 = vadd.f32 %v1162_v15, %v1161_v6  ;;  %v1256_v17 = vpop.f32.mrf.mxu1  ;;  %v973_v3 = vadd.f32 %v972_v61, %v949_v46  ;;  %v917_v5 = vadd.f32 %v916_v62, %v1751_v25 }
 0x12b   :  { %v1164_v22 = vpop.f32.mrf.mxu0  ;;  %v1257_v26 = vadd.f32 %v1256_v17, %v1255_v10  ;;  %v951_v6 = vmul.f32 %v1760_v36, %v1760_v36  ;;  %v952_v15 = vmul.f32 %v1776_v37, %v1776_v37  ;;  %v953_v21 = vmul.f32 %v1789_v0, %v1789_v0 }
 0x12c   :  { %v1802_v18 = vmax.f32 %v819_v9, 0.0  ;;  %v686_v23 = vadd.f32 %v1163_v16, %v1664_v24  ;;  %v1258_v27 = vpop.f32.mrf.mxu1  ;;  %v974_v12 = vadd.f32 %v973_v3, %v950_v55  ;;  %v918_v13 = vadd.f32 %v917_v5, %v1760_v36 }
 0x12d   :  { %v1165_v32 = vpop.f32.mrf.mxu0 }
 0x12e   :  { %897 = vst [vmem:[%s1880_s3 + $0x80] sm:$0xff] %v1802_v18  ;;  %v822_v28 = vadd.f32 %v1257_v26, %v686_v23  ;;  %v1166_v33 = vadd.f32 %v1165_v32, %v1164_v22  ;;  %v1259_v34 = vpop.f32.mrf.mxu1  ;;  %v975_v19 = vadd.f32 %v974_v12, %v951_v6  ;;  %v919_v20 = vadd.f32 %v918_v13, %v1776_v37 }
 0x12f   :  { %v1167_v41 = vpop.f32.mrf.mxu0  ;;  %v1260_v43 = vadd.f32 %v1259_v34, %v1258_v27  ;;  %v954_v31 = vmul.f32 %v1802_v18, %v1802_v18 }
 0x130   :  { %v1815_v38 = vmax.f32 %v822_v28, 0.0  ;;  %v691_v42 = vadd.f32 %v1166_v33, %v1664_v24  ;;  %v1261_v44 = vpop.f32.mrf.mxu1  ;;  %v976_v29 = vadd.f32 %v975_v19, %v952_v15  ;;  %v920_v30 = vadd.f32 %v919_v20, %v1789_v0 }
 0x131   :  { %v1168_v50 = vpop.f32.mrf.mxu0 }
 0x132   :  { %898 = vst [vmem:[%s1880_s3 + $0x88] sm:$0xff] %v1815_v38  ;;  %v827_v48 = vadd.f32 %v1260_v43, %v691_v42  ;;  %v1169_v51 = vadd.f32 %v1168_v50, %v1167_v41  ;;  %v1262_v52 = vpop.f32.mrf.mxu1  ;;  %v977_v34 = vadd.f32 %v976_v29, %v953_v21  ;;  %v921_v35 = vadd.f32 %v920_v30, %v1802_v18 }
 0x133   :  { %v1170_v56 = vpop.f32.mrf.mxu0  ;;  %v1263_v59 = vadd.f32 %v1262_v52, %v1261_v44  ;;  %v955_v39 = vmul.f32 %v1815_v38, %v1815_v38 }
 0x134   :  { %v874_v58 = vmax.f32 %v827_v48, 0.0  ;;  %v694_v57 = vadd.f32 %v1169_v51, %v1664_v24  ;;  %v1264_v60 = vpop.f32.mrf.mxu1  ;;  %v978_v44 = vadd.f32 %v977_v34, %v954_v31  ;;  %v922_v45 = vadd.f32 %v921_v35, %v1815_v38 }
 0x135   :  { %v1171_v63 = vpop.f32.mrf.mxu0  ;;  %v994_v31 = vlaneseq }
 0x136   :  { %899 = vst [vmem:[%s1880_s3 + $0x90] sm:$0xff] %v874_v58  ;;  %v830_v4 = vadd.f32 %v1263_v59, %v694_v57  ;;  %v1172_v1 = vadd.f32 %v1171_v63, %v1170_v56  ;;  %v1265_v2 = vpop.f32.mrf.mxu1  ;;  %v956_v47 = vmul.f32 %v874_v58, %v874_v58  ;;  %v979_v51 = vadd.f32 %v978_v44, %v955_v39 }
 0x137   :  { %v1173_v7 = vpop.f32.mrf.mxu0  ;;  %v1266_v10 = vadd.f32 %v1265_v2, %v1264_v60  ;;  %v923_v52 = vadd.f32 %v922_v45, %v874_v58  ;;  %v995_v34 = vshrl.u32 %v994_v31, 7 }
 0x138   :  { %v875_v8 = vmax.f32 %v830_v4, 0.0  ;;  %v699_v14 = vadd.f32 %v1172_v1, %v1664_v24  ;;  %v1267_v11 = vpop.f32.mrf.mxu1  ;;  %v980_v60 = vadd.f32 %v979_v51, %v956_v47 }
 0x139   :  { %v1174_v9 = vpop.f32.mrf.mxu0  ;;  %vm997_vm1 = vcmp.eq.s32.totalorder %v995_v34, 1  ;;  %vm996_vm2 = vcmp.eq.s32.totalorder %v995_v34, 0 }
 0x13a   :  { %900 = vst [vmem:[%s1880_s3 + $0x98] sm:$0xff] %v875_v8  ;;  %v835_v25 = vadd.f32 %v1266_v10, %v699_v14  ;;  %v1175_v16 = vadd.f32 %v1174_v9, %v1173_v7  ;;  %v1268_v17 = vpop.f32.mrf.mxu1  ;;  %v957_v53 = vmul.f32 %v875_v8, %v875_v8  ;;  %v924_v38 = vadd.f32 %v923_v52, %v875_v8 }
 0x13b   :  { %v1176_v22 = vpop.f32.mrf.mxu0  ;;  %v1269_v26 = vadd.f32 %v1268_v17, %v1267_v11 }
 0x13c   :  { %v876_v23 = vmax.f32 %v835_v25, 0.0  ;;  %v702_v36 = vadd.f32 %v1175_v16, %v1664_v24  ;;  %v1270_v27 = vpop.f32.mrf.mxu1  ;;  %v981_v1 = vadd.f32 %v980_v60, %v957_v53 }
 0x13d   :  { %v1177_v32 = vpop.f32.mrf.mxu0 }
 0x13e   :  { %901 = vst [vmem:[%s1880_s3 + $0xa0] sm:$0xff] %v876_v23  ;;  %v838_v37 = vadd.f32 %v1269_v26, %v702_v36  ;;  %v1178_v28 = vadd.f32 %v1177_v32, %v1176_v22  ;;  %v1271_v33 = vpop.f32.mrf.mxu1  ;;  %v958_v61 = vmul.f32 %v876_v23, %v876_v23  ;;  %v925_v58 = vadd.f32 %v924_v38, %v876_v23 }
 0x13f   :  { %v1179_v40 = vpop.f32.mrf.mxu0  ;;  %v1272_v42 = vadd.f32 %v1271_v33, %v1270_v27 }
 0x140   :  { %v877_v41 = vmax.f32 %v838_v37, 0.0  ;;  %v707_v0 = vadd.f32 %v1178_v28, %v1664_v24  ;;  %v1273_v43 = vpop.f32.mrf.mxu1  ;;  %v982_v10 = vadd.f32 %v981_v1, %v958_v61 }
 0x141   :  { %v1180_v49 = vpop.f32.mrf.mxu0 }
 0x142   :  { %902 = vst [vmem:[%s1880_s3 + $0xa8] sm:$0xff] %v877_v41  ;;  %v843_v50 = vadd.f32 %v1272_v42, %v707_v0  ;;  %v1181_v18 = vadd.f32 %v1180_v49, %v1179_v40  ;;  %v1274_v48 = vpop.f32.mrf.mxu1  ;;  %v959_v2 = vmul.f32 %v877_v41, %v877_v41  ;;  %v926_v8 = vadd.f32 %v925_v58, %v877_v41 }
 0x143   :  { %v1182_v54 = vpop.f32.mrf.mxu0  ;;  %v1275_v57 = vadd.f32 %v1274_v48, %v1273_v43 }
 0x144   :  { %v878_v46 = vmax.f32 %v843_v50, 0.0  ;;  %v710_v56 = vadd.f32 %v1181_v18, %v1664_v24  ;;  %v1276_v59 = vpop.f32.mrf.mxu1  ;;  %v983_v9 = vadd.f32 %v982_v10, %v959_v2 }
 0x145   :  { %v1183_v62 = vpop.f32.mrf.mxu0 }
 0x146   :  { %903 = vst [vmem:[%s1880_s3 + $0xb0] sm:$0xff] %v878_v46  ;;  %v846_v55 = vadd.f32 %v1275_v57, %v710_v56  ;;  %v1184_v63 = vadd.f32 %v1183_v62, %v1182_v54  ;;  %v1277_v4 = vpop.f32.mrf.mxu1  ;;  %v960_v11 = vmul.f32 %v878_v46, %v878_v46  ;;  %v927_v25 = vadd.f32 %v926_v8, %v878_v46 }
 0x147   :  { %v1185_v3 = vpop.f32.mrf.mxu0  ;;  %v1278_v7 = vadd.f32 %v1277_v4, %v1276_v59 }
 0x148   :  { %v879_v5 = vmax.f32 %v846_v55, 0.0  ;;  %v715_v6 = vadd.f32 %v1184_v63, %v1664_v24  ;;  %v1279_v14 = vpop.f32.mrf.mxu1  ;;  %v984_v19 = vadd.f32 %v983_v9, %v960_v11 }
 0x149   :  { %v1186_v12 = vpop.f32.mrf.mxu0 }
 0x14a   :  { %904 = vst [vmem:[%s1880_s3 + $0xb8] sm:$0xff] %v879_v5  ;;  %v851_v13 = vadd.f32 %v1278_v7, %v715_v6  ;;  %v1280_v15 = vpop.f32.mrf.mxu1  ;;  %v961_v16 = vmul.f32 %v879_v5, %v879_v5  ;;  %v928_v20 = vadd.f32 %v927_v25, %v879_v5 }
 0x14c   :  { %v880_v17 = vmax.f32 %v851_v13, 0.0  ;;  %v985_v22 = vadd.f32 %v984_v19, %v961_v16 }
 0x14e   :  { %905 = vst [vmem:[%s1880_s3 + $0xc0] sm:$0xf] %v880_v17  ;;  %v930_v24 = vsel %vm929_vm0, %v880_v17, 0.0  ;;  %v962_v21 = vmul.f32 %v880_v17, %v880_v17 }
 0x14f   :  { %v931_v23 = vadd.f32 %v930_v24, %v928_v20 }
 0x150   :  { %v986_v36 = vsel %vm929_vm0, %v962_v21, 0.0 }
 0x151   :  { %v932_v26 = vrot.slane %v931_v23, 4  ;;  %v987_v27 = vadd.f32 %v986_v36, %v985_v22 }
 0x153   :  { %v933_v29 = vadd.f32 %v932_v26, %v931_v23  ;;  %v988_v30 = vrot.slane %v987_v27, 4 }
 0x155   :  { %v934_v32 = vrot.slane %v933_v29, 2  ;;  %v989_v37 = vadd.f32 %v988_v30, %v987_v27 }
 0x157   :  { %v935_v28 = vadd.f32 %v934_v32, %v933_v29  ;;  %v990_v33 = vrot.slane %v989_v37, 2 }
 0x159   :  { %v991_v35 = vadd.f32 %v990_v33, %v989_v37  ;;  %v936_v39 = vrot.slane %v935_v28, 1 }
 0x15b   :  { %v992_v40 = vrot.slane %v991_v35, 1  ;;  %v937_v0 = vadd.f32 %v936_v39, %v935_v28 }
 0x15d   :  { %v993_v41 = vadd.f32 %v992_v40, %v991_v35 }
 0x15f   :  { %v998_v42 = vsel %vm997_vm1, %v993_v41, 0.0 }
 0x160   :  { %v999_v43 = vsel %vm996_vm2, %v937_v0, %v998_v42 }
 0x161   :  { %1000 = vst [vmem:[%s1881_s4] sm:$0xff] %v999_v43 }

// kernel: decoder_forward.10
= control target key start
LH: loop header
LB: loop body
LE: loop exit
PB: predicated region body
PF: predicated region fallthrough
CT: control target
= control target key end

     0   :  { %vm513_vm0 = vcmask 1043456   ;;  %s1164_s1 = inlined_call_operand.vmem [shape: bf16[256,128], index: 1, kind: input, shape index: {}]   ;;  %s1165_s0 = inlined_call_operand.vmem [shape: bf16[196,256], index: 0, kind: input, shape index: {}]   ;;  %s1166_s2 = inlined_call_operand.vmem [shape: f32[1,128], index: 2, kind: input, shape index: {}]   ;;  %s1167_s3 = inlined_call_operand.vmem [shape: f32[196,128], index: 3, kind: output, shape index: {0}]   ;;  %s1168_s4 = inlined_call_operand.vmem [shape: f32[8,128], index: 4, kind: output, shape index: {1}]  }
   0x1   :  { %v746_v0 = vld [vmem:[%s1164_s1 + $0x78] sm:$0xff]   ;;  %v748_v2 = vld [vmem:[%s1164_s1 + $0x70] sm:$0xff]   ;;  %v750_v4 = vld [vmem:[%s1164_s1 + $0x68] sm:$0xff]  }
   0x2   :  { %v747_v1 = vld [vmem:[%s1164_s1 + $0x38] sm:$0xff]   ;;  %636 = vmatprep.subr.bf16.mxu0 %v746_v0  ;;  %730 = vmatprep.subr.bf16.mxu1 %v746_v0  ;;  %v749_v3 = vld [vmem:[%s1164_s1 + $0x30] sm:$0xff]   ;;  %v751_v5 = vld [vmem:[%s1164_s1 + $0x28] sm:$0xff]  }
   0x3   :  { %637 = vmatpush3.bf16.msra.mxu0 %v747_v1  ;;  %738 = vmatpush3.bf16.msra.mxu1 %v747_v1  ;;  %v752_v6 = vld [vmem:[%s1164_s1 + $0x60] sm:$0xff]   ;;  %v754_v8 = vld [vmem:[%s1164_s1 + $0x58] sm:$0xff]   ;;  %v756_v10 = vld [vmem:[%s1164_s1 + $0x50] sm:$0xff]  }
   0x4   :  { %638 = vmatprep.subr.bf16.mxu0 %v748_v2  ;;  %731 = vmatprep.subr.bf16.mxu1 %v748_v2  ;;  %v753_v7 = vld [vmem:[%s1164_s1 + $0x20] sm:$0xff]   ;;  %v755_v9 = vld [vmem:[%s1164_s1 + $0x18] sm:$0xff]   ;;  %v757_v12 = vld [vmem:[%s1164_s1 + $0x10] sm:$0xff]  }
   0x5   :  { %v764_v11 = vld [vmem:[%s1165_s0 + $0x4] ss:$8 sps:$4 sm:$0xff]   ;;  %v776_v14 = vld [vmem:[%s1165_s0 + $0x74] ss:$8 sps:$4 sm:$0xff]   ;;  %v762_v18 = vld [vmem:[%s1165_s0] ss:$8 sps:$4 sm:$0xff]  }
   0x6   :  { %336 = vmatprep.mubr.bf16.mxu0 %v764_v11  ;;  %v758_v13 = vld [vmem:[%s1164_s1 + $0x48] sm:$0xff]   ;;  %v760_v16 = vld [vmem:[%s1164_s1 + $0x40] sm:$0xff]   ;;  %392 = vmatprep.mubr.bf16.mxu1 %v776_v14  ;;  %v765_v19 = vld [vmem:[%s1165_s0 + $0x14] ss:$8 sps:$4 sm:$0xff]  }
   0x7   :  { %639 = vmatpush3.bf16.msra.mxu0 %v749_v3  ;;  %739 = vmatpush3.bf16.msra.mxu1 %v749_v3  ;;  %v759_v15 = vld [vmem:[%s1164_s1 + $0x8] sm:$0xff]   ;;  %v761_v17 = vld [vmem:[%s1164_s1] sm:$0xff]   ;;  %v774_v20 = vld [vmem:[%s1165_s0 + $0x70] ss:$8 sps:$4 sm:$0xff]  }
   0x8   :  { %640 = vmatprep.subr.bf16.mxu0 %v750_v4  ;;  %732 = vmatprep.subr.bf16.mxu1 %v750_v4  ;;  %v780_v21 = vld [vmem:[%s1165_s0 + $0x84] ss:$8 sps:$4 sm:$0xff]   ;;  %v767_v22 = vld [vmem:[%s1165_s0 + $0x10] ss:$8 sps:$4 sm:$0xff]   ;;  %v782_v24 = vld [vmem:[%s1165_s0 + $0x80] ss:$8 sps:$4 sm:$0xff]  }
   0x9   :  { %v768_v23 = vld [vmem:[%s1165_s0 + $0x24] ss:$8 sps:$4 sm:$0xff]   ;;  %v786_v25 = vld [vmem:[%s1165_s0 + $0x94] ss:$8 sps:$4 sm:$0xff]   ;;  %v770_v26 = vld [vmem:[%s1165_s0 + $0x20] ss:$8 sps:$4 sm:$0xff]  }
   0xa   :  { %v771_v27 = vld [vmem:[%s1165_s0 + $0x34] ss:$8 sps:$4 sm:$0xff]   ;;  %v788_v28 = vld [vmem:[%s1165_s0 + $0x90] ss:$8 sps:$4 sm:$0xff]   ;;  %v792_v29 = vld [vmem:[%s1165_s0 + $0xa4] ss:$8 sps:$4 sm:$0xff]  }
   0xb   :  { %641 = vmatpush3.bf16.msra.mxu0 %v751_v5  ;;  %740 = vmatpush3.bf16.msra.mxu1 %v751_v5  ;;  %v773_v30 = vld [vmem:[%s1165_s0 + $0x30] ss:$8 sps:$4 sm:$0xff]   ;;  %v777_v31 = vld [vmem:[%s1165_s0 + $0x44] ss:$8 sps:$4 sm:$0xff]   ;;  %v794_v32 = vld [vmem:[%s1165_s0 + $0xa0] ss:$8 sps:$4 sm:$0xff]  }
   0xc   :  { %642 = vmatprep.subr.bf16.mxu0 %v752_v6  ;;  %733 = vmatprep.subr.bf16.mxu1 %v752_v6  ;;  %v795_v33 = vld [vmem:[%s1165_s0 + $0xb4] ss:$8 sps:$4 sm:$0xff]   ;;  %v41_v34 = vld [vmem:[%s1165_s0 + $0xc0] sm:$0x33]  ;;  %v797_v37 = vld [vmem:[%s1165_s0 + $0xb0] ss:$8 sps:$4 sm:$0xff]  }
   0xd   :  { %v779_v35 = vld [vmem:[%s1165_s0 + $0x40] ss:$8 sps:$4 sm:$0xff]   ;;  %v783_v36 = vld [vmem:[%s1165_s0 + $0x54] ss:$8 sps:$4 sm:$0xff]   ;;  %v619_v38 = vcombine.high %v41_v34, %v41_v34  ;;  %v785_v39 = vld [vmem:[%s1165_s0 + $0x50] ss:$8 sps:$4 sm:$0xff]   ;;  %v618_v41 = vcombine.low %v41_v34, %v41_v34 }
   0xe   :  { %v789_v40 = vld [vmem:[%s1165_s0 + $0x64] ss:$8 sps:$4 sm:$0xff]   ;;  %v791_v42 = vld [vmem:[%s1165_s0 + $0x60] ss:$8 sps:$4 sm:$0xff]  }
   0xf   :  { %643 = vmatpush3.bf16.msra.mxu0 %v753_v7  ;;  %741 = vmatpush3.bf16.msra.mxu1 %v753_v7  ;;  %v951_v45 = vld [vmem:[%s1166_s2] ss:$0 sm:$0xff] }
  0x10   :  { %644 = vmatprep.subr.bf16.mxu0 %v754_v8  ;;  %734 = vmatprep.subr.bf16.mxu1 %v754_v8 }
  0x13   :  { %645 = vmatpush3.bf16.msra.mxu0 %v755_v9  ;;  %742 = vmatpush3.bf16.msra.mxu1 %v755_v9 }
  0x14   :  { %646 = vmatprep.subr.bf16.mxu0 %v756_v10  ;;  %735 = vmatprep.subr.bf16.mxu1 %v756_v10 }
  0x17   :  { %647 = vmatpush3.bf16.msra.mxu0 %v757_v12  ;;  %743 = vmatpush3.bf16.msra.mxu1 %v757_v12 }
  0x18   :  { %648 = vmatprep.subr.bf16.mxu0 %v758_v13  ;;  %736 = vmatprep.subr.bf16.mxu1 %v758_v13 }
  0x1b   :  { %649 = vmatpush3.bf16.msra.mxu0 %v759_v15  ;;  %744 = vmatpush3.bf16.msra.mxu1 %v759_v15 }
  0x1c   :  { %650 = vmatprep.subr.bf16.mxu0 %v760_v16  ;;  %737 = vmatprep.subr.bf16.mxu1 %v760_v16 }
  0x1f   :  { %651 = vmatpush3.bf16.msra.mxu0 %v761_v17  ;;  %745 = vmatpush3.bf16.msra.mxu1 %v761_v17 }
  0x22   :  { %337 = vmatmul.mubr.bf16.vlgmr.msra.gmra.mxu0 %v762_v18  ;;  %393 = vmatmul.mubr.bf16.vlgmr.msra.gmra.mxu1 %v774_v20 }
  0x23   :  { %344 = vmatprep.mubr.bf16.mxu0 %v765_v19  ;;  %400 = vmatprep.mubr.bf16.mxu1 %v780_v21 }
  0x2a   :  { %345 = vmatmul.mubr.bf16.gmra.mxu0 %v767_v22  ;;  %401 = vmatmul.mubr.bf16.gmra.mxu1 %v782_v24 }
  0x2b   :  { %352 = vmatprep.mubr.bf16.mxu0 %v768_v23  ;;  %408 = vmatprep.mubr.bf16.mxu1 %v786_v25 }
  0x32   :  { %353 = vmatmul.mubr.bf16.gmra.mxu0 %v770_v26  ;;  %409 = vmatmul.mubr.bf16.gmra.mxu1 %v788_v28 }
  0x33   :  { %360 = vmatprep.mubr.bf16.mxu0 %v771_v27  ;;  %416 = vmatprep.mubr.bf16.mxu1 %v792_v29 }
  0x3a   :  { %361 = vmatmul.mubr.bf16.gmra.mxu0 %v773_v30  ;;  %417 = vmatmul.mubr.bf16.gmra.mxu1 %v794_v32 }
  0x3b   :  { %368 = vmatprep.mubr.bf16.mxu0 %v777_v31  ;;  %424 = vmatprep.mubr.bf16.mxu1 %v795_v33 }
  0x42   :  { %369 = vmatmul.mubr.bf16.gmra.mxu0 %v779_v35  ;;  %425 = vmatmul.mubr.bf16.gmra.mxu1 %v797_v37 }
  0x43   :  { %376 = vmatprep.mubr.bf16.mxu0 %v783_v36  ;;  %432 = vmatprep.mubr.bf16.mxu1 %v619_v38 }
  0x4a   :  { %377 = vmatmul.mubr.bf16.gmra.mxu0 %v785_v39  ;;  %433 = vmatmul.mubr.bf16.gmra.mxu1 %v618_v41 }
  0x4b   :  { %384 = vmatprep.mubr.bf16.mxu0 %v789_v40 }
  0x52   :  { %385 = vmatmul.mubr.bf16.gmra.mxu0 %v791_v42 }
  0xe2   :  { %v652_v43 = vpop.f32.mrf.mxu0  ;;  %v694_v44 = vpop.f32.mrf.mxu1 }
  0xe4   :  { %v653_v46 = vpop.f32.mrf.mxu0  ;;  %v695_v48 = vpop.f32.mrf.mxu1 }
  0xe5   :  { %v654_v47 = vadd.f32 %v653_v46, %v652_v43  ;;  %v696_v50 = vadd.f32 %v695_v48, %v694_v44 }
  0xe6   :  { %v655_v49 = vpop.f32.mrf.mxu0  ;;  %v697_v52 = vpop.f32.mrf.mxu1 }
  0xe7   :  { %v339_v51 = vadd.f32 %v654_v47, %v951_v45  ;;  %v395_v54 = vadd.f32 %v696_v50, %v951_v45 }
  0xe8   :  { %v656_v53 = vpop.f32.mrf.mxu0  ;;  %v698_v57 = vpop.f32.mrf.mxu1 }
  0xe9   :  { %v955_v55 = vmax.f32 %v339_v51, 0.0  ;;  %v657_v56 = vadd.f32 %v656_v53, %v655_v49  ;;  %v957_v59 = vmax.f32 %v395_v54, 0.0  ;;  %v699_v60 = vadd.f32 %v698_v57, %v697_v52 }
  0xea   :  { %v658_v58 = vpop.f32.mrf.mxu0  ;;  %v700_v62 = vpop.f32.mrf.mxu1 }
  0xeb   :  { %465 = vst [vmem:[%s1167_s3] sm:$0xff] %v955_v55  ;;  %v342_v61 = vadd.f32 %v657_v56, %v951_v45  ;;  %479 = vst [vmem:[%s1167_s3 + $0x70] sm:$0xff] %v957_v59  ;;  %v398_v0 = vadd.f32 %v699_v60, %v951_v45 }
  0xec   :  { %v659_v63 = vpop.f32.mrf.mxu0  ;;  %v701_v3 = vpop.f32.mrf.mxu1 }
  0xed   :  { %v969_v1 = vmax.f32 %v342_v61, 0.0  ;;  %v660_v2 = vadd.f32 %v659_v63, %v658_v58  ;;  %v971_v5 = vmax.f32 %v398_v0, 0.0  ;;  %v702_v6 = vadd.f32 %v701_v3, %v700_v62 }
  0xee   :  { %v661_v4 = vpop.f32.mrf.mxu0  ;;  %v703_v8 = vpop.f32.mrf.mxu1 }
  0xef   :  { %466 = vst [vmem:[%s1167_s3 + $0x8] sm:$0xff] %v969_v1  ;;  %v347_v7 = vadd.f32 %v660_v2, %v951_v45  ;;  %480 = vst [vmem:[%s1167_s3 + $0x78] sm:$0xff] %v971_v5  ;;  %v403_v10 = vadd.f32 %v702_v6, %v951_v45  ;;  %v523_v62 = vmul.f32 %v969_v1, %v969_v1 }
  0xf0   :  { %v662_v9 = vpop.f32.mrf.mxu0  ;;  %v704_v13 = vpop.f32.mrf.mxu1  ;;  %v522_v6 = vmul.f32 %v955_v55, %v955_v55 }
  0xf1   :  { %v983_v11 = vmax.f32 %v347_v7, 0.0  ;;  %v663_v12 = vadd.f32 %v662_v9, %v661_v4  ;;  %v985_v15 = vmax.f32 %v403_v10, 0.0  ;;  %v705_v16 = vadd.f32 %v704_v13, %v703_v8 }
  0xf2   :  { %v664_v14 = vpop.f32.mrf.mxu0  ;;  %v706_v18 = vpop.f32.mrf.mxu1 }
  0xf3   :  { %467 = vst [vmem:[%s1167_s3 + $0x10] sm:$0xff] %v983_v11  ;;  %v350_v17 = vadd.f32 %v663_v12, %v951_v45  ;;  %481 = vst [vmem:[%s1167_s3 + $0x80] sm:$0xff] %v985_v15  ;;  %v406_v20 = vadd.f32 %v705_v16, %v951_v45  ;;  %v524_v7 = vmul.f32 %v983_v11, %v983_v11 }
  0xf4   :  { %v665_v19 = vpop.f32.mrf.mxu0  ;;  %v707_v23 = vpop.f32.mrf.mxu1  ;;  %v490_v12 = vadd.f32 %v969_v1, %v955_v55  ;;  %v547_v16 = vadd.f32 %v523_v62, %v522_v6 }
  0xf5   :  { %v997_v21 = vmax.f32 %v350_v17, 0.0  ;;  %v666_v22 = vadd.f32 %v665_v19, %v664_v14  ;;  %v999_v25 = vmax.f32 %v406_v20, 0.0  ;;  %v708_v26 = vadd.f32 %v707_v23, %v706_v18 }
  0xf6   :  { %v667_v24 = vpop.f32.mrf.mxu0  ;;  %v709_v28 = vpop.f32.mrf.mxu1  ;;  %v491_v55 = vadd.f32 %v490_v12, %v983_v11  ;;  %v548_v23 = vadd.f32 %v547_v16, %v524_v7 }
  0xf7   :  { %468 = vst [vmem:[%s1167_s3 + $0x18] sm:$0xff] %v997_v21  ;;  %v355_v27 = vadd.f32 %v666_v22, %v951_v45  ;;  %482 = vst [vmem:[%s1167_s3 + $0x88] sm:$0xff] %v999_v25  ;;  %v411_v30 = vadd.f32 %v708_v26, %v951_v45  ;;  %v525_v17 = vmul.f32 %v997_v21, %v997_v21 }
  0xf8   :  { %v668_v29 = vpop.f32.mrf.mxu0  ;;  %v710_v33 = vpop.f32.mrf.mxu1 }
  0xf9   :  { %v1011_v31 = vmax.f32 %v355_v27, 0.0  ;;  %v669_v32 = vadd.f32 %v668_v29, %v667_v24  ;;  %v1013_v35 = vmax.f32 %v411_v30, 0.0  ;;  %v711_v36 = vadd.f32 %v710_v33, %v709_v28 }
  0xfa   :  { %v670_v34 = vpop.f32.mrf.mxu0  ;;  %v712_v38 = vpop.f32.mrf.mxu1  ;;  %v492_v29 = vadd.f32 %v491_v55, %v997_v21 }
  0xfb   :  { %469 = vst [vmem:[%s1167_s3 + $0x20] sm:$0xff] %v1011_v31  ;;  %v358_v37 = vadd.f32 %v669_v32, %v951_v45  ;;  %483 = vst [vmem:[%s1167_s3 + $0x90] sm:$0xff] %v1013_v35  ;;  %v414_v40 = vadd.f32 %v711_v36, %v951_v45  ;;  %v526_v24 = vmul.f32 %v1011_v31, %v1011_v31 }
  0xfc   :  { %v671_v39 = vpop.f32.mrf.mxu0  ;;  %v713_v43 = vpop.f32.mrf.mxu1  ;;  %v549_v32 = vadd.f32 %v548_v23, %v525_v17  ;;  %v493_v21 = vadd.f32 %v492_v29, %v1011_v31 }
  0xfd   :  { %v1025_v41 = vmax.f32 %v358_v37, 0.0  ;;  %v672_v42 = vadd.f32 %v671_v39, %v670_v34  ;;  %v1027_v46 = vmax.f32 %v414_v40, 0.0  ;;  %v714_v47 = vadd.f32 %v713_v43, %v712_v38 }
  0xfe   :  { %v673_v44 = vpop.f32.mrf.mxu0  ;;  %v715_v49 = vpop.f32.mrf.mxu1  ;;  %v550_v40 = vadd.f32 %v549_v32, %v526_v24 }
  0xff   :  { %470 = vst [vmem:[%s1167_s3 + $0x28] sm:$0xff] %v1025_v41  ;;  %v363_v48 = vadd.f32 %v672_v42, %v951_v45  ;;  %484 = vst [vmem:[%s1167_s3 + $0x98] sm:$0xff] %v1027_v46  ;;  %v419_v51 = vadd.f32 %v714_v47, %v951_v45  ;;  %v527_v33 = vmul.f32 %v1025_v41, %v1025_v41 }
 0x100   :  { %v674_v50 = vpop.f32.mrf.mxu0  ;;  %v716_v54 = vpop.f32.mrf.mxu1 }
 0x101   :  { %v1039_v52 = vmax.f32 %v363_v48, 0.0  ;;  %v675_v53 = vadd.f32 %v674_v50, %v673_v44  ;;  %v1041_v57 = vmax.f32 %v419_v51, 0.0  ;;  %v717_v58 = vadd.f32 %v716_v54, %v715_v49 }
 0x102   :  { %v676_v56 = vpop.f32.mrf.mxu0  ;;  %v718_v61 = vpop.f32.mrf.mxu1  ;;  %v494_v48 = vadd.f32 %v493_v21, %v1025_v41  ;;  %v551_v50 = vadd.f32 %v550_v40, %v527_v33  ;;  %v538_v40 = vmul.f32 %v985_v15, %v985_v15 }
 0x103   :  { %471 = vst [vmem:[%s1167_s3 + $0x30] sm:$0xff] %v1039_v52  ;;  %v366_v60 = vadd.f32 %v675_v53, %v951_v45  ;;  %485 = vst [vmem:[%s1167_s3 + $0xa0] sm:$0xff] %v1041_v57  ;;  %v422_v0 = vadd.f32 %v717_v58, %v951_v45  ;;  %v528_v42 = vmul.f32 %v1039_v52, %v1039_v52 }
 0x104   :  { %v677_v63 = vpop.f32.mrf.mxu0  ;;  %v719_v4 = vpop.f32.mrf.mxu1 }
 0x105   :  { %v447_v2 = vmax.f32 %v366_v60, 0.0  ;;  %v678_v3 = vadd.f32 %v677_v63, %v676_v56  ;;  %v1059_v9 = vmax.f32 %v422_v0, 0.0  ;;  %v720_v10 = vadd.f32 %v719_v4, %v718_v61 }
 0x106   :  { %v679_v8 = vpop.f32.mrf.mxu0  ;;  %v721_v14 = vpop.f32.mrf.mxu1  ;;  %v495_v56 = vadd.f32 %v494_v48, %v1039_v52  ;;  %v552_v61 = vadd.f32 %v551_v50, %v528_v42 }
 0x107   :  { %472 = vst [vmem:[%s1167_s3 + $0x38] sm:$0xff] %v447_v2  ;;  %v371_v13 = vadd.f32 %v678_v3, %v951_v45  ;;  %486 = vst [vmem:[%s1167_s3 + $0xa8] sm:$0xff] %v1059_v9  ;;  %v427_v19 = vadd.f32 %v720_v10, %v951_v45  ;;  %v529_v51 = vmul.f32 %v447_v2, %v447_v2 }
 0x108   :  { %v680_v18 = vpop.f32.mrf.mxu0  ;;  %v722_v22 = vpop.f32.mrf.mxu1  ;;  %v496_v3 = vadd.f32 %v495_v56, %v447_v2 }
 0x109   :  { %v448_v1 = vmax.f32 %v371_v13, 0.0  ;;  %v681_v20 = vadd.f32 %v680_v18, %v679_v8  ;;  %v1077_v27 = vmax.f32 %v427_v19, 0.0  ;;  %v723_v28 = vadd.f32 %v722_v22, %v721_v14 }
 0x10a   :  { %v682_v26 = vpop.f32.mrf.mxu0  ;;  %v724_v11 = vpop.f32.mrf.mxu1  ;;  %v553_v6 = vadd.f32 %v552_v61, %v529_v51 }
 0x10b   :  { %473 = vst [vmem:[%s1167_s3 + $0x40] sm:$0xff] %v448_v1  ;;  %v374_v30 = vadd.f32 %v681_v20, %v951_v45  ;;  %487 = vst [vmem:[%s1167_s3 + $0xb0] sm:$0xff] %v1077_v27  ;;  %v430_v36 = vadd.f32 %v723_v28, %v951_v45  ;;  %v530_v62 = vmul.f32 %v448_v1, %v448_v1 }
 0x10c   :  { %v683_v34 = vpop.f32.mrf.mxu0  ;;  %v725_v39 = vpop.f32.mrf.mxu1  ;;  %v497_v52 = vadd.f32 %v496_v3, %v448_v1  ;;  %v544_v61 = vmul.f32 %v1077_v27, %v1077_v27 }
 0x10d   :  { %v449_v37 = vmax.f32 %v374_v30, 0.0  ;;  %v684_v38 = vadd.f32 %v683_v34, %v682_v26  ;;  %v1094_v44 = vmax.f32 %v430_v36, 0.0  ;;  %v726_v47 = vadd.f32 %v725_v39, %v724_v11 }
 0x10e   :  { %v685_v43 = vpop.f32.mrf.mxu0  ;;  %v727_v31 = vpop.f32.mrf.mxu1  ;;  %v554_v13 = vadd.f32 %v553_v6, %v530_v62  ;;  %v536_v36 = vmul.f32 %v957_v59, %v957_v59 }
 0x10f   :  { %474 = vst [vmem:[%s1167_s3 + $0x48] sm:$0xff] %v449_v37  ;;  %v379_v49 = vadd.f32 %v684_v38, %v951_v45  ;;  %488 = vst [vmem:[%s1167_s3 + $0xb8] sm:$0xff] %v1094_v44  ;;  %v435_v54 = vadd.f32 %v726_v47, %v951_v45  ;;  %v531_v7 = vmul.f32 %v449_v37, %v449_v37 }
 0x110   :  { %v686_v53 = vpop.f32.mrf.mxu0  ;;  %v728_v60 = vpop.f32.mrf.mxu1  ;;  %v498_v2 = vadd.f32 %v497_v52, %v449_v37  ;;  %v537_v38 = vmul.f32 %v971_v5, %v971_v5  ;;  %v539_v47 = vmul.f32 %v999_v25, %v999_v25 }
 0x111   :  { %v450_v41 = vmax.f32 %v379_v49, 0.0  ;;  %v687_v58 = vadd.f32 %v686_v53, %v685_v43  ;;  %v1107_v0 = vmax.f32 %v435_v54, 0.0  ;;  %v555_v18 = vadd.f32 %v554_v13, %v531_v7 }
 0x112   :  { %v688_v63 = vpop.f32.mrf.mxu0 }
 0x113   :  { %475 = vst [vmem:[%s1167_s3 + $0x50] sm:$0xff] %v450_v41  ;;  %v382_v4 = vadd.f32 %v687_v58, %v951_v45  ;;  %489 = vst [vmem:[%s1167_s3 + $0xc0] sm:$0xf] %v1107_v0  ;;  %v532_v16 = vmul.f32 %v450_v41, %v450_v41  ;;  %v499_v55 = vadd.f32 %v498_v2, %v450_v41  ;;  %v514_v3 = vsel %vm513_vm0, %v1107_v0, 0.0 }
 0x114   :  { %v689_v8 = vpop.f32.mrf.mxu0  ;;  %v543_v41 = vmul.f32 %v1059_v9, %v1059_v9 }
 0x115   :  { %v451_v10 = vmax.f32 %v382_v4, 0.0  ;;  %v690_v12 = vadd.f32 %v689_v8, %v688_v63  ;;  %v556_v24 = vadd.f32 %v555_v18, %v532_v16  ;;  %v545_v63 = vmul.f32 %v1094_v44, %v1094_v44 }
 0x116   :  { %v691_v14 = vpop.f32.mrf.mxu0 }
 0x117   :  { %476 = vst [vmem:[%s1167_s3 + $0x58] sm:$0xff] %v451_v10  ;;  %v387_v17 = vadd.f32 %v690_v12, %v951_v45  ;;  %v533_v20 = vmul.f32 %v451_v10, %v451_v10  ;;  %v500_v1 = vadd.f32 %v499_v55, %v451_v10 }
 0x118   :  { %v692_v19 = vpop.f32.mrf.mxu0 }
 0x119   :  { %v452_v22 = vmax.f32 %v387_v17, 0.0  ;;  %v693_v23 = vadd.f32 %v692_v19, %v691_v14  ;;  %v557_v29 = vadd.f32 %v556_v24, %v533_v20 }
 0x11b   :  { %477 = vst [vmem:[%s1167_s3 + $0x60] sm:$0xff] %v452_v22  ;;  %v534_v26 = vmul.f32 %v452_v22, %v452_v22  ;;  %v390_v28 = vadd.f32 %v693_v23, %v951_v45  ;;  %v501_v30 = vadd.f32 %v500_v1, %v452_v22 }
 0x11d   :  { %v453_v11 = vmax.f32 %v390_v28, 0.0  ;;  %v558_v32 = vadd.f32 %v557_v29, %v534_v26 }
 0x11f   :  { %478 = vst [vmem:[%s1167_s3 + $0x68] sm:$0xff] %v453_v11  ;;  %v502_v33 = vadd.f32 %v501_v30, %v453_v11  ;;  %v535_v34 = vmul.f32 %v453_v11, %v453_v11 }
 0x121   :  { %v503_v21 = vadd.f32 %v502_v33, %v957_v59  ;;  %v559_v37 = vadd.f32 %v558_v32, %v535_v34  ;;  %v540_v59 = vmul.f32 %v1013_v35, %v1013_v35 }
 0x123   :  { %v504_v45 = vadd.f32 %v503_v21, %v971_v5  ;;  %v560_v39 = vadd.f32 %v559_v37, %v536_v36  ;;  %v541_v5 = vmul.f32 %v1027_v46, %v1027_v46 }
 0x125   :  { %v505_v42 = vadd.f32 %v504_v45, %v985_v15  ;;  %v561_v43 = vadd.f32 %v560_v39, %v537_v38  ;;  %v542_v15 = vmul.f32 %v1041_v57, %v1041_v57 }
 0x127   :  { %v562_v48 = vadd.f32 %v561_v43, %v538_v40  ;;  %v506_v49 = vadd.f32 %v505_v42, %v999_v25 }
 0x129   :  { %v507_v31 = vadd.f32 %v506_v49, %v1013_v35  ;;  %v563_v50 = vadd.f32 %v562_v48, %v539_v47 }
 0x12b   :  { %v508_v51 = vadd.f32 %v507_v31, %v1027_v46  ;;  %v564_v53 = vadd.f32 %v563_v50, %v540_v59  ;;  %v546_v46 = vmul.f32 %v1107_v0, %v1107_v0 }
 0x12d   :  { %v509_v54 = vadd.f32 %v508_v51, %v1041_v57  ;;  %v565_v56 = vadd.f32 %v564_v53, %v541_v5  ;;  %v570_v6 = vsel %vm513_vm0, %v546_v46, 0.0 }
 0x12f   :  { %v510_v25 = vadd.f32 %v509_v54, %v1059_v9  ;;  %v566_v58 = vadd.f32 %v565_v56, %v542_v15 }
 0x131   :  { %v567_v35 = vadd.f32 %v566_v58, %v543_v41  ;;  %v511_v60 = vadd.f32 %v510_v25, %v1077_v27  ;;  %v578_v27 = vlaneseq }
 0x133   :  { %v568_v62 = vadd.f32 %v567_v35, %v544_v61  ;;  %v512_v57 = vadd.f32 %v511_v60, %v1094_v44  ;;  %v579_v16 = vshrl.u32 %v578_v27, 7 }
 0x135   :  { %v569_v9 = vadd.f32 %v568_v62, %v545_v63  ;;  %v515_v4 = vadd.f32 %v514_v3, %v512_v57  ;;  %vm581_vm1 = vcmp.eq.s32.totalorder %v579_v16, 1  ;;  %vm580_vm2 = vcmp.eq.s32.totalorder %v579_v16, 0 }
 0x137   :  { %v516_v7 = vrot.slane %v515_v4, 4  ;;  %v571_v8 = vadd.f32 %v570_v6, %v569_v9 }
 0x139   :  { %v517_v52 = vadd.f32 %v516_v7, %v515_v4  ;;  %v572_v10 = vrot.slane %v571_v8, 4 }
 0x13b   :  { %v518_v12 = vrot.slane %v517_v52, 2  ;;  %v573_v13 = vadd.f32 %v572_v10, %v571_v8 }
 0x13d   :  { %v519_v14 = vadd.f32 %v518_v12, %v517_v52  ;;  %v574_v2 = vrot.slane %v573_v13, 2 }
 0x13f   :  { %v575_v17 = vadd.f32 %v574_v2, %v573_v13  ;;  %v520_v18 = vrot.slane %v519_v14, 1 }
 0x141   :  { %v576_v19 = vrot.slane %v575_v17, 1  ;;  %v521_v0 = vadd.f32 %v520_v18, %v519_v14 }
 0x143   :  { %v577_v44 = vadd.f32 %v576_v19, %v575_v17 }
 0x145   :  { %v582_v55 = vsel %vm581_vm1, %v577_v44, 0.0 }
 0x146   :  { %v583_v20 = vsel %vm580_vm2, %v521_v0, %v582_v55 }
 0x147   :  { %584 = vst [vmem:[%s1168_s4] sm:$0xff] %v583_v20 }

// kernel: decoder_forward.14
= control target key start
LH: loop header
LB: loop body
LE: loop exit
PB: predicated region body
PF: predicated region fallthrough
CT: control target
= control target key end

     0   :  { %s5518_s15 = smov 0   ;;  %s7027_s0 = inlined_call_operand.vmem [shape: bf16[1024,1152], index: 0, kind: input, shape index: {}]   ;;  %s7028_s1 = inlined_call_operand.vmem [shape: bf16[1152,128], index: 1, kind: input, shape index: {}]   ;;  %s7029_s2 = inlined_call_operand.vmem [shape: f32[1,128], index: 2, kind: input, shape index: {}]   ;;  %s7030_s3 = inlined_call_operand.vmem [shape: f32[1024,128], index: 3, kind: output, shape index: {0}]   ;;  %s7031_s4 = inlined_call_operand.vmem [shape: f32[16,128], index: 4, kind: output, shape index: {1}]  }
   0x1 LB: > { %s5524_s16 = sadd.s32 4294967295, %s5490_s15   ;;  %p4464_p0 = scmp.ge.s32.totalorder %s5490_s15, 1  ;;  %s5490_s15 = sphi %s5518_s15, %s15_s15  }
   0x2   : > { %p167_p1 = scmp.lt.s32.totalorder %s5490_s15, 3 }
   0x4   : > { %p168_p2 = pnand %p4464_p0, %p167_p1 }
   0x6   : > { %171 = sbr.rel (%p168_p2) target bundleno = 870 (0x366), region = 32 }
   0xb   : > { %v4995_v0 = vld [vmem:[%s7028_s1 + $0x38] sm:$0xff]   ;;  %v5492_v1 = vmov 0   ;;  %s4465_s19 = sshll.u32 %s5524_s16, 6  ;;  %v4996_v2 = vld [vmem:[%s7028_s1 + $0x30] sm:$0xff]   ;;  %v4997_v3 = vld [vmem:[%s7028_s1 + $0x28] sm:$0xff]   ;;  %p211_p4 = scmp.lt.s32.totalorder %s5524_s16, 1 }
   0xc   : > { %2591 = vmatprep.subr.bf16.mxu0 %v5492_v1  ;;  %4953 = vmatprep.subr.bf16.mxu1 %v5492_v1  ;;  %p199_p3 = scmp.lt.s32.totalorder %s4465_s19, 127  ;;  %v4998_v4 = vld [vmem:[%s7028_s1 + $0x20] sm:$0xff]   ;;  %v4999_v5 = vld [vmem:[%s7028_s1 + $0x18] sm:$0xff]   ;;  %v5000_v7 = vld [vmem:[%s7028_s1 + $0x10] sm:$0xff]  }
   0xd   : > { %2592 = vmatpush1.bf16.msra.mxu0 %v4995_v0  ;;  %4969 = vmatpush1.bf16.msra.mxu1 %v4995_v0  ;;  %v5001_v9 = vld [vmem:[%s7028_s1 + $0x8] sm:$0xff]   ;;  %v5002_v10 = vld [vmem:[%s7028_s1] sm:$0xff]   ;;  %v5003_v11 = vld [vmem:[%s7028_s1 + $0x78] sm:$0xff]   ;;  %s7141_s16 = smov (!%p211_p4, %s5524_s16), 1 }
   0xe   : > { %2593 = vmatprep.subr.bf16.mxu0 %v5492_v1  ;;  %4954 = vmatprep.subr.bf16.mxu1 %v5492_v1  ;;  %s7139_s19 = smov (!%p199_p3, %s4465_s19), 127  ;;  %v5004_v12 = vld [vmem:[%s7028_s1 + $0x70] sm:$0xff]   ;;  %v5005_v13 = vld [vmem:[%s7028_s1 + $0x68] sm:$0xff]   ;;  %v5006_v14 = vld [vmem:[%s7028_s1 + $0x60] sm:$0xff]  }
   0xf   : > { %s4985_s26 = smul.u32 36, %s7139_s19  ;;  %v5007_v15 = vld [vmem:[%s7028_s1 + $0x58] sm:$0xff]   ;;  %v5008_v16 = vld [vmem:[%s7028_s1 + $0x50] sm:$0xff]   ;;  %v5009_v17 = vld [vmem:[%s7028_s1 + $0x48] sm:$0xff]  }
  0x10   : > { %v5010_v18 = vld [vmem:[%s7028_s1 + $0x40] sm:$0xff]   ;;  %v5017_v21 = vld [vmem:[%s7028_s1 + $0xb8] sm:$0xff]   ;;  %v5019_v25 = vld [vmem:[%s7028_s1 + $0xb0] sm:$0xff]  }
  0x11   : > { %2594 = vmatpush1.bf16.msra.mxu0 %v4996_v2  ;;  %4970 = vmatpush1.bf16.msra.mxu1 %v4996_v2  ;;  %s5558_s5 = scalar_lea.vmem %s7027_s0, %s4985_s26  ;;  %v5018_v22 = vld [vmem:[%s7028_s1 + $0x138] sm:$0xff]   ;;  %v5028_v26 = vld [vmem:[%s7028_s1 + $0x130] sm:$0xff]   ;;  %v5026_v29 = vld [vmem:[%s7028_s1 + $0xa8] sm:$0xff]  }
  0x12   : > { %2595 = vmatprep.subr.bf16.mxu0 %v5492_v1  ;;  %4955 = vmatprep.subr.bf16.mxu1 %v5492_v1  ;;  %v5013_v6 = vld [vmem:[%s5558_s5 + $0x4] ss:$36 sps:$4 sm:$0xff]   ;;  %v5020_v23 = vld [vmem:[%s5558_s5 + $0x4c] ss:$36 sps:$4 sm:$0xff]   ;;  %v5029_v30 = vld [vmem:[%s5558_s5 + $0x94] ss:$36 sps:$4 sm:$0xff]  }
  0x13   : > { %v5016_v8 = vld [vmem:[%s5558_s5 + $0x6c4] ss:$36 sps:$4 sm:$0xff]   ;;  %2623 = vmatprep.mubr.bf16.mxu0 %v5013_v6  ;;  %v5022_v24 = vld [vmem:[%s5558_s5 + $0x70c] ss:$36 sps:$4 sm:$0xff]   ;;  %v5031_v31 = vld [vmem:[%s5558_s5 + $0x754] ss:$36 sps:$4 sm:$0xff]  }
  0x14   : > { %2815 = vmatprep.mubr.bf16.mxu1 %v5016_v8  ;;  %v5011_v19 = vld [vmem:[%s5558_s5] ss:$36 sps:$4 sm:$0xff]   ;;  %v5024_v27 = vld [vmem:[%s5558_s5 + $0x48] ss:$36 sps:$4 sm:$0xff]   ;;  %v5033_v34 = vld [vmem:[%s5558_s5 + $0x90] ss:$36 sps:$4 sm:$0xff]  }
  0x15   : > { %2596 = vmatpush1.bf16.msra.mxu0 %v4997_v3  ;;  %4971 = vmatpush1.bf16.msra.mxu1 %v4997_v3  ;;  %v5014_v20 = vld [vmem:[%s5558_s5 + $0x6c0] ss:$36 sps:$4 sm:$0xff]   ;;  %v5025_v28 = vld [vmem:[%s5558_s5 + $0x708] ss:$36 sps:$4 sm:$0xff]   ;;  %v5034_v35 = vld [vmem:[%s5558_s5 + $0x750] ss:$36 sps:$4 sm:$0xff]  }
  0x16   : > { %2597 = vmatprep.subr.bf16.mxu0 %v5492_v1  ;;  %4956 = vmatprep.subr.bf16.mxu1 %v5492_v1  ;;  %v5044_v32 = vld [vmem:[%s7028_s1 + $0x128] sm:$0xff]   ;;  %v5027_v33 = vld [vmem:[%s7028_s1 + $0xa0] sm:$0xff]   ;;  %v5035_v37 = vld [vmem:[%s7028_s1 + $0x98] sm:$0xff]  }
  0x17   : > { %v5054_v36 = vld [vmem:[%s7028_s1 + $0x120] sm:$0xff]   ;;  %v5070_v40 = vld [vmem:[%s7028_s1 + $0x118] sm:$0xff]   ;;  %v5036_v41 = vld [vmem:[%s7028_s1 + $0x90] sm:$0xff]  }
  0x18   : > { %v5037_v38 = vld [vmem:[%s5558_s5 + $0xdc] ss:$36 sps:$4 sm:$0xff]   ;;  %v5043_v44 = vld [vmem:[%s7028_s1 + $0x88] sm:$0xff]   ;;  %v5080_v47 = vld [vmem:[%s7028_s1 + $0x110] sm:$0xff]  }
  0x19   : > { %2598 = vmatpush1.bf16.msra.mxu0 %v4998_v4  ;;  %4972 = vmatpush1.bf16.msra.mxu1 %v4998_v4  ;;  %v5039_v39 = vld [vmem:[%s5558_s5 + $0x79c] ss:$36 sps:$4 sm:$0xff]   ;;  %v5046_v45 = vld [vmem:[%s5558_s5 + $0x124] ss:$36 sps:$4 sm:$0xff]   ;;  %v5055_v53 = vld [vmem:[%s5558_s5 + $0x16c] ss:$36 sps:$4 sm:$0xff]  }
  0x1a   : > { %2599 = vmatprep.subr.bf16.mxu0 %v5492_v1  ;;  %4957 = vmatprep.subr.bf16.mxu1 %v5492_v1  ;;  %v5041_v42 = vld [vmem:[%s5558_s5 + $0xd8] ss:$36 sps:$4 sm:$0xff]   ;;  %v5048_v46 = vld [vmem:[%s5558_s5 + $0x7e4] ss:$36 sps:$4 sm:$0xff]   ;;  %v5057_v54 = vld [vmem:[%s5558_s5 + $0x82c] ss:$36 sps:$4 sm:$0xff]  }
  0x1b   : > { %v5042_v43 = vld [vmem:[%s5558_s5 + $0x798] ss:$36 sps:$4 sm:$0xff]   ;;  %v5045_v48 = vld [vmem:[%s7028_s1 + $0x80] sm:$0xff]   ;;  %v5094_v51 = vld [vmem:[%s7028_s1 + $0x108] sm:$0xff]  }
  0x1c   : > { %v5050_v49 = vld [vmem:[%s5558_s5 + $0x120] ss:$36 sps:$4 sm:$0xff]   ;;  %v5052_v52 = vld [vmem:[%s7028_s1 + $0xf8] sm:$0xff]   ;;  %v5053_v56 = vld [vmem:[%s7028_s1 + $0xf0] sm:$0xff]  }
  0x1d   : > { %2600 = vmatpush1.bf16.msra.mxu0 %v4999_v5  ;;  %4973 = vmatpush1.bf16.msra.mxu1 %v4999_v5  ;;  %v5051_v50 = vld [vmem:[%s5558_s5 + $0x7e0] ss:$36 sps:$4 sm:$0xff]   ;;  %v5059_v57 = vld [vmem:[%s5558_s5 + $0x168] ss:$36 sps:$4 sm:$0xff]   ;;  %v5063_v60 = vld [vmem:[%s5558_s5 + $0x1b4] ss:$36 sps:$4 sm:$0xff]  }
  0x1e   : > { %2601 = vmatprep.subr.bf16.mxu0 %v5492_v1  ;;  %4958 = vmatprep.subr.bf16.mxu1 %v5492_v1  ;;  %v5101_v55 = vld [vmem:[%s7028_s1 + $0x100] sm:$0xff]   ;;  %v5060_v58 = vld [vmem:[%s5558_s5 + $0x828] ss:$36 sps:$4 sm:$0xff]   ;;  %v5065_v61 = vld [vmem:[%s5558_s5 + $0x874] ss:$36 sps:$4 sm:$0xff]  }
  0x1f   : > { %v5061_v59 = vld [vmem:[%s7028_s1 + $0xe8] sm:$0xff]   ;;  %v5115_v62 = vld [vmem:[%s7028_s1 + $0x178] sm:$0xff]   ;;  %v5062_v63 = vld [vmem:[%s7028_s1 + $0xe0] sm:$0xff]  }
  0x20   : > { %v5067_v0 = vld [vmem:[%s5558_s5 + $0x1b0] ss:$36 sps:$4 sm:$0xff]   ;;  %v5069_v4 = vld [vmem:[%s7028_s1 + $0xd8] sm:$0xff]  }
  0x21   : > { %2602 = vmatpush1.bf16.msra.mxu0 %v5000_v7  ;;  %4974 = vmatpush1.bf16.msra.mxu1 %v5000_v7  ;;  %v5068_v2 = vld [vmem:[%s5558_s5 + $0x870] ss:$36 sps:$4 sm:$0xff]   ;;  %v5072_v5 = vld [vmem:[%s5558_s5 + $0x1fc] ss:$36 sps:$4 sm:$0xff]   ;;  %v5137_v7 = vld [vmem:[%s7028_s1 + $0x168] sm:$0xff]  }
  0x22   : > { %2603 = vmatprep.subr.bf16.mxu0 %v5492_v1  ;;  %4959 = vmatprep.subr.bf16.mxu1 %v5492_v1  ;;  %v5123_v3 = vld [vmem:[%s7028_s1 + $0x170] sm:$0xff]   ;;  %v5074_v6 = vld [vmem:[%s5558_s5 + $0x8bc] ss:$36 sps:$4 sm:$0xff]  }
  0x23   : > { %v5071_v8 = vld [vmem:[%s7028_s1 + $0xd0] sm:$0xff]  }
  0x25   : > { %2604 = vmatpush1.bf16.msra.mxu0 %v5001_v9  ;;  %4975 = vmatpush1.bf16.msra.mxu1 %v5001_v9  ;;  %v5076_v9 = vld [vmem:[%s5558_s5 + $0x1f8] ss:$36 sps:$4 sm:$0xff]  }
  0x26   : > { %2605 = vmatprep.subr.bf16.mxu0 %v5492_v1  ;;  %4960 = vmatprep.subr.bf16.mxu1 %v5492_v1 }
  0x29   : > { %2606 = vmatpush1.bf16.msra.mxu0 %v5002_v10  ;;  %4976 = vmatpush1.bf16.msra.mxu1 %v5002_v10  ;;  %v5077_v10 = vld [vmem:[%s5558_s5 + $0x8b8] ss:$36 sps:$4 sm:$0xff]  }
  0x2a   : > { %2607 = vmatprep.subr.bf16.mxu0 %v5492_v1  ;;  %4961 = vmatprep.subr.bf16.mxu1 %v5492_v1 }
  0x2d   : > { %2608 = vmatpush2.bf16.msra.mxu0 %v5003_v11  ;;  %4977 = vmatpush2.bf16.msra.mxu1 %v5003_v11  ;;  %v5078_v11 = vld [vmem:[%s7028_s1 + $0xc8] sm:$0xff]  }
  0x2e   : > { %2609 = vmatprep.subr.bf16.mxu0 %v5492_v1  ;;  %4962 = vmatprep.subr.bf16.mxu1 %v5492_v1 }
  0x31   : > { %2610 = vmatpush2.bf16.msra.mxu0 %v5004_v12  ;;  %4978 = vmatpush2.bf16.msra.mxu1 %v5004_v12  ;;  %v5081_v12 = vld [vmem:[%s5558_s5 + $0x244] ss:$36 sps:$4 sm:$0xff]  }
  0x32   : > { %2611 = vmatprep.subr.bf16.mxu0 %v5492_v1  ;;  %4963 = vmatprep.subr.bf16.mxu1 %v5492_v1 }
  0x35   : > { %2612 = vmatpush2.bf16.msra.mxu0 %v5005_v13  ;;  %4979 = vmatpush2.bf16.msra.mxu1 %v5005_v13  ;;  %v5085_v13 = vld [vmem:[%s5558_s5 + $0xc] ss:$36 sps:$4 sm:$0xff]  }
  0x36   : > { %2613 = vmatprep.subr.bf16.mxu0 %v5492_v1  ;;  %4964 = vmatprep.subr.bf16.mxu1 %v5492_v1 }
  0x39   : > { %2614 = vmatpush2.bf16.msra.mxu0 %v5006_v14  ;;  %4980 = vmatpush2.bf16.msra.mxu1 %v5006_v14  ;;  %v5144_v14 = vld [vmem:[%s7028_s1 + $0x160] sm:$0xff]  }
  0x3a   : > { %2615 = vmatprep.subr.bf16.mxu0 %v5492_v1  ;;  %4965 = vmatprep.subr.bf16.mxu1 %v5492_v1 }
  0x3d   : > { %2616 = vmatpush2.bf16.msra.mxu0 %v5007_v15  ;;  %4981 = vmatpush2.bf16.msra.mxu1 %v5007_v15  ;;  %v5079_v15 = vld [vmem:[%s7028_s1 + $0xc0] sm:$0xff]  }
  0x3e   : > { %2617 = vmatprep.subr.bf16.mxu0 %v5492_v1  ;;  %4966 = vmatprep.subr.bf16.mxu1 %v5492_v1 }
  0x41   : > { %2618 = vmatpush2.bf16.msra.mxu0 %v5008_v16  ;;  %4982 = vmatpush2.bf16.msra.mxu1 %v5008_v16  ;;  %v5158_v16 = vld [vmem:[%s7028_s1 + $0x158] sm:$0xff]  }
  0x42   : > { %2619 = vmatprep.subr.bf16.mxu0 %v5492_v1  ;;  %4967 = vmatprep.subr.bf16.mxu1 %v5492_v1 }
  0x45   : > { %2620 = vmatpush2.bf16.msra.mxu0 %v5009_v17  ;;  %4983 = vmatpush2.bf16.msra.mxu1 %v5009_v17  ;;  %v5083_v17 = vld [vmem:[%s5558_s5 + $0x8] ss:$36 sps:$4 sm:$0xff]  }
  0x46   : > { %2621 = vmatprep.subr.bf16.mxu0 %v5492_v1  ;;  %4968 = vmatprep.subr.bf16.mxu1 %v5492_v1 }
  0x49   : > { %2622 = vmatpush2.bf16.msra.mxu0 %v5010_v18  ;;  %4984 = vmatpush2.bf16.msra.mxu1 %v5010_v18  ;;  %v5086_v18 = vld [vmem:[%s5558_s5 + $0x240] ss:$36 sps:$4 sm:$0xff]  }
  0x4a   : > { %2880 = vmatprep.subr.bf16.mxu1 %v5492_v1  ;;  %3169 = vmatprep.subr.bf16.mxu0 %v5492_v1 }
  0x4c   : > { %2624 = vmatmul.mubr.bf16.vlgmr.msra.gmra.mxu0 %v5011_v19  ;;  %2816 = vmatmul.mubr.bf16.vlgmr.msra.gmra.mxu1 %v5014_v20  ;;  %v5087_v19 = vld [vmem:[%s7028_s1 + $0x1b8] sm:$0xff]   ;;  %v5088_v20 = vld [vmem:[%s5558_s5 + $0x28c] ss:$36 sps:$4 sm:$0xff]  }
  0x4d   : > { %2881 = vmatpush1.bf16.msra.mxu1 %v5017_v21  ;;  %3170 = vmatpush1.bf16.msra.mxu0 %v5018_v22  ;;  %v5090_v21 = vld [vmem:[%s5558_s5 + $0x54] ss:$36 sps:$4 sm:$0xff]  }
  0x4e   : > { %2882 = vmatprep.subr.bf16.mxu1 %v5492_v1  ;;  %2631 = vmatprep.mubr.bf16.mxu0 %v5020_v23  ;;  %v5166_v22 = vld [vmem:[%s7028_s1 + $0x150] sm:$0xff]  }
  0x4f   : > { %2823 = vmatprep.mubr.bf16.mxu1 %v5022_v24  ;;  %3171 = vmatprep.subr.bf16.mxu0 %v5492_v1  ;;  %v5102_v23 = vld [vmem:[%s7028_s1 + $0x1b0] sm:$0xff]   ;;  %v5092_v24 = vld [vmem:[%s5558_s5 + $0x288] ss:$36 sps:$4 sm:$0xff]  }
  0x51   : > { %2883 = vmatpush1.bf16.msra.mxu1 %v5019_v25  ;;  %3172 = vmatpush1.bf16.msra.mxu0 %v5028_v26  ;;  %v5093_v25 = vld [vmem:[%s5558_s5 + $0x50] ss:$36 sps:$4 sm:$0xff]  }
  0x52   : > { %2884 = vmatprep.subr.bf16.mxu1 %v5492_v1  ;;  %3173 = vmatprep.subr.bf16.mxu0 %v5492_v1  ;;  %v5095_v26 = vld [vmem:[%s5558_s5 + $0x2d4] ss:$36 sps:$4 sm:$0xff]  }
  0x54   : > { %2632 = vmatmul.mubr.bf16.gmra.mxu0 %v5024_v27  ;;  %2824 = vmatmul.mubr.bf16.gmra.mxu1 %v5025_v28  ;;  %v5097_v27 = vld [vmem:[%s5558_s5 + $0x9c] ss:$36 sps:$4 sm:$0xff]   ;;  %v5116_v28 = vld [vmem:[%s7028_s1 + $0x1a8] sm:$0xff]  }
  0x55   : > { %2885 = vmatpush1.bf16.msra.mxu1 %v5026_v29  ;;  %2639 = vmatprep.mubr.bf16.mxu0 %v5029_v30  ;;  %v5180_v29 = vld [vmem:[%s7028_s1 + $0x148] sm:$0xff]   ;;  %v5130_v30 = vld [vmem:[%s7028_s1 + $0x1a0] sm:$0xff]  }
  0x56   : > { %2886 = vmatprep.subr.bf16.mxu1 %v5492_v1  ;;  %2831 = vmatprep.mubr.bf16.mxu1 %v5031_v31  ;;  %v5187_v31 = vld [vmem:[%s7028_s1 + $0x140] sm:$0xff]  }
  0x57   : > { %3174 = vmatpush1.bf16.msra.mxu0 %v5044_v32  ;;  %v5804_v32 = vld [vmem:[%s7028_s1 + $0x238] sm:$0xff]  }
  0x58   : > { %3175 = vmatprep.subr.bf16.mxu0 %v5492_v1 }
  0x59   : > { %2887 = vmatpush1.bf16.msra.mxu1 %v5027_v33  ;;  %v5099_v33 = vld [vmem:[%s5558_s5 + $0x2d0] ss:$36 sps:$4 sm:$0xff]  }
  0x5a   : > { %2888 = vmatprep.subr.bf16.mxu1 %v5492_v1 }
  0x5b   : > { %3176 = vmatpush1.bf16.msra.mxu0 %v5054_v36  ;;  %v5105_v36 = vld [vmem:[%s5558_s5 + $0xe4] ss:$36 sps:$4 sm:$0xff]  }
  0x5c   : > { %2640 = vmatmul.mubr.bf16.gmra.mxu0 %v5033_v34  ;;  %2832 = vmatmul.mubr.bf16.gmra.mxu1 %v5034_v35  ;;  %v5100_v34 = vld [vmem:[%s5558_s5 + $0x98] ss:$36 sps:$4 sm:$0xff]  }
  0x5d   : > { %2889 = vmatpush1.bf16.msra.mxu1 %v5035_v37  ;;  %2647 = vmatprep.mubr.bf16.mxu0 %v5037_v38  ;;  %v5103_v35 = vld [vmem:[%s5558_s5 + $0x31c] ss:$36 sps:$4 sm:$0xff]   ;;  %v5159_v38 = vld [vmem:[%s7028_s1 + $0x190] sm:$0xff]  }
  0x5e   : > { %2890 = vmatprep.subr.bf16.mxu1 %v5492_v1  ;;  %2839 = vmatprep.mubr.bf16.mxu1 %v5039_v39  ;;  %v5145_v37 = vld [vmem:[%s7028_s1 + $0x198] sm:$0xff]  }
  0x5f   : > { %3177 = vmatprep.subr.bf16.mxu0 %v5492_v1  ;;  %v5107_v39 = vld [vmem:[%s5558_s5 + $0x318] ss:$36 sps:$4 sm:$0xff]  }
  0x60   : > { %3178 = vmatpush1.bf16.msra.mxu0 %v5070_v40  ;;  %v5108_v40 = vld [vmem:[%s5558_s5 + $0xe0] ss:$36 sps:$4 sm:$0xff]  }
  0x61   : > { %2891 = vmatpush1.bf16.msra.mxu1 %v5036_v41  ;;  %3179 = vmatprep.subr.bf16.mxu0 %v5492_v1  ;;  %v5109_v41 = vld [vmem:[%s5558_s5 + $0x364] ss:$36 sps:$4 sm:$0xff]  }
  0x62   : > { %2892 = vmatprep.subr.bf16.mxu1 %v5492_v1 }
  0x64   : > { %2648 = vmatmul.mubr.bf16.gmra.mxu0 %v5041_v42  ;;  %2840 = vmatmul.mubr.bf16.gmra.mxu1 %v5042_v43  ;;  %v5111_v42 = vld [vmem:[%s5558_s5 + $0x12c] ss:$36 sps:$4 sm:$0xff]  }
  0x65   : > { %2893 = vmatpush1.bf16.msra.mxu1 %v5043_v44  ;;  %2655 = vmatprep.mubr.bf16.mxu0 %v5046_v45  ;;  %v5173_v43 = vld [vmem:[%s7028_s1 + $0x188] sm:$0xff]   ;;  %v5188_v44 = vld [vmem:[%s7028_s1 + $0x180] sm:$0xff]  }
  0x66   : > { %2894 = vmatprep.subr.bf16.mxu1 %v5492_v1  ;;  %2847 = vmatprep.mubr.bf16.mxu1 %v5048_v46  ;;  %v5113_v45 = vld [vmem:[%s5558_s5 + $0x360] ss:$36 sps:$4 sm:$0xff]   ;;  %v5114_v46 = vld [vmem:[%s5558_s5 + $0x128] ss:$36 sps:$4 sm:$0xff]  }
  0x67   : > { %3180 = vmatpush1.bf16.msra.mxu0 %v5080_v47  ;;  %v5117_v47 = vld [vmem:[%s5558_s5 + $0x3ac] ss:$36 sps:$4 sm:$0xff]  }
  0x68   : > { %3181 = vmatprep.subr.bf16.mxu0 %v5492_v1 }
  0x69   : > { %2895 = vmatpush1.bf16.msra.mxu1 %v5045_v48  ;;  %v5119_v48 = vld [vmem:[%s5558_s5 + $0x174] ss:$36 sps:$4 sm:$0xff]  }
  0x6a   : > { %2896 = vmatprep.subr.bf16.mxu1 %v5492_v1 }
  0x6b   : > { %3182 = vmatpush1.bf16.msra.mxu0 %v5094_v51  ;;  %v5121_v51 = vld [vmem:[%s5558_s5 + $0x3a8] ss:$36 sps:$4 sm:$0xff]  }
  0x6c   : > { %2656 = vmatmul.mubr.bf16.gmra.mxu0 %v5050_v49  ;;  %2848 = vmatmul.mubr.bf16.gmra.mxu1 %v5051_v50  ;;  %v5202_v49 = vld [vmem:[%s7028_s1 + $0x1f8] sm:$0xff]   ;;  %v5215_v50 = vld [vmem:[%s7028_s1 + $0x1f0] sm:$0xff]  }
  0x6d   : > { %2897 = vmatpush2.bf16.msra.mxu1 %v5052_v52  ;;  %2663 = vmatprep.mubr.bf16.mxu0 %v5055_v53  ;;  %v5122_v52 = vld [vmem:[%s5558_s5 + $0x170] ss:$36 sps:$4 sm:$0xff]  }
  0x6e   : > { %2898 = vmatprep.subr.bf16.mxu1 %v5492_v1  ;;  %2855 = vmatprep.mubr.bf16.mxu1 %v5057_v54  ;;  %v5124_v53 = vld [vmem:[%s5558_s5 + $0x3f4] ss:$36 sps:$4 sm:$0xff]   ;;  %v5126_v54 = vld [vmem:[%s5558_s5 + $0x1bc] ss:$36 sps:$4 sm:$0xff]  }
  0x6f   : > { %3183 = vmatprep.subr.bf16.mxu0 %v5492_v1 }
  0x70   : > { %3184 = vmatpush1.bf16.msra.mxu0 %v5101_v55  ;;  %v5229_v55 = vld [vmem:[%s7028_s1 + $0x1e8] sm:$0xff]  }
  0x71   : > { %2899 = vmatpush2.bf16.msra.mxu1 %v5053_v56  ;;  %3185 = vmatprep.subr.bf16.mxu0 %v5492_v1  ;;  %v5128_v56 = vld [vmem:[%s5558_s5 + $0x3f0] ss:$36 sps:$4 sm:$0xff]  }
  0x72   : > { %2900 = vmatprep.subr.bf16.mxu1 %v5492_v1 }
  0x74   : > { %2664 = vmatmul.mubr.bf16.gmra.mxu0 %v5059_v57  ;;  %2856 = vmatmul.mubr.bf16.gmra.mxu1 %v5060_v58  ;;  %v5129_v57 = vld [vmem:[%s5558_s5 + $0x1b8] ss:$36 sps:$4 sm:$0xff]  }
  0x75   : > { %2901 = vmatpush2.bf16.msra.mxu1 %v5061_v59  ;;  %2671 = vmatprep.mubr.bf16.mxu0 %v5063_v60  ;;  %v5131_v58 = vld [vmem:[%s5558_s5 + $0x43c] ss:$36 sps:$4 sm:$0xff]   ;;  %v5133_v59 = vld [vmem:[%s5558_s5 + $0x204] ss:$36 sps:$4 sm:$0xff]  }
  0x76   : > { %2902 = vmatprep.subr.bf16.mxu1 %v5492_v1  ;;  %2863 = vmatprep.mubr.bf16.mxu1 %v5065_v61  ;;  %v5135_v60 = vld [vmem:[%s5558_s5 + $0x438] ss:$36 sps:$4 sm:$0xff]   ;;  %v5136_v61 = vld [vmem:[%s5558_s5 + $0x200] ss:$36 sps:$4 sm:$0xff]  }
  0x77   : > { %3186 = vmatpush2.bf16.msra.mxu0 %v5115_v62  ;;  %v5138_v62 = vld [vmem:[%s5558_s5 + $0x484] ss:$36 sps:$4 sm:$0xff]  }
  0x78   : > { %3187 = vmatprep.subr.bf16.mxu0 %v5492_v1 }
  0x79   : > { %2903 = vmatpush2.bf16.msra.mxu1 %v5062_v63  ;;  %v5140_v63 = vld [vmem:[%s5558_s5 + $0x24c] ss:$36 sps:$4 sm:$0xff]  }
  0x7a   : > { %2904 = vmatprep.subr.bf16.mxu1 %v5492_v1 }
  0x7b   : > { %3188 = vmatpush2.bf16.msra.mxu0 %v5123_v3  ;;  %v5143_v3 = vld [vmem:[%s5558_s5 + $0x248] ss:$36 sps:$4 sm:$0xff]  }
  0x7c   : > { %2672 = vmatmul.mubr.bf16.gmra.mxu0 %v5067_v0  ;;  %2864 = vmatmul.mubr.bf16.gmra.mxu1 %v5068_v2  ;;  %v5242_v0 = vld [vmem:[%s7028_s1 + $0x1e0] sm:$0xff]  }
  0x7d   : > { %2905 = vmatpush2.bf16.msra.mxu1 %v5069_v4  ;;  %2679 = vmatprep.mubr.bf16.mxu0 %v5072_v5  ;;  %v5142_v2 = vld [vmem:[%s5558_s5 + $0x480] ss:$36 sps:$4 sm:$0xff]   ;;  %v5146_v4 = vld [vmem:[%s5558_s5 + $0x4cc] ss:$36 sps:$4 sm:$0xff]   ;;  %v5148_v5 = vld [vmem:[%s5558_s5 + $0x294] ss:$36 sps:$4 sm:$0xff]  }
  0x7e   : > { %2906 = vmatprep.subr.bf16.mxu1 %v5492_v1  ;;  %2871 = vmatprep.mubr.bf16.mxu1 %v5074_v6  ;;  %v5150_v6 = vld [vmem:[%s5558_s5 + $0x4c8] ss:$36 sps:$4 sm:$0xff]  }
  0x7f   : > { %3189 = vmatprep.subr.bf16.mxu0 %v5492_v1 }
  0x80   : > { %3190 = vmatpush2.bf16.msra.mxu0 %v5137_v7  ;;  %v5151_v7 = vld [vmem:[%s5558_s5 + $0x290] ss:$36 sps:$4 sm:$0xff]  }
  0x81   : > { %2907 = vmatpush2.bf16.msra.mxu1 %v5071_v8  ;;  %3191 = vmatprep.subr.bf16.mxu0 %v5492_v1  ;;  %v5152_v8 = vld [vmem:[%s5558_s5 + $0x514] ss:$36 sps:$4 sm:$0xff]  }
  0x82   : > { %2908 = vmatprep.subr.bf16.mxu1 %v5492_v1 }
  0x84   : > { %2680 = vmatmul.mubr.bf16.gmra.mxu0 %v5076_v9  ;;  %2872 = vmatmul.mubr.bf16.gmra.mxu1 %v5077_v10  ;;  %v5154_v9 = vld [vmem:[%s5558_s5 + $0x2dc] ss:$36 sps:$4 sm:$0xff]  }
  0x85   : > { %2909 = vmatpush2.bf16.msra.mxu1 %v5078_v11  ;;  %2687 = vmatprep.mubr.bf16.mxu0 %v5081_v12  ;;  %v5256_v10 = vld [vmem:[%s7028_s1 + $0x1d8] sm:$0xff]   ;;  %v5156_v11 = vld [vmem:[%s5558_s5 + $0x510] ss:$36 sps:$4 sm:$0xff]  }
  0x86   : > { %2910 = vmatprep.subr.bf16.mxu1 %v5492_v1  ;;  %2912 = vmatprep.mubr.bf16.mxu1 %v5085_v13  ;;  %v5157_v12 = vld [vmem:[%s5558_s5 + $0x2d8] ss:$36 sps:$4 sm:$0xff]  }
  0x87   : > { %3192 = vmatpush2.bf16.msra.mxu0 %v5144_v14  ;;  %v5160_v13 = vld [vmem:[%s5558_s5 + $0x55c] ss:$36 sps:$4 sm:$0xff]   ;;  %v5162_v14 = vld [vmem:[%s5558_s5 + $0x324] ss:$36 sps:$4 sm:$0xff]  }
  0x88   : > { %3193 = vmatprep.subr.bf16.mxu0 %v5492_v1 }
  0x89   : > { %2911 = vmatpush2.bf16.msra.mxu1 %v5079_v15  ;;  %v5164_v15 = vld [vmem:[%s5558_s5 + $0x558] ss:$36 sps:$4 sm:$0xff]  }
  0x8a   : > { %3458 = vmatprep.subr.bf16.mxu1 %v5492_v1 }
  0x8b   : > { %3194 = vmatpush2.bf16.msra.mxu0 %v5158_v16  ;;  %v5165_v16 = vld [vmem:[%s5558_s5 + $0x320] ss:$36 sps:$4 sm:$0xff]  }
  0x8c   : > { %2688 = vmatmul.mubr.bf16.gmra.mxu0 %v5086_v18  ;;  %2913 = vmatmul.mubr.bf16.vlgmr.msra.gmra.mxu1 %v5083_v17  ;;  %v5167_v17 = vld [vmem:[%s5558_s5 + $0x5a4] ss:$36 sps:$4 sm:$0xff]   ;;  %v5169_v18 = vld [vmem:[%s5558_s5 + $0x36c] ss:$36 sps:$4 sm:$0xff]  }
  0x8d   : > { %3459 = vmatpush1.bf16.msra.mxu1 %v5087_v19  ;;  %2695 = vmatprep.mubr.bf16.mxu0 %v5088_v20  ;;  %v5269_v19 = vld [vmem:[%s7028_s1 + $0x1d0] sm:$0xff]   ;;  %v5171_v20 = vld [vmem:[%s5558_s5 + $0x5a0] ss:$36 sps:$4 sm:$0xff]  }
  0x8e   : > { %2920 = vmatprep.mubr.bf16.mxu1 %v5090_v21  ;;  %3460 = vmatprep.subr.bf16.mxu1 %v5492_v1  ;;  %v5172_v21 = vld [vmem:[%s5558_s5 + $0x368] ss:$36 sps:$4 sm:$0xff]  }
  0x8f   : > { %3195 = vmatprep.subr.bf16.mxu0 %v5492_v1 }
  0x90   : > { %3196 = vmatpush2.bf16.msra.mxu0 %v5166_v22  ;;  %v5174_v22 = vld [vmem:[%s5558_s5 + $0x5ec] ss:$36 sps:$4 sm:$0xff]  }
  0x91   : > { %3461 = vmatpush1.bf16.msra.mxu1 %v5102_v23  ;;  %3197 = vmatprep.subr.bf16.mxu0 %v5492_v1  ;;  %v5176_v23 = vld [vmem:[%s5558_s5 + $0x3b4] ss:$36 sps:$4 sm:$0xff]  }
  0x92   : > { %3462 = vmatprep.subr.bf16.mxu1 %v5492_v1 }
  0x94   : > { %2696 = vmatmul.mubr.bf16.gmra.mxu0 %v5092_v24  ;;  %2921 = vmatmul.mubr.bf16.gmra.mxu1 %v5093_v25  ;;  %v5178_v24 = vld [vmem:[%s5558_s5 + $0x5e8] ss:$36 sps:$4 sm:$0xff]   ;;  %v5179_v25 = vld [vmem:[%s5558_s5 + $0x3b0] ss:$36 sps:$4 sm:$0xff]  }
  0x95   : > { %2703 = vmatprep.mubr.bf16.mxu0 %v5095_v26  ;;  %2928 = vmatprep.mubr.bf16.mxu1 %v5097_v27  ;;  %v5181_v26 = vld [vmem:[%s5558_s5 + $0x634] ss:$36 sps:$4 sm:$0xff]   ;;  %v5183_v27 = vld [vmem:[%s5558_s5 + $0x3fc] ss:$36 sps:$4 sm:$0xff]  }
  0x96   : > { %3463 = vmatpush1.bf16.msra.mxu1 %v5116_v28  ;;  %3198 = vmatpush2.bf16.msra.mxu0 %v5180_v29  ;;  %v5283_v28 = vld [vmem:[%s7028_s1 + $0x1c8] sm:$0xff]   ;;  %v5185_v29 = vld [vmem:[%s5558_s5 + $0x630] ss:$36 sps:$4 sm:$0xff]  }
  0x97   : > { %3464 = vmatprep.subr.bf16.mxu1 %v5492_v1  ;;  %3199 = vmatprep.subr.bf16.mxu0 %v5492_v1 }
  0x9a   : > { %3465 = vmatpush1.bf16.msra.mxu1 %v5130_v30  ;;  %3200 = vmatpush2.bf16.msra.mxu0 %v5187_v31  ;;  %v5186_v30 = vld [vmem:[%s5558_s5 + $0x3f8] ss:$36 sps:$4 sm:$0xff]  }
  0x9b   : > { %3466 = vmatprep.subr.bf16.mxu1 %v5492_v1  ;;  %4873 = vmatprep.subr.bf16.mxu0 %v5804_v32  ;;  %v5189_v31 = vld [vmem:[%s5558_s5 + $0x67c] ss:$36 sps:$4 sm:$0xff]  }
  0x9c   : > { %2704 = vmatmul.mubr.bf16.gmra.mxu0 %v5099_v33  ;;  %2929 = vmatmul.mubr.bf16.gmra.mxu1 %v5100_v34  ;;  %v5191_v33 = vld [vmem:[%s5558_s5 + $0x444] ss:$36 sps:$4 sm:$0xff]   ;;  %v5193_v34 = vld [vmem:[%s5558_s5 + $0x678] ss:$36 sps:$4 sm:$0xff]  }
  0x9d   : > { %2711 = vmatprep.mubr.bf16.mxu0 %v5103_v35  ;;  %2936 = vmatprep.mubr.bf16.mxu1 %v5105_v36  ;;  %v5194_v35 = vld [vmem:[%s5558_s5 + $0x440] ss:$36 sps:$4 sm:$0xff]   ;;  %v5195_v36 = vld [vmem:[%s5558_s5 + $0x48c] ss:$36 sps:$4 sm:$0xff]  }
  0x9e   : > { %3467 = vmatpush1.bf16.msra.mxu1 %v5145_v37  ;;  %v5199_v37 = vld [vmem:[%s5558_s5 + $0x14] ss:$36 sps:$4 sm:$0xff]  }
  0x9f   : > { %3468 = vmatprep.subr.bf16.mxu1 %v5492_v1 }
  0xa2   : > { %3469 = vmatpush1.bf16.msra.mxu1 %v5159_v38  ;;  %v5197_v38 = vld [vmem:[%s5558_s5 + $0x10] ss:$36 sps:$4 sm:$0xff]  }
  0xa3   : > { %3470 = vmatprep.subr.bf16.mxu1 %v5492_v1 }
  0xa4   : > { %2712 = vmatmul.mubr.bf16.gmra.mxu0 %v5107_v39  ;;  %2937 = vmatmul.mubr.bf16.gmra.mxu1 %v5108_v40  ;;  %v5200_v39 = vld [vmem:[%s5558_s5 + $0x488] ss:$36 sps:$4 sm:$0xff]   ;;  %v5203_v40 = vld [vmem:[%s5558_s5 + $0x4d4] ss:$36 sps:$4 sm:$0xff]  }
  0xa5   : > { %2719 = vmatprep.mubr.bf16.mxu0 %v5109_v41  ;;  %2944 = vmatprep.mubr.bf16.mxu1 %v5111_v42  ;;  %v5205_v41 = vld [vmem:[%s5558_s5 + $0x5c] ss:$36 sps:$4 sm:$0xff]   ;;  %v5228_v42 = vld [vmem:[%s7028_s1 + $0x230] sm:$0xff]  }
  0xa6   : > { %3471 = vmatpush1.bf16.msra.mxu1 %v5173_v43 }
  0xa7   : > { %3472 = vmatprep.subr.bf16.mxu1 %v5492_v1 }
  0xaa   : > { %3473 = vmatpush1.bf16.msra.mxu1 %v5188_v44 }
  0xab   : > { %3474 = vmatprep.subr.bf16.mxu1 %v5492_v1 }
  0xac   : > { %2720 = vmatmul.mubr.bf16.gmra.mxu0 %v5113_v45  ;;  %2945 = vmatmul.mubr.bf16.gmra.mxu1 %v5114_v46 }
  0xad   : > { %2727 = vmatprep.mubr.bf16.mxu0 %v5117_v47  ;;  %2952 = vmatprep.mubr.bf16.mxu1 %v5119_v48  ;;  %v5255_v47 = vld [vmem:[%s7028_s1 + $0x228] sm:$0xff]  }
  0xae   : > { %3475 = vmatpush2.bf16.msra.mxu1 %v5202_v49 }
  0xaf   : > { %3476 = vmatprep.subr.bf16.mxu1 %v5492_v1 }
  0xb2   : > { %3477 = vmatpush2.bf16.msra.mxu1 %v5215_v50  ;;  %v5207_v50 = vld [vmem:[%s5558_s5 + $0x4d0] ss:$36 sps:$4 sm:$0xff]  }
  0xb3   : > { %3478 = vmatprep.subr.bf16.mxu1 %v5492_v1 }
  0xb4   : > { %2728 = vmatmul.mubr.bf16.gmra.mxu0 %v5121_v51  ;;  %2953 = vmatmul.mubr.bf16.gmra.mxu1 %v5122_v52  ;;  %v5208_v51 = vld [vmem:[%s5558_s5 + $0x58] ss:$36 sps:$4 sm:$0xff]  }
  0xb5   : > { %2735 = vmatprep.mubr.bf16.mxu0 %v5124_v53  ;;  %2960 = vmatprep.mubr.bf16.mxu1 %v5126_v54  ;;  %v5209_v52 = vld [vmem:[%s5558_s5 + $0x51c] ss:$36 sps:$4 sm:$0xff]   ;;  %v5211_v53 = vld [vmem:[%s5558_s5 + $0xa4] ss:$36 sps:$4 sm:$0xff]  }
  0xb6   : > { %3479 = vmatpush2.bf16.msra.mxu1 %v5229_v55  ;;  %v5282_v55 = vld [vmem:[%s7028_s1 + $0x220] sm:$0xff]  }
  0xb7   : > { %3480 = vmatprep.subr.bf16.mxu1 %v5492_v1 }
  0xba   : > { %3481 = vmatpush2.bf16.msra.mxu1 %v5242_v0  ;;  %v5214_v0 = vld [vmem:[%s5558_s5 + $0xa0] ss:$36 sps:$4 sm:$0xff]  }
  0xbb   : > { %3482 = vmatprep.subr.bf16.mxu1 %v5492_v1 }
  0xbc   : > { %2736 = vmatmul.mubr.bf16.gmra.mxu0 %v5128_v56  ;;  %2961 = vmatmul.mubr.bf16.gmra.mxu1 %v5129_v57 }
  0xbd   : > { %2743 = vmatprep.mubr.bf16.mxu0 %v5131_v58  ;;  %2968 = vmatprep.mubr.bf16.mxu1 %v5133_v59 }
  0xbe   : > { %3483 = vmatpush2.bf16.msra.mxu1 %v5256_v10 }
  0xbf   : > { %3484 = vmatprep.subr.bf16.mxu1 %v5492_v1 }
  0xc2   : > { %3485 = vmatpush2.bf16.msra.mxu1 %v5269_v19 }
  0xc3   : > { %3486 = vmatprep.subr.bf16.mxu1 %v5492_v1 }
  0xc4   : > { %2744 = vmatmul.mubr.bf16.gmra.mxu0 %v5135_v60  ;;  %2969 = vmatmul.mubr.bf16.gmra.mxu1 %v5136_v61  ;;  %v5309_v60 = vld [vmem:[%s7028_s1 + $0x218] sm:$0xff]  }
  0xc5   : > { %2751 = vmatprep.mubr.bf16.mxu0 %v5138_v62  ;;  %2976 = vmatprep.mubr.bf16.mxu1 %v5140_v63  ;;  %v5213_v63 = vld [vmem:[%s5558_s5 + $0x518] ss:$36 sps:$4 sm:$0xff]  }
  0xc6   : > { %3487 = vmatpush2.bf16.msra.mxu1 %v5283_v28 }
  0xc7   : > { %3488 = vmatprep.subr.bf16.mxu1 %v5492_v1  ;;  %v5296_v1 = vld [vmem:[%s7028_s1 + $0x1c0] sm:$0xff]  }
  0xca   : > { %3489 = vmatpush2.bf16.msra.mxu1 %v5296_v1  ;;  %v5230_v1 = vld [vmem:[%s5558_s5 + $0x5f0] ss:$36 sps:$4 sm:$0xff]  }
  0xcc   : > { %2752 = vmatmul.mubr.bf16.gmra.mxu0 %v5142_v2  ;;  %2977 = vmatmul.mubr.bf16.gmra.mxu1 %v5143_v3  ;;  %v5216_v2 = vld [vmem:[%s5558_s5 + $0x564] ss:$36 sps:$4 sm:$0xff]   ;;  %v5218_v3 = vld [vmem:[%s5558_s5 + $0xec] ss:$36 sps:$4 sm:$0xff]  }
  0xcd   : > { %2759 = vmatprep.mubr.bf16.mxu0 %v5146_v4  ;;  %2984 = vmatprep.mubr.bf16.mxu1 %v5148_v5 }
  0xd4   : > { %2760 = vmatmul.mubr.bf16.gmra.mxu0 %v5150_v6  ;;  %2985 = vmatmul.mubr.bf16.gmra.mxu1 %v5151_v7 }
  0xd5   : > { %2767 = vmatprep.mubr.bf16.mxu0 %v5152_v8  ;;  %2992 = vmatprep.mubr.bf16.mxu1 %v5154_v9 }
  0xdc   : > { %2768 = vmatmul.mubr.bf16.gmra.mxu0 %v5156_v11  ;;  %2993 = vmatmul.mubr.bf16.gmra.mxu1 %v5157_v12  ;;  %v5220_v12 = vld [vmem:[%s5558_s5 + $0x560] ss:$36 sps:$4 sm:$0xff]  }
  0xdd   : > { %2775 = vmatprep.mubr.bf16.mxu0 %v5160_v13  ;;  %3000 = vmatprep.mubr.bf16.mxu1 %v5162_v14  ;;  %v5221_v13 = vld [vmem:[%s5558_s5 + $0xe8] ss:$36 sps:$4 sm:$0xff]  }
  0xde   : > { %v5224_v14 = vld [vmem:[%s5558_s5 + $0x5ac] ss:$36 sps:$4 sm:$0xff]  }
  0xe4   : > { %2776 = vmatmul.mubr.bf16.gmra.mxu0 %v5164_v15  ;;  %3001 = vmatmul.mubr.bf16.gmra.mxu1 %v5165_v16  ;;  %v5227_v15 = vld [vmem:[%s5558_s5 + $0x134] ss:$36 sps:$4 sm:$0xff]  }
  0xe5   : > { %2783 = vmatprep.mubr.bf16.mxu0 %v5167_v17  ;;  %3008 = vmatprep.mubr.bf16.mxu1 %v5169_v18 }
  0xec   : > { %2784 = vmatmul.mubr.bf16.gmra.mxu0 %v5171_v20  ;;  %3009 = vmatmul.mubr.bf16.gmra.mxu1 %v5172_v21 }
  0xed   : > { %2791 = vmatprep.mubr.bf16.mxu0 %v5174_v22  ;;  %3016 = vmatprep.mubr.bf16.mxu1 %v5176_v23 }
  0xf4   : > { %2792 = vmatmul.mubr.bf16.gmra.mxu0 %v5178_v24  ;;  %3017 = vmatmul.mubr.bf16.gmra.mxu1 %v5179_v25  ;;  %v5222_v24 = vld [vmem:[%s5558_s5 + $0x5a8] ss:$36 sps:$4 sm:$0xff]   ;;  %v5225_v25 = vld [vmem:[%s5558_s5 + $0x130] ss:$36 sps:$4 sm:$0xff]  }
  0xf5   : > { %2799 = vmatprep.mubr.bf16.mxu0 %v5181_v26  ;;  %3024 = vmatprep.mubr.bf16.mxu1 %v5183_v27  ;;  %v5232_v26 = vld [vmem:[%s5558_s5 + $0x5f4] ss:$36 sps:$4 sm:$0xff]   ;;  %v5235_v27 = vld [vmem:[%s5558_s5 + $0x17c] ss:$36 sps:$4 sm:$0xff]  }
  0xfc   : > { %2800 = vmatmul.mubr.bf16.gmra.mxu0 %v5185_v29  ;;  %3025 = vmatmul.mubr.bf16.gmra.mxu1 %v5186_v30 }
  0xfd   : > { %2807 = vmatprep.mubr.bf16.mxu0 %v5189_v31  ;;  %3032 = vmatprep.mubr.bf16.mxu1 %v5191_v33  ;;  %v5334_v33 = vld [vmem:[%s7028_s1 + $0x210] sm:$0xff]  }
 0x104   : > { %2808 = vmatmul.mubr.bf16.gmra.mxu0 %v5193_v34  ;;  %3033 = vmatmul.mubr.bf16.gmra.mxu1 %v5194_v35 }
 0x105   : > { %3040 = vmatprep.mubr.bf16.mxu1 %v5195_v36  ;;  %3201 = vmatprep.mubr.bf16.mxu0 %v5199_v37 }
 0x10c   : > { %v5920_v43 = vpop.f32.mrf.mxu0  ;;  %v5922_v44 = vpop.f32.mrf.mxu1  ;;  %3041 = vmatmul.mubr.bf16.gmra.mxu1 %v5200_v39  ;;  %3202 = vmatmul.mubr.bf16.vlgmr.msra.gmra.mxu0 %v5197_v38  ;;  %v5233_v38 = vld [vmem:[%s5558_s5 + $0x178] ss:$36 sps:$4 sm:$0xff]  }
 0x10d   : > { %4874 = vmatpush3.bf16.msra.mxu0 %v5804_v32  ;;  %3048 = vmatprep.mubr.bf16.mxu1 %v5203_v40  ;;  %v5238_v39 = vld [vmem:[%s5558_s5 + $0x63c] ss:$36 sps:$4 sm:$0xff]   ;;  %v5241_v40 = vld [vmem:[%s5558_s5 + $0x1c4] ss:$36 sps:$4 sm:$0xff]  }
 0x10e   : > { %v2627_v45 = vpop.f32.mrf.mxu0  ;;  %v2819_v46 = vpop.f32.mrf.mxu1  ;;  %3209 = vmatprep.mubr.bf16.mxu0 %v5205_v41  ;;  %4875 = vmatprep.subr.bf16.mxu0 %v5228_v42 }
 0x110   : > { %v5928_v48 = vpop.f32.mrf.mxu0  ;;  %v5930_v49 = vpop.f32.mrf.mxu1 }
 0x111   : > { %4876 = vmatpush3.bf16.msra.mxu0 %v5228_v42 }
 0x112   : > { %v2630_v54 = vpop.f32.mrf.mxu0  ;;  %v2822_v32 = vpop.f32.mrf.mxu1  ;;  %4877 = vmatprep.subr.bf16.mxu0 %v5255_v47 }
 0x113   : > { %v5239_v54 = vld [vmem:[%s5558_s5 + $0x1c0] ss:$36 sps:$4 sm:$0xff]  }
 0x114   : > { %v5939_v56 = vpop.f32.mrf.mxu0  ;;  %v5941_v57 = vpop.f32.mrf.mxu1  ;;  %3049 = vmatmul.mubr.bf16.gmra.mxu1 %v5207_v50  ;;  %3210 = vmatmul.mubr.bf16.gmra.mxu0 %v5208_v51  ;;  %v5245_v32 = vld [vmem:[%s5558_s5 + $0x684] ss:$36 sps:$4 sm:$0xff]  }
 0x115   : > { %3056 = vmatprep.mubr.bf16.mxu1 %v5209_v52  ;;  %3217 = vmatprep.mubr.bf16.mxu0 %v5211_v53  ;;  %v5236_v53 = vld [vmem:[%s5558_s5 + $0x638] ss:$36 sps:$4 sm:$0xff]  }
 0x116   : > { %v2635_v58 = vpop.f32.mrf.mxu0  ;;  %v2827_v59 = vpop.f32.mrf.mxu1  ;;  %4878 = vmatpush3.bf16.msra.mxu0 %v5255_v47 }
 0x117   : > { %4879 = vmatprep.subr.bf16.mxu0 %v5282_v55 }
 0x118   : > { %v5946_v61 = vpop.f32.mrf.mxu0  ;;  %v5948_v62 = vpop.f32.mrf.mxu1 }
 0x11a   : > { %v2638_v4 = vpop.f32.mrf.mxu0  ;;  %v2830_v5 = vpop.f32.mrf.mxu1  ;;  %4880 = vmatpush3.bf16.msra.mxu0 %v5282_v55  ;;  %v5248_v55 = vld [vmem:[%s5558_s5 + $0x20c] ss:$36 sps:$4 sm:$0xff]  }
 0x11b   : > { %4881 = vmatprep.subr.bf16.mxu0 %v5309_v60  ;;  %v5243_v5 = vld [vmem:[%s5558_s5 + $0x680] ss:$36 sps:$4 sm:$0xff]  }
 0x11c   : > { %v5954_v6 = vpop.f32.mrf.mxu0  ;;  %v5956_v7 = vpop.f32.mrf.mxu1  ;;  %3057 = vmatmul.mubr.bf16.gmra.mxu1 %v5213_v63  ;;  %3218 = vmatmul.mubr.bf16.gmra.mxu0 %v5214_v0 }
 0x11d   : > { %3064 = vmatprep.mubr.bf16.mxu1 %v5216_v2  ;;  %3225 = vmatprep.mubr.bf16.mxu0 %v5218_v3 }
 0x11e   : > { %v2643_v8 = vpop.f32.mrf.mxu0  ;;  %v2835_v9 = vpop.f32.mrf.mxu1  ;;  %4882 = vmatpush3.bf16.msra.mxu0 %v5309_v60 }
 0x11f   : > { %4883 = vmatprep.subr.bf16.mxu0 %v5334_v33  ;;  %v5246_v8 = vld [vmem:[%s5558_s5 + $0x208] ss:$36 sps:$4 sm:$0xff]  }
 0x120   : > { %v5958_v10 = vpop.f32.mrf.mxu0  ;;  %v5960_v11 = vpop.f32.mrf.mxu1  ;;  %v5251_v9 = vld [vmem:[%s5558_s5 + $0x6cc] ss:$36 sps:$4 sm:$0xff]  }
 0x122   : > { %v2646_v16 = vpop.f32.mrf.mxu0  ;;  %v2838_v17 = vpop.f32.mrf.mxu1  ;;  %4884 = vmatpush3.bf16.msra.mxu0 %v5334_v33 }
 0x124   : > { %v5966_v18 = vpop.f32.mrf.mxu0  ;;  %v5968_v19 = vpop.f32.mrf.mxu1  ;;  %3065 = vmatmul.mubr.bf16.gmra.mxu1 %v5220_v12  ;;  %3226 = vmatmul.mubr.bf16.gmra.mxu0 %v5221_v13  ;;  %v5254_v12 = vld [vmem:[%s5558_s5 + $0x254] ss:$36 sps:$4 sm:$0xff]  }
 0x125   : > { %3072 = vmatprep.mubr.bf16.mxu1 %v5224_v14  ;;  %3233 = vmatprep.mubr.bf16.mxu0 %v5227_v15 }
 0x126   : > { %v2651_v20 = vpop.f32.mrf.mxu0  ;;  %v2843_v21 = vpop.f32.mrf.mxu1 }
 0x127   : > { %v6024_v21 = vld [vmem:[%s7029_s2] ss:$0 sm:$0xff] }
 0x128   : > { %v5970_v22 = vpop.f32.mrf.mxu0  ;;  %v5972_v23 = vpop.f32.mrf.mxu1 }
 0x129   : > { %7032 = vst [vmem:[#allocation2_spill] sm:$0xff] %v5972_v23  ;;  %v5346_v23 = vld [vmem:[%s5558_s5 + $0x1cc] ss:$36 sps:$4 sm:$0xff]  }
 0x12a   : > { %v2654_v28 = vpop.f32.mrf.mxu0  ;;  %v2846_v29 = vpop.f32.mrf.mxu1 }
 0x12b   : > { %v5259_v28 = vld [vmem:[%s5558_s5 + $0x714] ss:$36 sps:$4 sm:$0xff]   ;;  %v5262_v29 = vld [vmem:[%s5558_s5 + $0x29c] ss:$36 sps:$4 sm:$0xff]  }
 0x12c   : > { %v5978_v30 = vpop.f32.mrf.mxu0  ;;  %v5980_v31 = vpop.f32.mrf.mxu1  ;;  %3073 = vmatmul.mubr.bf16.gmra.mxu1 %v5222_v24  ;;  %3234 = vmatmul.mubr.bf16.gmra.mxu0 %v5225_v25 }
 0x12d   : > { %7033 = vst [vmem:[#allocation3_spill] sm:$0xff] %v5980_v31  ;;  %3080 = vmatprep.mubr.bf16.mxu1 %v5232_v26  ;;  %3241 = vmatprep.mubr.bf16.mxu0 %v5235_v27  ;;  %v5249_v26 = vld [vmem:[%s5558_s5 + $0x6c8] ss:$36 sps:$4 sm:$0xff]   ;;  %v5252_v27 = vld [vmem:[%s5558_s5 + $0x250] ss:$36 sps:$4 sm:$0xff]  }
 0x12e   : > { %v2659_v34 = vpop.f32.mrf.mxu0  ;;  %v2851_v35 = vpop.f32.mrf.mxu1  ;;  %v5340_v31 = vld [vmem:[%s5558_s5 + $0x184] ss:$36 sps:$4 sm:$0xff]  }
 0x12f   : > { %v2626_v35 = vadd.f32 %v6024_v21, %v5920_v43  ;;  %v2629_v43 = vadd.f32 %v6024_v21, %v5928_v48 }
 0x130   : > { %v5985_v36 = vpop.f32.mrf.mxu0  ;;  %v5987_v37 = vpop.f32.mrf.mxu1 }
 0x131   : > { %7034 = vst [vmem:[#allocation4_spill] sm:$0xff] %v5987_v37  ;;  %v5337_v37 = vld [vmem:[%s5558_s5 + $0x5fc] ss:$36 sps:$4 sm:$0xff]  }
 0x132   : > { %v2662_v41 = vpop.f32.mrf.mxu0  ;;  %v2854_v42 = vpop.f32.mrf.mxu1 }
 0x134   : > { %v5993_v45 = vpop.f32.mrf.mxu0  ;;  %v5995_v46 = vpop.f32.mrf.mxu1  ;;  %3081 = vmatmul.mubr.bf16.gmra.mxu1 %v5230_v1  ;;  %3242 = vmatmul.mubr.bf16.gmra.mxu0 %v5233_v38 }
 0x135   : > { %7035 = vst [vmem:[#allocation5_spill] sm:$0xff] %v5995_v46  ;;  %3088 = vmatprep.mubr.bf16.mxu1 %v5238_v39  ;;  %3249 = vmatprep.mubr.bf16.mxu0 %v5241_v40  ;;  %v5359_v40 = vld [vmem:[%s7028_s1 + $0x208] sm:$0xff]   ;;  %v5333_v46 = vld [vmem:[%s5558_s5 + $0x13c] ss:$36 sps:$4 sm:$0xff]  }
 0x136   : > { %v2667_v47 = vpop.f32.mrf.mxu0  ;;  %v2859_v50 = vpop.f32.mrf.mxu1  ;;  %4885 = vmatprep.subr.bf16.mxu0 %v5359_v40 }
 0x137   : > { %4886 = vmatpush3.bf16.msra.mxu0 %v5359_v40 }
 0x138   : > { %v5997_v51 = vpop.f32.mrf.mxu0  ;;  %v5999_v52 = vpop.f32.mrf.mxu1 }
 0x139   : > { %7036 = vst [vmem:[#allocation6_spill] sm:$0xff] %v5999_v52  ;;  %v5330_v52 = vld [vmem:[%s5558_s5 + $0x5b4] ss:$36 sps:$4 sm:$0xff]  }
 0x13a   : > { %v2670_v58 = vpop.f32.mrf.mxu0  ;;  %v2862_v59 = vpop.f32.mrf.mxu1 }
 0x13b   : > { %v5268_v58 = vld [vmem:[%s5558_s5 + $0x2e4] ss:$36 sps:$4 sm:$0xff]  }
 0x13c   : > { %v6005_v60 = vpop.f32.mrf.mxu0  ;;  %v6007_v63 = vpop.f32.mrf.mxu1  ;;  %3089 = vmatmul.mubr.bf16.gmra.mxu1 %v5236_v53  ;;  %3250 = vmatmul.mubr.bf16.gmra.mxu0 %v5239_v54  ;;  %v5257_v53 = vld [vmem:[%s5558_s5 + $0x710] ss:$36 sps:$4 sm:$0xff]   ;;  %v5260_v54 = vld [vmem:[%s5558_s5 + $0x298] ss:$36 sps:$4 sm:$0xff]  }
 0x13d   : > { %7037 = vst [vmem:[#allocation7_spill] sm:$0xff] %v6007_v63  ;;  %3096 = vmatprep.mubr.bf16.mxu1 %v5245_v32  ;;  %3257 = vmatprep.mubr.bf16.mxu0 %v5248_v55  ;;  %v5265_v55 = vld [vmem:[%s5558_s5 + $0x75c] ss:$36 sps:$4 sm:$0xff]   ;;  %v5327_v63 = vld [vmem:[%s5558_s5 + $0xf4] ss:$36 sps:$4 sm:$0xff]  }
 0x13e   : > { %v2675_v0 = vpop.f32.mrf.mxu0  ;;  %v2867_v2 = vpop.f32.mrf.mxu1 }
 0x13f   : > { %v2634_v2 = vadd.f32 %v6024_v21, %v5939_v56  ;;  %v5263_v56 = vld [vmem:[%s5558_s5 + $0x758] ss:$36 sps:$4 sm:$0xff]  }
 0x140   : > { %v6009_v3 = vpop.f32.mrf.mxu0  ;;  %v6011_v4 = vpop.f32.mrf.mxu1 }
 0x141   : > { %7038 = vst [vmem:[#allocation8_spill] sm:$0xff] %v6011_v4  ;;  %v5324_v4 = vld [vmem:[%s5558_s5 + $0x56c] ss:$36 sps:$4 sm:$0xff]  }
 0x142   : > { %v2678_v13 = vpop.f32.mrf.mxu0  ;;  %v2870_v14 = vpop.f32.mrf.mxu1 }
 0x143   : > { %v2637_v13 = vadd.f32 %v6024_v21, %v5946_v61 }
 0x144   : > { %v6017_v15 = vpop.f32.mrf.mxu0  ;;  %v6019_v16 = vpop.f32.mrf.mxu1  ;;  %3097 = vmatmul.mubr.bf16.gmra.mxu1 %v5243_v5  ;;  %3258 = vmatmul.mubr.bf16.gmra.mxu0 %v5246_v8 }
 0x145   : > { %7039 = vst [vmem:[#allocation9_spill] sm:$0xff] %v6019_v16  ;;  %3104 = vmatprep.mubr.bf16.mxu1 %v5251_v9  ;;  %3265 = vmatprep.mubr.bf16.mxu0 %v5254_v12  ;;  %v5321_v16 = vld [vmem:[%s5558_s5 + $0xac] ss:$36 sps:$4 sm:$0xff]  }
 0x146   : > { %v2683_v17 = vpop.f32.mrf.mxu0  ;;  %v2875_v20 = vpop.f32.mrf.mxu1 }
 0x147   : > { %v5266_v20 = vld [vmem:[%s5558_s5 + $0x2e0] ss:$36 sps:$4 sm:$0xff]  }
 0x148   : > { %v6026_v24 = vpop.f32.mrf.mxu0  ;;  %v6028_v25 = vpop.f32.mrf.mxu1 }
 0x149   : > { %7040 = vst [vmem:[#allocation10_spill] sm:$0xff] %v6028_v25  ;;  %v5318_v25 = vld [vmem:[%s5558_s5 + $0x524] ss:$36 sps:$4 sm:$0xff]  }
 0x14a   : > { %v2686_v33 = vpop.f32.mrf.mxu0  ;;  %v2878_v34 = vpop.f32.mrf.mxu1 }
 0x14b   : > { %v2642_v34 = vadd.f32 %v6024_v21, %v5954_v6  ;;  %v5270_v6 = vld [vmem:[%s5558_s5 + $0x7a0] ss:$36 sps:$4 sm:$0xff]  }
 0x14c   : > { %v6036_v1 = vpop.f32.mrf.mxu0  ;;  %v2914_v38 = vpop.f32.mrf.mxu1  ;;  %3105 = vmatmul.mubr.bf16.gmra.mxu1 %v5249_v26  ;;  %3266 = vmatmul.mubr.bf16.gmra.mxu0 %v5252_v27  ;;  %v5272_v27 = vld [vmem:[%s5558_s5 + $0x7a4] ss:$36 sps:$4 sm:$0xff]  }
 0x14d   : > { %v6038_v39 = vadd.f32 %v2914_v38, %v2626_v35  ;;  %3112 = vmatprep.mubr.bf16.mxu1 %v5259_v28  ;;  %3273 = vmatprep.mubr.bf16.mxu0 %v5262_v29  ;;  %v5275_v28 = vld [vmem:[%s5558_s5 + $0x32c] ss:$36 sps:$4 sm:$0xff]  }
 0x14e   : > { %v2691_v41 = vpop.f32.mrf.mxu0  ;;  %v2916_v42 = vpop.f32.mrf.mxu1 }
 0x14f   : > { %v2645_v42 = vadd.f32 %v6024_v21, %v5958_v10 }
 0x150   : > { %v6045_v47 = vpop.f32.mrf.mxu0  ;;  %v2917_v50 = vpop.f32.mrf.mxu1 }
 0x151   : > { %v6049_v32 = vadd.f32 %v2917_v50, %v2629_v43 }
 0x152   : > { %v2694_v59 = vpop.f32.mrf.mxu0  ;;  %v2919_v0 = vpop.f32.mrf.mxu1 }
 0x154   : > { %v6055_v48 = vpop.f32.mrf.mxu0  ;;  %v2922_v5 = vpop.f32.mrf.mxu1  ;;  %3113 = vmatmul.mubr.bf16.gmra.mxu1 %v5257_v53  ;;  %3274 = vmatmul.mubr.bf16.gmra.mxu0 %v5260_v54  ;;  %v5273_v53 = vld [vmem:[%s5558_s5 + $0x328] ss:$36 sps:$4 sm:$0xff]  }
 0x155   : > { %v6057_v8 = vadd.f32 %v2922_v5, %v2634_v2  ;;  %3120 = vmatprep.mubr.bf16.mxu1 %v5265_v55  ;;  %3281 = vmatprep.mubr.bf16.mxu0 %v5268_v58  ;;  %v5278_v55 = vld [vmem:[%s5558_s5 + $0x7ec] ss:$36 sps:$4 sm:$0xff]   ;;  %v5281_v58 = vld [vmem:[%s5558_s5 + $0x374] ss:$36 sps:$4 sm:$0xff]   ;;  %v2650_v2 = vadd.f32 %v6024_v21, %v5966_v18 }
 0x156   : > { %v2699_v9 = vpop.f32.mrf.mxu0  ;;  %v2924_v12 = vpop.f32.mrf.mxu1  ;;  %v5276_v18 = vld [vmem:[%s5558_s5 + $0x7e8] ss:$36 sps:$4 sm:$0xff]  }
 0x158   : > { %v6061_v14 = vpop.f32.mrf.mxu0  ;;  %v2925_v17 = vpop.f32.mrf.mxu1 }
 0x159   : > { %v6065_v26 = vadd.f32 %v2925_v17, %v2637_v13  ;;  %v2653_v17 = vadd.f32 %v6024_v21, %v5970_v22 }
 0x15a   : > { %v2702_v29 = vpop.f32.mrf.mxu0  ;;  %v2927_v33 = vpop.f32.mrf.mxu1 }
 0x15b   : > { %v5286_v29 = vld [vmem:[%s5558_s5 + $0x834] ss:$36 sps:$4 sm:$0xff]   ;;  %v5289_v33 = vld [vmem:[%s5558_s5 + $0x3bc] ss:$36 sps:$4 sm:$0xff]  }
 0x15c   : > { %v6071_v35 = vpop.f32.mrf.mxu0  ;;  %v2930_v61 = vpop.f32.mrf.mxu1  ;;  %3121 = vmatmul.mubr.bf16.gmra.mxu1 %v5263_v56  ;;  %3282 = vmatmul.mubr.bf16.gmra.mxu0 %v5266_v20 }
 0x15d   : > { %v6073_v38 = vadd.f32 %v2930_v61, %v2642_v34  ;;  %3128 = vmatprep.mubr.bf16.mxu1 %v5272_v27  ;;  %3289 = vmatprep.mubr.bf16.mxu0 %v5275_v28  ;;  %v5279_v27 = vld [vmem:[%s5558_s5 + $0x370] ss:$36 sps:$4 sm:$0xff]  }
 0x15e   : > { %v2707_v40 = vpop.f32.mrf.mxu0  ;;  %v2932_v41 = vpop.f32.mrf.mxu1 }
 0x15f   : > { %v2658_v40 = vadd.f32 %v6024_v21, %v5978_v30  ;;  %v2661_v30 = vadd.f32 %v6024_v21, %v5985_v36 }
 0x160   : > { %v6077_v43 = vpop.f32.mrf.mxu0  ;;  %v2933_v50 = vpop.f32.mrf.mxu1 }
 0x161   : > { %v6081_v54 = vadd.f32 %v2933_v50, %v2645_v42  ;;  %v5384_v50 = vld [vmem:[%s7028_s1 + $0x200] sm:$0xff]  }
 0x162   : > { %v2710_v59 = vpop.f32.mrf.mxu0  ;;  %v2935_v0 = vpop.f32.mrf.mxu1  ;;  %4887 = vmatprep.subr.bf16.mxu0 %v5384_v50 }
 0x163   : > { %v5284_v59 = vld [vmem:[%s5558_s5 + $0x830] ss:$36 sps:$4 sm:$0xff]   ;;  %v5287_v0 = vld [vmem:[%s5558_s5 + $0x3b8] ss:$36 sps:$4 sm:$0xff]   ;;  %4888 = vmatpush3.bf16.msra.mxu0 %v5384_v50 }
 0x164   : > { %v6087_v5 = vpop.f32.mrf.mxu0  ;;  %v2938_v10 = vpop.f32.mrf.mxu1  ;;  %3129 = vmatmul.mubr.bf16.gmra.mxu1 %v5270_v6  ;;  %3290 = vmatmul.mubr.bf16.gmra.mxu0 %v5273_v53 }
 0x165   : > { %v6089_v9 = vadd.f32 %v2938_v10, %v2650_v2  ;;  %3136 = vmatprep.mubr.bf16.mxu1 %v5278_v55  ;;  %3297 = vmatprep.mubr.bf16.mxu0 %v5281_v58  ;;  %v5292_v10 = vld [vmem:[%s5558_s5 + $0x87c] ss:$36 sps:$4 sm:$0xff]  }
 0x166   : > { %v2715_v12 = vpop.f32.mrf.mxu0  ;;  %v2940_v13 = vpop.f32.mrf.mxu1 }
 0x167   : > { %v5295_v12 = vld [vmem:[%s5558_s5 + $0x404] ss:$36 sps:$4 sm:$0xff]  }
 0x168   : > { %v6093_v56 = vpop.f32.mrf.mxu0  ;;  %v2941_v20 = vpop.f32.mrf.mxu1 }
 0x169   : > { %v6097_v28 = vadd.f32 %v2941_v20, %v2653_v17  ;;  %v2666_v20 = vadd.f32 %v6024_v21, %v5993_v45  ;;  %v5290_v45 = vld [vmem:[%s5558_s5 + $0x878] ss:$36 sps:$4 sm:$0xff]  }
 0x16a   : > { %v2718_v34 = vpop.f32.mrf.mxu0  ;;  %v2943_v61 = vpop.f32.mrf.mxu1 }
 0x16b   : > { %v2669_v34 = vadd.f32 %v6024_v21, %v5997_v51 }
 0x16c   : > { %v6103_v41 = vpop.f32.mrf.mxu0  ;;  %v2946_v42 = vpop.f32.mrf.mxu1  ;;  %3137 = vmatmul.mubr.bf16.gmra.mxu1 %v5276_v18  ;;  %3298 = vmatmul.mubr.bf16.gmra.mxu0 %v5279_v27 }
 0x16d   : > { %v6105_v22 = vadd.f32 %v2946_v42, %v2658_v40  ;;  %3144 = vmatprep.mubr.bf16.mxu1 %v5286_v29  ;;  %3305 = vmatprep.mubr.bf16.mxu0 %v5289_v33  ;;  %v5293_v42 = vld [vmem:[%s5558_s5 + $0x400] ss:$36 sps:$4 sm:$0xff]  }
 0x16e   : > { %v2723_v6 = vpop.f32.mrf.mxu0  ;;  %v2948_v53 = vpop.f32.mrf.mxu1 }
 0x16f   : > { %v5299_v6 = vld [vmem:[%s5558_s5 + $0x8c4] ss:$36 sps:$4 sm:$0xff]   ;;  %v5302_v53 = vld [vmem:[%s5558_s5 + $0x44c] ss:$36 sps:$4 sm:$0xff]  }
 0x170   : > { %v6112_v55 = vpop.f32.mrf.mxu0  ;;  %v2949_v58 = vpop.f32.mrf.mxu1 }
 0x171   : > { %v6116_v2 = vadd.f32 %v2949_v58, %v2661_v30 }
 0x172   : > { %v2726_v13 = vpop.f32.mrf.mxu0  ;;  %v2951_v17 = vpop.f32.mrf.mxu1 }
 0x173   : > { %v2677_v17 = vadd.f32 %v6024_v21, %v6009_v3 }
 0x174   : > { %v6122_v36 = vpop.f32.mrf.mxu0  ;;  %v2954_v18 = vpop.f32.mrf.mxu1  ;;  %3145 = vmatmul.mubr.bf16.gmra.mxu1 %v5284_v59  ;;  %3306 = vmatmul.mubr.bf16.gmra.mxu0 %v5287_v0  ;;  %v2674_v59 = vadd.f32 %v6024_v21, %v6005_v60  ;;  %v5297_v60 = vld [vmem:[%s5558_s5 + $0x8c0] ss:$36 sps:$4 sm:$0xff]  }
 0x175   : > { %v6124_v27 = vadd.f32 %v2954_v18, %v2666_v20  ;;  %3152 = vmatprep.mubr.bf16.mxu1 %v5292_v10  ;;  %3313 = vmatprep.mubr.bf16.mxu0 %v5295_v12 }
 0x176   : > { %v2731_v29 = vpop.f32.mrf.mxu0  ;;  %v2956_v33 = vpop.f32.mrf.mxu1 }
 0x177   : > { %v5300_v29 = vld [vmem:[%s5558_s5 + $0x448] ss:$36 sps:$4 sm:$0xff]  }
 0x178   : > { %v6128_v61 = vpop.f32.mrf.mxu0  ;;  %v2957_v40 = vpop.f32.mrf.mxu1 }
 0x179   : > { %v6132_v50 = vadd.f32 %v2957_v40, %v2669_v34  ;;  %v5305_v34 = vld [vmem:[%s5558_s5 + $0x494] ss:$36 sps:$4 sm:$0xff]   ;;  %v5308_v40 = vld [vmem:[%s5558_s5 + $0x1c] ss:$36 sps:$4 sm:$0xff]  }
 0x17a   : > { %v2734_v30 = vpop.f32.mrf.mxu0  ;;  %v2959_v58 = vpop.f32.mrf.mxu1 }
 0x17c   : > { %v6138_v0 = vpop.f32.mrf.mxu0  ;;  %v2962_v51 = vpop.f32.mrf.mxu1  ;;  %3153 = vmatmul.mubr.bf16.gmra.mxu1 %v5290_v45  ;;  %3314 = vmatmul.mubr.bf16.gmra.mxu0 %v5293_v42 }
 0x17d   : > { %v6140_v10 = vadd.f32 %v2962_v51, %v2674_v59  ;;  %3160 = vmatprep.mubr.bf16.mxu1 %v5299_v6  ;;  %3321 = vmatprep.mubr.bf16.mxu0 %v5302_v53  ;;  %v2682_v6 = vadd.f32 %v6024_v21, %v6017_v15  ;;  %v2685_v51 = vadd.f32 %v6024_v21, %v6026_v24  ;;  %v5303_v15 = vld [vmem:[%s5558_s5 + $0x490] ss:$36 sps:$4 sm:$0xff]  }
 0x17e   : > { %v2739_v12 = vpop.f32.mrf.mxu0  ;;  %v2964_v13 = vpop.f32.mrf.mxu1 }
 0x180   : > { %v6144_v20 = vpop.f32.mrf.mxu0  ;;  %v2965_v18 = vpop.f32.mrf.mxu1 }
 0x181   : > { %v6148_v33 = vadd.f32 %v2965_v18, %v2677_v17  ;;  %v5306_v17 = vld [vmem:[%s5558_s5 + $0x18] ss:$36 sps:$4 sm:$0xff]  }
 0x182   : > { %v2742_v45 = vpop.f32.mrf.mxu0  ;;  %v2967_v42 = vpop.f32.mrf.mxu1 }
 0x183   : > { %v5312_v45 = vld [vmem:[%s5558_s5 + $0x4dc] ss:$36 sps:$4 sm:$0xff]   ;;  %v5315_v42 = vld [vmem:[%s5558_s5 + $0x64] ss:$36 sps:$4 sm:$0xff]  }
 0x184   : > { %v6154_v53 = vpop.f32.mrf.mxu0  ;;  %v2970_v3 = vpop.f32.mrf.mxu1  ;;  %3161 = vmatmul.mubr.bf16.gmra.mxu1 %v5297_v60  ;;  %3322 = vmatmul.mubr.bf16.gmra.mxu0 %v5300_v29 }
 0x185   : > { %v6156_v30 = vadd.f32 %v2970_v3, %v2682_v6  ;;  %3329 = vmatprep.mubr.bf16.mxu0 %v5305_v34  ;;  %3490 = vmatprep.mubr.bf16.mxu1 %v5308_v40  ;;  %v2690_v34 = vadd.f32 %v6024_v21, %v6036_v1  ;;  %v5310_v1 = vld [vmem:[%s5558_s5 + $0x4d8] ss:$36 sps:$4 sm:$0xff]  }
 0x186   : > { %v2747_v58 = vpop.f32.mrf.mxu0  ;;  %v2972_v59 = vpop.f32.mrf.mxu1 }
 0x187   : > { %v2693_v59 = vadd.f32 %v6024_v21, %v6045_v47 }
 0x188   : > { %v6160_v12 = vpop.f32.mrf.mxu0  ;;  %v2973_v13 = vpop.f32.mrf.mxu1 }
 0x189   : > { %v6164_v18 = vadd.f32 %v2973_v13, %v2685_v51 }
 0x18a   : > { %v2750_v60 = vpop.f32.mrf.mxu0  ;;  %v2975_v29 = vpop.f32.mrf.mxu1 }
 0x18b   : > { %v5313_v60 = vld [vmem:[%s5558_s5 + $0x60] ss:$36 sps:$4 sm:$0xff]  }
 0x18c   : > { %v6170_v40 = vpop.f32.mrf.mxu0  ;;  %v2978_v24 = vpop.f32.mrf.mxu1  ;;  %3330 = vmatmul.mubr.bf16.gmra.mxu0 %v5303_v15  ;;  %3491 = vmatmul.mubr.bf16.vlgmr.msra.gmra.mxu1 %v5306_v17 }
 0x18d   : > { %v6172_v6 = vadd.f32 %v2978_v24, %v2690_v34  ;;  %3337 = vmatprep.mubr.bf16.mxu0 %v5312_v45  ;;  %3498 = vmatprep.mubr.bf16.mxu1 %v5315_v42  ;;  %v2698_v45 = vadd.f32 %v6024_v21, %v6055_v48  ;;  %v5316_v48 = vld [vmem:[%s5558_s5 + $0x520] ss:$36 sps:$4 sm:$0xff]  }
 0x18e   : > { %v2755_v3 = vpop.f32.mrf.mxu0  ;;  %v2980_v58 = vpop.f32.mrf.mxu1 }
 0x18f   : > { %v2701_v58 = vadd.f32 %v6024_v21, %v6061_v14 }
 0x190   : > { %v6176_v51 = vpop.f32.mrf.mxu0  ;;  %v2981_v13 = vpop.f32.mrf.mxu1 }
 0x191   : > { %v6180_v29 = vadd.f32 %v2981_v13, %v2693_v59 }
 0x192   : > { %v2758_v15 = vpop.f32.mrf.mxu0  ;;  %v2983_v17 = vpop.f32.mrf.mxu1 }
 0x193   : > { %v5319_v15 = vld [vmem:[%s5558_s5 + $0xa8] ss:$36 sps:$4 sm:$0xff]  }
 0x194   : > { %v6186_v42 = vpop.f32.mrf.mxu0  ;;  %v2986_v47 = vpop.f32.mrf.mxu1  ;;  %3338 = vmatmul.mubr.bf16.gmra.mxu0 %v5310_v1  ;;  %3499 = vmatmul.mubr.bf16.gmra.mxu1 %v5313_v60 }
 0x195   : > { %v6188_v34 = vadd.f32 %v2986_v47, %v2698_v45  ;;  %3345 = vmatprep.mubr.bf16.mxu0 %v5318_v25  ;;  %3506 = vmatprep.mubr.bf16.mxu1 %v5321_v16  ;;  %v2706_v16 = vadd.f32 %v6024_v21, %v6071_v35  ;;  %v5322_v35 = vld [vmem:[%s5558_s5 + $0x568] ss:$36 sps:$4 sm:$0xff]  }
 0x196   : > { %v2763_v24 = vpop.f32.mrf.mxu0  ;;  %v2988_v3 = vpop.f32.mrf.mxu1 }
 0x197   : > { %v2709_v3 = vadd.f32 %v6024_v21, %v6077_v43 }
 0x198   : > { %v6192_v59 = vpop.f32.mrf.mxu0  ;;  %v2989_v13 = vpop.f32.mrf.mxu1 }
 0x199   : > { %v6196_v17 = vadd.f32 %v2989_v13, %v2701_v58 }
 0x19a   : > { %v2766_v1 = vpop.f32.mrf.mxu0  ;;  %v2991_v60 = vpop.f32.mrf.mxu1 }
 0x19b   : > { %v5325_v1 = vld [vmem:[%s5558_s5 + $0xf0] ss:$36 sps:$4 sm:$0xff]  }
 0x19c   : > { %v6202_v25 = vpop.f32.mrf.mxu0  ;;  %v2994_v14 = vpop.f32.mrf.mxu1  ;;  %3346 = vmatmul.mubr.bf16.gmra.mxu0 %v5316_v48  ;;  %3507 = vmatmul.mubr.bf16.gmra.mxu1 %v5319_v15 }
 0x19d   : > { %v6204_v45 = vadd.f32 %v2994_v14, %v2706_v16  ;;  %3353 = vmatprep.mubr.bf16.mxu0 %v5324_v4  ;;  %3514 = vmatprep.mubr.bf16.mxu1 %v5327_v63  ;;  %v2714_v63 = vadd.f32 %v6024_v21, %v6087_v5  ;;  %v5328_v5 = vld [vmem:[%s5558_s5 + $0x5b0] ss:$36 sps:$4 sm:$0xff]  }
 0x19e   : > { %v2771_v47 = vpop.f32.mrf.mxu0  ;;  %v2996_v24 = vpop.f32.mrf.mxu1 }
 0x19f   : > { %v2717_v24 = vadd.f32 %v6024_v21, %v6093_v56 }
 0x1a0   : > { %v6208_v58 = vpop.f32.mrf.mxu0  ;;  %v2997_v13 = vpop.f32.mrf.mxu1 }
 0x1a1   : > { %v6212_v60 = vadd.f32 %v2997_v13, %v2709_v3 }
 0x1a2   : > { %v2774_v48 = vpop.f32.mrf.mxu0  ;;  %v2999_v15 = vpop.f32.mrf.mxu1 }
 0x1a3   : > { %v5331_v48 = vld [vmem:[%s5558_s5 + $0x138] ss:$36 sps:$4 sm:$0xff]  }
 0x1a4   : > { %v6218_v4 = vpop.f32.mrf.mxu0  ;;  %v3002_v43 = vpop.f32.mrf.mxu1  ;;  %3354 = vmatmul.mubr.bf16.gmra.mxu0 %v5322_v35  ;;  %3515 = vmatmul.mubr.bf16.gmra.mxu1 %v5325_v1 }
 0x1a5   : > { %v6220_v16 = vadd.f32 %v3002_v43, %v2714_v63  ;;  %3361 = vmatprep.mubr.bf16.mxu0 %v5330_v52  ;;  %3522 = vmatprep.mubr.bf16.mxu1 %v5333_v46  ;;  %v2722_v46 = vadd.f32 %v6024_v21, %v6103_v41  ;;  %v5335_v41 = vld [vmem:[%s5558_s5 + $0x5f8] ss:$36 sps:$4 sm:$0xff]  }
 0x1a6   : > { %v2779_v14 = vpop.f32.mrf.mxu0  ;;  %v3004_v47 = vpop.f32.mrf.mxu1 }
 0x1a7   : > { %v2725_v47 = vadd.f32 %v6024_v21, %v6112_v55 }
 0x1a8   : > { %v6224_v3 = vpop.f32.mrf.mxu0  ;;  %v3005_v13 = vpop.f32.mrf.mxu1 }
 0x1a9   : > { %v6228_v15 = vadd.f32 %v3005_v13, %v2717_v24 }
 0x1aa   : > { %v2782_v35 = vpop.f32.mrf.mxu0  ;;  %v3007_v1 = vpop.f32.mrf.mxu1 }
 0x1ab   : > { %7041 = vst [vmem:[#allocation11_spill] sm:$0xff] %v6228_v15  ;;  %v5338_v35 = vld [vmem:[%s5558_s5 + $0x180] ss:$36 sps:$4 sm:$0xff]  }
 0x1ac   : > { %v6234_v52 = vpop.f32.mrf.mxu0  ;;  %v3010_v56 = vpop.f32.mrf.mxu1  ;;  %3362 = vmatmul.mubr.bf16.gmra.mxu0 %v5328_v5  ;;  %3523 = vmatmul.mubr.bf16.gmra.mxu1 %v5331_v48  ;;  %v5343_v15 = vld [vmem:[%s5558_s5 + $0x644] ss:$36 sps:$4 sm:$0xff]  }
 0x1ad   : > { %v6236_v63 = vadd.f32 %v3010_v56, %v2722_v46  ;;  %3369 = vmatprep.mubr.bf16.mxu0 %v5337_v37  ;;  %3530 = vmatprep.mubr.bf16.mxu1 %v5340_v31  ;;  %v2730_v31 = vadd.f32 %v6024_v21, %v6122_v36  ;;  %v5341_v36 = vld [vmem:[%s5558_s5 + $0x640] ss:$36 sps:$4 sm:$0xff]  }
 0x1ae   : > { %v2787_v43 = vpop.f32.mrf.mxu0  ;;  %v3012_v14 = vpop.f32.mrf.mxu1 }
 0x1af   : > { %7042 = vst [vmem:[#allocation12_spill] sm:$0xff] %v6236_v63  ;;  %v2733_v14 = vadd.f32 %v6024_v21, %v6128_v61  ;;  %v5352_v63 = vld [vmem:[%s5558_s5 + $0x214] ss:$36 sps:$4 sm:$0xff]  }
 0x1b0   : > { %v6240_v24 = vpop.f32.mrf.mxu0  ;;  %v3013_v13 = vpop.f32.mrf.mxu1 }
 0x1b1   : > { %v6244_v1 = vadd.f32 %v3013_v13, %v2725_v47 }
 0x1b2   : > { %v2790_v5 = vpop.f32.mrf.mxu0  ;;  %v3015_v48 = vpop.f32.mrf.mxu1 }
 0x1b3   : > { %7043 = vst [vmem:[#allocation13_spill] sm:$0xff] %v6244_v1  ;;  %v5344_v5 = vld [vmem:[%s5558_s5 + $0x1c8] ss:$36 sps:$4 sm:$0xff]  }
 0x1b4   : > { %v6250_v37 = vpop.f32.mrf.mxu0  ;;  %v3018_v55 = vpop.f32.mrf.mxu1  ;;  %3370 = vmatmul.mubr.bf16.gmra.mxu0 %v5335_v41  ;;  %3531 = vmatmul.mubr.bf16.gmra.mxu1 %v5338_v35  ;;  %v5349_v1 = vld [vmem:[%s5558_s5 + $0x68c] ss:$36 sps:$4 sm:$0xff]  }
 0x1b5   : > { %v6252_v46 = vadd.f32 %v3018_v55, %v2730_v31  ;;  %3377 = vmatprep.mubr.bf16.mxu0 %v5343_v15  ;;  %3538 = vmatprep.mubr.bf16.mxu1 %v5346_v23  ;;  %v2738_v23 = vadd.f32 %v6024_v21, %v6138_v0  ;;  %v5347_v0 = vld [vmem:[%s5558_s5 + $0x688] ss:$36 sps:$4 sm:$0xff]  }
 0x1b6   : > { %v2795_v56 = vpop.f32.mrf.mxu0  ;;  %v3020_v43 = vpop.f32.mrf.mxu1 }
 0x1b7   : > { %7044 = vst [vmem:[#allocation14_spill] sm:$0xff] %v6252_v46  ;;  %v2741_v43 = vadd.f32 %v6024_v21, %v6144_v20  ;;  %v5358_v46 = vld [vmem:[%s5558_s5 + $0x25c] ss:$36 sps:$4 sm:$0xff]  }
 0x1b8   : > { %v6256_v47 = vpop.f32.mrf.mxu0  ;;  %v3021_v13 = vpop.f32.mrf.mxu1 }
 0x1b9   : > { %v6260_v48 = vadd.f32 %v3021_v13, %v2733_v14 }
 0x1ba   : > { %v2798_v41 = vpop.f32.mrf.mxu0  ;;  %v3023_v35 = vpop.f32.mrf.mxu1 }
 0x1bb   : > { %7045 = vst [vmem:[#allocation15_spill] sm:$0xff] %v6260_v48  ;;  %v5350_v41 = vld [vmem:[%s5558_s5 + $0x210] ss:$36 sps:$4 sm:$0xff]  }
 0x1bc   : > { %v6266_v15 = vpop.f32.mrf.mxu0  ;;  %v3026_v61 = vpop.f32.mrf.mxu1  ;;  %3378 = vmatmul.mubr.bf16.gmra.mxu0 %v5341_v36  ;;  %3539 = vmatmul.mubr.bf16.gmra.mxu1 %v5344_v5  ;;  %v5355_v48 = vld [vmem:[%s5558_s5 + $0x6d4] ss:$36 sps:$4 sm:$0xff]  }
 0x1bd   : > { %v6268_v31 = vadd.f32 %v3026_v61, %v2738_v23  ;;  %3385 = vmatprep.mubr.bf16.mxu0 %v5349_v1  ;;  %3546 = vmatprep.mubr.bf16.mxu1 %v5352_v63  ;;  %v2746_v63 = vadd.f32 %v6024_v21, %v6154_v53  ;;  %v5353_v53 = vld [vmem:[%s5558_s5 + $0x6d0] ss:$36 sps:$4 sm:$0xff]  }
 0x1be   : > { %v2803_v55 = vpop.f32.mrf.mxu0  ;;  %v3028_v56 = vpop.f32.mrf.mxu1 }
 0x1bf   : > { %7046 = vst [vmem:[#allocation16_spill] sm:$0xff] %v6268_v31  ;;  %v2749_v56 = vadd.f32 %v6024_v21, %v6160_v12  ;;  %v5365_v31 = vld [vmem:[%s5558_s5 + $0x2a4] ss:$36 sps:$4 sm:$0xff]  }
 0x1c0   : > { %v6272_v14 = vpop.f32.mrf.mxu0  ;;  %v3029_v13 = vpop.f32.mrf.mxu1 }
 0x1c1   : > { %v6276_v35 = vadd.f32 %v3029_v13, %v2741_v43 }
 0x1c2   : > { %v2806_v36 = vpop.f32.mrf.mxu0  ;;  %v3031_v5 = vpop.f32.mrf.mxu1 }
 0x1c3   : > { %7047 = vst [vmem:[#allocation17_spill] sm:$0xff] %v6276_v35  ;;  %v5356_v36 = vld [vmem:[%s5558_s5 + $0x258] ss:$36 sps:$4 sm:$0xff]  }
 0x1c4   : > { %v6282_v1 = vpop.f32.mrf.mxu0  ;;  %v3034_v20 = vpop.f32.mrf.mxu1  ;;  %3386 = vmatmul.mubr.bf16.gmra.mxu0 %v5347_v0  ;;  %3547 = vmatmul.mubr.bf16.gmra.mxu1 %v5350_v41  ;;  %v5362_v35 = vld [vmem:[%s5558_s5 + $0x71c] ss:$36 sps:$4 sm:$0xff]  }
 0x1c5   : > { %v6284_v23 = vadd.f32 %v3034_v20, %v2746_v63  ;;  %3393 = vmatprep.mubr.bf16.mxu0 %v5355_v48  ;;  %3554 = vmatprep.mubr.bf16.mxu1 %v5358_v46  ;;  %v2754_v46 = vadd.f32 %v6024_v21, %v6170_v40 }
 0x1c6   : > { %v2811_v61 = vpop.f32.mrf.mxu0  ;;  %v3036_v55 = vpop.f32.mrf.mxu1 }
 0x1c8   : > { %v6288_v43 = vpop.f32.mrf.mxu0  ;;  %v3037_v13 = vpop.f32.mrf.mxu1 }
 0x1c9   : > { %v6292_v5 = vadd.f32 %v3037_v13, %v2749_v56  ;;  %v2757_v56 = vadd.f32 %v6024_v21, %v6176_v51 }
 0x1ca   : > { %v2814_v0 = vpop.f32.mrf.mxu0  ;;  %v3039_v41 = vpop.f32.mrf.mxu1 }
 0x1cb   : > { %7048 = vst [vmem:[#allocation18_spill] sm:$0xff] %v6292_v5  ;;  %v5360_v0 = vld [vmem:[%s5558_s5 + $0x718] ss:$36 sps:$4 sm:$0xff]   ;;  %v5363_v41 = vld [vmem:[%s5558_s5 + $0x2a0] ss:$36 sps:$4 sm:$0xff]  }
 0x1cc   : > { %v3042_v48 = vpop.f32.mrf.mxu1  ;;  %v3203_v63 = vpop.f32.mrf.mxu0  ;;  %3394 = vmatmul.mubr.bf16.gmra.mxu0 %v5353_v53  ;;  %3555 = vmatmul.mubr.bf16.gmra.mxu1 %v5356_v36  ;;  %v5368_v36 = vld [vmem:[%s5558_s5 + $0x764] ss:$36 sps:$4 sm:$0xff]  }
 0x1cd   : > { %v6298_v12 = vadd.f32 %v3042_v48, %v2754_v46  ;;  %v6301_v20 = vadd.f32 %v3203_v63, %v6038_v39  ;;  %3401 = vmatprep.mubr.bf16.mxu0 %v5362_v35  ;;  %3562 = vmatprep.mubr.bf16.mxu1 %v5365_v31  ;;  %v5371_v46 = vld [vmem:[%s5558_s5 + $0x2ec] ss:$36 sps:$4 sm:$0xff]   ;;  %v2762_v31 = vadd.f32 %v6024_v21, %v6186_v42 }
 0x1ce   : > { %v3044_v61 = vpop.f32.mrf.mxu1  ;;  %v3205_v55 = vpop.f32.mrf.mxu0 }
 0x1d0   : > { %v3045_v13 = vpop.f32.mrf.mxu1  ;;  %v3206_v40 = vpop.f32.mrf.mxu0 }
 0x1d1   : > { %v6307_v5 = vadd.f32 %v3045_v13, %v2757_v56  ;;  %v6310_v53 = vadd.f32 %v3206_v40, %v6049_v32  ;;  %v2765_v56 = vadd.f32 %v6024_v21, %v6192_v59  ;;  %v5366_v40 = vld [vmem:[%s5558_s5 + $0x760] ss:$36 sps:$4 sm:$0xff]  }
 0x1d2   : > { %v3047_v39 = vpop.f32.mrf.mxu1  ;;  %v3208_v35 = vpop.f32.mrf.mxu0 }
 0x1d3   : > { %v5369_v39 = vld [vmem:[%s5558_s5 + $0x2e8] ss:$36 sps:$4 sm:$0xff]  }
 0x1d4   : > { %v3050_v48 = vpop.f32.mrf.mxu1  ;;  %v3211_v51 = vpop.f32.mrf.mxu0  ;;  %3402 = vmatmul.mubr.bf16.gmra.mxu0 %v5360_v0  ;;  %3563 = vmatmul.mubr.bf16.gmra.mxu1 %v5363_v41  ;;  %v5374_v41 = vld [vmem:[%s5558_s5 + $0x7ac] ss:$36 sps:$4 sm:$0xff]  }
 0x1d5   : > { %v6316_v63 = vadd.f32 %v3050_v48, %v2762_v31  ;;  %v6319_v32 = vadd.f32 %v3211_v51, %v6057_v8  ;;  %3409 = vmatprep.mubr.bf16.mxu0 %v5368_v36  ;;  %3570 = vmatprep.mubr.bf16.mxu1 %v5371_v46  ;;  %v5377_v31 = vld [vmem:[%s5558_s5 + $0x334] ss:$36 sps:$4 sm:$0xff]   ;;  %v2770_v46 = vadd.f32 %v6024_v21, %v6202_v25 }
 0x1d6   : > { %v3052_v61 = vpop.f32.mrf.mxu1  ;;  %v3213_v55 = vpop.f32.mrf.mxu0 }
 0x1d8   : > { %v3053_v13 = vpop.f32.mrf.mxu1  ;;  %v3214_v42 = vpop.f32.mrf.mxu0 }
 0x1d9   : > { %v6325_v35 = vadd.f32 %v3053_v13, %v2765_v56  ;;  %v6328_v0 = vadd.f32 %v3214_v42, %v6065_v26  ;;  %v2773_v56 = vadd.f32 %v6024_v21, %v6208_v58  ;;  %v5372_v42 = vld [vmem:[%s5558_s5 + $0x7a8] ss:$36 sps:$4 sm:$0xff]  }
 0x1da   : > { %v3055_v8 = vpop.f32.mrf.mxu1  ;;  %v3216_v36 = vpop.f32.mrf.mxu0 }
 0x1db   : > { %v5375_v8 = vld [vmem:[%s5558_s5 + $0x330] ss:$36 sps:$4 sm:$0xff]  }
 0x1dc   : > { %v3058_v48 = vpop.f32.mrf.mxu1  ;;  %v3219_v59 = vpop.f32.mrf.mxu0  ;;  %3410 = vmatmul.mubr.bf16.gmra.mxu0 %v5366_v40  ;;  %3571 = vmatmul.mubr.bf16.gmra.mxu1 %v5369_v39  ;;  %v5380_v39 = vld [vmem:[%s5558_s5 + $0x7f4] ss:$36 sps:$4 sm:$0xff]  }
 0x1dd   : > { %v6334_v51 = vadd.f32 %v3058_v48, %v2770_v46  ;;  %v6337_v26 = vadd.f32 %v3219_v59, %v6073_v38  ;;  %3417 = vmatprep.mubr.bf16.mxu0 %v5374_v41  ;;  %3578 = vmatprep.mubr.bf16.mxu1 %v5377_v31  ;;  %v5383_v46 = vld [vmem:[%s5558_s5 + $0x37c] ss:$36 sps:$4 sm:$0xff]   ;;  %v2778_v31 = vadd.f32 %v6024_v21, %v6218_v4 }
 0x1de   : > { %v3060_v61 = vpop.f32.mrf.mxu1  ;;  %v3221_v55 = vpop.f32.mrf.mxu0 }
 0x1e0   : > { %v3061_v13 = vpop.f32.mrf.mxu1  ;;  %v3222_v25 = vpop.f32.mrf.mxu0 }
 0x1e1   : > { %v6343_v36 = vadd.f32 %v3061_v13, %v2773_v56  ;;  %v6346_v40 = vadd.f32 %v3222_v25, %v6081_v54  ;;  %v2781_v56 = vadd.f32 %v6024_v21, %v6224_v3  ;;  %v5378_v25 = vld [vmem:[%s5558_s5 + $0x7f0] ss:$36 sps:$4 sm:$0xff]  }
 0x1e2   : > { %v3063_v38 = vpop.f32.mrf.mxu1  ;;  %v3224_v41 = vpop.f32.mrf.mxu0 }
 0x1e3   : > { %v5381_v38 = vld [vmem:[%s5558_s5 + $0x378] ss:$36 sps:$4 sm:$0xff]  }
 0x1e4   : > { %v3066_v48 = vpop.f32.mrf.mxu1  ;;  %v3227_v58 = vpop.f32.mrf.mxu0  ;;  %3418 = vmatmul.mubr.bf16.gmra.mxu0 %v5372_v42  ;;  %3579 = vmatmul.mubr.bf16.gmra.mxu1 %v5375_v8  ;;  %v5387_v8 = vld [vmem:[%s5558_s5 + $0x83c] ss:$36 sps:$4 sm:$0xff]  }
 0x1e5   : > { %v6352_v59 = vadd.f32 %v3066_v48, %v2778_v31  ;;  %v6355_v54 = vadd.f32 %v3227_v58, %v6089_v9  ;;  %3425 = vmatprep.mubr.bf16.mxu0 %v5380_v39  ;;  %3586 = vmatprep.mubr.bf16.mxu1 %v5383_v46  ;;  %v5390_v31 = vld [vmem:[%s5558_s5 + $0x3c4] ss:$36 sps:$4 sm:$0xff]   ;;  %v2786_v46 = vadd.f32 %v6024_v21, %v6234_v52 }
 0x1e6   : > { %v3068_v61 = vpop.f32.mrf.mxu1  ;;  %v3229_v55 = vpop.f32.mrf.mxu0 }
 0x1e8   : > { %v3069_v13 = vpop.f32.mrf.mxu1  ;;  %v3230_v4 = vpop.f32.mrf.mxu0 }
 0x1e9   : > { %v6361_v41 = vadd.f32 %v3069_v13, %v2781_v56  ;;  %v6364_v42 = vadd.f32 %v3230_v4, %v6097_v28  ;;  %v2789_v56 = vadd.f32 %v6024_v21, %v6240_v24  ;;  %v5385_v4 = vld [vmem:[%s5558_s5 + $0x838] ss:$36 sps:$4 sm:$0xff]  }
 0x1ea   : > { %v3071_v9 = vpop.f32.mrf.mxu1  ;;  %v3232_v39 = vpop.f32.mrf.mxu0 }
 0x1eb   : > { %v5388_v9 = vld [vmem:[%s5558_s5 + $0x3c0] ss:$36 sps:$4 sm:$0xff]  }
 0x1ec   : > { %v3074_v48 = vpop.f32.mrf.mxu1  ;;  %v3235_v3 = vpop.f32.mrf.mxu0  ;;  %3426 = vmatmul.mubr.bf16.gmra.mxu0 %v5378_v25  ;;  %3587 = vmatmul.mubr.bf16.gmra.mxu1 %v5381_v38  ;;  %v5393_v38 = vld [vmem:[%s5558_s5 + $0x884] ss:$36 sps:$4 sm:$0xff]  }
 0x1ed   : > { %v6370_v58 = vadd.f32 %v3074_v48, %v2786_v46  ;;  %v6373_v28 = vadd.f32 %v3235_v3, %v6105_v22  ;;  %3433 = vmatprep.mubr.bf16.mxu0 %v5387_v8  ;;  %3594 = vmatprep.mubr.bf16.mxu1 %v5390_v31  ;;  %v5396_v46 = vld [vmem:[%s5558_s5 + $0x40c] ss:$36 sps:$4 sm:$0xff]   ;;  %v2794_v31 = vadd.f32 %v6024_v21, %v6250_v37 }
 0x1ee   : > { %v3076_v61 = vpop.f32.mrf.mxu1  ;;  %v3237_v55 = vpop.f32.mrf.mxu0 }
 0x1f0   : > { %v3077_v13 = vpop.f32.mrf.mxu1  ;;  %v3238_v52 = vpop.f32.mrf.mxu0 }
 0x1f1   : > { %v6379_v39 = vadd.f32 %v3077_v13, %v2789_v56  ;;  %v6382_v25 = vadd.f32 %v3238_v52, %v6116_v2  ;;  %v2797_v56 = vadd.f32 %v6024_v21, %v6256_v47  ;;  %v5391_v52 = vld [vmem:[%s5558_s5 + $0x880] ss:$36 sps:$4 sm:$0xff]  }
 0x1f2   : > { %v3079_v22 = vpop.f32.mrf.mxu1  ;;  %v3240_v8 = vpop.f32.mrf.mxu0 }
 0x1f3   : > { %v5394_v22 = vld [vmem:[%s5558_s5 + $0x408] ss:$36 sps:$4 sm:$0xff]  }
 0x1f4   : > { %v3082_v48 = vpop.f32.mrf.mxu1  ;;  %v3243_v24 = vpop.f32.mrf.mxu0  ;;  %3434 = vmatmul.mubr.bf16.gmra.mxu0 %v5385_v4  ;;  %3595 = vmatmul.mubr.bf16.gmra.mxu1 %v5388_v9  ;;  %v5399_v9 = vld [vmem:[%s5558_s5 + $0x8cc] ss:$36 sps:$4 sm:$0xff]  }
 0x1f5   : > { %v6388_v3 = vadd.f32 %v3082_v48, %v2794_v31  ;;  %v6391_v2 = vadd.f32 %v3243_v24, %v6124_v27  ;;  %3441 = vmatprep.mubr.bf16.mxu0 %v5393_v38  ;;  %3602 = vmatprep.mubr.bf16.mxu1 %v5396_v46  ;;  %v5402_v31 = vld [vmem:[%s5558_s5 + $0x454] ss:$36 sps:$4 sm:$0xff]   ;;  %v2802_v46 = vadd.f32 %v6024_v21, %v6266_v15 }
 0x1f6   : > { %v3084_v61 = vpop.f32.mrf.mxu1  ;;  %v3245_v55 = vpop.f32.mrf.mxu0 }
 0x1f8   : > { %v3085_v13 = vpop.f32.mrf.mxu1  ;;  %v3246_v37 = vpop.f32.mrf.mxu0 }
 0x1f9   : > { %v6397_v8 = vadd.f32 %v3085_v13, %v2797_v56  ;;  %v6400_v4 = vadd.f32 %v3246_v37, %v6132_v50  ;;  %v2805_v56 = vadd.f32 %v6024_v21, %v6272_v14  ;;  %v5397_v37 = vld [vmem:[%s5558_s5 + $0x8c8] ss:$36 sps:$4 sm:$0xff]  }
 0x1fa   : > { %v3087_v27 = vpop.f32.mrf.mxu1  ;;  %v3248_v38 = vpop.f32.mrf.mxu0 }
 0x1fb   : > { %v5400_v27 = vld [vmem:[%s5558_s5 + $0x450] ss:$36 sps:$4 sm:$0xff]  }
 0x1fc   : > { %v3090_v48 = vpop.f32.mrf.mxu1  ;;  %v3251_v47 = vpop.f32.mrf.mxu0  ;;  %3442 = vmatmul.mubr.bf16.gmra.mxu0 %v5391_v52  ;;  %3603 = vmatmul.mubr.bf16.gmra.mxu1 %v5394_v22  ;;  %v5405_v22 = vld [vmem:[%s5558_s5 + $0x49c] ss:$36 sps:$4 sm:$0xff]  }
 0x1fd   : > { %v6406_v24 = vadd.f32 %v3090_v48, %v2802_v46  ;;  %v6409_v50 = vadd.f32 %v3251_v47, %v6140_v10  ;;  %3449 = vmatprep.mubr.bf16.mxu0 %v5399_v9  ;;  %3610 = vmatprep.mubr.bf16.mxu1 %v5402_v31  ;;  %v5406_v46 = vld [vmem:[%s5558_s5 + $0x20] ss:$36 sps:$4 sm:$0xff]   ;;  %v2810_v31 = vadd.f32 %v6024_v21, %v6282_v1 }
 0x1fe   : > { %v3092_v61 = vpop.f32.mrf.mxu1  ;;  %v3253_v55 = vpop.f32.mrf.mxu0 }
 0x200   : > { %v3093_v13 = vpop.f32.mrf.mxu1  ;;  %v3254_v15 = vpop.f32.mrf.mxu0 }
 0x201   : > { %v6415_v38 = vadd.f32 %v3093_v13, %v2805_v56  ;;  %v6418_v52 = vadd.f32 %v3254_v15, %v6148_v33  ;;  %v2813_v56 = vadd.f32 %v6024_v21, %v6288_v43  ;;  %v5403_v15 = vld [vmem:[%s5558_s5 + $0x498] ss:$36 sps:$4 sm:$0xff]  }
 0x202   : > { %v3095_v10 = vpop.f32.mrf.mxu1  ;;  %v3256_v9 = vpop.f32.mrf.mxu0 }
 0x203   : > { %v5407_v10 = vld [vmem:[%s5558_s5 + $0x68] ss:$36 sps:$4 sm:$0xff]  }
 0x204   : > { %v3098_v48 = vpop.f32.mrf.mxu1  ;;  %v3259_v14 = vpop.f32.mrf.mxu0  ;;  %3450 = vmatmul.mubr.bf16.gmra.mxu0 %v5397_v37  ;;  %3611 = vmatmul.mubr.bf16.gmra.mxu1 %v5400_v27  ;;  %v5410_v27 = vld [vmem:[%s5558_s5 + $0x4e4] ss:$36 sps:$4 sm:$0xff]  }
 0x205   : > { %v6424_v47 = vadd.f32 %v3098_v48, %v2810_v31  ;;  %v6427_v33 = vadd.f32 %v3259_v14, %v6156_v30  ;;  %3618 = vmatprep.mubr.bf16.mxu1 %v5405_v22  ;;  %4889 = vmatprep.mubr.bf16.mxu0 %v5406_v46  ;;  %v5411_v31 = vld [vmem:[%s5558_s5 + $0xb0] ss:$36 sps:$4 sm:$0xff]   ;;  %v2818_v22 = vadd.f32 %v6024_v21, %v5922_v44  ;;  %v6450_v44 = vld [vmem:[%s7029_s2] ss:$0 sm:$0xff] }
 0x206   : > { %v3100_v61 = vpop.f32.mrf.mxu1  ;;  %v3261_v55 = vpop.f32.mrf.mxu0  ;;  %v2821_v21 = vadd.f32 %v6450_v44, %v5930_v49 }
 0x208   : > { %v3101_v13 = vpop.f32.mrf.mxu1  ;;  %v3262_v1 = vpop.f32.mrf.mxu0 }
 0x209   : > { %v6433_v9 = vadd.f32 %v3101_v13, %v2813_v56  ;;  %v6436_v37 = vadd.f32 %v3262_v1, %v6164_v18  ;;  %v5408_v1 = vld [vmem:[%s5558_s5 + $0x4e0] ss:$36 sps:$4 sm:$0xff]  }
 0x20a   : > { %v3103_v30 = vpop.f32.mrf.mxu1  ;;  %v3264_v48 = vpop.f32.mrf.mxu0 }
 0x20c   : > { %v3106_v46 = vpop.f32.mrf.mxu1  ;;  %v3267_v43 = vpop.f32.mrf.mxu0  ;;  %3619 = vmatmul.mubr.bf16.gmra.mxu1 %v5403_v15  ;;  %4890 = vmatmul.mubr.bf16.vlgmr.msra.gmra.mxu0 %v5407_v10  ;;  %v5412_v15 = vld [vmem:[%s5558_s5 + $0xf8] ss:$36 sps:$4 sm:$0xff]  }
 0x20d   : > { %v6442_v14 = vadd.f32 %v3106_v46, %v2818_v22  ;;  %v6445_v18 = vadd.f32 %v3267_v43, %v6172_v6  ;;  %3626 = vmatprep.mubr.bf16.mxu1 %v5410_v27  ;;  %4893 = vmatprep.mubr.bf16.mxu0 %v5411_v31  ;;  %v5415_v27 = vld [vmem:[%s5558_s5 + $0x52c] ss:$36 sps:$4 sm:$0xff]   ;;  %v5416_v31 = vld [vmem:[%s5558_s5 + $0x140] ss:$36 sps:$4 sm:$0xff]   ;;  %v2826_v22 = vadd.f32 %v6450_v44, %v5941_v57 }
 0x20e   : > { %v3108_v61 = vpop.f32.mrf.mxu1  ;;  %v3269_v55 = vpop.f32.mrf.mxu0 }
 0x210   : > { %v3109_v56 = vpop.f32.mrf.mxu1  ;;  %v3270_v13 = vpop.f32.mrf.mxu0 }
 0x211   : > { %v6456_v10 = vadd.f32 %v3109_v56, %v2821_v21  ;;  %v6459_v6 = vadd.f32 %v3270_v13, %v6180_v29  ;;  %v2829_v21 = vadd.f32 %v6450_v44, %v5948_v62  ;;  %v5413_v13 = vld [vmem:[%s5558_s5 + $0x528] ss:$36 sps:$4 sm:$0xff]  }
 0x212   : > { %v3111_v30 = vpop.f32.mrf.mxu1  ;;  %v3272_v48 = vpop.f32.mrf.mxu0 }
 0x213   : > { %v5417_v30 = vld [vmem:[%s5558_s5 + $0x188] ss:$36 sps:$4 sm:$0xff]  }
 0x214   : > { %v3114_v46 = vpop.f32.mrf.mxu1  ;;  %v3275_v49 = vpop.f32.mrf.mxu0  ;;  %3627 = vmatmul.mubr.bf16.gmra.mxu1 %v5408_v1  ;;  %4894 = vmatmul.mubr.bf16.gmra.mxu0 %v5412_v15  ;;  %v5420_v15 = vld [vmem:[%s5558_s5 + $0x574] ss:$36 sps:$4 sm:$0xff]  }
 0x215   : > { %v6465_v43 = vadd.f32 %v3114_v46, %v2826_v22  ;;  %v6468_v29 = vadd.f32 %v3275_v49, %v6188_v34  ;;  %3634 = vmatprep.mubr.bf16.mxu1 %v5415_v27  ;;  %4897 = vmatprep.mubr.bf16.mxu0 %v5416_v31  ;;  %v5421_v22 = vld [vmem:[%s5558_s5 + $0x1d0] ss:$36 sps:$4 sm:$0xff]   ;;  %v2834_v31 = vadd.f32 %v6450_v44, %v5956_v7 }
 0x216   : > { %v3116_v61 = vpop.f32.mrf.mxu1  ;;  %v3277_v55 = vpop.f32.mrf.mxu0 }
 0x218   : > { %v3117_v56 = vpop.f32.mrf.mxu1  ;;  %v3278_v57 = vpop.f32.mrf.mxu0 }
 0x219   : > { %v6474_v48 = vadd.f32 %v3117_v56, %v2829_v21  ;;  %v6477_v1 = vadd.f32 %v3278_v57, %v6196_v17  ;;  %v2837_v21 = vadd.f32 %v6450_v44, %v5960_v11  ;;  %v5418_v57 = vld [vmem:[%s5558_s5 + $0x570] ss:$36 sps:$4 sm:$0xff]  }
 0x21a   : > { %v3119_v34 = vpop.f32.mrf.mxu1  ;;  %v3280_v27 = vpop.f32.mrf.mxu0 }
 0x21b   : > { %v5422_v34 = vld [vmem:[%s5558_s5 + $0x218] ss:$36 sps:$4 sm:$0xff]  }
 0x21c   : > { %v3122_v46 = vpop.f32.mrf.mxu1  ;;  %v3283_v62 = vpop.f32.mrf.mxu0  ;;  %3635 = vmatmul.mubr.bf16.gmra.mxu1 %v5413_v13  ;;  %4898 = vmatmul.mubr.bf16.gmra.mxu0 %v5417_v30  ;;  %v5425_v30 = vld [vmem:[%s5558_s5 + $0x5bc] ss:$36 sps:$4 sm:$0xff]  }
 0x21d   : > { %v6483_v49 = vadd.f32 %v3122_v46, %v2834_v31  ;;  %v6486_v17 = vadd.f32 %v3283_v62, %v6204_v45  ;;  %3642 = vmatprep.mubr.bf16.mxu1 %v5420_v15  ;;  %4901 = vmatprep.mubr.bf16.mxu0 %v5421_v22  ;;  %v5426_v31 = vld [vmem:[%s5558_s5 + $0x260] ss:$36 sps:$4 sm:$0xff]   ;;  %v2842_v22 = vadd.f32 %v6450_v44, %v5968_v19 }
 0x21e   : > { %v3124_v61 = vpop.f32.mrf.mxu1  ;;  %v3285_v55 = vpop.f32.mrf.mxu0 }
 0x220   : > { %v3125_v56 = vpop.f32.mrf.mxu1  ;;  %v3286_v7 = vpop.f32.mrf.mxu0 }
 0x221   : > { %v6492_v27 = vadd.f32 %v3125_v56, %v2837_v21  ;;  %v6495_v13 = vadd.f32 %v3286_v7, %v6212_v60  ;;  %v7052_v21 = vld [vmem:[#allocation2_spill] sm:$0xff] }
 0x222   : > { %v3127_v45 = vpop.f32.mrf.mxu1  ;;  %v3288_v15 = vpop.f32.mrf.mxu0  ;;  %v2845_v56 = vadd.f32 %v6450_v44, %v7052_v21 }
 0x223   : > { %7049 = vst [vmem:[#allocation19_spill] sm:$0xff] %v6495_v13  ;;  %v5423_v45 = vld [vmem:[%s5558_s5 + $0x5b8] ss:$36 sps:$4 sm:$0xff]   ;;  %v5427_v15 = vld [vmem:[%s5558_s5 + $0x2a8] ss:$36 sps:$4 sm:$0xff]  }
 0x224   : > { %v3130_v46 = vpop.f32.mrf.mxu1  ;;  %v3291_v11 = vpop.f32.mrf.mxu0  ;;  %3643 = vmatmul.mubr.bf16.gmra.mxu1 %v5418_v57  ;;  %4902 = vmatmul.mubr.bf16.gmra.mxu0 %v5422_v34  ;;  %v7054_v57 = vld [vmem:[#allocation11_spill] sm:$0xff] }
 0x225   : > { %v6501_v62 = vadd.f32 %v3130_v46, %v2842_v22  ;;  %v6504_v60 = vadd.f32 %v3291_v11, %v6220_v16  ;;  %3650 = vmatprep.mubr.bf16.mxu1 %v5425_v30  ;;  %4905 = vmatprep.mubr.bf16.mxu0 %v5426_v31  ;;  %v5430_v22 = vld [vmem:[%s5558_s5 + $0x604] ss:$36 sps:$4 sm:$0xff]   ;;  %v5431_v46 = vld [vmem:[%s5558_s5 + $0x2f0] ss:$36 sps:$4 sm:$0xff]  }
 0x226   : > { %v3132_v61 = vpop.f32.mrf.mxu1  ;;  %v3293_v55 = vpop.f32.mrf.mxu0  ;;  %v7056_v31 = vld [vmem:[#allocation3_spill] sm:$0xff] }
 0x227   : > { %7050 = vst [vmem:[#allocation20_spill] sm:$0xff] %v6501_v62  ;;  %7051 = vst [vmem:[#allocation21_spill] sm:$0xff] %v6504_v60  ;;  %v2850_v11 = vadd.f32 %v6450_v44, %v7056_v31  ;;  %v5432_v60 = vld [vmem:[%s5558_s5 + $0x338] ss:$36 sps:$4 sm:$0xff]  }
 0x228   : > { %v3133_v7 = vpop.f32.mrf.mxu1  ;;  %v3294_v19 = vpop.f32.mrf.mxu0 }
 0x229   : > { %v6510_v13 = vadd.f32 %v3133_v7, %v2845_v56  ;;  %v6513_v34 = vadd.f32 %v3294_v19, %v7054_v57  ;;  %v7058_v56 = vld [vmem:[#allocation12_spill] sm:$0xff] }
 0x22a   : > { %v3135_v16 = vpop.f32.mrf.mxu1  ;;  %v3296_v30 = vpop.f32.mrf.mxu0 }
 0x22b   : > { %7053 = vst [vmem:[#allocation2_spill] sm:$0xff] %v6510_v13  ;;  %7055 = vst [vmem:[#allocation11_spill] sm:$0xff] %v6513_v34  ;;  %v7060_v16 = vld [vmem:[#allocation4_spill] sm:$0xff]  ;;  %v5428_v13 = vld [vmem:[%s5558_s5 + $0x600] ss:$36 sps:$4 sm:$0xff]  }
 0x22c   : > { %v3138_v61 = vpop.f32.mrf.mxu1  ;;  %v3299_v55 = vpop.f32.mrf.mxu0  ;;  %3651 = vmatmul.mubr.bf16.gmra.mxu1 %v5423_v45  ;;  %4906 = vmatmul.mubr.bf16.gmra.mxu0 %v5427_v15  ;;  %v2853_v30 = vadd.f32 %v6450_v44, %v7060_v16  ;;  %v7062_v45 = vld [vmem:[#allocation13_spill] sm:$0xff]  ;;  %v7066_v16 = vld [vmem:[#allocation14_spill] sm:$0xff] }
 0x22d   : > { %v6519_v21 = vadd.f32 %v3138_v61, %v2850_v11  ;;  %v6522_v7 = vadd.f32 %v3299_v55, %v7058_v56  ;;  %3658 = vmatprep.mubr.bf16.mxu1 %v5430_v22  ;;  %4909 = vmatprep.mubr.bf16.mxu0 %v5431_v46  ;;  %v5435_v11 = vld [vmem:[%s5558_s5 + $0x64c] ss:$36 sps:$4 sm:$0xff]   ;;  %v5436_v61 = vld [vmem:[%s5558_s5 + $0x380] ss:$36 sps:$4 sm:$0xff]   ;;  %v7064_v46 = vld [vmem:[#allocation5_spill] sm:$0xff] }
 0x22e   : > { %v3140_v19 = vpop.f32.mrf.mxu1  ;;  %v3301_v57 = vpop.f32.mrf.mxu0  ;;  %v2858_v56 = vadd.f32 %v6450_v44, %v7064_v46 }
 0x22f   : > { %7057 = vst [vmem:[#allocation3_spill] sm:$0xff] %v6519_v21  ;;  %7059 = vst [vmem:[#allocation12_spill] sm:$0xff] %v6522_v7  ;;  %v5437_v7 = vld [vmem:[%s5558_s5 + $0x3c8] ss:$36 sps:$4 sm:$0xff]  }
 0x230   : > { %v3141_v34 = vpop.f32.mrf.mxu1  ;;  %v3302_v31 = vpop.f32.mrf.mxu0 }
 0x231   : > { %v6528_v62 = vadd.f32 %v3141_v34, %v2853_v30  ;;  %v6531_v15 = vadd.f32 %v3302_v31, %v7062_v45 }
 0x232   : > { %v3143_v55 = vpop.f32.mrf.mxu1  ;;  %v3304_v22 = vpop.f32.mrf.mxu0 }
 0x233   : > { %7061 = vst [vmem:[#allocation4_spill] sm:$0xff] %v6528_v62  ;;  %7063 = vst [vmem:[#allocation13_spill] sm:$0xff] %v6531_v15  ;;  %v7068_v55 = vld [vmem:[#allocation6_spill] sm:$0xff]  ;;  %v5433_v62 = vld [vmem:[%s5558_s5 + $0x648] ss:$36 sps:$4 sm:$0xff]  }
 0x234   : > { %v3146_v19 = vpop.f32.mrf.mxu1  ;;  %v3307_v57 = vpop.f32.mrf.mxu0  ;;  %3659 = vmatmul.mubr.bf16.gmra.mxu1 %v5428_v13  ;;  %4910 = vmatmul.mubr.bf16.gmra.mxu0 %v5432_v60  ;;  %v2861_v22 = vadd.f32 %v6450_v44, %v7068_v55  ;;  %v7070_v13 = vld [vmem:[#allocation15_spill] sm:$0xff]  ;;  %v7073_v55 = vld [vmem:[#allocation16_spill] sm:$0xff] }
 0x235   : > { %v6537_v34 = vadd.f32 %v3146_v19, %v2858_v56  ;;  %v6540_v30 = vadd.f32 %v3307_v57, %v7066_v16  ;;  %3666 = vmatprep.mubr.bf16.mxu1 %v5435_v11  ;;  %4913 = vmatprep.mubr.bf16.mxu0 %v5436_v61  ;;  %v5440_v56 = vld [vmem:[%s5558_s5 + $0x694] ss:$36 sps:$4 sm:$0xff]   ;;  %v7072_v61 = vld [vmem:[#allocation7_spill] sm:$0xff] }
 0x236   : > { %v3148_v31 = vpop.f32.mrf.mxu1  ;;  %v3309_v45 = vpop.f32.mrf.mxu0  ;;  %v5441_v19 = vld [vmem:[%s5558_s5 + $0x410] ss:$36 sps:$4 sm:$0xff]   ;;  %v2866_v16 = vadd.f32 %v6450_v44, %v7072_v61 }
 0x237   : > { %7065 = vst [vmem:[#allocation5_spill] sm:$0xff] %v6537_v34  ;;  %7067 = vst [vmem:[#allocation14_spill] sm:$0xff] %v6540_v30  ;;  %v5442_v30 = vld [vmem:[%s5558_s5 + $0x458] ss:$36 sps:$4 sm:$0xff]  }
 0x238   : > { %v3149_v15 = vpop.f32.mrf.mxu1  ;;  %v3310_v46 = vpop.f32.mrf.mxu0 }
 0x239   : > { %v6546_v21 = vadd.f32 %v3149_v15, %v2861_v22  ;;  %v6549_v60 = vadd.f32 %v3310_v46, %v7070_v13 }
 0x23a   : > { %v3151_v57 = vpop.f32.mrf.mxu1  ;;  %v3312_v11 = vpop.f32.mrf.mxu0 }
 0x23b   : > { %7069 = vst [vmem:[#allocation6_spill] sm:$0xff] %v6546_v21  ;;  %7071 = vst [vmem:[#allocation15_spill] sm:$0xff] %v6549_v60  ;;  %v7075_v57 = vld [vmem:[#allocation8_spill] sm:$0xff] }
 0x23c   : > { %v3154_v31 = vpop.f32.mrf.mxu1  ;;  %v3315_v45 = vpop.f32.mrf.mxu0  ;;  %3667 = vmatmul.mubr.bf16.gmra.mxu1 %v5433_v62  ;;  %4914 = vmatmul.mubr.bf16.gmra.mxu0 %v5437_v7  ;;  %v2869_v11 = vadd.f32 %v6450_v44, %v7075_v57  ;;  %v5438_v21 = vld [vmem:[%s5558_s5 + $0x690] ss:$36 sps:$4 sm:$0xff]   ;;  %v7077_v62 = vld [vmem:[#allocation17_spill] sm:$0xff] }
 0x23d   : > { %v6555_v15 = vadd.f32 %v3154_v31, %v2866_v16  ;;  %v6558_v22 = vadd.f32 %v3315_v45, %v7073_v55  ;;  %3674 = vmatprep.mubr.bf16.mxu1 %v5440_v56  ;;  %4917 = vmatprep.mubr.bf16.mxu0 %v5441_v19  ;;  %v5445_v16 = vld [vmem:[%s5558_s5 + $0x6dc] ss:$36 sps:$4 sm:$0xff]  }
 0x23e   : > { %v3156_v46 = vpop.f32.mrf.mxu1  ;;  %v3317_v13 = vpop.f32.mrf.mxu0  ;;  %v5446_v31 = vld [vmem:[%s5558_s5 + $0x4a0] ss:$36 sps:$4 sm:$0xff]   ;;  %v7079_v19 = vld [vmem:[#allocation9_spill] sm:$0xff] }
 0x23f   : > { %7074 = vst [vmem:[#allocation7_spill] sm:$0xff] %v6558_v22  ;;  %v2874_v55 = vadd.f32 %v6450_v44, %v7079_v19 }
 0x240   : > { %v3157_v60 = vpop.f32.mrf.mxu1  ;;  %v3318_v61 = vpop.f32.mrf.mxu0 }
 0x241   : > { %v6564_v34 = vadd.f32 %v3157_v60, %v2869_v11  ;;  %v6567_v7 = vadd.f32 %v3318_v61, %v7077_v62  ;;  %v7080_v62 = vld [vmem:[#allocation10_spill] sm:$0xff] }
 0x242   : > { %v3159_v45 = vpop.f32.mrf.mxu1  ;;  %v3320_v56 = vpop.f32.mrf.mxu0 }
 0x243   : > { %7076 = vst [vmem:[#allocation16_spill] sm:$0xff] %v6564_v34  ;;  %7078 = vst [vmem:[#allocation8_spill] sm:$0xff] %v6567_v7  ;;  %v2877_v45 = vadd.f32 %v6450_v44, %v7080_v62  ;;  %v5443_v7 = vld [vmem:[%s5558_s5 + $0x6d8] ss:$36 sps:$4 sm:$0xff]   ;;  %v5447_v34 = vld [vmem:[%s5558_s5 + $0x4e8] ss:$36 sps:$4 sm:$0xff]  }
 0x244   : > { %v3162_v46 = vpop.f32.mrf.mxu1  ;;  %v3323_v13 = vpop.f32.mrf.mxu0  ;;  %3675 = vmatmul.mubr.bf16.gmra.mxu1 %v5438_v21  ;;  %4918 = vmatmul.mubr.bf16.gmra.mxu0 %v5442_v30  ;;  %v7081_v21 = vld [vmem:[#allocation18_spill] sm:$0xff] }
 0x245   : > { %v6573_v60 = vadd.f32 %v3162_v46, %v2874_v55  ;;  %v6576_v57 = vadd.f32 %v3323_v13, %v6284_v23  ;;  %3682 = vmatprep.mubr.bf16.mxu1 %v5445_v16  ;;  %4921 = vmatprep.mubr.bf16.mxu0 %v5446_v31  ;;  %v5450_v55 = vld [vmem:[%s5558_s5 + $0x724] ss:$36 sps:$4 sm:$0xff]   ;;  %v5451_v23 = vld [vmem:[%s5558_s5 + $0x530] ss:$36 sps:$4 sm:$0xff]  }
 0x246   : > { %v3164_v11 = vpop.f32.mrf.mxu1  ;;  %v3325_v61 = vpop.f32.mrf.mxu0 }
 0x248   : > { %v3165_v56 = vpop.f32.mrf.mxu1  ;;  %v3326_v19 = vpop.f32.mrf.mxu0 }
 0x249   : > { %v6582_v22 = vadd.f32 %v3165_v56, %v2877_v45  ;;  %v6585_v30 = vadd.f32 %v3326_v19, %v7081_v21  ;;  %v5448_v19 = vld [vmem:[%s5558_s5 + $0x720] ss:$36 sps:$4 sm:$0xff]   ;;  %v5452_v21 = vld [vmem:[%s5558_s5 + $0x578] ss:$36 sps:$4 sm:$0xff]  }
 0x24a   : > { %v3167_v16 = vpop.f32.mrf.mxu1  ;;  %v3328_v31 = vpop.f32.mrf.mxu0 }
 0x24c   : > { %v3331_v46 = vpop.f32.mrf.mxu0  ;;  %v3492_v13 = vpop.f32.mrf.mxu1  ;;  %3683 = vmatmul.mubr.bf16.gmra.mxu1 %v5443_v7  ;;  %4922 = vmatmul.mubr.bf16.gmra.mxu0 %v5447_v34  ;;  %v5455_v34 = vld [vmem:[%s5558_s5 + $0x76c] ss:$36 sps:$4 sm:$0xff]  }
 0x24d   : > { %v6590_v44 = vadd.f32 %v3331_v46, %v6298_v12  ;;  %v6593_v11 = vadd.f32 %v3492_v13, %v6301_v20  ;;  %3690 = vmatprep.mubr.bf16.mxu1 %v5450_v55  ;;  %4925 = vmatprep.mubr.bf16.mxu0 %v5451_v23  ;;  %v5456_v12 = vld [vmem:[%s5558_s5 + $0x5c0] ss:$36 sps:$4 sm:$0xff]  }
 0x24e   : > { %v3333_v61 = vpop.f32.mrf.mxu0  ;;  %v3494_v62 = vpop.f32.mrf.mxu1 }
 0x250   : > { %v3334_v45 = vpop.f32.mrf.mxu0  ;;  %v3495_v56 = vpop.f32.mrf.mxu1 }
 0x251   : > { %v6598_v16 = vadd.f32 %v3334_v45, %v6307_v5  ;;  %v6601_v7 = vadd.f32 %v3495_v56, %v6310_v53  ;;  %v5453_v45 = vld [vmem:[%s5558_s5 + $0x768] ss:$36 sps:$4 sm:$0xff]  }
 0x252   : > { %v3336_v20 = vpop.f32.mrf.mxu0  ;;  %v3497_v31 = vpop.f32.mrf.mxu1  ;;  %v5457_v56 = vld [vmem:[%s5558_s5 + $0x608] ss:$36 sps:$4 sm:$0xff]  }
 0x254   : > { %v3339_v55 = vpop.f32.mrf.mxu0  ;;  %v3500_v23 = vpop.f32.mrf.mxu1  ;;  %3691 = vmatmul.mubr.bf16.gmra.mxu1 %v5448_v19  ;;  %4926 = vmatmul.mubr.bf16.gmra.mxu0 %v5452_v21  ;;  %v5460_v21 = vld [vmem:[%s5558_s5 + $0x7b4] ss:$36 sps:$4 sm:$0xff]  }
 0x255   : > { %v6606_v46 = vadd.f32 %v3339_v55, %v6316_v63  ;;  %v6609_v5 = vadd.f32 %v3500_v23, %v6319_v32  ;;  %3698 = vmatprep.mubr.bf16.mxu1 %v5455_v34  ;;  %4929 = vmatprep.mubr.bf16.mxu0 %v5456_v12  ;;  %v5461_v63 = vld [vmem:[%s5558_s5 + $0x650] ss:$36 sps:$4 sm:$0xff]  }
 0x256   : > { %v3341_v53 = vpop.f32.mrf.mxu0  ;;  %v3502_v13 = vpop.f32.mrf.mxu1 }
 0x258   : > { %v3342_v61 = vpop.f32.mrf.mxu0  ;;  %v3503_v62 = vpop.f32.mrf.mxu1 }
 0x259   : > { %v6614_v20 = vadd.f32 %v3342_v61, %v6325_v35  ;;  %v6617_v19 = vadd.f32 %v3503_v62, %v6328_v0  ;;  %v5458_v61 = vld [vmem:[%s5558_s5 + $0x7b0] ss:$36 sps:$4 sm:$0xff]   ;;  %v5462_v62 = vld [vmem:[%s5558_s5 + $0x698] ss:$36 sps:$4 sm:$0xff]  }
 0x25a   : > { %v3344_v32 = vpop.f32.mrf.mxu0  ;;  %v3505_v31 = vpop.f32.mrf.mxu1 }
 0x25c   : > { %v3347_v34 = vpop.f32.mrf.mxu0  ;;  %v3508_v12 = vpop.f32.mrf.mxu1  ;;  %3699 = vmatmul.mubr.bf16.gmra.mxu1 %v5453_v45  ;;  %4930 = vmatmul.mubr.bf16.gmra.mxu0 %v5457_v56  ;;  %v5465_v56 = vld [vmem:[%s5558_s5 + $0x7fc] ss:$36 sps:$4 sm:$0xff]  }
 0x25d   : > { %v6622_v55 = vadd.f32 %v3347_v34, %v6334_v51  ;;  %v6625_v35 = vadd.f32 %v3508_v12, %v6337_v26  ;;  %3706 = vmatprep.mubr.bf16.mxu1 %v5460_v21  ;;  %4933 = vmatprep.mubr.bf16.mxu0 %v5461_v63  ;;  %v5466_v51 = vld [vmem:[%s5558_s5 + $0x6e0] ss:$36 sps:$4 sm:$0xff]  }
 0x25e   : > { %v3349_v0 = vpop.f32.mrf.mxu0  ;;  %v3510_v23 = vpop.f32.mrf.mxu1 }
 0x260   : > { %v3350_v53 = vpop.f32.mrf.mxu0  ;;  %v3511_v13 = vpop.f32.mrf.mxu1 }
 0x261   : > { %v6630_v32 = vadd.f32 %v3350_v53, %v6343_v36  ;;  %v6633_v45 = vadd.f32 %v3511_v13, %v6346_v40  ;;  %v5463_v53 = vld [vmem:[%s5558_s5 + $0x7f8] ss:$36 sps:$4 sm:$0xff]   ;;  %v5467_v13 = vld [vmem:[%s5558_s5 + $0x728] ss:$36 sps:$4 sm:$0xff]  }
 0x262   : > { %v3352_v26 = vpop.f32.mrf.mxu0  ;;  %v3513_v31 = vpop.f32.mrf.mxu1 }
 0x264   : > { %v3355_v21 = vpop.f32.mrf.mxu0  ;;  %v3516_v63 = vpop.f32.mrf.mxu1  ;;  %3707 = vmatmul.mubr.bf16.gmra.mxu1 %v5458_v61  ;;  %4934 = vmatmul.mubr.bf16.gmra.mxu0 %v5462_v62  ;;  %v5470_v62 = vld [vmem:[%s5558_s5 + $0x844] ss:$36 sps:$4 sm:$0xff]  }
 0x265   : > { %v6638_v34 = vadd.f32 %v3355_v21, %v6352_v59  ;;  %v6641_v36 = vadd.f32 %v3516_v63, %v6355_v54  ;;  %3714 = vmatprep.mubr.bf16.mxu1 %v5465_v56  ;;  %4937 = vmatprep.mubr.bf16.mxu0 %v5466_v51  ;;  %v5471_v59 = vld [vmem:[%s5558_s5 + $0x770] ss:$36 sps:$4 sm:$0xff]  }
 0x266   : > { %v3357_v40 = vpop.f32.mrf.mxu0  ;;  %v3518_v12 = vpop.f32.mrf.mxu1 }
 0x268   : > { %v3358_v0 = vpop.f32.mrf.mxu0  ;;  %v3519_v23 = vpop.f32.mrf.mxu1 }
 0x269   : > { %v6646_v26 = vadd.f32 %v3358_v0, %v6361_v41  ;;  %v6649_v61 = vadd.f32 %v3519_v23, %v6364_v42  ;;  %v5468_v0 = vld [vmem:[%s5558_s5 + $0x840] ss:$36 sps:$4 sm:$0xff]   ;;  %v5472_v23 = vld [vmem:[%s5558_s5 + $0x7b8] ss:$36 sps:$4 sm:$0xff]  }
 0x26a   : > { %v3360_v54 = vpop.f32.mrf.mxu0  ;;  %v3521_v31 = vpop.f32.mrf.mxu1 }
 0x26c   : > { %v3363_v56 = vpop.f32.mrf.mxu0  ;;  %v3524_v51 = vpop.f32.mrf.mxu1  ;;  %3715 = vmatmul.mubr.bf16.gmra.mxu1 %v5463_v53  ;;  %4938 = vmatmul.mubr.bf16.gmra.mxu0 %v5467_v13  ;;  %v5475_v13 = vld [vmem:[%s5558_s5 + $0x88c] ss:$36 sps:$4 sm:$0xff]  }
 0x26d   : > { %v6654_v21 = vadd.f32 %v3363_v56, %v6370_v58  ;;  %v6657_v41 = vadd.f32 %v3524_v51, %v6373_v28  ;;  %3722 = vmatprep.mubr.bf16.mxu1 %v5470_v62  ;;  %4941 = vmatprep.mubr.bf16.mxu0 %v5471_v59  ;;  %v5476_v58 = vld [vmem:[%s5558_s5 + $0x800] ss:$36 sps:$4 sm:$0xff]  }
 0x26e   : > { %v3365_v42 = vpop.f32.mrf.mxu0  ;;  %v3526_v63 = vpop.f32.mrf.mxu1 }
 0x270   : > { %v3366_v40 = vpop.f32.mrf.mxu0  ;;  %v3527_v12 = vpop.f32.mrf.mxu1 }
 0x271   : > { %v6662_v54 = vadd.f32 %v3366_v40, %v6379_v39  ;;  %v6665_v53 = vadd.f32 %v3527_v12, %v6382_v25  ;;  %v5473_v40 = vld [vmem:[%s5558_s5 + $0x888] ss:$36 sps:$4 sm:$0xff]  }
 0x272   : > { %v3368_v28 = vpop.f32.mrf.mxu0  ;;  %v3529_v31 = vpop.f32.mrf.mxu1  ;;  %v5477_v12 = vld [vmem:[%s5558_s5 + $0x848] ss:$36 sps:$4 sm:$0xff]  }
 0x274   : > { %v3371_v62 = vpop.f32.mrf.mxu0  ;;  %v3532_v59 = vpop.f32.mrf.mxu1  ;;  %3723 = vmatmul.mubr.bf16.gmra.mxu1 %v5468_v0  ;;  %4942 = vmatmul.mubr.bf16.gmra.mxu0 %v5472_v23  ;;  %v5480_v23 = vld [vmem:[%s5558_s5 + $0x8d4] ss:$36 sps:$4 sm:$0xff]  }
 0x275   : > { %v6670_v56 = vadd.f32 %v3371_v62, %v6388_v3  ;;  %v6673_v39 = vadd.f32 %v3532_v59, %v6391_v2  ;;  %3730 = vmatprep.mubr.bf16.mxu1 %v5475_v13  ;;  %4945 = vmatprep.mubr.bf16.mxu0 %v5476_v58  ;;  %v5481_v3 = vld [vmem:[%s5558_s5 + $0x890] ss:$36 sps:$4 sm:$0xff]  }
 0x276   : > { %v3373_v25 = vpop.f32.mrf.mxu0  ;;  %v3534_v51 = vpop.f32.mrf.mxu1 }
 0x278   : > { %v3374_v42 = vpop.f32.mrf.mxu0  ;;  %v3535_v63 = vpop.f32.mrf.mxu1 }
 0x279   : > { %v6678_v28 = vadd.f32 %v3374_v42, %v6397_v8  ;;  %v6681_v0 = vadd.f32 %v3535_v63, %v6400_v4  ;;  %v5478_v42 = vld [vmem:[%s5558_s5 + $0x8d0] ss:$36 sps:$4 sm:$0xff]   ;;  %v5482_v63 = vld [vmem:[%s5558_s5 + $0x8d8] ss:$36 sps:$4 sm:$0xff]   ;;  %s4468_s5 = sshll.u32 %s7139_s19, 3  ;;  %s4469_s19 = sshll.u32 %s7141_s16, 3 }
 0x27a   : > { %v3376_v2 = vpop.f32.mrf.mxu0  ;;  %v3537_v31 = vpop.f32.mrf.mxu1  ;;  %s6813_s14 = scalar_lea.vmem %s7030_s3, %s4468_s5  ;;  %s214_s20 = scalar_lea.vmem %s7031_s4, %s4469_s19 }
 0x27c   : > { %v3379_v13 = vpop.f32.mrf.mxu0  ;;  %v3540_v58 = vpop.f32.mrf.mxu1  ;;  %3731 = vmatmul.mubr.bf16.gmra.mxu1 %v5473_v40  ;;  %4946 = vmatmul.mubr.bf16.gmra.mxu0 %v5477_v12 }
 0x27d   : > { %v6686_v62 = vadd.f32 %v3379_v13, %v6406_v24  ;;  %v6689_v59 = vadd.f32 %v3540_v58, %v6409_v50  ;;  %3738 = vmatprep.mubr.bf16.mxu1 %v5480_v23  ;;  %4949 = vmatprep.mubr.bf16.mxu0 %v5481_v3 }
 0x27e   : > { %v3381_v8 = vpop.f32.mrf.mxu0  ;;  %v3542_v4 = vpop.f32.mrf.mxu1 }
 0x27f   : > { %7082 = vst [vmem:[#allocation17_spill] sm:$0xff] %v6686_v62 }
 0x280   : > { %v3382_v25 = vpop.f32.mrf.mxu0  ;;  %v3543_v51 = vpop.f32.mrf.mxu1 }
 0x281   : > { %v6694_v2 = vadd.f32 %v3382_v25, %v6415_v38  ;;  %v6697_v40 = vadd.f32 %v3543_v51, %v6418_v52 }
 0x282   : > { %v3384_v12 = vpop.f32.mrf.mxu0  ;;  %v3545_v24 = vpop.f32.mrf.mxu1 }
 0x283   : > { %7083 = vst [vmem:[#allocation9_spill] sm:$0xff] %v6694_v2 }
 0x284   : > { %v3387_v31 = vpop.f32.mrf.mxu0  ;;  %v3548_v13 = vpop.f32.mrf.mxu1  ;;  %3739 = vmatmul.mubr.bf16.gmra.mxu1 %v5478_v42  ;;  %4950 = vmatmul.mubr.bf16.gmra.mxu0 %v5482_v63 }
 0x285   : > { %v6700_v50 = vadd.f32 %v3387_v31, %v6424_v47  ;;  %v6703_v23 = vadd.f32 %v3548_v13, %v6427_v33 }
 0x286   : > { %v3389_v3 = vpop.f32.mrf.mxu0  ;;  %v3550_v58 = vpop.f32.mrf.mxu1 }
 0x287   : > { %7084 = vst [vmem:[#allocation10_spill] sm:$0xff] %v6700_v50 }
 0x288   : > { %v3390_v8 = vpop.f32.mrf.mxu0  ;;  %v3551_v38 = vpop.f32.mrf.mxu1 }
 0x289   : > { %v6706_v4 = vadd.f32 %v3390_v8, %v6433_v9  ;;  %v6709_v52 = vadd.f32 %v3551_v38, %v6436_v37 }
 0x28a   : > { %v3392_v25 = vpop.f32.mrf.mxu0  ;;  %v3553_v51 = vpop.f32.mrf.mxu1 }
 0x28b   : > { %7085 = vst [vmem:[#allocation18_spill] sm:$0xff] %v6706_v4  ;;  %v7108_v4 = vld [vmem:[#allocation6_spill] sm:$0xff] }
 0x28c   : > { %v3395_v42 = vpop.f32.mrf.mxu0  ;;  %v3556_v63 = vpop.f32.mrf.mxu1 }
 0x28d   : > { %v6712_v47 = vadd.f32 %v3395_v42, %v6442_v14  ;;  %v6715_v33 = vadd.f32 %v3556_v63, %v6445_v18 }
 0x28e   : > { %v3397_v12 = vpop.f32.mrf.mxu0  ;;  %v3558_v24 = vpop.f32.mrf.mxu1 }
 0x28f   : > { %7086 = vst [vmem:[#allocation22_spill] sm:$0xff] %v6712_v47  ;;  %v7105_v47 = vld [vmem:[#allocation5_spill] sm:$0xff] }
 0x290   : > { %v3398_v31 = vpop.f32.mrf.mxu0  ;;  %v3559_v13 = vpop.f32.mrf.mxu1 }
 0x291   : > { %v6718_v9 = vadd.f32 %v3398_v31, %v6456_v10  ;;  %v6721_v37 = vadd.f32 %v3559_v13, %v6459_v6 }
 0x292   : > { %v3400_v3 = vpop.f32.mrf.mxu0  ;;  %v3561_v58 = vpop.f32.mrf.mxu1 }
 0x293   : > { %7087 = vst [vmem:[#allocation23_spill] sm:$0xff] %v6718_v9  ;;  %v7099_v9 = vld [vmem:[#allocation3_spill] sm:$0xff] }
 0x294   : > { %v3403_v8 = vpop.f32.mrf.mxu0  ;;  %v3564_v38 = vpop.f32.mrf.mxu1 }
 0x295   : > { %v6724_v14 = vadd.f32 %v3403_v8, %v6465_v43  ;;  %v6727_v18 = vadd.f32 %v3564_v38, %v6468_v29 }
 0x296   : > { %v3405_v25 = vpop.f32.mrf.mxu0  ;;  %v3566_v51 = vpop.f32.mrf.mxu1 }
 0x297   : > { %7088 = vst [vmem:[#allocation24_spill] sm:$0xff] %v6724_v14  ;;  %v7092_v25 = vld [vmem:[#allocation19_spill] sm:$0xff]  ;;  %v7102_v14 = vld [vmem:[#allocation4_spill] sm:$0xff] }
 0x298   : > { %v3406_v42 = vpop.f32.mrf.mxu0  ;;  %v3567_v63 = vpop.f32.mrf.mxu1 }
 0x299   : > { %v6730_v10 = vadd.f32 %v3406_v42, %v6474_v48  ;;  %v6733_v6 = vadd.f32 %v3567_v63, %v6477_v1 }
 0x29a   : > { %v3408_v12 = vpop.f32.mrf.mxu0  ;;  %v3569_v24 = vpop.f32.mrf.mxu1 }
 0x29b   : > { %7089 = vst [vmem:[#allocation25_spill] sm:$0xff] %v6730_v10  ;;  %v7093_v24 = vld [vmem:[#allocation20_spill] sm:$0xff]  ;;  %v7096_v10 = vld [vmem:[#allocation2_spill] sm:$0xff] }
 0x29c   : > { %v3411_v31 = vpop.f32.mrf.mxu0  ;;  %v3572_v13 = vpop.f32.mrf.mxu1 }
 0x29d   : > { %v6736_v43 = vadd.f32 %v3411_v31, %v6483_v49  ;;  %v6739_v29 = vadd.f32 %v3572_v13, %v6486_v17  ;;  %v7095_v31 = vld [vmem:[#allocation21_spill] sm:$0xff] }
 0x29e   : > { %v3413_v3 = vpop.f32.mrf.mxu0  ;;  %v3574_v58 = vpop.f32.mrf.mxu1 }
 0x29f   : > { %7090 = vst [vmem:[#allocation26_spill] sm:$0xff] %v6736_v43 }
 0x2a0   : > { %v3414_v8 = vpop.f32.mrf.mxu0  ;;  %v3575_v38 = vpop.f32.mrf.mxu1 }
 0x2a1   : > { %v6742_v48 = vadd.f32 %v3414_v8, %v6492_v27  ;;  %v6745_v1 = vadd.f32 %v3575_v38, %v7092_v25  ;;  %v7098_v8 = vld [vmem:[#allocation11_spill] sm:$0xff] }
 0x2a2   : > { %v3416_v51 = vpop.f32.mrf.mxu0  ;;  %v3577_v42 = vpop.f32.mrf.mxu1 }
 0x2a3   : > { %7091 = vst [vmem:[#allocation27_spill] sm:$0xff] %v6742_v48 }
 0x2a4   : > { %v3419_v63 = vpop.f32.mrf.mxu0  ;;  %v3580_v12 = vpop.f32.mrf.mxu1 }
 0x2a5   : > { %v6748_v49 = vadd.f32 %v3419_v63, %v7093_v24  ;;  %v6751_v17 = vadd.f32 %v3580_v12, %v7095_v31  ;;  %v7101_v24 = vld [vmem:[#allocation12_spill] sm:$0xff] }
 0x2a6   : > { %v3421_v13 = vpop.f32.mrf.mxu0  ;;  %v3582_v3 = vpop.f32.mrf.mxu1 }
 0x2a7   : > { %7094 = vst [vmem:[#allocation19_spill] sm:$0xff] %v6748_v49 }
 0x2a8   : > { %v3422_v58 = vpop.f32.mrf.mxu0  ;;  %v3583_v43 = vpop.f32.mrf.mxu1 }
 0x2a9   : > { %v6754_v27 = vadd.f32 %v3422_v58, %v7096_v10  ;;  %v6757_v38 = vadd.f32 %v3583_v43, %v7098_v8  ;;  %v7104_v58 = vld [vmem:[#allocation13_spill] sm:$0xff] }
 0x2aa   : > { %v3424_v25 = vpop.f32.mrf.mxu0  ;;  %v3585_v51 = vpop.f32.mrf.mxu1 }
 0x2ab   : > { %7097 = vst [vmem:[#allocation20_spill] sm:$0xff] %v6754_v27 }
 0x2ac   : > { %v3427_v42 = vpop.f32.mrf.mxu0  ;;  %v3588_v48 = vpop.f32.mrf.mxu1 }
 0x2ad   : > { %v6760_v63 = vadd.f32 %v3427_v42, %v7099_v9  ;;  %v6763_v12 = vadd.f32 %v3588_v48, %v7101_v24  ;;  %v7107_v42 = vld [vmem:[#allocation14_spill] sm:$0xff] }
 0x2ae   : > { %v3429_v31 = vpop.f32.mrf.mxu0  ;;  %v3590_v13 = vpop.f32.mrf.mxu1 }
 0x2af   : > { %7100 = vst [vmem:[#allocation21_spill] sm:$0xff] %v6760_v63 }
 0x2b0   : > { %v3430_v3 = vpop.f32.mrf.mxu0  ;;  %v3591_v49 = vpop.f32.mrf.mxu1 }
 0x2b1   : > { %v6766_v10 = vadd.f32 %v3430_v3, %v7102_v14  ;;  %v6769_v43 = vadd.f32 %v3591_v49, %v7104_v58  ;;  %v7110_v3 = vld [vmem:[#allocation15_spill] sm:$0xff] }
 0x2b2   : > { %v3432_v8 = vpop.f32.mrf.mxu0  ;;  %v3593_v25 = vpop.f32.mrf.mxu1 }
 0x2b3   : > { %7103 = vst [vmem:[#allocation2_spill] sm:$0xff] %v6766_v10 }
 0x2b4   : > { %v3435_v51 = vpop.f32.mrf.mxu0  ;;  %v3596_v27 = vpop.f32.mrf.mxu1 }
 0x2b5   : > { %v6772_v9 = vadd.f32 %v3435_v51, %v7105_v47  ;;  %v6775_v48 = vadd.f32 %v3596_v27, %v7107_v42  ;;  %v7112_v51 = vld [vmem:[#allocation7_spill] sm:$0xff] }
 0x2b6   : > { %v3437_v24 = vpop.f32.mrf.mxu0  ;;  %v3598_v31 = vpop.f32.mrf.mxu1 }
 0x2b7   : > { %7106 = vst [vmem:[#allocation11_spill] sm:$0xff] %v6772_v9 }
 0x2b8   : > { %v3438_v13 = vpop.f32.mrf.mxu0  ;;  %v3599_v63 = vpop.f32.mrf.mxu1 }
 0x2b9   : > { %v6778_v14 = vadd.f32 %v3438_v13, %v7108_v4  ;;  %v6781_v49 = vadd.f32 %v3599_v63, %v7110_v3  ;;  %v7113_v4 = vld [vmem:[#allocation16_spill] sm:$0xff] }
 0x2ba   : > { %v3440_v58 = vpop.f32.mrf.mxu0  ;;  %v3601_v8 = vpop.f32.mrf.mxu1  ;;  %v7115_v63 = vld [vmem:[#allocation8_spill] sm:$0xff] }
 0x2bb   : > { %7109 = vst [vmem:[#allocation3_spill] sm:$0xff] %v6778_v14 }
 0x2bc   : > { %v3443_v25 = vpop.f32.mrf.mxu0  ;;  %v3604_v10 = vpop.f32.mrf.mxu1 }
 0x2bd   : > { %v6784_v47 = vadd.f32 %v3443_v25, %v6555_v15  ;;  %v6787_v27 = vadd.f32 %v3604_v10, %v7112_v51 }
 0x2be   : > { %v3445_v42 = vpop.f32.mrf.mxu0  ;;  %v3606_v24 = vpop.f32.mrf.mxu1 }
 0x2bf   : > { %7111 = vst [vmem:[#allocation12_spill] sm:$0xff] %v6784_v47 }
 0x2c0   : > { %v3446_v31 = vpop.f32.mrf.mxu0  ;;  %v3607_v9 = vpop.f32.mrf.mxu1 }
 0x2c1   : > { %v6790_v13 = vadd.f32 %v3446_v31, %v7113_v4  ;;  %v6793_v3 = vadd.f32 %v3607_v9, %v7115_v63 }
 0x2c2   : > { %v3448_v58 = vpop.f32.mrf.mxu0  ;;  %v3609_v8 = vpop.f32.mrf.mxu1 }
 0x2c3   : > { %7114 = vst [vmem:[#allocation4_spill] sm:$0xff] %v6790_v13 }
 0x2c4   : > { %v3451_v14 = vpop.f32.mrf.mxu0  ;;  %v6795_v2 = vpop.f32.mrf.mxu1 }
 0x2c5   : > { %v6798_v15 = vadd.f32 %v3451_v14, %v6573_v60 }
 0x2c6   : > { %v3453_v10 = vpop.f32.mrf.mxu0  ;;  %v3614_v25 = vpop.f32.mrf.mxu1 }
 0x2c7   : > { %7116 = vst [vmem:[#allocation13_spill] sm:$0xff] %v6798_v15 }
 0x2c8   : > { %v3454_v51 = vpop.f32.mrf.mxu0  ;;  %v6800_v42 = vpop.f32.mrf.mxu1 }
 0x2c9   : > { %v6803_v24 = vadd.f32 %v3454_v51, %v6582_v22 }
 0x2ca   : > { %v3456_v31 = vpop.f32.mrf.mxu0  ;;  %v3617_v4 = vpop.f32.mrf.mxu1 }
 0x2cb   : > { %7117 = vst [vmem:[#allocation5_spill] sm:$0xff] %v6803_v24 }
 0x2cc   : > { %v3620_v9 = vpop.f32.mrf.mxu1  ;;  %v4891_v63 = vpop.f32.mrf.mxu0 }
 0x2cd   : > { %v6807_v58 = vadd.f32 %v3620_v9, %v6590_v44  ;;  %v3790_v8 = vadd.f32 %v4891_v63, %v6609_v5 }
 0x2ce   : > { %v3622_v60 = vpop.f32.mrf.mxu1  ;;  %v3781_v22 = vpop.f32.mrf.mxu0 }
 0x2cf   : > { %v4038_v14 = vmax.f32 %v3790_v8, 0.0  ;;  %v3782_v10 = vadd.f32 %v3781_v22, %v6593_v11 }
 0x2d0   : > { %v3623_v25 = vpop.f32.mrf.mxu1  ;;  %v4892_v51 = vpop.f32.mrf.mxu0 }
 0x2d1   : > { %4102 = vst [vmem:[%s6813_s14 + $0x10] sm:$0xff] %v4038_v14  ;;  %v4036_v44 = vmax.f32 %v3782_v10, 0.0  ;;  %v6818_v5 = vadd.f32 %v3623_v25, %v6598_v16  ;;  %v3793_v31 = vadd.f32 %v4892_v51, %v6617_v19 }
 0x2d2   : > { %v3625_v4 = vpop.f32.mrf.mxu1  ;;  %v3784_v9 = vpop.f32.mrf.mxu0 }
 0x2d3   : > { %4100 = vst [vmem:[%s6813_s14] sm:$0xff] %v4036_v44  ;;  %v4039_v63 = vmax.f32 %v3793_v31, 0.0  ;;  %v3785_v60 = vadd.f32 %v3784_v9, %v6601_v7  ;;  %v4233_v10 = vmul.f32 %v4036_v44, %v4036_v44  ;;  %v4235_v9 = vmul.f32 %v4038_v14, %v4038_v14 }
 0x2d4   : > { %v6823_v13 = vpop.f32.mrf.mxu1  ;;  %v4895_v8 = vpop.f32.mrf.mxu0 }
 0x2d5   : > { %4103 = vst [vmem:[%s6813_s14 + $0x18] sm:$0xff] %v4039_v63  ;;  %v4037_v11 = vmax.f32 %v3785_v60, 0.0  ;;  %v3806_v22 = vadd.f32 %v4895_v8, %v6641_v36  ;;  %v4236_v50 = vmul.f32 %v4039_v63, %v4039_v63 }
 0x2d6   : > { %v3630_v24 = vpop.f32.mrf.mxu1  ;;  %v3797_v16 = vpop.f32.mrf.mxu0 }
 0x2d7   : > { %4101 = vst [vmem:[%s6813_s14 + $0x8] sm:$0xff] %v4037_v11  ;;  %v4164_v25 = vadd.f32 %v4037_v11, %v4036_v44  ;;  %v4234_v19 = vmul.f32 %v4037_v11, %v4037_v11  ;;  %v4042_v51 = vmax.f32 %v3806_v22, 0.0  ;;  %v3798_v31 = vadd.f32 %v3797_v16, %v6625_v35 }
 0x2d8   : > { %v6829_v4 = vpop.f32.mrf.mxu1  ;;  %v4896_v7 = vpop.f32.mrf.mxu0 }
 0x2d9   : > { %v4165_v47 = vadd.f32 %v4164_v25, %v4038_v14  ;;  %v4297_v15 = vadd.f32 %v4234_v19, %v4233_v10  ;;  %4106 = vst [vmem:[%s6813_s14 + $0x30] sm:$0xff] %v4042_v51  ;;  %v4040_v60 = vmax.f32 %v3798_v31, 0.0  ;;  %v3809_v36 = vadd.f32 %v4896_v7, %v6649_v61 }
 0x2da   : > { %v3633_v24 = vpop.f32.mrf.mxu1  ;;  %v3800_v8 = vpop.f32.mrf.mxu0 }
 0x2db   : > { %v4298_v44 = vadd.f32 %v4297_v15, %v4235_v9  ;;  %4104 = vst [vmem:[%s6813_s14 + $0x20] sm:$0xff] %v4040_v60  ;;  %v4166_v11 = vadd.f32 %v4165_v47, %v4039_v63  ;;  %v3801_v35 = vadd.f32 %v3800_v8, %v6633_v45  ;;  %v4043_v22 = vmax.f32 %v3809_v36, 0.0 }
 0x2dc   : > { %v6835_v16 = vpop.f32.mrf.mxu1  ;;  %v4899_v62 = vpop.f32.mrf.mxu0  ;;  %v4237_v10 = vmul.f32 %v4040_v60, %v4040_v60 }
 0x2dd   : > { %v4167_v14 = vadd.f32 %v4166_v11, %v4040_v60  ;;  %v4299_v25 = vadd.f32 %v4298_v44, %v4236_v50  ;;  %v4041_v19 = vmax.f32 %v3801_v35, 0.0  ;;  %4107 = vst [vmem:[%s6813_s14 + $0x38] sm:$0xff] %v4043_v22  ;;  %v3822_v61 = vadd.f32 %v4899_v62, %v6673_v39 }
 0x2de   : > { %v3638_v31 = vpop.f32.mrf.mxu1  ;;  %v3813_v7 = vpop.f32.mrf.mxu0  ;;  %v4239_v60 = vmul.f32 %v4042_v51, %v4042_v51  ;;  %v4240_v35 = vmul.f32 %v4043_v22, %v4043_v22 }
 0x2df   : > { %v4300_v15 = vadd.f32 %v4299_v25, %v4237_v10  ;;  %4105 = vst [vmem:[%s6813_s14 + $0x28] sm:$0xff] %v4041_v19  ;;  %v4168_v9 = vadd.f32 %v4167_v14, %v4041_v19  ;;  %v4238_v47 = vmul.f32 %v4041_v19, %v4041_v19  ;;  %v3814_v45 = vadd.f32 %v3813_v7, %v6657_v41 }
 0x2e0   : > { %v4046_v63 = vmax.f32 %v3822_v61, 0.0  ;;  %v6841_v36 = vpop.f32.mrf.mxu1  ;;  %v4900_v24 = vpop.f32.mrf.mxu0 }
 0x2e1   : > { %v4169_v50 = vadd.f32 %v4168_v9, %v4042_v51  ;;  %v4301_v8 = vadd.f32 %v4300_v15, %v4238_v47  ;;  %v4044_v44 = vmax.f32 %v3814_v45, 0.0  ;;  %v3825_v39 = vadd.f32 %v4900_v24, %v6681_v0 }
 0x2e2   : > { %4110 = vst [vmem:[%s6813_s14 + $0x50] sm:$0xff] %v4046_v63  ;;  %v3641_v62 = vpop.f32.mrf.mxu1  ;;  %v3816_v11 = vpop.f32.mrf.mxu0 }
 0x2e3   : > { %v4302_v14 = vadd.f32 %v4301_v8, %v4239_v60  ;;  %4108 = vst [vmem:[%s6813_s14 + $0x40] sm:$0xff] %v4044_v44  ;;  %v4170_v10 = vadd.f32 %v4169_v50, %v4043_v22  ;;  %v3817_v41 = vadd.f32 %v3816_v11, %v6665_v53  ;;  %v4047_v25 = vmax.f32 %v3825_v39, 0.0 }
 0x2e4   : > { %v6847_v19 = vpop.f32.mrf.mxu1  ;;  %v4903_v61 = vpop.f32.mrf.mxu0  ;;  %v4241_v31 = vmul.f32 %v4044_v44, %v4044_v44 }
 0x2e5   : > { %v4171_v51 = vadd.f32 %v4170_v10, %v4044_v44  ;;  %v4303_v7 = vadd.f32 %v4302_v14, %v4240_v35  ;;  %v4045_v15 = vmax.f32 %v3817_v41, 0.0  ;;  %4111 = vst [vmem:[%s6813_s14 + $0x58] sm:$0xff] %v4047_v25  ;;  %v3838_v0 = vadd.f32 %v4903_v61, %v6703_v23 }
 0x2e6   : > { %v3646_v9 = vpop.f32.mrf.mxu1  ;;  %v3829_v47 = vpop.f32.mrf.mxu0  ;;  %v4243_v44 = vmul.f32 %v4046_v63, %v4046_v63  ;;  %v4244_v10 = vmul.f32 %v4047_v25, %v4047_v25 }
 0x2e7   : > { %v4304_v45 = vadd.f32 %v4303_v7, %v4241_v31  ;;  %4109 = vst [vmem:[%s6813_s14 + $0x48] sm:$0xff] %v4045_v15  ;;  %v4172_v24 = vadd.f32 %v4171_v51, %v4045_v15  ;;  %v4242_v22 = vmul.f32 %v4045_v15, %v4045_v15  ;;  %v3830_v53 = vadd.f32 %v3829_v47, %v6689_v59 }
 0x2e8   : > { %v4050_v60 = vmax.f32 %v3838_v0, 0.0  ;;  %v6853_v50 = vpop.f32.mrf.mxu1  ;;  %v4904_v8 = vpop.f32.mrf.mxu0 }
 0x2e9   : > { %v4173_v39 = vadd.f32 %v4172_v24, %v4046_v63  ;;  %v4305_v62 = vadd.f32 %v4304_v45, %v4242_v22  ;;  %v4048_v11 = vmax.f32 %v3830_v53, 0.0  ;;  %v3841_v23 = vadd.f32 %v4904_v8, %v6709_v52 }
 0x2ea   : > { %4114 = vst [vmem:[%s6813_s14 + $0x70] sm:$0xff] %v4050_v60  ;;  %v3649_v35 = vpop.f32.mrf.mxu1  ;;  %v3832_v14 = vpop.f32.mrf.mxu0 }
 0x2eb   : > { %v4306_v41 = vadd.f32 %v4305_v62, %v4243_v44  ;;  %4112 = vst [vmem:[%s6813_s14 + $0x60] sm:$0xff] %v4048_v11  ;;  %v4174_v61 = vadd.f32 %v4173_v39, %v4047_v25  ;;  %v3833_v59 = vadd.f32 %v3832_v14, %v6697_v40  ;;  %v4051_v51 = vmax.f32 %v3841_v23, 0.0 }
 0x2ec   : > { %v6859_v31 = vpop.f32.mrf.mxu1  ;;  %v4907_v7 = vpop.f32.mrf.mxu0  ;;  %v4245_v15 = vmul.f32 %v4048_v11, %v4048_v11  ;;  %v4247_v39 = vmul.f32 %v4050_v60, %v4050_v60 }
 0x2ed   : > { %v4175_v63 = vadd.f32 %v4174_v61, %v4048_v11  ;;  %v4307_v0 = vadd.f32 %v4306_v41, %v4244_v10  ;;  %v4049_v9 = vmax.f32 %v3833_v59, 0.0  ;;  %4115 = vst [vmem:[%s6813_s14 + $0x78] sm:$0xff] %v4051_v51  ;;  %v3854_v52 = vadd.f32 %v4907_v7, %v6727_v18 }
 0x2ee   : > { %v3654_v47 = vpop.f32.mrf.mxu1  ;;  %v3845_v45 = vpop.f32.mrf.mxu0  ;;  %v4248_v10 = vmul.f32 %v4051_v51, %v4051_v51 }
 0x2ef   : > { %v4308_v24 = vadd.f32 %v4307_v0, %v4245_v15  ;;  %4113 = vst [vmem:[%s6813_s14 + $0x68] sm:$0xff] %v4049_v9  ;;  %v4176_v22 = vadd.f32 %v4175_v63, %v4049_v9  ;;  %v4246_v25 = vmul.f32 %v4049_v9, %v4049_v9  ;;  %v3846_v40 = vadd.f32 %v3845_v45, %v6715_v33 }
 0x2f0   : > { %v4054_v53 = vmax.f32 %v3854_v52, 0.0  ;;  %v6865_v8 = vpop.f32.mrf.mxu1  ;;  %v4908_v44 = vpop.f32.mrf.mxu0 }
 0x2f1   : > { %v4177_v62 = vadd.f32 %v4176_v22, %v4050_v60  ;;  %v4309_v11 = vadd.f32 %v4308_v24, %v4246_v25  ;;  %v4052_v23 = vmax.f32 %v3846_v40, 0.0  ;;  %v3857_v18 = vadd.f32 %v4908_v44, %v6733_v6 }
 0x2f2   : > { %4118 = vst [vmem:[%s6813_s14 + $0x90] sm:$0xff] %v4054_v53  ;;  %v3657_v35 = vpop.f32.mrf.mxu1  ;;  %v3848_v14 = vpop.f32.mrf.mxu0  ;;  %v4251_v44 = vmul.f32 %v4054_v53, %v4054_v53 }
 0x2f3   : > { %v4310_v41 = vadd.f32 %v4309_v11, %v4247_v39  ;;  %4116 = vst [vmem:[%s6813_s14 + $0x80] sm:$0xff] %v4052_v23  ;;  %v4178_v61 = vadd.f32 %v4177_v62, %v4051_v51  ;;  %v3849_v33 = vadd.f32 %v3848_v14, %v6721_v37  ;;  %v4055_v59 = vmax.f32 %v3857_v18, 0.0 }
 0x2f4   : > { %v6871_v7 = vpop.f32.mrf.mxu1  ;;  %v4911_v63 = vpop.f32.mrf.mxu0  ;;  %v4249_v15 = vmul.f32 %v4052_v23, %v4052_v23 }
 0x2f5   : > { %v4179_v60 = vadd.f32 %v4178_v61, %v4052_v23  ;;  %v4311_v0 = vadd.f32 %v4310_v41, %v4248_v10  ;;  %v4053_v9 = vmax.f32 %v3849_v33, 0.0  ;;  %4119 = vst [vmem:[%s6813_s14 + $0x98] sm:$0xff] %v4055_v59  ;;  %v3870_v6 = vadd.f32 %v4911_v63, %v6751_v17 }
 0x2f6   : > { %v3662_v52 = vpop.f32.mrf.mxu1  ;;  %v3861_v47 = vpop.f32.mrf.mxu0  ;;  %v4252_v35 = vmul.f32 %v4055_v59, %v4055_v59 }
 0x2f7   : > { %v4312_v45 = vadd.f32 %v4311_v0, %v4249_v15  ;;  %4117 = vst [vmem:[%s6813_s14 + $0x88] sm:$0xff] %v4053_v9  ;;  %v4180_v24 = vadd.f32 %v4179_v60, %v4053_v9  ;;  %v4250_v51 = vmul.f32 %v4053_v9, %v4053_v9  ;;  %v3862_v37 = vadd.f32 %v3861_v47, %v6739_v29 }
 0x2f8   : > { %v4058_v22 = vmax.f32 %v3870_v6, 0.0  ;;  %v6877_v25 = vpop.f32.mrf.mxu1  ;;  %v4912_v40 = vpop.f32.mrf.mxu0 }
 0x2f9   : > { %v4181_v39 = vadd.f32 %v4180_v24, %v4054_v53  ;;  %v4313_v62 = vadd.f32 %v4312_v45, %v4250_v51  ;;  %v4056_v11 = vmax.f32 %v3862_v37, 0.0  ;;  %v3873_v17 = vadd.f32 %v4912_v40, %v6757_v38 }
 0x2fa   : > { %4122 = vst [vmem:[%s6813_s14 + $0xb0] sm:$0xff] %v4058_v22  ;;  %v3665_v23 = vpop.f32.mrf.mxu1  ;;  %v3864_v18 = vpop.f32.mrf.mxu0  ;;  %v4255_v51 = vmul.f32 %v4058_v22, %v4058_v22 }
 0x2fb   : > { %v4314_v14 = vadd.f32 %v4313_v62, %v4251_v44  ;;  %4120 = vst [vmem:[%s6813_s14 + $0xa0] sm:$0xff] %v4056_v11  ;;  %v4182_v10 = vadd.f32 %v4181_v39, %v4055_v59  ;;  %v3865_v29 = vadd.f32 %v3864_v18, %v6745_v1  ;;  %v4059_v41 = vmax.f32 %v3873_v17, 0.0 }
 0x2fc   : > { %v6883_v61 = vpop.f32.mrf.mxu1  ;;  %v4915_v33 = vpop.f32.mrf.mxu0  ;;  %v4253_v63 = vmul.f32 %v4056_v11, %v4056_v11  ;;  %v3613_v18 = vadd.f32 %v6795_v2, %v6576_v57  ;;  %v3616_v2 = vadd.f32 %v6800_v42, %v6585_v30  ;;  %v3629_v42 = vadd.f32 %v6823_v13, %v6606_v46 }
 0x2fd   : > { %v4183_v53 = vadd.f32 %v4182_v10, %v4056_v11  ;;  %v4315_v60 = vadd.f32 %v4314_v14, %v4252_v35  ;;  %v4057_v15 = vmax.f32 %v3865_v29, 0.0  ;;  %4123 = vst [vmem:[%s6813_s14 + $0xb8] sm:$0xff] %v4059_v41  ;;  %v3886_v38 = vadd.f32 %v4915_v33, %v6775_v48 }
 0x2fe   : > { %v3670_v0 = vpop.f32.mrf.mxu1  ;;  %v3877_v9 = vpop.f32.mrf.mxu0  ;;  %v4256_v11 = vmul.f32 %v4059_v41, %v4059_v41  ;;  %v3632_v13 = vadd.f32 %v6829_v4, %v6614_v20  ;;  %v3637_v4 = vadd.f32 %v6835_v16, %v6622_v55 }
 0x2ff   : > { %v4316_v6 = vadd.f32 %v4315_v60, %v4253_v63  ;;  %4121 = vst [vmem:[%s6813_s14 + $0xa8] sm:$0xff] %v4057_v15  ;;  %v4184_v52 = vadd.f32 %v4183_v53, %v4057_v15  ;;  %v4254_v59 = vmul.f32 %v4057_v15, %v4057_v15  ;;  %v3878_v1 = vadd.f32 %v3877_v9, %v6763_v12 }
 0x300   : > { %v4062_v47 = vmax.f32 %v3886_v38, 0.0  ;;  %v6889_v45 = vpop.f32.mrf.mxu1  ;;  %v4916_v24 = vpop.f32.mrf.mxu0 }
 0x301   : > { %v4185_v37 = vadd.f32 %v4184_v52, %v4058_v22  ;;  %v4317_v40 = vadd.f32 %v4316_v6, %v4254_v59  ;;  %v4060_v44 = vmax.f32 %v3878_v1, 0.0  ;;  %v3889_v48 = vadd.f32 %v4916_v24, %v6781_v49 }
 0x302   : > { %4126 = vst [vmem:[%s6813_s14 + $0xd0] sm:$0xff] %v4062_v47  ;;  %v3673_v39 = vpop.f32.mrf.mxu1  ;;  %v3880_v62 = vpop.f32.mrf.mxu0  ;;  %v4259_v6 = vmul.f32 %v4062_v47, %v4062_v47 }
 0x303   : > { %v4318_v17 = vadd.f32 %v4317_v40, %v4255_v51  ;;  %4124 = vst [vmem:[%s6813_s14 + $0xc0] sm:$0xff] %v4060_v44  ;;  %v4186_v23 = vadd.f32 %v4185_v37, %v4059_v41  ;;  %v3881_v12 = vadd.f32 %v3880_v62, %v6769_v43  ;;  %v4063_v35 = vmax.f32 %v3889_v48, 0.0 }
 0x304   : > { %v6897_v22 = vpop.f32.mrf.mxu1  ;;  %v4919_v14 = vpop.f32.mrf.mxu0  ;;  %v4257_v29 = vmul.f32 %v4060_v44, %v4060_v44 }
 0x305   : > { %v4187_v10 = vadd.f32 %v4186_v23, %v4060_v44  ;;  %v4319_v49 = vadd.f32 %v4318_v17, %v4256_v11  ;;  %v4061_v33 = vmax.f32 %v3881_v12, 0.0  ;;  %4127 = vst [vmem:[%s6813_s14 + $0xd8] sm:$0xff] %v4063_v35  ;;  %v3902_v53 = vadd.f32 %v4919_v14, %v3613_v18 }
 0x306   : > { %v3678_v63 = vpop.f32.mrf.mxu1  ;;  %v3893_v60 = vpop.f32.mrf.mxu0  ;;  %v4260_v40 = vmul.f32 %v4063_v35, %v4063_v35 }
 0x307   : > { %v4320_v15 = vadd.f32 %v4319_v49, %v4257_v29  ;;  %4125 = vst [vmem:[%s6813_s14 + $0xc8] sm:$0xff] %v4061_v33  ;;  %v4188_v41 = vadd.f32 %v4187_v10, %v4061_v33  ;;  %v4258_v43 = vmul.f32 %v4061_v33, %v4061_v33  ;;  %v3894_v57 = vadd.f32 %v3893_v60, %v6787_v27 }
 0x308   : > { %v4066_v38 = vmax.f32 %v3902_v53, 0.0  ;;  %v6904_v0 = vpop.f32.mrf.mxu1  ;;  %v4920_v9 = vpop.f32.mrf.mxu0 }
 0x309   : > { %v4189_v52 = vadd.f32 %v4188_v41, %v4062_v47  ;;  %v4321_v59 = vadd.f32 %v4320_v15, %v4258_v43  ;;  %v4064_v1 = vmax.f32 %v3894_v57, 0.0  ;;  %v3905_v24 = vadd.f32 %v4920_v9, %v3616_v2 }
 0x30a   : > { %4130 = vst [vmem:[%s6813_s14 + $0xf0] sm:$0xff] %v4066_v38  ;;  %v3681_v51 = vpop.f32.mrf.mxu1  ;;  %v3896_v37 = vpop.f32.mrf.mxu0  ;;  %v4263_v53 = vmul.f32 %v4066_v38, %v4066_v38 }
 0x30b   : > { %v4322_v44 = vadd.f32 %v4321_v59, %v4259_v6  ;;  %4128 = vst [vmem:[%s6813_s14 + $0xe0] sm:$0xff] %v4064_v1  ;;  %v4190_v27 = vadd.f32 %v4189_v52, %v4063_v35  ;;  %v3897_v30 = vadd.f32 %v3896_v37, %v6793_v3  ;;  %v4067_v48 = vmax.f32 %v3905_v24, 0.0 }
 0x30c   : > { %v6911_v39 = vpop.f32.mrf.mxu1  ;;  %v4923_v47 = vpop.f32.mrf.mxu0  ;;  %v4261_v11 = vmul.f32 %v4064_v1, %v4064_v1 }
 0x30d   : > { %v4191_v62 = vadd.f32 %v4190_v27, %v4064_v1  ;;  %v4323_v17 = vadd.f32 %v4322_v44, %v4260_v40  ;;  %v4065_v23 = vmax.f32 %v3897_v30, 0.0  ;;  %4131 = vst [vmem:[%s6813_s14 + $0xf8] sm:$0xff] %v4067_v48  ;;  %v3918_v12 = vadd.f32 %v4923_v47, %v3629_v42 }
 0x30e   : > { %v3686_v18 = vpop.f32.mrf.mxu1  ;;  %v3909_v14 = vpop.f32.mrf.mxu0  ;;  %v4264_v2 = vmul.f32 %v4067_v48, %v4067_v48 }
 0x30f   : > { %v4324_v10 = vadd.f32 %v4323_v17, %v4261_v11  ;;  %4129 = vst [vmem:[%s6813_s14 + $0xe8] sm:$0xff] %v4065_v23  ;;  %v4192_v35 = vadd.f32 %v4191_v62, %v4065_v23  ;;  %v4262_v3 = vmul.f32 %v4065_v23, %v4065_v23  ;;  %v3910_v46 = vadd.f32 %v3909_v14, %v6807_v58 }
 0x310   : > { %v4070_v29 = vmax.f32 %v3918_v12, 0.0  ;;  %v6918_v49 = vpop.f32.mrf.mxu1  ;;  %v4924_v33 = vpop.f32.mrf.mxu0 }
 0x311   : > { %v4193_v63 = vadd.f32 %v4192_v35, %v4066_v38  ;;  %v4325_v60 = vadd.f32 %v4324_v10, %v4262_v3  ;;  %v4068_v15 = vmax.f32 %v3910_v46, 0.0  ;;  %v3921_v41 = vadd.f32 %v4924_v33, %v3632_v13 }
 0x312   : > { %4134 = vst [vmem:[%s6813_s14 + $0x110] sm:$0xff] %v4070_v29  ;;  %v3689_v43 = vpop.f32.mrf.mxu1  ;;  %v3912_v57 = vpop.f32.mrf.mxu0  ;;  %v3645_v38 = vadd.f32 %v6847_v19, %v6638_v34  ;;  %v3640_v34 = vadd.f32 %v6841_v36, %v6630_v32  ;;  %v3648_v19 = vadd.f32 %v6853_v50, %v6646_v26  ;;  %v4267_v62 = vmul.f32 %v4070_v29, %v4070_v29 }
 0x313   : > { %v4326_v9 = vadd.f32 %v4325_v60, %v4263_v53  ;;  %4132 = vst [vmem:[%s6813_s14 + $0x100] sm:$0xff] %v4068_v15  ;;  %v4194_v58 = vadd.f32 %v4193_v63, %v4067_v48  ;;  %v3913_v20 = vadd.f32 %v3912_v57, %v6818_v5  ;;  %v4071_v6 = vmax.f32 %v3921_v41, 0.0 }
 0x314   : > { %v6927_v52 = vpop.f32.mrf.mxu1  ;;  %v4927_v59 = vpop.f32.mrf.mxu0  ;;  %v4265_v24 = vmul.f32 %v4068_v15, %v4068_v15  ;;  %v3653_v26 = vadd.f32 %v6859_v31, %v6654_v21  ;;  %v3661_v50 = vadd.f32 %v6871_v7, %v6670_v56  ;;  %v3656_v56 = vadd.f32 %v6865_v8, %v6662_v54 }
 0x315   : > { %v4195_v1 = vadd.f32 %v4194_v58, %v4068_v15  ;;  %v4327_v51 = vadd.f32 %v4326_v9, %v4264_v2  ;;  %v4069_v37 = vmax.f32 %v3913_v20, 0.0  ;;  %4135 = vst [vmem:[%s6813_s14 + $0x118] sm:$0xff] %v4071_v6  ;;  %v3934_v40 = vadd.f32 %v4927_v59, %v3645_v38 }
 0x316   : > { %v3694_v44 = vpop.f32.mrf.mxu1  ;;  %v3925_v27 = vpop.f32.mrf.mxu0  ;;  %v4268_v10 = vmul.f32 %v4071_v6, %v4071_v6  ;;  %v3664_v7 = vadd.f32 %v6877_v25, %v6678_v28  ;;  %v7118_v28 = vld [vmem:[#allocation17_spill] sm:$0xff] }
 0x317   : > { %v4328_v5 = vadd.f32 %v4327_v51, %v4265_v24  ;;  %4133 = vst [vmem:[%s6813_s14 + $0x108] sm:$0xff] %v4069_v37  ;;  %v4196_v30 = vadd.f32 %v4195_v1, %v4069_v37  ;;  %v4266_v55 = vmul.f32 %v4069_v37, %v4069_v37  ;;  %v3926_v16 = vadd.f32 %v3925_v27, %v3637_v4 }
 0x318   : > { %v4074_v42 = vmax.f32 %v3934_v40, 0.0  ;;  %v6935_v48 = vpop.f32.mrf.mxu1  ;;  %v4928_v47 = vpop.f32.mrf.mxu0  ;;  %v3669_v25 = vadd.f32 %v6883_v61, %v7118_v28  ;;  %v7119_v40 = vld [vmem:[#allocation10_spill] sm:$0xff] }
 0x319   : > { %v4197_v11 = vadd.f32 %v4196_v30, %v4070_v29  ;;  %v4329_v17 = vadd.f32 %v4328_v5, %v4266_v55  ;;  %v4072_v23 = vmax.f32 %v3926_v16, 0.0  ;;  %v3937_v12 = vadd.f32 %v4928_v47, %v3648_v19 }
 0x31a   : > { %4138 = vst [vmem:[%s6813_s14 + $0x130] sm:$0xff] %v4074_v42  ;;  %v3697_v18 = vpop.f32.mrf.mxu1  ;;  %v3928_v14 = vpop.f32.mrf.mxu0  ;;  %v4271_v20 = vmul.f32 %v4074_v42, %v4074_v42  ;;  %v3677_v44 = vadd.f32 %v6897_v22, %v7119_v40 }
 0x31b   : > { %v4330_v35 = vadd.f32 %v4329_v17, %v4267_v62  ;;  %4136 = vst [vmem:[%s6813_s14 + $0x120] sm:$0xff] %v4072_v23  ;;  %v4198_v32 = vadd.f32 %v4197_v11, %v4071_v6  ;;  %v3929_v36 = vadd.f32 %v3928_v14, %v3640_v34  ;;  %v4075_v3 = vmax.f32 %v3937_v12, 0.0  ;;  %v7120_v12 = vld [vmem:[#allocation9_spill] sm:$0xff]  ;;  %v7121_v18 = vld [vmem:[#allocation18_spill] sm:$0xff] }
 0x31c   : > { %v6943_v46 = vpop.f32.mrf.mxu1  ;;  %v4931_v13 = vpop.f32.mrf.mxu0  ;;  %v4269_v33 = vmul.f32 %v4072_v23, %v4072_v23  ;;  %v3672_v22 = vadd.f32 %v6889_v45, %v7120_v12  ;;  %v3680_v14 = vadd.f32 %v6904_v0, %v7121_v18  ;;  %v7122_v0 = vld [vmem:[#allocation22_spill] sm:$0xff] }
 0x31d   : > { %v4199_v29 = vadd.f32 %v4198_v32, %v4072_v23  ;;  %v4331_v53 = vadd.f32 %v4330_v35, %v4268_v10  ;;  %v4073_v63 = vmax.f32 %v3929_v36, 0.0  ;;  %4139 = vst [vmem:[%s6813_s14 + $0x138] sm:$0xff] %v4075_v3  ;;  %v3950_v60 = vadd.f32 %v4931_v13, %v3661_v50 }
 0x31e   : > { %v3702_v15 = vpop.f32.mrf.mxu1  ;;  %v3941_v41 = vpop.f32.mrf.mxu0  ;;  %v4272_v51 = vmul.f32 %v4075_v3, %v4075_v3 }
 0x31f   : > { %v4332_v43 = vadd.f32 %v4331_v53, %v4269_v33  ;;  %4137 = vst [vmem:[%s6813_s14 + $0x128] sm:$0xff] %v4073_v63  ;;  %v4200_v57 = vadd.f32 %v4199_v29, %v4073_v63  ;;  %v4270_v21 = vmul.f32 %v4073_v63, %v4073_v63  ;;  %v3942_v31 = vadd.f32 %v3941_v41, %v3653_v26  ;;  %v7123_v41 = vld [vmem:[#allocation24_spill] sm:$0xff] }
 0x320   : > { %v4078_v2 = vmax.f32 %v3950_v60, 0.0  ;;  %v6951_v9 = vpop.f32.mrf.mxu1  ;;  %v4932_v58 = vpop.f32.mrf.mxu0  ;;  %v3685_v15 = vadd.f32 %v6911_v39, %v7122_v0 }
 0x321   : > { %v4201_v4 = vadd.f32 %v4200_v57, %v4074_v42  ;;  %v4333_v38 = vadd.f32 %v4332_v43, %v4270_v21  ;;  %v4076_v6 = vmax.f32 %v3942_v31, 0.0  ;;  %v3953_v59 = vadd.f32 %v4932_v58, %v3664_v7 }
 0x322   : > { %4142 = vst [vmem:[%s6813_s14 + $0x150] sm:$0xff] %v4078_v2  ;;  %v3705_v1 = vpop.f32.mrf.mxu1  ;;  %v3944_v24 = vpop.f32.mrf.mxu0  ;;  %v4275_v36 = vmul.f32 %v4078_v2, %v4078_v2  ;;  %v3693_v43 = vadd.f32 %v6927_v52, %v7123_v41 }
 0x323   : > { %v4334_v37 = vadd.f32 %v4333_v38, %v4271_v20  ;;  %4140 = vst [vmem:[%s6813_s14 + $0x140] sm:$0xff] %v4076_v6  ;;  %v4202_v54 = vadd.f32 %v4201_v4, %v4075_v3  ;;  %v3945_v8 = vadd.f32 %v3944_v24, %v3656_v56  ;;  %v4079_v27 = vmax.f32 %v3953_v59, 0.0  ;;  %v7124_v24 = vld [vmem:[#allocation23_spill] sm:$0xff] }
 0x324   : > { %v6959_v5 = vpop.f32.mrf.mxu1  ;;  %v4935_v30 = vpop.f32.mrf.mxu0  ;;  %v4273_v16 = vmul.f32 %v4076_v6, %v4076_v6  ;;  %v3688_v52 = vadd.f32 %v6918_v49, %v7124_v24 }
 0x325   : > { %v4203_v55 = vadd.f32 %v4202_v54, %v4076_v6  ;;  %v4335_v34 = vadd.f32 %v4334_v37, %v4272_v51  ;;  %v4077_v19 = vmax.f32 %v3945_v8, 0.0  ;;  %4143 = vst [vmem:[%s6813_s14 + $0x158] sm:$0xff] %v4079_v27  ;;  %v3966_v42 = vadd.f32 %v4935_v30, %v3677_v44  ;;  %v7125_v51 = vld [vmem:[#allocation25_spill] sm:$0xff] }
 0x326   : > { %v3710_v47 = vpop.f32.mrf.mxu1  ;;  %v3957_v62 = vpop.f32.mrf.mxu0  ;;  %v4276_v53 = vmul.f32 %v4079_v27, %v4079_v27  ;;  %v3696_v37 = vadd.f32 %v6935_v48, %v7125_v51  ;;  %v7126_v48 = vld [vmem:[#allocation26_spill] sm:$0xff] }
 0x327   : > { %v4336_v11 = vadd.f32 %v4335_v34, %v4273_v16  ;;  %4141 = vst [vmem:[%s6813_s14 + $0x148] sm:$0xff] %v4077_v19  ;;  %v4204_v17 = vadd.f32 %v4203_v55, %v4077_v19  ;;  %v4274_v61 = vmul.f32 %v4077_v19, %v4077_v19  ;;  %v3958_v23 = vadd.f32 %v3957_v62, %v3669_v25  ;;  %v7127_v62 = vld [vmem:[#allocation19_spill] sm:$0xff] }
 0x328   : > { %v4082_v10 = vmax.f32 %v3966_v42, 0.0  ;;  %v6967_v35 = vpop.f32.mrf.mxu1  ;;  %v4936_v32 = vpop.f32.mrf.mxu0  ;;  %v3701_v47 = vadd.f32 %v6943_v46, %v7126_v48 }
 0x329   : > { %v4205_v26 = vadd.f32 %v4204_v17, %v4078_v2  ;;  %v4337_v50 = vadd.f32 %v4336_v11, %v4274_v61  ;;  %v4080_v3 = vmax.f32 %v3958_v23, 0.0  ;;  %v3969_v13 = vadd.f32 %v4936_v32, %v3680_v14 }
 0x32a   : > { %4146 = vst [vmem:[%s6813_s14 + $0x170] sm:$0xff] %v4082_v10  ;;  %v3713_v29 = vpop.f32.mrf.mxu1  ;;  %v3960_v33 = vpop.f32.mrf.mxu0  ;;  %v4279_v25 = vmul.f32 %v4082_v10, %v4082_v10  ;;  %v3709_v11 = vadd.f32 %v6959_v5, %v7127_v62 }
 0x32b   : > { %v4338_v63 = vadd.f32 %v4337_v50, %v4275_v36  ;;  %4144 = vst [vmem:[%s6813_s14 + $0x160] sm:$0xff] %v4080_v3  ;;  %v4206_v45 = vadd.f32 %v4205_v26, %v4079_v27  ;;  %v3961_v60 = vadd.f32 %v3960_v33, %v3672_v22  ;;  %v4083_v57 = vmax.f32 %v3969_v13, 0.0  ;;  %v7128_v13 = vld [vmem:[#allocation27_spill] sm:$0xff]  ;;  %v7129_v29 = vld [vmem:[#allocation20_spill] sm:$0xff] }
 0x32c   : > { %v6975_v21 = vpop.f32.mrf.mxu1  ;;  %v4939_v31 = vpop.f32.mrf.mxu0  ;;  %v4277_v7 = vmul.f32 %v4080_v3, %v4080_v3  ;;  %v3704_v5 = vadd.f32 %v6951_v9, %v7128_v13  ;;  %v3712_v33 = vadd.f32 %v6967_v35, %v7129_v29 }
 0x32d   : > { %v4207_v56 = vadd.f32 %v4206_v45, %v4080_v3  ;;  %v4339_v2 = vadd.f32 %v4338_v63, %v4276_v53  ;;  %v4081_v58 = vmax.f32 %v3961_v60, 0.0  ;;  %4147 = vst [vmem:[%s6813_s14 + $0x178] sm:$0xff] %v4083_v57  ;;  %v3982_v20 = vadd.f32 %v4939_v31, %v3693_v43 }
 0x32e   : > { %v3718_v4 = vpop.f32.mrf.mxu1  ;;  %v3973_v38 = vpop.f32.mrf.mxu0  ;;  %v4280_v34 = vmul.f32 %v4083_v57, %v4083_v57 }
 0x32f   : > { %v4340_v6 = vadd.f32 %v4339_v2, %v4277_v7  ;;  %4145 = vst [vmem:[%s6813_s14 + $0x168] sm:$0xff] %v4081_v58  ;;  %v4208_v59 = vadd.f32 %v4207_v56, %v4081_v58  ;;  %v4278_v39 = vmul.f32 %v4081_v58, %v4081_v58  ;;  %v3974_v1 = vadd.f32 %v3973_v38, %v3685_v15  ;;  %v7130_v58 = vld [vmem:[#allocation21_spill] sm:$0xff] }
 0x330   : > { %v4086_v54 = vmax.f32 %v3982_v20, 0.0  ;;  %v6983_v8 = vpop.f32.mrf.mxu1  ;;  %v4940_v28 = vpop.f32.mrf.mxu0  ;;  %v3717_v35 = vadd.f32 %v6975_v21, %v7130_v58  ;;  %v7131_v20 = vld [vmem:[#allocation11_spill] sm:$0xff]  ;;  %v7132_v21 = vld [vmem:[#allocation2_spill] sm:$0xff] }
 0x331   : > { %v4209_v40 = vadd.f32 %v4208_v59, %v4082_v10  ;;  %v4341_v44 = vadd.f32 %v4340_v6, %v4278_v39  ;;  %v4084_v27 = vmax.f32 %v3974_v1, 0.0  ;;  %v3985_v30 = vadd.f32 %v4940_v28, %v3696_v37 }
 0x332   : > { %4150 = vst [vmem:[%s6813_s14 + $0x190] sm:$0xff] %v4086_v54  ;;  %v3721_v55 = vpop.f32.mrf.mxu1  ;;  %v3976_v16 = vpop.f32.mrf.mxu0  ;;  %v4283_v60 = vmul.f32 %v4086_v54, %v4086_v54 }
 0x333   : > { %v4342_v19 = vadd.f32 %v4341_v44, %v4279_v25  ;;  %4148 = vst [vmem:[%s6813_s14 + $0x180] sm:$0xff] %v4084_v27  ;;  %v4210_v49 = vadd.f32 %v4209_v40, %v4083_v57  ;;  %v3977_v42 = vadd.f32 %v3976_v16, %v3688_v52  ;;  %v4087_v17 = vmax.f32 %v3985_v30, 0.0  ;;  %v7133_v30 = vld [vmem:[#allocation3_spill] sm:$0xff] }
 0x334   : > { %v3724_v61 = vpop.f32.mrf.mxu1  ;;  %v4943_v23 = vpop.f32.mrf.mxu0  ;;  %v4281_v22 = vmul.f32 %v4084_v27, %v4084_v27 }
 0x335   : > { %v4211_v12 = vadd.f32 %v4210_v49, %v4084_v27  ;;  %v4343_v18 = vadd.f32 %v4342_v19, %v4280_v34  ;;  %v4085_v14 = vmax.f32 %v3977_v42, 0.0  ;;  %4151 = vst [vmem:[%s6813_s14 + $0x198] sm:$0xff] %v4087_v17  ;;  %v3998_v10 = vadd.f32 %v4943_v23, %v3709_v11 }
 0x336   : > { %v3726_v32 = vpop.f32.mrf.mxu1  ;;  %v3989_v36 = vpop.f32.mrf.mxu0  ;;  %v4284_v56 = vmul.f32 %v4087_v17, %v4087_v17  ;;  %v3725_v4 = vadd.f32 %v3724_v61, %v7131_v20  ;;  %v3720_v27 = vadd.f32 %v6983_v8, %v7132_v21 }
 0x337   : > { %v4344_v26 = vadd.f32 %v4343_v18, %v4281_v22  ;;  %4149 = vst [vmem:[%s6813_s14 + $0x188] sm:$0xff] %v4085_v14  ;;  %v4212_v50 = vadd.f32 %v4211_v12, %v4085_v14  ;;  %v4282_v3 = vmul.f32 %v4085_v14, %v4085_v14  ;;  %v3990_v46 = vadd.f32 %v3989_v36, %v3701_v47 }
 0x338   : > { %v4090_v53 = vmax.f32 %v3998_v10, 0.0  ;;  %v3727_v63 = vpop.f32.mrf.mxu1  ;;  %v4944_v45 = vpop.f32.mrf.mxu0 }
 0x339   : > { %v4213_v0 = vadd.f32 %v4212_v50, %v4086_v54  ;;  %v4345_v15 = vadd.f32 %v4344_v26, %v4282_v3  ;;  %v4088_v41 = vmax.f32 %v3990_v46, 0.0  ;;  %v4001_v43 = vadd.f32 %v4944_v45, %v3712_v33  ;;  %v7134_v50 = vld [vmem:[#allocation13_spill] sm:$0xff]  ;;  %v7135_v46 = vld [vmem:[#allocation12_spill] sm:$0xff] }
 0x33a   : > { %4154 = vst [vmem:[%s6813_s14 + $0x1b0] sm:$0xff] %v4090_v53  ;;  %v3729_v57 = vpop.f32.mrf.mxu1  ;;  %v3992_v31 = vpop.f32.mrf.mxu0  ;;  %v3728_v55 = vadd.f32 %v3727_v63, %v7133_v30  ;;  %v4287_v49 = vmul.f32 %v4090_v53, %v4090_v53 }
 0x33b   : > { %v4346_v7 = vadd.f32 %v4345_v15, %v4283_v60  ;;  %4152 = vst [vmem:[%s6813_s14 + $0x1a0] sm:$0xff] %v4088_v41  ;;  %v4214_v2 = vadd.f32 %v4213_v0, %v4087_v17  ;;  %v3993_v9 = vadd.f32 %v3992_v31, %v3704_v5  ;;  %v4091_v38 = vmax.f32 %v4001_v43, 0.0 }
 0x33c   : > { %v3732_v6 = vpop.f32.mrf.mxu1  ;;  %v4947_v59 = vpop.f32.mrf.mxu0  ;;  %v4285_v1 = vmul.f32 %v4088_v41, %v4088_v41 }
 0x33d   : > { %v4215_v39 = vadd.f32 %v4214_v2, %v4088_v41  ;;  %v4347_v24 = vadd.f32 %v4346_v7, %v4284_v56  ;;  %v4089_v52 = vmax.f32 %v3993_v9, 0.0  ;;  %4155 = vst [vmem:[%s6813_s14 + $0x1b8] sm:$0xff] %v4091_v38  ;;  %v4014_v51 = vadd.f32 %v4947_v59, %v3725_v4  ;;  %v7136_v56 = vld [vmem:[#allocation5_spill] sm:$0xff]  ;;  %v7137_v2 = vld [vmem:[#allocation4_spill] sm:$0xff] }
 0x33e   : > { %v3734_v37 = vpop.f32.mrf.mxu1  ;;  %v4005_v54 = vpop.f32.mrf.mxu0  ;;  %v4288_v61 = vmul.f32 %v4091_v38, %v4091_v38  ;;  %v3733_v13 = vadd.f32 %v3732_v6, %v7135_v46 }
 0x33f   : > { %v4348_v28 = vadd.f32 %v4347_v24, %v4285_v1  ;;  %4153 = vst [vmem:[%s6813_s14 + $0x1a8] sm:$0xff] %v4089_v52  ;;  %v4216_v25 = vadd.f32 %v4215_v39, %v4089_v52  ;;  %v4286_v40 = vmul.f32 %v4089_v52, %v4089_v52  ;;  %v4006_v44 = vadd.f32 %v4005_v54, %v3717_v35 }
 0x340   : > { %v4094_v16 = vmax.f32 %v4014_v51, 0.0  ;;  %v3735_v34 = vpop.f32.mrf.mxu1  ;;  %v4948_v19 = vpop.f32.mrf.mxu0 }
 0x341   : > { %v4217_v42 = vadd.f32 %v4216_v25, %v4090_v53  ;;  %v4349_v48 = vadd.f32 %v4348_v28, %v4286_v40  ;;  %v4092_v47 = vmax.f32 %v4006_v44, 0.0  ;;  %v4017_v62 = vadd.f32 %v4948_v19, %v3728_v55 }
 0x342   : > { %4158 = vst [vmem:[%s6813_s14 + $0x1d0] sm:$0xff] %v4094_v16  ;;  %v3737_v11 = vpop.f32.mrf.mxu1  ;;  %v4008_v17 = vpop.f32.mrf.mxu0  ;;  %v4291_v60 = vmul.f32 %v4094_v16, %v4094_v16  ;;  %v3736_v9 = vadd.f32 %v3735_v34, %v7137_v2 }
 0x343   : > { %v4350_v23 = vadd.f32 %v4349_v48, %v4287_v49  ;;  %4156 = vst [vmem:[%s6813_s14 + $0x1c0] sm:$0xff] %v4092_v47  ;;  %v4218_v12 = vadd.f32 %v4217_v42, %v4091_v38  ;;  %v4009_v8 = vadd.f32 %v4008_v17, %v3720_v27  ;;  %v4289_v22 = vmul.f32 %v4092_v47, %v4092_v47 }
 0x344   : > { %v4095_v18 = vmax.f32 %v4017_v62, 0.0  ;;  %v3740_v14 = vpop.f32.mrf.mxu1  ;;  %v4951_v10 = vpop.f32.mrf.mxu0  ;;  %v4366_v42 = vlaneseq }
 0x345   : > { %v4219_v32 = vadd.f32 %v4218_v12, %v4092_v47  ;;  %v4351_v36 = vadd.f32 %v4350_v23, %v4288_v61  ;;  %v4093_v26 = vmax.f32 %v4009_v8, 0.0  ;;  %v3741_v3 = vadd.f32 %v3740_v14, %v7134_v50 }
 0x346   : > { %4159 = vst [vmem:[%s6813_s14 + $0x1d8] sm:$0xff] %v4095_v18  ;;  %v3742_v5 = vpop.f32.mrf.mxu1  ;;  %v4021_v29 = vpop.f32.mrf.mxu0  ;;  %v4292_v4 = vmul.f32 %v4095_v18, %v4095_v18  ;;  %v4367_v17 = vshrl.u32 %v4366_v42, 7 }
 0x347   : > { %v4352_v33 = vadd.f32 %v4351_v36, %v4289_v22  ;;  %4157 = vst [vmem:[%s6813_s14 + $0x1c8] sm:$0xff] %v4093_v26  ;;  %v4220_v53 = vadd.f32 %v4219_v32, %v4093_v26  ;;  %v4290_v63 = vmul.f32 %v4093_v26, %v4093_v26  ;;  %v4030_v45 = vadd.f32 %v4951_v10, %v3741_v3 }
 0x348   : > { %v4022_v0 = vadd.f32 %v4021_v29, %v3733_v13  ;;  %v3743_v15 = vpop.f32.mrf.mxu1  ;;  %v4952_v41 = vpop.f32.mrf.mxu0  ;;  %vm4369_vm0 = vcmp.eq.s32.totalorder %v4367_v17, 1  ;;  %vm4368_vm1 = vcmp.eq.s32.totalorder %v4367_v17, 0 }
 0x349   : > { %v4221_v43 = vadd.f32 %v4220_v53, %v4094_v16  ;;  %v4353_v57 = vadd.f32 %v4352_v33, %v4290_v63  ;;  %v4098_v31 = vmax.f32 %v4030_v45, 0.0  ;;  %v3744_v7 = vadd.f32 %v3743_v15, %v7136_v56 }
 0x34a   : > { %v4096_v58 = vmax.f32 %v4022_v0, 0.0  ;;  %v3745_v35 = vpop.f32.mrf.mxu1  ;;  %v4024_v20 = vpop.f32.mrf.mxu0 }
 0x34b   : > { %v4354_v38 = vadd.f32 %v4353_v57, %v4291_v60  ;;  %4162 = vst [vmem:[%s6813_s14 + $0x1f0] sm:$0xff] %v4098_v31  ;;  %v4222_v6 = vadd.f32 %v4221_v43, %v4095_v18  ;;  %v4033_v59 = vadd.f32 %v4952_v41, %v3744_v7  ;;  %v4025_v39 = vadd.f32 %v4024_v20, %v3736_v9 }
 0x34c   : > { %4160 = vst [vmem:[%s6813_s14 + $0x1e0] sm:$0xff] %v4096_v58  ;;  %v4293_v24 = vmul.f32 %v4096_v58, %v4096_v58  ;;  %v4295_v40 = vmul.f32 %v4098_v31, %v4098_v31 }
 0x34d   : > { %v4223_v1 = vadd.f32 %v4222_v6, %v4096_v58  ;;  %v4355_v52 = vadd.f32 %v4354_v38, %v4292_v4  ;;  %v4099_v51 = vmax.f32 %v4033_v59, 0.0  ;;  %v4097_v37 = vmax.f32 %v4025_v39, 0.0 }
 0x34f   : > { %v4356_v54 = vadd.f32 %v4355_v52, %v4293_v24  ;;  %4163 = vst [vmem:[%s6813_s14 + $0x1f8] sm:$0xff] %v4099_v51  ;;  %4161 = vst [vmem:[%s6813_s14 + $0x1e8] sm:$0xff] %v4097_v37  ;;  %v4224_v28 = vadd.f32 %v4223_v1, %v4097_v37  ;;  %v4294_v25 = vmul.f32 %v4097_v37, %v4097_v37 }
 0x350   : > { %v4296_v27 = vmul.f32 %v4099_v51, %v4099_v51 }
 0x351   : > { %v4225_v44 = vadd.f32 %v4224_v28, %v4098_v31  ;;  %v4357_v21 = vadd.f32 %v4356_v54, %v4294_v25 }
 0x353   : > { %v4226_v30 = vadd.f32 %v4225_v44, %v4099_v51  ;;  %v4358_v55 = vadd.f32 %v4357_v21, %v4295_v40 }
 0x355   : > { %v4227_v16 = vrot.slane %v4226_v30, 4  ;;  %v4359_v34 = vadd.f32 %v4358_v55, %v4296_v27 }
 0x357   : > { %v4228_v19 = vadd.f32 %v4227_v16, %v4226_v30  ;;  %v4360_v49 = vrot.slane %v4359_v34, 4 }
 0x359   : > { %v4229_v48 = vrot.slane %v4228_v19, 2  ;;  %v4361_v47 = vadd.f32 %v4360_v49, %v4359_v34 }
 0x35b   : > { %v4230_v62 = vadd.f32 %v4229_v48, %v4228_v19  ;;  %v4362_v11 = vrot.slane %v4361_v47, 2 }
 0x35d   : > { %v4363_v61 = vadd.f32 %v4362_v11, %v4361_v47  ;;  %v4231_v23 = vrot.slane %v4230_v62, 1 }
 0x35f   : > { %v4364_v12 = vrot.slane %v4363_v61, 1  ;;  %v4232_v22 = vadd.f32 %v4231_v23, %v4230_v62 }
 0x361   : > { %v4365_v8 = vadd.f32 %v4364_v12, %v4363_v61 }
 0x363   : > { %v4370_v18 = vsel %vm4369_vm0, %v4365_v8, 0.0 }
 0x364   : > { %v4371_v14 = vsel %vm4368_vm1, %v4232_v22, %v4370_v18 }
 0x365   : > { %4372 = vst [vmem:[%s214_s20] sm:$0xff] %v4371_v14 }
 0x366 PF: > { %s15_s15 = sadd.s32 1, %s5490_s15  }
 0x367   : > { %p12_p5 = scmp.ge.s32.totalorder %s15_s15, 4  }
 0x369   :  { %14 = sbr.rel (!%p12_p5) target bundleno = 1 (0x1), region = 74 }

// kernel: decoder_forward.15
= control target key start
LH: loop header
LB: loop body
LE: loop exit
PB: predicated region body
PF: predicated region fallthrough
CT: control target
= control target key end

     0   :  { %s3577_s15 = smov 0   ;;  %s4462_s0 = inlined_call_operand.vmem [shape: bf16[1024,576], index: 0, kind: input, shape index: {}]   ;;  %s4463_s1 = inlined_call_operand.vmem [shape: bf16[576,128], index: 1, kind: input, shape index: {}]   ;;  %s4464_s2 = inlined_call_operand.vmem [shape: f32[1,128], index: 2, kind: input, shape index: {}]   ;;  %s4465_s3 = inlined_call_operand.vmem [shape: f32[1024,128], index: 3, kind: output, shape index: {0}]   ;;  %s4466_s4 = inlined_call_operand.vmem [shape: f32[16,128], index: 4, kind: output, shape index: {1}]  }
   0x1 LB: > { %s3583_s16 = sadd.s32 4294967295, %s3549_s15   ;;  %p2895_p0 = scmp.ge.s32.totalorder %s3549_s15, 1  ;;  %s3549_s15 = sphi %s3577_s15, %s15_s15  }
   0x2   : > { %p167_p1 = scmp.lt.s32.totalorder %s3549_s15, 3 }
   0x4   : > { %p168_p2 = pnand %p2895_p0, %p167_p1 }
   0x6   : > { %171 = sbr.rel (%p168_p2) target bundleno = 614 (0x266), region = 32 }
   0xb   : > { %v3282_v0 = vld [vmem:[%s4463_s1 + $0x38] sm:$0xff]   ;;  %v3551_v1 = vmov 0   ;;  %s2896_s19 = sshll.u32 %s3583_s16, 6  ;;  %v3283_v2 = vld [vmem:[%s4463_s1 + $0x30] sm:$0xff]   ;;  %v3284_v3 = vld [vmem:[%s4463_s1 + $0x28] sm:$0xff]   ;;  %vm1503_vm0 = vcmask 523264  }
   0xc   : > { %1600 = vmatprep.subr.bf16.mxu0 %v3551_v1  ;;  %3240 = vmatprep.subr.bf16.mxu1 %v3551_v1  ;;  %p199_p3 = scmp.lt.s32.totalorder %s2896_s19, 127  ;;  %v3285_v4 = vld [vmem:[%s4463_s1 + $0x20] sm:$0xff]   ;;  %v3286_v5 = vld [vmem:[%s4463_s1 + $0x18] sm:$0xff]   ;;  %v3287_v7 = vld [vmem:[%s4463_s1 + $0x10] sm:$0xff]   ;;  %p211_p4 = scmp.lt.s32.totalorder %s3583_s16, 1 }
   0xd   : > { %1601 = vmatpush1.bf16.msra.mxu0 %v3282_v0  ;;  %3256 = vmatpush1.bf16.msra.mxu1 %v3282_v0  ;;  %v3288_v9 = vld [vmem:[%s4463_s1 + $0x8] sm:$0xff]   ;;  %v3289_v10 = vld [vmem:[%s4463_s1] sm:$0xff]   ;;  %v3290_v11 = vld [vmem:[%s4463_s1 + $0x78] sm:$0xff]  }
   0xe   : > { %1602 = vmatprep.subr.bf16.mxu0 %v3551_v1  ;;  %3241 = vmatprep.subr.bf16.mxu1 %v3551_v1  ;;  %s4510_s19 = smov (!%p199_p3, %s2896_s19), 127  ;;  %v3291_v12 = vld [vmem:[%s4463_s1 + $0x70] sm:$0xff]   ;;  %v3292_v13 = vld [vmem:[%s4463_s1 + $0x68] sm:$0xff]   ;;  %v3293_v14 = vld [vmem:[%s4463_s1 + $0x60] sm:$0xff]   ;;  %s4512_s16 = smov (!%p211_p4, %s3583_s16), 1 }
   0xf   : > { %s3272_s26 = smul.u32 20, %s4510_s19  ;;  %v3294_v15 = vld [vmem:[%s4463_s1 + $0x58] sm:$0xff]   ;;  %v3295_v16 = vld [vmem:[%s4463_s1 + $0x50] sm:$0xff]   ;;  %v3296_v17 = vld [vmem:[%s4463_s1 + $0x48] sm:$0xff]   ;;  %s2900_s8 = sshll.u32 %s4512_s16, 3 }
  0x10   : > { %v3297_v18 = vld [vmem:[%s4463_s1 + $0x40] sm:$0xff]   ;;  %v3304_v19 = vld [vmem:[%s4463_s1 + $0x118] sm:$0xff]   ;;  %v3353_v25 = vld [vmem:[%s4463_s1 + $0x110] sm:$0xff]   ;;  %s214_s11 = scalar_lea.vmem %s4466_s4, %s2900_s8 }
  0x11   : > { %1603 = vmatpush1.bf16.msra.mxu0 %v3283_v2  ;;  %3257 = vmatpush1.bf16.msra.mxu1 %v3283_v2  ;;  %s3617_s5 = scalar_lea.vmem %s4462_s0, %s3272_s26  ;;  %v3305_v22 = vld [vmem:[%s4463_s1 + $0xb8] sm:$0xff]   ;;  %v3306_v26 = vld [vmem:[%s4463_s1 + $0xb0] sm:$0xff]   ;;  %v3313_v29 = vld [vmem:[%s4463_s1 + $0xa8] sm:$0xff]  }
  0x12   : > { %1604 = vmatprep.subr.bf16.mxu0 %v3551_v1  ;;  %3242 = vmatprep.subr.bf16.mxu1 %v3551_v1  ;;  %v3300_v6 = vld [vmem:[%s3617_s5 + $0x4] ss:$20 sps:$4 sm:$0xff]   ;;  %v3298_v20 = vld [vmem:[%s3617_s5] ss:$20 sps:$4 sm:$0xff]   ;;  %v3311_v27 = vld [vmem:[%s3617_s5 + $0x28] ss:$20 sps:$4 sm:$0xff]  }
  0x13   : > { %v3303_v8 = vld [vmem:[%s3617_s5 + $0x3c4] ss:$20 sps:$4 sm:$0xff]   ;;  %1632 = vmatprep.mubr.bf16.mxu0 %v3300_v6  ;;  %v3301_v21 = vld [vmem:[%s3617_s5 + $0x3c0] ss:$20 sps:$4 sm:$0xff]   ;;  %v3312_v28 = vld [vmem:[%s3617_s5 + $0x3e8] ss:$20 sps:$4 sm:$0xff]  }
  0x14   : > { %1824 = vmatprep.mubr.bf16.mxu1 %v3303_v8  ;;  %v3307_v23 = vld [vmem:[%s3617_s5 + $0x2c] ss:$20 sps:$4 sm:$0xff]   ;;  %v3315_v31 = vld [vmem:[%s3617_s5 + $0x54] ss:$20 sps:$4 sm:$0xff]   ;;  %v3319_v34 = vld [vmem:[%s3617_s5 + $0x50] ss:$20 sps:$4 sm:$0xff]  }
  0x15   : > { %1605 = vmatpush1.bf16.msra.mxu0 %v3284_v3  ;;  %3258 = vmatpush1.bf16.msra.mxu1 %v3284_v3  ;;  %v3309_v24 = vld [vmem:[%s3617_s5 + $0x3ec] ss:$20 sps:$4 sm:$0xff]   ;;  %v3317_v32 = vld [vmem:[%s3617_s5 + $0x414] ss:$20 sps:$4 sm:$0xff]   ;;  %v3320_v35 = vld [vmem:[%s3617_s5 + $0x410] ss:$20 sps:$4 sm:$0xff]  }
  0x16   : > { %1606 = vmatprep.subr.bf16.mxu0 %v3551_v1  ;;  %3243 = vmatprep.subr.bf16.mxu1 %v3551_v1  ;;  %v3394_v30 = vld [vmem:[%s4463_s1 + $0x108] sm:$0xff]   ;;  %v3314_v33 = vld [vmem:[%s4463_s1 + $0xa0] sm:$0xff]   ;;  %v3321_v36 = vld [vmem:[%s4463_s1 + $0x98] sm:$0xff]  }
  0x17   : > { %v3323_v37 = vld [vmem:[%s3617_s5 + $0x7c] ss:$20 sps:$4 sm:$0xff]   ;;  %v3327_v40 = vld [vmem:[%s3617_s5 + $0x78] ss:$20 sps:$4 sm:$0xff]   ;;  %v3431_v44 = vld [vmem:[%s4463_s1 + $0x100] sm:$0xff]  }
  0x18   : > { %v3325_v38 = vld [vmem:[%s3617_s5 + $0x43c] ss:$20 sps:$4 sm:$0xff]   ;;  %v3328_v41 = vld [vmem:[%s3617_s5 + $0x438] ss:$20 sps:$4 sm:$0xff]   ;;  %v3330_v46 = vld [vmem:[%s4463_s1 + $0x80] sm:$0xff]  }
  0x19   : > { %1607 = vmatpush1.bf16.msra.mxu0 %v3285_v4  ;;  %3259 = vmatpush1.bf16.msra.mxu1 %v3285_v4  ;;  %v3322_v39 = vld [vmem:[%s4463_s1 + $0x90] sm:$0xff]   ;;  %v3329_v42 = vld [vmem:[%s4463_s1 + $0x88] sm:$0xff]   ;;  %v3331_v43 = vld [vmem:[%s3617_s5 + $0xa4] ss:$20 sps:$4 sm:$0xff]  }
  0x1a   : > { %1608 = vmatprep.subr.bf16.mxu0 %v3551_v1  ;;  %3244 = vmatprep.subr.bf16.mxu1 %v3551_v1  ;;  %v3333_v45 = vld [vmem:[%s3617_s5 + $0x464] ss:$20 sps:$4 sm:$0xff]   ;;  %v3335_v47 = vld [vmem:[%s3617_s5 + $0xa0] ss:$20 sps:$4 sm:$0xff]   ;;  %v3343_v53 = vld [vmem:[%s3617_s5 + $0xc8] ss:$20 sps:$4 sm:$0xff]  }
  0x1b   : > { %v3336_v48 = vld [vmem:[%s3617_s5 + $0x460] ss:$20 sps:$4 sm:$0xff]   ;;  %v3337_v49 = vld [vmem:[%s4463_s1 + $0xf8] sm:$0xff]   ;;  %v3345_v55 = vld [vmem:[%s4463_s1 + $0xe8] sm:$0xff]  }
  0x1c   : > { %v3339_v50 = vld [vmem:[%s3617_s5 + $0xcc] ss:$20 sps:$4 sm:$0xff]   ;;  %v3338_v52 = vld [vmem:[%s4463_s1 + $0xf0] sm:$0xff]   ;;  %v3344_v54 = vld [vmem:[%s3617_s5 + $0x488] ss:$20 sps:$4 sm:$0xff]  }
  0x1d   : > { %1609 = vmatpush1.bf16.msra.mxu0 %v3286_v5  ;;  %3260 = vmatpush1.bf16.msra.mxu1 %v3286_v5  ;;  %v3341_v51 = vld [vmem:[%s3617_s5 + $0x48c] ss:$20 sps:$4 sm:$0xff]   ;;  %v3347_v56 = vld [vmem:[%s3617_s5 + $0xf4] ss:$20 sps:$4 sm:$0xff]   ;;  %v3351_v59 = vld [vmem:[%s3617_s5 + $0xf0] ss:$20 sps:$4 sm:$0xff]  }
  0x1e   : > { %1610 = vmatprep.subr.bf16.mxu0 %v3551_v1  ;;  %3245 = vmatprep.subr.bf16.mxu1 %v3551_v1  ;;  %v3349_v57 = vld [vmem:[%s3617_s5 + $0x4b4] ss:$20 sps:$4 sm:$0xff]   ;;  %v3346_v58 = vld [vmem:[%s4463_s1 + $0xe0] sm:$0xff]   ;;  %v3354_v61 = vld [vmem:[%s4463_s1 + $0xd8] sm:$0xff]  }
  0x1f   : > { %v3352_v60 = vld [vmem:[%s3617_s5 + $0x4b0] ss:$20 sps:$4 sm:$0xff]   ;;  %v3360_v2 = vld [vmem:[%s3617_s5 + $0x118] ss:$20 sps:$4 sm:$0xff]   ;;  %v3366_v8 = vld [vmem:[%s3617_s5 + $0x8] ss:$20 sps:$4 sm:$0xff]  }
  0x20   : > { %v3356_v62 = vld [vmem:[%s3617_s5 + $0x11c] ss:$20 sps:$4 sm:$0xff]   ;;  %v3361_v3 = vld [vmem:[%s3617_s5 + $0x4d8] ss:$20 sps:$4 sm:$0xff]  }
  0x21   : > { %1611 = vmatpush1.bf16.msra.mxu0 %v3287_v7  ;;  %3261 = vmatpush1.bf16.msra.mxu1 %v3287_v7  ;;  %v3358_v63 = vld [vmem:[%s3617_s5 + $0x4dc] ss:$20 sps:$4 sm:$0xff]   ;;  %v3362_v4 = vld [vmem:[%s4463_s1 + $0xc8] sm:$0xff]   ;;  %v3364_v5 = vld [vmem:[%s3617_s5 + $0x144] ss:$20 sps:$4 sm:$0xff]  }
  0x22   : > { %1612 = vmatprep.subr.bf16.mxu0 %v3551_v1  ;;  %3246 = vmatprep.subr.bf16.mxu1 %v3551_v1  ;;  %v3355_v0 = vld [vmem:[%s4463_s1 + $0xd0] sm:$0xff]   ;;  %v3368_v6 = vld [vmem:[%s3617_s5 + $0xc] ss:$20 sps:$4 sm:$0xff]  }
  0x23   : > { %v3363_v7 = vld [vmem:[%s4463_s1 + $0xc0] sm:$0xff]  }
  0x25   : > { %1613 = vmatpush1.bf16.msra.mxu0 %v3288_v9  ;;  %3262 = vmatpush1.bf16.msra.mxu1 %v3288_v9  ;;  %v3369_v9 = vld [vmem:[%s3617_s5 + $0x140] ss:$20 sps:$4 sm:$0xff]  }
  0x26   : > { %1614 = vmatprep.subr.bf16.mxu0 %v3551_v1  ;;  %3247 = vmatprep.subr.bf16.mxu1 %v3551_v1 }
  0x29   : > { %1615 = vmatpush1.bf16.msra.mxu0 %v3289_v10  ;;  %3263 = vmatpush1.bf16.msra.mxu1 %v3289_v10  ;;  %v3370_v10 = vld [vmem:[%s3617_s5 + $0x16c] ss:$20 sps:$4 sm:$0xff]  }
  0x2a   : > { %1616 = vmatprep.subr.bf16.mxu0 %v3551_v1  ;;  %3248 = vmatprep.subr.bf16.mxu1 %v3551_v1 }
  0x2d   : > { %1617 = vmatpush2.bf16.msra.mxu0 %v3290_v11  ;;  %3264 = vmatpush2.bf16.msra.mxu1 %v3290_v11  ;;  %v3372_v11 = vld [vmem:[%s3617_s5 + $0x34] ss:$20 sps:$4 sm:$0xff]  }
  0x2e   : > { %1618 = vmatprep.subr.bf16.mxu0 %v3551_v1  ;;  %3249 = vmatprep.subr.bf16.mxu1 %v3551_v1 }
  0x31   : > { %1619 = vmatpush2.bf16.msra.mxu0 %v3291_v12  ;;  %3265 = vmatpush2.bf16.msra.mxu1 %v3291_v12  ;;  %v3374_v12 = vld [vmem:[%s3617_s5 + $0x168] ss:$20 sps:$4 sm:$0xff]  }
  0x32   : > { %1620 = vmatprep.subr.bf16.mxu0 %v3551_v1  ;;  %3250 = vmatprep.subr.bf16.mxu1 %v3551_v1 }
  0x35   : > { %1621 = vmatpush2.bf16.msra.mxu0 %v3292_v13  ;;  %3266 = vmatpush2.bf16.msra.mxu1 %v3292_v13  ;;  %v3375_v13 = vld [vmem:[%s3617_s5 + $0x30] ss:$20 sps:$4 sm:$0xff]  }
  0x36   : > { %1622 = vmatprep.subr.bf16.mxu0 %v3551_v1  ;;  %3251 = vmatprep.subr.bf16.mxu1 %v3551_v1 }
  0x39   : > { %1623 = vmatpush2.bf16.msra.mxu0 %v3293_v14  ;;  %3267 = vmatpush2.bf16.msra.mxu1 %v3293_v14  ;;  %v3376_v14 = vld [vmem:[%s3617_s5 + $0x194] ss:$20 sps:$4 sm:$0xff]  }
  0x3a   : > { %1624 = vmatprep.subr.bf16.mxu0 %v3551_v1  ;;  %3252 = vmatprep.subr.bf16.mxu1 %v3551_v1 }
  0x3d   : > { %1625 = vmatpush2.bf16.msra.mxu0 %v3294_v15  ;;  %3268 = vmatpush2.bf16.msra.mxu1 %v3294_v15  ;;  %v3380_v15 = vld [vmem:[%s3617_s5 + $0x190] ss:$20 sps:$4 sm:$0xff]  }
  0x3e   : > { %1626 = vmatprep.subr.bf16.mxu0 %v3551_v1  ;;  %3253 = vmatprep.subr.bf16.mxu1 %v3551_v1 }
  0x41   : > { %1627 = vmatpush2.bf16.msra.mxu0 %v3295_v16  ;;  %3269 = vmatpush2.bf16.msra.mxu1 %v3295_v16  ;;  %v3381_v16 = vld [vmem:[%s3617_s5 + $0x58] ss:$20 sps:$4 sm:$0xff]  }
  0x42   : > { %1628 = vmatprep.subr.bf16.mxu0 %v3551_v1  ;;  %3254 = vmatprep.subr.bf16.mxu1 %v3551_v1 }
  0x45   : > { %1629 = vmatpush2.bf16.msra.mxu0 %v3296_v17  ;;  %3270 = vmatpush2.bf16.msra.mxu1 %v3296_v17  ;;  %v3382_v17 = vld [vmem:[%s3617_s5 + $0x1bc] ss:$20 sps:$4 sm:$0xff]  }
  0x46   : > { %1630 = vmatprep.subr.bf16.mxu0 %v3551_v1  ;;  %3255 = vmatprep.subr.bf16.mxu1 %v3551_v1 }
  0x49   : > { %1631 = vmatpush2.bf16.msra.mxu0 %v3297_v18  ;;  %3271 = vmatpush2.bf16.msra.mxu1 %v3297_v18  ;;  %v3384_v18 = vld [vmem:[%s3617_s5 + $0x84] ss:$20 sps:$4 sm:$0xff]  }
  0x4a   : > { %1889 = vmatprep.subr.bf16.mxu1 %v3551_v1  ;;  %3168 = vmatprep.subr.bf16.mxu0 %v3304_v19 }
  0x4c   : > { %1633 = vmatmul.mubr.bf16.vlgmr.msra.gmra.mxu0 %v3298_v20  ;;  %1825 = vmatmul.mubr.bf16.vlgmr.msra.gmra.mxu1 %v3301_v21  ;;  %v3387_v20 = vld [vmem:[%s3617_s5 + $0x80] ss:$20 sps:$4 sm:$0xff]   ;;  %v3388_v21 = vld [vmem:[%s3617_s5 + $0x1e4] ss:$20 sps:$4 sm:$0xff]  }
  0x4d   : > { %1890 = vmatpush1.bf16.msra.mxu1 %v3305_v22  ;;  %3169 = vmatpush3.bf16.msra.mxu0 %v3304_v19  ;;  %v3386_v19 = vld [vmem:[%s3617_s5 + $0x1b8] ss:$20 sps:$4 sm:$0xff]  }
  0x4e   : > { %1891 = vmatprep.subr.bf16.mxu1 %v3551_v1  ;;  %1640 = vmatprep.mubr.bf16.mxu0 %v3307_v23  ;;  %v3390_v22 = vld [vmem:[%s3617_s5 + $0xac] ss:$20 sps:$4 sm:$0xff]  }
  0x4f   : > { %1832 = vmatprep.mubr.bf16.mxu1 %v3309_v24  ;;  %3170 = vmatprep.subr.bf16.mxu0 %v3353_v25  ;;  %v3392_v23 = vld [vmem:[%s3617_s5 + $0x1e0] ss:$20 sps:$4 sm:$0xff]   ;;  %v3393_v24 = vld [vmem:[%s3617_s5 + $0xa8] ss:$20 sps:$4 sm:$0xff]  }
  0x51   : > { %1892 = vmatpush1.bf16.msra.mxu1 %v3306_v26  ;;  %3171 = vmatpush3.bf16.msra.mxu0 %v3353_v25  ;;  %v3395_v25 = vld [vmem:[%s3617_s5 + $0x20c] ss:$20 sps:$4 sm:$0xff]   ;;  %v3397_v26 = vld [vmem:[%s3617_s5 + $0xd4] ss:$20 sps:$4 sm:$0xff]  }
  0x52   : > { %1893 = vmatprep.subr.bf16.mxu1 %v3551_v1  ;;  %3172 = vmatprep.subr.bf16.mxu0 %v3394_v30 }
  0x54   : > { %1641 = vmatmul.mubr.bf16.gmra.mxu0 %v3311_v27  ;;  %1833 = vmatmul.mubr.bf16.gmra.mxu1 %v3312_v28  ;;  %v3399_v27 = vld [vmem:[%s3617_s5 + $0x208] ss:$20 sps:$4 sm:$0xff]   ;;  %v3400_v28 = vld [vmem:[%s3617_s5 + $0xd0] ss:$20 sps:$4 sm:$0xff]  }
  0x55   : > { %1894 = vmatpush1.bf16.msra.mxu1 %v3313_v29  ;;  %1648 = vmatprep.mubr.bf16.mxu0 %v3315_v31  ;;  %v3401_v29 = vld [vmem:[%s3617_s5 + $0x234] ss:$20 sps:$4 sm:$0xff]   ;;  %v3405_v31 = vld [vmem:[%s3617_s5 + $0x230] ss:$20 sps:$4 sm:$0xff]  }
  0x56   : > { %1895 = vmatprep.subr.bf16.mxu1 %v3551_v1  ;;  %1840 = vmatprep.mubr.bf16.mxu1 %v3317_v32  ;;  %v3406_v32 = vld [vmem:[%s3617_s5 + $0xf8] ss:$20 sps:$4 sm:$0xff]  }
  0x57   : > { %3173 = vmatpush3.bf16.msra.mxu0 %v3394_v30  ;;  %v3403_v30 = vld [vmem:[%s3617_s5 + $0xfc] ss:$20 sps:$4 sm:$0xff]  }
  0x58   : > { %3174 = vmatprep.subr.bf16.mxu0 %v3431_v44 }
  0x59   : > { %1896 = vmatpush1.bf16.msra.mxu1 %v3314_v33  ;;  %v3407_v33 = vld [vmem:[%s3617_s5 + $0x25c] ss:$20 sps:$4 sm:$0xff]  }
  0x5a   : > { %1897 = vmatprep.subr.bf16.mxu1 %v3551_v1 }
  0x5b   : > { %3175 = vmatpush3.bf16.msra.mxu0 %v3431_v44  ;;  %v3424_v44 = vld [vmem:[%s3617_s5 + $0x170] ss:$20 sps:$4 sm:$0xff]  }
  0x5c   : > { %1649 = vmatmul.mubr.bf16.gmra.mxu0 %v3319_v34  ;;  %1841 = vmatmul.mubr.bf16.gmra.mxu1 %v3320_v35  ;;  %v3409_v34 = vld [vmem:[%s3617_s5 + $0x124] ss:$20 sps:$4 sm:$0xff]  }
  0x5d   : > { %1898 = vmatpush1.bf16.msra.mxu1 %v3321_v36  ;;  %1656 = vmatprep.mubr.bf16.mxu0 %v3323_v37  ;;  %v3411_v35 = vld [vmem:[%s3617_s5 + $0x258] ss:$20 sps:$4 sm:$0xff]   ;;  %v3412_v36 = vld [vmem:[%s3617_s5 + $0x120] ss:$20 sps:$4 sm:$0xff]  }
  0x5e   : > { %1899 = vmatprep.subr.bf16.mxu1 %v3551_v1  ;;  %1848 = vmatprep.mubr.bf16.mxu1 %v3325_v38  ;;  %v3413_v37 = vld [vmem:[%s3617_s5 + $0x284] ss:$20 sps:$4 sm:$0xff]   ;;  %v3415_v38 = vld [vmem:[%s3617_s5 + $0x14c] ss:$20 sps:$4 sm:$0xff]  }
  0x61   : > { %1900 = vmatpush1.bf16.msra.mxu1 %v3322_v39  ;;  %v3417_v39 = vld [vmem:[%s3617_s5 + $0x280] ss:$20 sps:$4 sm:$0xff]  }
  0x62   : > { %1901 = vmatprep.subr.bf16.mxu1 %v3551_v1 }
  0x64   : > { %1657 = vmatmul.mubr.bf16.gmra.mxu0 %v3327_v40  ;;  %1849 = vmatmul.mubr.bf16.gmra.mxu1 %v3328_v41  ;;  %v3418_v40 = vld [vmem:[%s3617_s5 + $0x148] ss:$20 sps:$4 sm:$0xff]   ;;  %v3419_v41 = vld [vmem:[%s3617_s5 + $0x2ac] ss:$20 sps:$4 sm:$0xff]  }
  0x65   : > { %1902 = vmatpush1.bf16.msra.mxu1 %v3329_v42  ;;  %1664 = vmatprep.mubr.bf16.mxu0 %v3331_v43  ;;  %v3421_v42 = vld [vmem:[%s3617_s5 + $0x174] ss:$20 sps:$4 sm:$0xff]  }
  0x66   : > { %1903 = vmatprep.subr.bf16.mxu1 %v3551_v1  ;;  %1856 = vmatprep.mubr.bf16.mxu1 %v3333_v45  ;;  %v3423_v43 = vld [vmem:[%s3617_s5 + $0x2a8] ss:$20 sps:$4 sm:$0xff]  }
  0x67   : > { %v3425_v45 = vld [vmem:[%s3617_s5 + $0x2d4] ss:$20 sps:$4 sm:$0xff]  }
  0x69   : > { %1904 = vmatpush1.bf16.msra.mxu1 %v3330_v46  ;;  %v3427_v46 = vld [vmem:[%s3617_s5 + $0x19c] ss:$20 sps:$4 sm:$0xff]  }
  0x6a   : > { %1905 = vmatprep.subr.bf16.mxu1 %v3551_v1 }
  0x6c   : > { %1665 = vmatmul.mubr.bf16.gmra.mxu0 %v3335_v47  ;;  %1857 = vmatmul.mubr.bf16.gmra.mxu1 %v3336_v48  ;;  %v3429_v47 = vld [vmem:[%s3617_s5 + $0x2d0] ss:$20 sps:$4 sm:$0xff]   ;;  %v3430_v48 = vld [vmem:[%s3617_s5 + $0x198] ss:$20 sps:$4 sm:$0xff]  }
  0x6d   : > { %1906 = vmatpush2.bf16.msra.mxu1 %v3337_v49  ;;  %1672 = vmatprep.mubr.bf16.mxu0 %v3339_v50  ;;  %v3432_v49 = vld [vmem:[%s3617_s5 + $0x2fc] ss:$20 sps:$4 sm:$0xff]   ;;  %v3434_v50 = vld [vmem:[%s3617_s5 + $0x1c4] ss:$20 sps:$4 sm:$0xff]  }
  0x6e   : > { %1907 = vmatprep.subr.bf16.mxu1 %v3551_v1  ;;  %1864 = vmatprep.mubr.bf16.mxu1 %v3341_v51  ;;  %v3436_v51 = vld [vmem:[%s3617_s5 + $0x2f8] ss:$20 sps:$4 sm:$0xff]  }
  0x71   : > { %1908 = vmatpush2.bf16.msra.mxu1 %v3338_v52  ;;  %v3437_v52 = vld [vmem:[%s3617_s5 + $0x1c0] ss:$20 sps:$4 sm:$0xff]  }
  0x72   : > { %1909 = vmatprep.subr.bf16.mxu1 %v3551_v1 }
  0x74   : > { %1673 = vmatmul.mubr.bf16.gmra.mxu0 %v3343_v53  ;;  %1865 = vmatmul.mubr.bf16.gmra.mxu1 %v3344_v54  ;;  %v3438_v53 = vld [vmem:[%s3617_s5 + $0x324] ss:$20 sps:$4 sm:$0xff]   ;;  %v3440_v54 = vld [vmem:[%s3617_s5 + $0x1ec] ss:$20 sps:$4 sm:$0xff]  }
  0x75   : > { %1910 = vmatpush2.bf16.msra.mxu1 %v3345_v55  ;;  %1680 = vmatprep.mubr.bf16.mxu0 %v3347_v56  ;;  %v3442_v55 = vld [vmem:[%s3617_s5 + $0x320] ss:$20 sps:$4 sm:$0xff]   ;;  %v3443_v56 = vld [vmem:[%s3617_s5 + $0x1e8] ss:$20 sps:$4 sm:$0xff]  }
  0x76   : > { %1911 = vmatprep.subr.bf16.mxu1 %v3551_v1  ;;  %1872 = vmatprep.mubr.bf16.mxu1 %v3349_v57  ;;  %v3444_v57 = vld [vmem:[%s3617_s5 + $0x34c] ss:$20 sps:$4 sm:$0xff]  }
  0x79   : > { %1912 = vmatpush2.bf16.msra.mxu1 %v3346_v58  ;;  %v3446_v58 = vld [vmem:[%s3617_s5 + $0x214] ss:$20 sps:$4 sm:$0xff]  }
  0x7a   : > { %1913 = vmatprep.subr.bf16.mxu1 %v3551_v1 }
  0x7c   : > { %1681 = vmatmul.mubr.bf16.gmra.mxu0 %v3351_v59  ;;  %1873 = vmatmul.mubr.bf16.gmra.mxu1 %v3352_v60  ;;  %v3448_v59 = vld [vmem:[%s3617_s5 + $0x348] ss:$20 sps:$4 sm:$0xff]   ;;  %v3449_v60 = vld [vmem:[%s3617_s5 + $0x210] ss:$20 sps:$4 sm:$0xff]  }
  0x7d   : > { %1914 = vmatpush2.bf16.msra.mxu1 %v3354_v61  ;;  %1688 = vmatprep.mubr.bf16.mxu0 %v3356_v62  ;;  %v3450_v61 = vld [vmem:[%s3617_s5 + $0x374] ss:$20 sps:$4 sm:$0xff]   ;;  %v3452_v62 = vld [vmem:[%s3617_s5 + $0x23c] ss:$20 sps:$4 sm:$0xff]  }
  0x7e   : > { %1915 = vmatprep.subr.bf16.mxu1 %v3551_v1  ;;  %1880 = vmatprep.mubr.bf16.mxu1 %v3358_v63  ;;  %v3454_v63 = vld [vmem:[%s3617_s5 + $0x370] ss:$20 sps:$4 sm:$0xff]  }
  0x81   : > { %1916 = vmatpush2.bf16.msra.mxu1 %v3355_v0  ;;  %v3455_v0 = vld [vmem:[%s3617_s5 + $0x238] ss:$20 sps:$4 sm:$0xff]  }
  0x82   : > { %1917 = vmatprep.subr.bf16.mxu1 %v3551_v1 }
  0x84   : > { %1689 = vmatmul.mubr.bf16.gmra.mxu0 %v3360_v2  ;;  %1881 = vmatmul.mubr.bf16.gmra.mxu1 %v3361_v3  ;;  %v3456_v2 = vld [vmem:[%s3617_s5 + $0x39c] ss:$20 sps:$4 sm:$0xff]   ;;  %v3458_v3 = vld [vmem:[%s3617_s5 + $0x264] ss:$20 sps:$4 sm:$0xff]  }
  0x85   : > { %1918 = vmatpush2.bf16.msra.mxu1 %v3362_v4  ;;  %1696 = vmatprep.mubr.bf16.mxu0 %v3364_v5  ;;  %v3460_v4 = vld [vmem:[%s3617_s5 + $0x398] ss:$20 sps:$4 sm:$0xff]   ;;  %v3461_v5 = vld [vmem:[%s3617_s5 + $0x260] ss:$20 sps:$4 sm:$0xff]  }
  0x86   : > { %1919 = vmatprep.subr.bf16.mxu1 %v3551_v1  ;;  %1921 = vmatprep.mubr.bf16.mxu1 %v3368_v6  ;;  %v3378_v1 = vld [vmem:[%s3617_s5 + $0x5c] ss:$20 sps:$4 sm:$0xff]   ;;  %v3462_v6 = vld [vmem:[%s3617_s5 + $0x28c] ss:$20 sps:$4 sm:$0xff]  }
  0x89   : > { %1920 = vmatpush2.bf16.msra.mxu1 %v3363_v7  ;;  %v3464_v7 = vld [vmem:[%s3617_s5 + $0x10] ss:$20 sps:$4 sm:$0xff]  }
  0x8c   : > { %1697 = vmatmul.mubr.bf16.gmra.mxu0 %v3369_v9  ;;  %1922 = vmatmul.mubr.bf16.vlgmr.msra.gmra.mxu1 %v3366_v8  ;;  %v3465_v8 = vld [vmem:[%s3617_s5 + $0x288] ss:$20 sps:$4 sm:$0xff]   ;;  %v3466_v9 = vld [vmem:[%s3617_s5 + $0x38] ss:$20 sps:$4 sm:$0xff]  }
  0x8d   : > { %1704 = vmatprep.mubr.bf16.mxu0 %v3370_v10  ;;  %1929 = vmatprep.mubr.bf16.mxu1 %v3372_v11  ;;  %v3467_v10 = vld [vmem:[%s3617_s5 + $0x2b4] ss:$20 sps:$4 sm:$0xff]  }
  0x8e   : > { %v3469_v11 = vld [vmem:[%s3617_s5 + $0x60] ss:$20 sps:$4 sm:$0xff]  }
  0x94   : > { %1705 = vmatmul.mubr.bf16.gmra.mxu0 %v3374_v12  ;;  %1930 = vmatmul.mubr.bf16.gmra.mxu1 %v3375_v13 }
  0x95   : > { %1712 = vmatprep.mubr.bf16.mxu0 %v3376_v14  ;;  %1937 = vmatprep.mubr.bf16.mxu1 %v3378_v1 }
  0x9c   : > { %1713 = vmatmul.mubr.bf16.gmra.mxu0 %v3380_v15  ;;  %1938 = vmatmul.mubr.bf16.gmra.mxu1 %v3381_v16 }
  0x9d   : > { %1720 = vmatprep.mubr.bf16.mxu0 %v3382_v17  ;;  %1945 = vmatprep.mubr.bf16.mxu1 %v3384_v18  ;;  %v3470_v17 = vld [vmem:[%s3617_s5 + $0x2b0] ss:$20 sps:$4 sm:$0xff]   ;;  %v3471_v18 = vld [vmem:[%s3617_s5 + $0x88] ss:$20 sps:$4 sm:$0xff]  }
  0xa4   : > { %1721 = vmatmul.mubr.bf16.gmra.mxu0 %v3386_v19  ;;  %1946 = vmatmul.mubr.bf16.gmra.mxu1 %v3387_v20  ;;  %v3472_v19 = vld [vmem:[%s3617_s5 + $0x2dc] ss:$20 sps:$4 sm:$0xff]  }
  0xa5   : > { %1728 = vmatprep.mubr.bf16.mxu0 %v3388_v21  ;;  %1953 = vmatprep.mubr.bf16.mxu1 %v3390_v22  ;;  %v3474_v20 = vld [vmem:[%s3617_s5 + $0xb0] ss:$20 sps:$4 sm:$0xff]  }
  0xac   : > { %1729 = vmatmul.mubr.bf16.gmra.mxu0 %v3392_v23  ;;  %1954 = vmatmul.mubr.bf16.gmra.mxu1 %v3393_v24 }
  0xad   : > { %1736 = vmatprep.mubr.bf16.mxu0 %v3395_v25  ;;  %1961 = vmatprep.mubr.bf16.mxu1 %v3397_v26 }
  0xb4   : > { %1737 = vmatmul.mubr.bf16.gmra.mxu0 %v3399_v27  ;;  %1962 = vmatmul.mubr.bf16.gmra.mxu1 %v3400_v28 }
  0xb5   : > { %1744 = vmatprep.mubr.bf16.mxu0 %v3401_v29  ;;  %1969 = vmatprep.mubr.bf16.mxu1 %v3403_v30  ;;  %v3475_v29 = vld [vmem:[%s3617_s5 + $0x2d8] ss:$20 sps:$4 sm:$0xff]  }
  0xb6   : > { %v3476_v30 = vld [vmem:[%s3617_s5 + $0xd8] ss:$20 sps:$4 sm:$0xff]  }
  0xbc   : > { %1745 = vmatmul.mubr.bf16.gmra.mxu0 %v3405_v31  ;;  %1970 = vmatmul.mubr.bf16.gmra.mxu1 %v3406_v32  ;;  %v3477_v31 = vld [vmem:[%s3617_s5 + $0x304] ss:$20 sps:$4 sm:$0xff]   ;;  %v3479_v32 = vld [vmem:[%s3617_s5 + $0x100] ss:$20 sps:$4 sm:$0xff]  }
  0xbd   : > { %1752 = vmatprep.mubr.bf16.mxu0 %v3407_v33  ;;  %1977 = vmatprep.mubr.bf16.mxu1 %v3409_v34 }
  0xc4   : > { %1753 = vmatmul.mubr.bf16.gmra.mxu0 %v3411_v35  ;;  %1978 = vmatmul.mubr.bf16.gmra.mxu1 %v3412_v36 }
  0xc5   : > { %1760 = vmatprep.mubr.bf16.mxu0 %v3413_v37  ;;  %1985 = vmatprep.mubr.bf16.mxu1 %v3415_v38 }
  0xcc   : > { %1761 = vmatmul.mubr.bf16.gmra.mxu0 %v3417_v39  ;;  %1986 = vmatmul.mubr.bf16.gmra.mxu1 %v3418_v40 }
  0xcd   : > { %1768 = vmatprep.mubr.bf16.mxu0 %v3419_v41  ;;  %1993 = vmatprep.mubr.bf16.mxu1 %v3421_v42  ;;  %v3480_v41 = vld [vmem:[%s3617_s5 + $0x300] ss:$20 sps:$4 sm:$0xff]   ;;  %v3481_v42 = vld [vmem:[%s3617_s5 + $0x128] ss:$20 sps:$4 sm:$0xff]  }
  0xd4   : > { %1769 = vmatmul.mubr.bf16.gmra.mxu0 %v3423_v43  ;;  %1994 = vmatmul.mubr.bf16.gmra.mxu1 %v3424_v44  ;;  %v3484_v43 = vld [vmem:[%s3617_s5 + $0x32c] ss:$20 sps:$4 sm:$0xff]   ;;  %v3485_v44 = vld [vmem:[%s3617_s5 + $0x150] ss:$20 sps:$4 sm:$0xff]  }
  0xd5   : > { %1776 = vmatprep.mubr.bf16.mxu0 %v3425_v45  ;;  %2001 = vmatprep.mubr.bf16.mxu1 %v3427_v46 }
  0xdc   : > { %1777 = vmatmul.mubr.bf16.gmra.mxu0 %v3429_v47  ;;  %2002 = vmatmul.mubr.bf16.gmra.mxu1 %v3430_v48 }
  0xdd   : > { %1784 = vmatprep.mubr.bf16.mxu0 %v3432_v49  ;;  %2009 = vmatprep.mubr.bf16.mxu1 %v3434_v50 }
  0xe4   : > { %1785 = vmatmul.mubr.bf16.gmra.mxu0 %v3436_v51  ;;  %2010 = vmatmul.mubr.bf16.gmra.mxu1 %v3437_v52 }
  0xe5   : > { %1792 = vmatprep.mubr.bf16.mxu0 %v3438_v53  ;;  %2017 = vmatprep.mubr.bf16.mxu1 %v3440_v54  ;;  %v3482_v53 = vld [vmem:[%s3617_s5 + $0x328] ss:$20 sps:$4 sm:$0xff]   ;;  %v3486_v54 = vld [vmem:[%s3617_s5 + $0x178] ss:$20 sps:$4 sm:$0xff]  }
  0xec   : > { %1793 = vmatmul.mubr.bf16.gmra.mxu0 %v3442_v55  ;;  %2018 = vmatmul.mubr.bf16.gmra.mxu1 %v3443_v56  ;;  %v3489_v55 = vld [vmem:[%s3617_s5 + $0x354] ss:$20 sps:$4 sm:$0xff]  }
  0xed   : > { %1800 = vmatprep.mubr.bf16.mxu0 %v3444_v57  ;;  %2025 = vmatprep.mubr.bf16.mxu1 %v3446_v58  ;;  %v3490_v56 = vld [vmem:[%s3617_s5 + $0x1a0] ss:$20 sps:$4 sm:$0xff]  }
  0xf4   : > { %1801 = vmatmul.mubr.bf16.gmra.mxu0 %v3448_v59  ;;  %2026 = vmatmul.mubr.bf16.gmra.mxu1 %v3449_v60 }
  0xf5   : > { %1808 = vmatprep.mubr.bf16.mxu0 %v3450_v61  ;;  %2033 = vmatprep.mubr.bf16.mxu1 %v3452_v62 }
  0xfc   : > { %1809 = vmatmul.mubr.bf16.gmra.mxu0 %v3454_v63  ;;  %2034 = vmatmul.mubr.bf16.gmra.mxu1 %v3455_v0 }
  0xfd   : > { %1816 = vmatprep.mubr.bf16.mxu0 %v3456_v2  ;;  %2041 = vmatprep.mubr.bf16.mxu1 %v3458_v3  ;;  %v3487_v2 = vld [vmem:[%s3617_s5 + $0x350] ss:$20 sps:$4 sm:$0xff]   ;;  %v3491_v3 = vld [vmem:[%s3617_s5 + $0x1c8] ss:$20 sps:$4 sm:$0xff]  }
 0x104   : > { %1817 = vmatmul.mubr.bf16.gmra.mxu0 %v3460_v4  ;;  %2042 = vmatmul.mubr.bf16.gmra.mxu1 %v3461_v5  ;;  %v3494_v4 = vld [vmem:[%s3617_s5 + $0x37c] ss:$20 sps:$4 sm:$0xff]  }
 0x105   : > { %2049 = vmatprep.mubr.bf16.mxu1 %v3462_v6  ;;  %3176 = vmatprep.mubr.msk.bf16.mxu0 %vm1503_vm0, %v3464_v7  ;;  %v3495_v5 = vld [vmem:[%s3617_s5 + $0x1f0] ss:$20 sps:$4 sm:$0xff]  }
 0x10c   : > { %v3855_v12 = vpop.f32.mrf.mxu0  ;;  %v3857_v13 = vpop.f32.mrf.mxu1  ;;  %2050 = vmatmul.mubr.bf16.gmra.mxu1 %v3465_v8  ;;  %3177 = vmatmul.mubr.msk.bf16.vlgmr.msra.gmra.mxu0 %vm1503_vm0, %v3466_v9 }
 0x10d   : > { %4467 = vst [vmem:[#allocation2_spill] sm:$0xff] %v3857_v13  ;;  %2057 = vmatprep.mubr.bf16.mxu1 %v3467_v10  ;;  %3180 = vmatprep.mubr.msk.bf16.mxu0 %vm1503_vm0, %v3469_v11 }
 0x10e   : > { %v1636_v14 = vpop.f32.mrf.mxu0  ;;  %v1828_v1 = vpop.f32.mrf.mxu1 }
 0x110   : > { %v3861_v15 = vpop.f32.mrf.mxu0  ;;  %v3863_v16 = vpop.f32.mrf.mxu1 }
 0x111   : > { %4468 = vst [vmem:[#allocation3_spill] sm:$0xff] %v3863_v16 }
 0x112   : > { %v1639_v21 = vpop.f32.mrf.mxu0  ;;  %v1831_v22 = vpop.f32.mrf.mxu1 }
 0x114   : > { %v3869_v23 = vpop.f32.mrf.mxu0  ;;  %v3871_v24 = vpop.f32.mrf.mxu1  ;;  %2058 = vmatmul.mubr.bf16.gmra.mxu1 %v3470_v17  ;;  %3181 = vmatmul.mubr.msk.bf16.gmra.mxu0 %vm1503_vm0, %v3471_v18  ;;  %v3492_v17 = vld [vmem:[%s3617_s5 + $0x378] ss:$20 sps:$4 sm:$0xff]  }
 0x115   : > { %4469 = vst [vmem:[#allocation4_spill] sm:$0xff] %v3871_v24  ;;  %2065 = vmatprep.mubr.bf16.mxu1 %v3472_v19  ;;  %3184 = vmatprep.mubr.msk.bf16.mxu0 %vm1503_vm0, %v3474_v20  ;;  %v3496_v18 = vld [vmem:[%s3617_s5 + $0x218] ss:$20 sps:$4 sm:$0xff]   ;;  %v3500_v20 = vld [vmem:[%s3617_s5 + $0x240] ss:$20 sps:$4 sm:$0xff]  }
 0x116   : > { %v1644_v25 = vpop.f32.mrf.mxu0  ;;  %v1836_v26 = vpop.f32.mrf.mxu1  ;;  %v3499_v19 = vld [vmem:[%s3617_s5 + $0x3a4] ss:$20 sps:$4 sm:$0xff]  }
 0x118   : > { %v3875_v27 = vpop.f32.mrf.mxu0  ;;  %v3877_v28 = vpop.f32.mrf.mxu1 }
 0x119   : > { %4470 = vst [vmem:[#allocation5_spill] sm:$0xff] %v3877_v28 }
 0x11a   : > { %v1647_v33 = vpop.f32.mrf.mxu0  ;;  %v1839_v34 = vpop.f32.mrf.mxu1 }
 0x11b   : > { %v3497_v33 = vld [vmem:[%s3617_s5 + $0x3a0] ss:$20 sps:$4 sm:$0xff]   ;;  %v3501_v34 = vld [vmem:[%s3617_s5 + $0x268] ss:$20 sps:$4 sm:$0xff]  }
 0x11c   : > { %v3883_v35 = vpop.f32.mrf.mxu0  ;;  %v3885_v36 = vpop.f32.mrf.mxu1  ;;  %2066 = vmatmul.mubr.bf16.gmra.mxu1 %v3475_v29  ;;  %3185 = vmatmul.mubr.msk.bf16.gmra.mxu0 %vm1503_vm0, %v3476_v30 }
 0x11d   : > { %4471 = vst [vmem:[#allocation6_spill] sm:$0xff] %v3885_v36  ;;  %2073 = vmatprep.mubr.bf16.mxu1 %v3477_v31  ;;  %3188 = vmatprep.mubr.msk.bf16.mxu0 %vm1503_vm0, %v3479_v32 }
 0x11e   : > { %v1652_v37 = vpop.f32.mrf.mxu0  ;;  %v1844_v38 = vpop.f32.mrf.mxu1 }
 0x11f   : > { %v3504_v37 = vld [vmem:[%s3617_s5 + $0x3cc] ss:$20 sps:$4 sm:$0xff]   ;;  %v3505_v38 = vld [vmem:[%s3617_s5 + $0x290] ss:$20 sps:$4 sm:$0xff]  }
 0x120   : > { %v3889_v39 = vpop.f32.mrf.mxu0  ;;  %v3891_v40 = vpop.f32.mrf.mxu1 }
 0x121   : > { %4472 = vst [vmem:[#allocation7_spill] sm:$0xff] %v3891_v40 }
 0x122   : > { %v1655_v45 = vpop.f32.mrf.mxu0  ;;  %v1847_v46 = vpop.f32.mrf.mxu1 }
 0x124   : > { %v3897_v47 = vpop.f32.mrf.mxu0  ;;  %v3899_v48 = vpop.f32.mrf.mxu1  ;;  %2074 = vmatmul.mubr.bf16.gmra.mxu1 %v3480_v41  ;;  %3189 = vmatmul.mubr.msk.bf16.gmra.mxu0 %vm1503_vm0, %v3481_v42 }
 0x125   : > { %4473 = vst [vmem:[#allocation8_spill] sm:$0xff] %v3899_v48  ;;  %2081 = vmatprep.mubr.bf16.mxu1 %v3484_v43  ;;  %3192 = vmatprep.mubr.msk.bf16.mxu0 %vm1503_vm0, %v3485_v44 }
 0x126   : > { %v1660_v49 = vpop.f32.mrf.mxu0  ;;  %v1852_v50 = vpop.f32.mrf.mxu1 }
 0x127   : > { %v3962_v49 = vld [vmem:[%s4464_s2] ss:$0 sm:$0xff] }
 0x128   : > { %v3903_v51 = vpop.f32.mrf.mxu0  ;;  %v3905_v52 = vpop.f32.mrf.mxu1 }
 0x129   : > { %4474 = vst [vmem:[#allocation9_spill] sm:$0xff] %v3905_v52 }
 0x12a   : > { %v1663_v57 = vpop.f32.mrf.mxu0  ;;  %v1855_v58 = vpop.f32.mrf.mxu1 }
 0x12b   : > { %v3510_v57 = vld [vmem:[%s3617_s5 + $0x2e0] ss:$20 sps:$4 sm:$0xff]  }
 0x12c   : > { %v3911_v59 = vpop.f32.mrf.mxu0  ;;  %v3913_v60 = vpop.f32.mrf.mxu1  ;;  %2082 = vmatmul.mubr.bf16.gmra.mxu1 %v3482_v53  ;;  %3193 = vmatmul.mubr.msk.bf16.gmra.mxu0 %vm1503_vm0, %v3486_v54  ;;  %v3502_v54 = vld [vmem:[%s3617_s5 + $0x3c8] ss:$20 sps:$4 sm:$0xff]  }
 0x12d   : > { %4475 = vst [vmem:[#allocation10_spill] sm:$0xff] %v3913_v60  ;;  %2089 = vmatprep.mubr.bf16.mxu1 %v3489_v55  ;;  %3196 = vmatprep.mubr.msk.bf16.mxu0 %vm1503_vm0, %v3490_v56  ;;  %v3506_v55 = vld [vmem:[%s3617_s5 + $0x2b8] ss:$20 sps:$4 sm:$0xff]   ;;  %v3509_v56 = vld [vmem:[%s3617_s5 + $0x3f4] ss:$20 sps:$4 sm:$0xff]  }
 0x12e   : > { %v1668_v61 = vpop.f32.mrf.mxu0  ;;  %v1860_v62 = vpop.f32.mrf.mxu1 }
 0x12f   : > { %v1635_v62 = vadd.f32 %v3962_v49, %v3855_v12 }
 0x130   : > { %v3917_v63 = vpop.f32.mrf.mxu0  ;;  %v3919_v0 = vpop.f32.mrf.mxu1 }
 0x131   : > { %4476 = vst [vmem:[#allocation11_spill] sm:$0xff] %v3919_v0 }
 0x132   : > { %v1671_v6 = vpop.f32.mrf.mxu0  ;;  %v1863_v7 = vpop.f32.mrf.mxu1 }
 0x133   : > { %v1638_v7 = vadd.f32 %v3962_v49, %v3861_v15 }
 0x134   : > { %v3925_v8 = vpop.f32.mrf.mxu0  ;;  %v3927_v9 = vpop.f32.mrf.mxu1  ;;  %2090 = vmatmul.mubr.bf16.gmra.mxu1 %v3487_v2  ;;  %3197 = vmatmul.mubr.msk.bf16.gmra.mxu0 %vm1503_vm0, %v3491_v3 }
 0x135   : > { %4477 = vst [vmem:[#allocation12_spill] sm:$0xff] %v3927_v9  ;;  %2097 = vmatprep.mubr.bf16.mxu1 %v3494_v4  ;;  %3200 = vmatprep.mubr.msk.bf16.mxu0 %vm1503_vm0, %v3495_v5 }
 0x136   : > { %v1676_v10 = vpop.f32.mrf.mxu0  ;;  %v1868_v11 = vpop.f32.mrf.mxu1 }
 0x137   : > { %v3507_v11 = vld [vmem:[%s3617_s5 + $0x3f0] ss:$20 sps:$4 sm:$0xff]  }
 0x138   : > { %v3931_v14 = vpop.f32.mrf.mxu0  ;;  %v3933_v1 = vpop.f32.mrf.mxu1 }
 0x139   : > { %4478 = vst [vmem:[#allocation13_spill] sm:$0xff] %v3933_v1 }
 0x13a   : > { %v1679_v21 = vpop.f32.mrf.mxu0  ;;  %v1871_v22 = vpop.f32.mrf.mxu1 }
 0x13c   : > { %v3939_v25 = vpop.f32.mrf.mxu0  ;;  %v3941_v26 = vpop.f32.mrf.mxu1  ;;  %2098 = vmatmul.mubr.bf16.gmra.mxu1 %v3492_v17  ;;  %3201 = vmatmul.mubr.msk.bf16.gmra.mxu0 %vm1503_vm0, %v3496_v18  ;;  %v3511_v17 = vld [vmem:[%s3617_s5 + $0x308] ss:$20 sps:$4 sm:$0xff]  }
 0x13d   : > { %4479 = vst [vmem:[#allocation14_spill] sm:$0xff] %v3941_v26  ;;  %2105 = vmatprep.mubr.bf16.mxu1 %v3499_v19  ;;  %3204 = vmatprep.mubr.msk.bf16.mxu0 %vm1503_vm0, %v3500_v20  ;;  %v3514_v19 = vld [vmem:[%s3617_s5 + $0x41c] ss:$20 sps:$4 sm:$0xff]  }
 0x13e   : > { %v1684_v29 = vpop.f32.mrf.mxu0  ;;  %v1876_v30 = vpop.f32.mrf.mxu1  ;;  %v3515_v20 = vld [vmem:[%s3617_s5 + $0x330] ss:$20 sps:$4 sm:$0xff]  }
 0x13f   : > { %v1643_v29 = vadd.f32 %v3962_v49, %v3869_v23 }
 0x140   : > { %v3945_v31 = vpop.f32.mrf.mxu0  ;;  %v3947_v32 = vpop.f32.mrf.mxu1 }
 0x141   : > { %4480 = vst [vmem:[#allocation15_spill] sm:$0xff] %v3947_v32 }
 0x142   : > { %v1687_v41 = vpop.f32.mrf.mxu0  ;;  %v1879_v42 = vpop.f32.mrf.mxu1 }
 0x143   : > { %v3512_v42 = vld [vmem:[%s3617_s5 + $0x418] ss:$20 sps:$4 sm:$0xff]  }
 0x144   : > { %v3953_v43 = vpop.f32.mrf.mxu0  ;;  %v3955_v44 = vpop.f32.mrf.mxu1  ;;  %2106 = vmatmul.mubr.bf16.gmra.mxu1 %v3497_v33  ;;  %3205 = vmatmul.mubr.msk.bf16.gmra.mxu0 %vm1503_vm0, %v3501_v34 }
 0x145   : > { %4481 = vst [vmem:[#allocation16_spill] sm:$0xff] %v3955_v44  ;;  %2113 = vmatprep.mubr.bf16.mxu1 %v3504_v37  ;;  %3208 = vmatprep.mubr.msk.bf16.mxu0 %vm1503_vm0, %v3505_v38  ;;  %v1646_v38 = vadd.f32 %v3962_v49, %v3875_v27 }
 0x146   : > { %v1692_v45 = vpop.f32.mrf.mxu0  ;;  %v1884_v46 = vpop.f32.mrf.mxu1 }
 0x147   : > { %v3516_v45 = vld [vmem:[%s3617_s5 + $0x358] ss:$20 sps:$4 sm:$0xff]  }
 0x148   : > { %v3964_v50 = vpop.f32.mrf.mxu0  ;;  %v3966_v53 = vpop.f32.mrf.mxu1 }
 0x149   : > { %4482 = vst [vmem:[#allocation17_spill] sm:$0xff] %v3966_v53 }
 0x14a   : > { %v1695_v58 = vpop.f32.mrf.mxu0  ;;  %v1887_v61 = vpop.f32.mrf.mxu1 }
 0x14b   : > { %v1651_v58 = vadd.f32 %v3962_v49, %v3883_v35 }
 0x14c   : > { %v3974_v2 = vpop.f32.mrf.mxu0  ;;  %v1923_v3 = vpop.f32.mrf.mxu1  ;;  %2114 = vmatmul.mubr.bf16.gmra.mxu1 %v3502_v54  ;;  %3209 = vmatmul.mubr.msk.bf16.gmra.mxu0 %vm1503_vm0, %v3506_v55  ;;  %v3519_v54 = vld [vmem:[%s3617_s5 + $0x444] ss:$20 sps:$4 sm:$0xff]   ;;  %v3520_v55 = vld [vmem:[%s3617_s5 + $0x380] ss:$20 sps:$4 sm:$0xff]  }
 0x14d   : > { %v3977_v4 = vadd.f32 %v1923_v3, %v1635_v62  ;;  %2121 = vmatprep.mubr.bf16.mxu1 %v3509_v56  ;;  %3212 = vmatprep.mubr.msk.bf16.mxu0 %vm1503_vm0, %v3510_v57 }
 0x14e   : > { %v1700_v5 = vpop.f32.mrf.mxu0  ;;  %v1925_v6 = vpop.f32.mrf.mxu1 }
 0x14f   : > { %v1654_v6 = vadd.f32 %v3962_v49, %v3889_v39 }
 0x150   : > { %v3982_v10 = vpop.f32.mrf.mxu0  ;;  %v1926_v12 = vpop.f32.mrf.mxu1 }
 0x151   : > { %v3986_v18 = vadd.f32 %v1926_v12, %v1638_v7  ;;  %v3517_v12 = vld [vmem:[%s3617_s5 + $0x440] ss:$20 sps:$4 sm:$0xff]  }
 0x152   : > { %v1703_v21 = vpop.f32.mrf.mxu0  ;;  %v1928_v22 = vpop.f32.mrf.mxu1 }
 0x154   : > { %v3992_v30 = vpop.f32.mrf.mxu0  ;;  %v1931_v15 = vpop.f32.mrf.mxu1  ;;  %2122 = vmatmul.mubr.bf16.gmra.mxu1 %v3507_v11  ;;  %3213 = vmatmul.mubr.msk.bf16.gmra.mxu0 %vm1503_vm0, %v3511_v17  ;;  %v3521_v11 = vld [vmem:[%s3617_s5 + $0x3a8] ss:$20 sps:$4 sm:$0xff]  }
 0x155   : > { %v3995_v33 = vadd.f32 %v1931_v15, %v1643_v29  ;;  %2129 = vmatprep.mubr.bf16.mxu1 %v3514_v19  ;;  %3216 = vmatprep.mubr.msk.bf16.mxu0 %vm1503_vm0, %v3515_v20  ;;  %v3524_v19 = vld [vmem:[%s3617_s5 + $0x46c] ss:$20 sps:$4 sm:$0xff]   ;;  %v3525_v20 = vld [vmem:[%s3617_s5 + $0x3d0] ss:$20 sps:$4 sm:$0xff]   ;;  %v1659_v29 = vadd.f32 %v3962_v49, %v3897_v47 }
 0x156   : > { %v1708_v34 = vpop.f32.mrf.mxu0  ;;  %v1933_v37 = vpop.f32.mrf.mxu1 }
 0x158   : > { %v4000_v41 = vpop.f32.mrf.mxu0  ;;  %v1934_v23 = vpop.f32.mrf.mxu1 }
 0x159   : > { %v4004_v46 = vadd.f32 %v1934_v23, %v1646_v38  ;;  %v1662_v23 = vadd.f32 %v3962_v49, %v3903_v51 }
 0x15a   : > { %v1711_v56 = vpop.f32.mrf.mxu0  ;;  %v1936_v57 = vpop.f32.mrf.mxu1 }
 0x15b   : > { %v3529_v56 = vld [vmem:[%s3617_s5 + $0x494] ss:$20 sps:$4 sm:$0xff]  }
 0x15c   : > { %v4010_v61 = vpop.f32.mrf.mxu0  ;;  %v1939_v27 = vpop.f32.mrf.mxu1  ;;  %2130 = vmatmul.mubr.bf16.gmra.mxu1 %v3512_v42  ;;  %3217 = vmatmul.mubr.msk.bf16.gmra.mxu0 %vm1503_vm0, %v3516_v45  ;;  %v3522_v45 = vld [vmem:[%s3617_s5 + $0x468] ss:$20 sps:$4 sm:$0xff]   ;;  %v3530_v57 = vld [vmem:[%s3617_s5 + $0x420] ss:$20 sps:$4 sm:$0xff]  }
 0x15d   : > { %v4013_v62 = vadd.f32 %v1939_v27, %v1651_v58  ;;  %2137 = vmatprep.mubr.bf16.mxu1 %v3519_v54  ;;  %3220 = vmatprep.mubr.msk.bf16.mxu0 %vm1503_vm0, %v3520_v55  ;;  %v3526_v54 = vld [vmem:[%s3617_s5 + $0x3f8] ss:$20 sps:$4 sm:$0xff]  }
 0x15e   : > { %v1716_v3 = vpop.f32.mrf.mxu0  ;;  %v1941_v5 = vpop.f32.mrf.mxu1 }
 0x15f   : > { %v1667_v3 = vadd.f32 %v3962_v49, %v3911_v59 }
 0x160   : > { %v4018_v7 = vpop.f32.mrf.mxu0  ;;  %v1942_v35 = vpop.f32.mrf.mxu1 }
 0x161   : > { %v4022_v17 = vadd.f32 %v1942_v35, %v1654_v6 }
 0x162   : > { %v1719_v21 = vpop.f32.mrf.mxu0  ;;  %v1944_v22 = vpop.f32.mrf.mxu1 }
 0x163   : > { %v3531_v21 = vld [vmem:[%s3617_s5 + $0x448] ss:$20 sps:$4 sm:$0xff]  }
 0x164   : > { %v4028_v15 = vpop.f32.mrf.mxu0  ;;  %v1947_v39 = vpop.f32.mrf.mxu1  ;;  %2138 = vmatmul.mubr.bf16.gmra.mxu1 %v3517_v12  ;;  %3221 = vmatmul.mubr.msk.bf16.gmra.mxu0 %vm1503_vm0, %v3521_v11  ;;  %v1670_v11 = vadd.f32 %v3962_v49, %v3917_v63 }
 0x165   : > { %v4031_v34 = vadd.f32 %v1947_v39, %v1659_v29  ;;  %2145 = vmatprep.mubr.bf16.mxu1 %v3524_v19  ;;  %3224 = vmatprep.mubr.msk.bf16.mxu0 %vm1503_vm0, %v3525_v20  ;;  %v3527_v20 = vld [vmem:[%s3617_s5 + $0x490] ss:$20 sps:$4 sm:$0xff]  }
 0x166   : > { %v1724_v37 = vpop.f32.mrf.mxu0  ;;  %v1949_v38 = vpop.f32.mrf.mxu1  ;;  %v3534_v29 = vld [vmem:[%s3617_s5 + $0x4bc] ss:$20 sps:$4 sm:$0xff]  }
 0x167   : > { %v3535_v39 = vld [vmem:[%s3617_s5 + $0x470] ss:$20 sps:$4 sm:$0xff]  }
 0x168   : > { %v4036_v42 = vpop.f32.mrf.mxu0  ;;  %v1950_v47 = vpop.f32.mrf.mxu1 }
 0x169   : > { %v4040_v55 = vadd.f32 %v1950_v47, %v1662_v23  ;;  %v1675_v23 = vadd.f32 %v3962_v49, %v3925_v8 }
 0x16a   : > { %v1727_v58 = vpop.f32.mrf.mxu0  ;;  %v1952_v27 = vpop.f32.mrf.mxu1 }
 0x16b   : > { %v3532_v27 = vld [vmem:[%s3617_s5 + $0x4b8] ss:$20 sps:$4 sm:$0xff]  }
 0x16c   : > { %v4046_v5 = vpop.f32.mrf.mxu0  ;;  %v1955_v51 = vpop.f32.mrf.mxu1  ;;  %2146 = vmatmul.mubr.bf16.gmra.mxu1 %v3522_v45  ;;  %3225 = vmatmul.mubr.msk.bf16.gmra.mxu0 %vm1503_vm0, %v3526_v54 }
 0x16d   : > { %v4049_v6 = vadd.f32 %v1955_v51, %v1667_v3  ;;  %2153 = vmatprep.mubr.bf16.mxu1 %v3529_v56  ;;  %3228 = vmatprep.mubr.msk.bf16.mxu0 %vm1503_vm0, %v3530_v57  ;;  %v1678_v57 = vadd.f32 %v3962_v49, %v3931_v14  ;;  %v3536_v3 = vld [vmem:[%s3617_s5 + $0x498] ss:$20 sps:$4 sm:$0xff]  }
 0x16e   : > { %v1732_v35 = vpop.f32.mrf.mxu0  ;;  %v1957_v12 = vpop.f32.mrf.mxu1 }
 0x16f   : > { %v3539_v35 = vld [vmem:[%s3617_s5 + $0x4e4] ss:$20 sps:$4 sm:$0xff]   ;;  %v3540_v12 = vld [vmem:[%s3617_s5 + $0x4c0] ss:$20 sps:$4 sm:$0xff]  }
 0x170   : > { %v4054_v19 = vpop.f32.mrf.mxu0  ;;  %v1958_v59 = vpop.f32.mrf.mxu1 }
 0x171   : > { %v4058_v22 = vadd.f32 %v1958_v59, %v1670_v11 }
 0x172   : > { %v1735_v37 = vpop.f32.mrf.mxu0  ;;  %v1960_v38 = vpop.f32.mrf.mxu1 }
 0x173   : > { %v1686_v38 = vadd.f32 %v3962_v49, %v3945_v31 }
 0x174   : > { %v4064_v47 = vpop.f32.mrf.mxu0  ;;  %v1963_v63 = vpop.f32.mrf.mxu1  ;;  %2154 = vmatmul.mubr.bf16.gmra.mxu1 %v3527_v20  ;;  %3229 = vmatmul.mubr.msk.bf16.gmra.mxu0 %vm1503_vm0, %v3531_v21  ;;  %v1683_v20 = vadd.f32 %v3962_v49, %v3939_v25  ;;  %v3537_v25 = vld [vmem:[%s3617_s5 + $0x4e0] ss:$20 sps:$4 sm:$0xff]  }
 0x175   : > { %v4067_v45 = vadd.f32 %v1963_v63, %v1675_v23  ;;  %2161 = vmatprep.mubr.bf16.mxu1 %v3534_v29  ;;  %3232 = vmatprep.mubr.msk.bf16.mxu0 %vm1503_vm0, %v3535_v39 }
 0x176   : > { %v1740_v54 = vpop.f32.mrf.mxu0  ;;  %v1965_v56 = vpop.f32.mrf.mxu1 }
 0x177   : > { %v3541_v54 = vld [vmem:[%s3617_s5 + $0x4e8] ss:$20 sps:$4 sm:$0xff]   ;;  %s2899_s5 = sshll.u32 %s4510_s19, 3 }
 0x178   : > { %v4072_v58 = vpop.f32.mrf.mxu0  ;;  %v1966_v8 = vpop.f32.mrf.mxu1  ;;  %s4210_s6 = scalar_lea.vmem %s4465_s3, %s2899_s5 }
 0x179   : > { %v4076_v51 = vadd.f32 %v1966_v8, %v1678_v57 }
 0x17a   : > { %v1743_v11 = vpop.f32.mrf.mxu0  ;;  %v1968_v59 = vpop.f32.mrf.mxu1 }
 0x17b   : > { %v1694_v59 = vadd.f32 %v3962_v49, %v3964_v50  ;;  %v1702_v50 = vadd.f32 %v3962_v49, %v3982_v10  ;;  %v1710_v10 = vadd.f32 %v3962_v49, %v4000_v41  ;;  %v1718_v41 = vadd.f32 %v3962_v49, %v4018_v7 }
 0x17c   : > { %v4082_v21 = vpop.f32.mrf.mxu0  ;;  %v1971_v29 = vpop.f32.mrf.mxu1  ;;  %2162 = vmatmul.mubr.bf16.gmra.mxu1 %v3532_v27  ;;  %3233 = vmatmul.mubr.msk.bf16.gmra.mxu0 %vm1503_vm0, %v3536_v3  ;;  %v1691_v27 = vadd.f32 %v3962_v49, %v3953_v43  ;;  %v1726_v7 = vadd.f32 %v3962_v49, %v4036_v42  ;;  %v1734_v42 = vadd.f32 %v3962_v49, %v4054_v19 }
 0x17d   : > { %v4085_v14 = vadd.f32 %v1971_v29, %v1683_v20  ;;  %2169 = vmatprep.mubr.bf16.mxu1 %v3539_v35  ;;  %3236 = vmatprep.mubr.msk.bf16.mxu0 %vm1503_vm0, %v3540_v12  ;;  %v1742_v19 = vadd.f32 %v3962_v49, %v4072_v58 }
 0x17e   : > { %v1748_v39 = vpop.f32.mrf.mxu0  ;;  %v1973_v37 = vpop.f32.mrf.mxu1 }
 0x180   : > { %v4090_v23 = vpop.f32.mrf.mxu0  ;;  %v1974_v63 = vpop.f32.mrf.mxu1 }
 0x181   : > { %v4094_v56 = vadd.f32 %v1974_v63, %v1686_v38  ;;  %v1699_v38 = vadd.f32 %v3962_v49, %v3974_v2  ;;  %v1707_v2 = vadd.f32 %v3962_v49, %v3992_v30  ;;  %v1715_v30 = vadd.f32 %v3962_v49, %v4010_v61 }
 0x182   : > { %v1751_v57 = vpop.f32.mrf.mxu0  ;;  %v1976_v8 = vpop.f32.mrf.mxu1  ;;  %v1723_v61 = vadd.f32 %v3962_v49, %v4028_v15  ;;  %v1731_v15 = vadd.f32 %v3962_v49, %v4046_v5  ;;  %v1739_v5 = vadd.f32 %v3962_v49, %v4064_v47  ;;  %v1747_v47 = vadd.f32 %v3962_v49, %v4082_v21 }
 0x183   : > { %v1750_v58 = vadd.f32 %v3962_v49, %v4090_v23 }
 0x184   : > { %v4098_v3 = vpop.f32.mrf.mxu0  ;;  %v1979_v35 = vpop.f32.mrf.mxu1  ;;  %2170 = vmatmul.mubr.bf16.gmra.mxu1 %v3537_v25  ;;  %3237 = vmatmul.mubr.msk.bf16.gmra.mxu0 %vm1503_vm0, %v3541_v54 }
 0x185   : > { %v4101_v12 = vadd.f32 %v1979_v35, %v1691_v27 }
 0x186   : > { %v1756_v31 = vpop.f32.mrf.mxu0  ;;  %v1981_v11 = vpop.f32.mrf.mxu1 }
 0x188   : > { %v4105_v20 = vpop.f32.mrf.mxu0  ;;  %v1982_v29 = vpop.f32.mrf.mxu1 }
 0x189   : > { %v4107_v39 = vadd.f32 %v1982_v29, %v1694_v59 }
 0x18a   : > { %v1759_v37 = vpop.f32.mrf.mxu0  ;;  %v1984_v43 = vpop.f32.mrf.mxu1 }
 0x18c   : > { %v4111_v63 = vpop.f32.mrf.mxu0  ;;  %v1987_v25 = vpop.f32.mrf.mxu1 }
 0x18d   : > { %v4113_v54 = vadd.f32 %v1987_v25, %v1699_v38  ;;  %v1763_v23 = vadd.f32 %v3962_v49, %v4111_v63 }
 0x18e   : > { %v1764_v57 = vpop.f32.mrf.mxu0  ;;  %v1989_v8 = vpop.f32.mrf.mxu1 }
 0x190   : > { %v4117_v27 = vpop.f32.mrf.mxu0  ;;  %v1990_v35 = vpop.f32.mrf.mxu1 }
 0x191   : > { %v4119_v31 = vadd.f32 %v1990_v35, %v1702_v50 }
 0x192   : > { %v1767_v11 = vpop.f32.mrf.mxu0  ;;  %v1992_v59 = vpop.f32.mrf.mxu1 }
 0x194   : > { %v4123_v29 = vpop.f32.mrf.mxu0  ;;  %v1995_v37 = vpop.f32.mrf.mxu1 }
 0x195   : > { %v4125_v43 = vadd.f32 %v1995_v37, %v1707_v2 }
 0x196   : > { %v1772_v38 = vpop.f32.mrf.mxu0  ;;  %v1997_v25 = vpop.f32.mrf.mxu1 }
 0x198   : > { %v4129_v57 = vpop.f32.mrf.mxu0  ;;  %v1998_v8 = vpop.f32.mrf.mxu1 }
 0x199   : > { %v4131_v50 = vadd.f32 %v1998_v8, %v1710_v10 }
 0x19a   : > { %v1775_v35 = vpop.f32.mrf.mxu0  ;;  %v2000_v11 = vpop.f32.mrf.mxu1 }
 0x19c   : > { %v4135_v59 = vpop.f32.mrf.mxu0  ;;  %v2003_v32 = vpop.f32.mrf.mxu1 }
 0x19d   : > { %v4137_v2 = vadd.f32 %v2003_v32, %v1715_v30 }
 0x19e   : > { %v1780_v37 = vpop.f32.mrf.mxu0  ;;  %v2005_v38 = vpop.f32.mrf.mxu1 }
 0x1a0   : > { %v4141_v25 = vpop.f32.mrf.mxu0  ;;  %v2006_v53 = vpop.f32.mrf.mxu1 }
 0x1a1   : > { %v4143_v10 = vadd.f32 %v2006_v53, %v1718_v41 }
 0x1a2   : > { %v1783_v8 = vpop.f32.mrf.mxu0  ;;  %v2008_v35 = vpop.f32.mrf.mxu1 }
 0x1a4   : > { %v4147_v11 = vpop.f32.mrf.mxu0  ;;  %v2011_v26 = vpop.f32.mrf.mxu1 }
 0x1a5   : > { %v4149_v32 = vadd.f32 %v2011_v26, %v1723_v61 }
 0x1a6   : > { %v1788_v30 = vpop.f32.mrf.mxu0  ;;  %v2013_v37 = vpop.f32.mrf.mxu1 }
 0x1a8   : > { %v4153_v38 = vpop.f32.mrf.mxu0  ;;  %v2014_v44 = vpop.f32.mrf.mxu1 }
 0x1a9   : > { %v4155_v53 = vadd.f32 %v2014_v44, %v1726_v7 }
 0x1aa   : > { %v1791_v41 = vpop.f32.mrf.mxu0  ;;  %v2016_v8 = vpop.f32.mrf.mxu1 }
 0x1ac   : > { %v4159_v35 = vpop.f32.mrf.mxu0  ;;  %v2019_v1 = vpop.f32.mrf.mxu1 }
 0x1ad   : > { %v4161_v26 = vadd.f32 %v2019_v1, %v1731_v15 }
 0x1ae   : > { %v1796_v61 = vpop.f32.mrf.mxu0  ;;  %v2021_v30 = vpop.f32.mrf.mxu1 }
 0x1b0   : > { %v4165_v37 = vpop.f32.mrf.mxu0  ;;  %v2022_v0 = vpop.f32.mrf.mxu1 }
 0x1b1   : > { %v4167_v44 = vadd.f32 %v2022_v0, %v1734_v42 }
 0x1b2   : > { %v1799_v7 = vpop.f32.mrf.mxu0  ;;  %v2024_v41 = vpop.f32.mrf.mxu1 }
 0x1b4   : > { %v4171_v8 = vpop.f32.mrf.mxu0  ;;  %v2027_v9 = vpop.f32.mrf.mxu1 }
 0x1b5   : > { %v4173_v1 = vadd.f32 %v2027_v9, %v1739_v5 }
 0x1b6   : > { %v1804_v15 = vpop.f32.mrf.mxu0  ;;  %v2029_v61 = vpop.f32.mrf.mxu1 }
 0x1b8   : > { %v4177_v30 = vpop.f32.mrf.mxu0  ;;  %v2030_v60 = vpop.f32.mrf.mxu1 }
 0x1b9   : > { %4483 = vst [vmem:[#allocation18_spill] sm:$0xff] %v4177_v30  ;;  %v4179_v0 = vadd.f32 %v2030_v60, %v1742_v19 }
 0x1ba   : > { %v1807_v42 = vpop.f32.mrf.mxu0  ;;  %v2032_v7 = vpop.f32.mrf.mxu1 }
 0x1bc   : > { %v4183_v41 = vpop.f32.mrf.mxu0  ;;  %v2035_v52 = vpop.f32.mrf.mxu1 }
 0x1bd   : > { %4484 = vst [vmem:[#allocation19_spill] sm:$0xff] %v4183_v41  ;;  %v4185_v9 = vadd.f32 %v2035_v52, %v1747_v47 }
 0x1be   : > { %v1812_v5 = vpop.f32.mrf.mxu0  ;;  %v2037_v15 = vpop.f32.mrf.mxu1 }
 0x1c0   : > { %v4189_v61 = vpop.f32.mrf.mxu0  ;;  %v2038_v60 = vpop.f32.mrf.mxu1 }
 0x1c1   : > { %4485 = vst [vmem:[#allocation20_spill] sm:$0xff] %v4189_v61  ;;  %v4191_v19 = vadd.f32 %v2038_v60, %v1750_v58 }
 0x1c2   : > { %v1815_v42 = vpop.f32.mrf.mxu0  ;;  %v2040_v7 = vpop.f32.mrf.mxu1 }
 0x1c4   : > { %v4193_v40 = vpop.f32.mrf.mxu0  ;;  %v4195_v21 = vpop.f32.mrf.mxu1 }
 0x1c5   : > { %4486 = vst [vmem:[#allocation21_spill] sm:$0xff] %v4193_v40 }
 0x1c6   : > { %v1820_v48 = vpop.f32.mrf.mxu0  ;;  %v2045_v52 = vpop.f32.mrf.mxu1 }
 0x1c8   : > { %v4197_v47 = vpop.f32.mrf.mxu0  ;;  %v4199_v5 = vpop.f32.mrf.mxu1 }
 0x1c9   : > { %4487 = vst [vmem:[#allocation22_spill] sm:$0xff] %v4197_v47 }
 0x1ca   : > { %v1823_v15 = vpop.f32.mrf.mxu0  ;;  %v2048_v36 = vpop.f32.mrf.mxu1 }
 0x1cb   : > { %v1766_v36 = vadd.f32 %v3962_v49, %v4117_v27 }
 0x1cc   : > { %v2051_v58 = vpop.f32.mrf.mxu1  ;;  %v3178_v60 = vpop.f32.mrf.mxu0 }
 0x1cd   : > { %v4204_v42 = vadd.f32 %v2051_v58, %v1763_v23  ;;  %v2221_v7 = vadd.f32 %v3178_v60, %v3995_v33 }
 0x1ce   : > { %v2053_v48 = vpop.f32.mrf.mxu1  ;;  %v2212_v52 = vpop.f32.mrf.mxu0 }
 0x1cf   : > { %v2469_v63 = vmax.f32 %v2221_v7, 0.0  ;;  %v2213_v15 = vadd.f32 %v2212_v52, %v3977_v4 }
 0x1d0   : > { %v2054_v23 = vpop.f32.mrf.mxu1  ;;  %v3179_v58 = vpop.f32.mrf.mxu0 }
 0x1d1   : > { %2533 = vst [vmem:[%s4210_s6 + $0x10] sm:$0xff] %v2469_v63  ;;  %v2467_v33 = vmax.f32 %v2213_v15, 0.0  ;;  %v4216_v60 = vadd.f32 %v2054_v23, %v1766_v36  ;;  %v2224_v28 = vadd.f32 %v3179_v58, %v4004_v46 }
 0x1d2   : > { %v2056_v16 = vpop.f32.mrf.mxu1  ;;  %v2215_v24 = vpop.f32.mrf.mxu0 }
 0x1d3   : > { %2531 = vst [vmem:[%s4210_s6] sm:$0xff] %v2467_v33  ;;  %v2470_v48 = vmax.f32 %v2224_v28, 0.0  ;;  %v2216_v13 = vadd.f32 %v2215_v24, %v3986_v18  ;;  %v2664_v15 = vmul.f32 %v2467_v33, %v2467_v33  ;;  %v2666_v18 = vmul.f32 %v2469_v63, %v2469_v63 }
 0x1d4   : > { %v4221_v27 = vpop.f32.mrf.mxu1  ;;  %v3182_v7 = vpop.f32.mrf.mxu0 }
 0x1d5   : > { %2534 = vst [vmem:[%s4210_s6 + $0x18] sm:$0xff] %v2470_v48  ;;  %v2468_v4 = vmax.f32 %v2216_v13, 0.0  ;;  %v2237_v52 = vadd.f32 %v3182_v7, %v4031_v34  ;;  %v2667_v41 = vmul.f32 %v2470_v48, %v2470_v48 }
 0x1d6   : > { %v2061_v47 = vpop.f32.mrf.mxu1  ;;  %v2228_v36 = vpop.f32.mrf.mxu0 }
 0x1d7   : > { %2532 = vst [vmem:[%s4210_s6 + $0x8] sm:$0xff] %v2468_v4  ;;  %v2595_v23 = vadd.f32 %v2468_v4, %v2467_v33  ;;  %v2665_v16 = vmul.f32 %v2468_v4, %v2468_v4  ;;  %v2473_v46 = vmax.f32 %v2237_v52, 0.0  ;;  %v2229_v28 = vadd.f32 %v2228_v36, %v4013_v62 }
 0x1d8   : > { %v4227_v58 = vpop.f32.mrf.mxu1  ;;  %v3183_v24 = vpop.f32.mrf.mxu0 }
 0x1d9   : > { %v2596_v61 = vadd.f32 %v2595_v23, %v2469_v63  ;;  %v2728_v40 = vadd.f32 %v2665_v16, %v2664_v15  ;;  %2537 = vst [vmem:[%s4210_s6 + $0x30] sm:$0xff] %v2473_v46  ;;  %v2471_v13 = vmax.f32 %v2229_v28, 0.0  ;;  %v2240_v34 = vadd.f32 %v3183_v24, %v4040_v55 }
 0x1da   : > { %v2064_v47 = vpop.f32.mrf.mxu1  ;;  %v2231_v7 = vpop.f32.mrf.mxu0 }
 0x1db   : > { %v2729_v33 = vadd.f32 %v2728_v40, %v2666_v18  ;;  %2535 = vst [vmem:[%s4210_s6 + $0x20] sm:$0xff] %v2471_v13  ;;  %v2597_v4 = vadd.f32 %v2596_v61, %v2470_v48  ;;  %v2232_v62 = vadd.f32 %v2231_v7, %v4022_v17  ;;  %v2474_v52 = vmax.f32 %v2240_v34, 0.0 }
 0x1dc   : > { %v4233_v36 = vpop.f32.mrf.mxu1  ;;  %v3186_v30 = vpop.f32.mrf.mxu0  ;;  %v2668_v15 = vmul.f32 %v2471_v13, %v2471_v13 }
 0x1dd   : > { %v2598_v63 = vadd.f32 %v2597_v4, %v2471_v13  ;;  %v2730_v23 = vadd.f32 %v2729_v33, %v2667_v41  ;;  %v2472_v16 = vmax.f32 %v2232_v62, 0.0  ;;  %2538 = vst [vmem:[%s4210_s6 + $0x38] sm:$0xff] %v2474_v52  ;;  %v2253_v55 = vadd.f32 %v3186_v30, %v4067_v45 }
 0x1de   : > { %v2069_v28 = vpop.f32.mrf.mxu1  ;;  %v2244_v24 = vpop.f32.mrf.mxu0  ;;  %v2670_v13 = vmul.f32 %v2473_v46, %v2473_v46  ;;  %v2671_v62 = vmul.f32 %v2474_v52, %v2474_v52 }
 0x1df   : > { %v2731_v40 = vadd.f32 %v2730_v23, %v2668_v15  ;;  %2536 = vst [vmem:[%s4210_s6 + $0x28] sm:$0xff] %v2472_v16  ;;  %v2599_v18 = vadd.f32 %v2598_v63, %v2472_v16  ;;  %v2669_v61 = vmul.f32 %v2472_v16, %v2472_v16  ;;  %v2245_v17 = vadd.f32 %v2244_v24, %v4049_v6 }
 0x1e0   : > { %v2477_v48 = vmax.f32 %v2253_v55, 0.0  ;;  %v4239_v34 = vpop.f32.mrf.mxu1  ;;  %v3187_v47 = vpop.f32.mrf.mxu0 }
 0x1e1   : > { %v2600_v41 = vadd.f32 %v2599_v18, %v2473_v46  ;;  %v2732_v7 = vadd.f32 %v2731_v40, %v2669_v61  ;;  %v2475_v33 = vmax.f32 %v2245_v17, 0.0  ;;  %v2256_v45 = vadd.f32 %v3187_v47, %v4076_v51 }
 0x1e2   : > { %2541 = vst [vmem:[%s4210_s6 + $0x50] sm:$0xff] %v2477_v48  ;;  %v2072_v30 = vpop.f32.mrf.mxu1  ;;  %v2247_v4 = vpop.f32.mrf.mxu0 }
 0x1e3   : > { %v2733_v63 = vadd.f32 %v2732_v7, %v2670_v13  ;;  %2539 = vst [vmem:[%s4210_s6 + $0x40] sm:$0xff] %v2475_v33  ;;  %v2601_v15 = vadd.f32 %v2600_v41, %v2474_v52  ;;  %v2248_v6 = vadd.f32 %v2247_v4, %v4058_v22  ;;  %v2478_v23 = vmax.f32 %v2256_v45, 0.0 }
 0x1e4   : > { %v4245_v16 = vpop.f32.mrf.mxu1  ;;  %v3190_v55 = vpop.f32.mrf.mxu0  ;;  %v2672_v28 = vmul.f32 %v2475_v33, %v2475_v33 }
 0x1e5   : > { %v2602_v46 = vadd.f32 %v2601_v15, %v2475_v33  ;;  %v2734_v24 = vadd.f32 %v2733_v63, %v2671_v62  ;;  %v2476_v40 = vmax.f32 %v2248_v6, 0.0  ;;  %2542 = vst [vmem:[%s4210_s6 + $0x58] sm:$0xff] %v2478_v23  ;;  %v2269_v51 = vadd.f32 %v3190_v55, %v4101_v12 }
 0x1e6   : > { %v2077_v18 = vpop.f32.mrf.mxu1  ;;  %v2260_v61 = vpop.f32.mrf.mxu0  ;;  %v2674_v33 = vmul.f32 %v2477_v48, %v2477_v48  ;;  %v2675_v15 = vmul.f32 %v2478_v23, %v2478_v23 }
 0x1e7   : > { %v2735_v17 = vadd.f32 %v2734_v24, %v2672_v28  ;;  %2540 = vst [vmem:[%s4210_s6 + $0x48] sm:$0xff] %v2476_v40  ;;  %v2603_v47 = vadd.f32 %v2602_v46, %v2476_v40  ;;  %v2673_v52 = vmul.f32 %v2476_v40, %v2476_v40  ;;  %v2261_v22 = vadd.f32 %v2260_v61, %v4085_v14 }
 0x1e8   : > { %v2481_v13 = vmax.f32 %v2269_v51, 0.0  ;;  %v4251_v41 = vpop.f32.mrf.mxu1  ;;  %v3191_v7 = vpop.f32.mrf.mxu0 }
 0x1e9   : > { %v2604_v45 = vadd.f32 %v2603_v47, %v2477_v48  ;;  %v2736_v30 = vadd.f32 %v2735_v17, %v2673_v52  ;;  %v2479_v4 = vmax.f32 %v2261_v22, 0.0  ;;  %v2272_v12 = vadd.f32 %v3191_v7, %v4107_v39 }
 0x1ea   : > { %2545 = vst [vmem:[%s4210_s6 + $0x70] sm:$0xff] %v2481_v13  ;;  %v2080_v62 = vpop.f32.mrf.mxu1  ;;  %v2263_v63 = vpop.f32.mrf.mxu0 }
 0x1eb   : > { %v2737_v6 = vadd.f32 %v2736_v30, %v2674_v33  ;;  %2543 = vst [vmem:[%s4210_s6 + $0x60] sm:$0xff] %v2479_v4  ;;  %v2605_v55 = vadd.f32 %v2604_v45, %v2478_v23  ;;  %v2264_v14 = vadd.f32 %v2263_v63, %v4094_v56  ;;  %v2482_v46 = vmax.f32 %v2272_v12, 0.0 }
 0x1ec   : > { %v4257_v28 = vpop.f32.mrf.mxu1  ;;  %v3194_v24 = vpop.f32.mrf.mxu0  ;;  %v2676_v40 = vmul.f32 %v2479_v4, %v2479_v4  ;;  %v2678_v45 = vmul.f32 %v2481_v13, %v2481_v13 }
 0x1ed   : > { %v2606_v48 = vadd.f32 %v2605_v55, %v2479_v4  ;;  %v2738_v51 = vadd.f32 %v2737_v6, %v2675_v15  ;;  %v2480_v18 = vmax.f32 %v2264_v14, 0.0  ;;  %2546 = vst [vmem:[%s4210_s6 + $0x78] sm:$0xff] %v2482_v46  ;;  %v2285_v39 = vadd.f32 %v3194_v24, %v4125_v43 }
 0x1ee   : > { %v2085_v61 = vpop.f32.mrf.mxu1  ;;  %v2276_v17 = vpop.f32.mrf.mxu0  ;;  %v2679_v15 = vmul.f32 %v2482_v46, %v2482_v46 }
 0x1ef   : > { %v2739_v47 = vadd.f32 %v2738_v51, %v2676_v40  ;;  %2544 = vst [vmem:[%s4210_s6 + $0x68] sm:$0xff] %v2480_v18  ;;  %v2607_v52 = vadd.f32 %v2606_v48, %v2480_v18  ;;  %v2677_v23 = vmul.f32 %v2480_v18, %v2480_v18  ;;  %v2277_v56 = vadd.f32 %v2276_v17, %v4113_v54 }
 0x1f0   : > { %v2485_v22 = vmax.f32 %v2285_v39, 0.0  ;;  %v4263_v7 = vpop.f32.mrf.mxu1  ;;  %v3195_v33 = vpop.f32.mrf.mxu0 }
 0x1f1   : > { %v2608_v30 = vadd.f32 %v2607_v52, %v2481_v13  ;;  %v2740_v4 = vadd.f32 %v2739_v47, %v2677_v23  ;;  %v2483_v12 = vmax.f32 %v2277_v56, 0.0  ;;  %v2288_v43 = vadd.f32 %v3195_v33, %v4131_v50 }
 0x1f2   : > { %2549 = vst [vmem:[%s4210_s6 + $0x90] sm:$0xff] %v2485_v22  ;;  %v2088_v62 = vpop.f32.mrf.mxu1  ;;  %v2279_v63 = vpop.f32.mrf.mxu0  ;;  %v2682_v33 = vmul.f32 %v2485_v22, %v2485_v22 }
 0x1f3   : > { %v2741_v6 = vadd.f32 %v2740_v4, %v2678_v45  ;;  %2547 = vst [vmem:[%s4210_s6 + $0x80] sm:$0xff] %v2483_v12  ;;  %v2609_v55 = vadd.f32 %v2608_v30, %v2482_v46  ;;  %v2280_v54 = vadd.f32 %v2279_v63, %v4119_v31  ;;  %v2486_v14 = vmax.f32 %v2288_v43, 0.0 }
 0x1f4   : > { %v4269_v24 = vpop.f32.mrf.mxu1  ;;  %v3198_v48 = vpop.f32.mrf.mxu0  ;;  %v2680_v40 = vmul.f32 %v2483_v12, %v2483_v12 }
 0x1f5   : > { %v2610_v13 = vadd.f32 %v2609_v55, %v2483_v12  ;;  %v2742_v51 = vadd.f32 %v2741_v6, %v2679_v15  ;;  %v2484_v18 = vmax.f32 %v2280_v54, 0.0  ;;  %2550 = vst [vmem:[%s4210_s6 + $0x98] sm:$0xff] %v2486_v14  ;;  %v2301_v50 = vadd.f32 %v3198_v48, %v4149_v32 }
 0x1f6   : > { %v2093_v39 = vpop.f32.mrf.mxu1  ;;  %v2292_v61 = vpop.f32.mrf.mxu0  ;;  %v2683_v62 = vmul.f32 %v2486_v14, %v2486_v14 }
 0x1f7   : > { %v2743_v17 = vadd.f32 %v2742_v51, %v2680_v40  ;;  %2548 = vst [vmem:[%s4210_s6 + $0x88] sm:$0xff] %v2484_v18  ;;  %v2611_v47 = vadd.f32 %v2610_v13, %v2484_v18  ;;  %v2681_v46 = vmul.f32 %v2484_v18, %v2484_v18  ;;  %v2293_v31 = vadd.f32 %v2292_v61, %v4137_v2 }
 0x1f8   : > { %v2489_v52 = vmax.f32 %v2301_v50, 0.0  ;;  %v4275_v23 = vpop.f32.mrf.mxu1  ;;  %v3199_v56 = vpop.f32.mrf.mxu0 }
 0x1f9   : > { %v2612_v45 = vadd.f32 %v2611_v47, %v2485_v22  ;;  %v2744_v30 = vadd.f32 %v2743_v17, %v2681_v46  ;;  %v2487_v4 = vmax.f32 %v2293_v31, 0.0  ;;  %v2304_v32 = vadd.f32 %v3199_v56, %v4155_v53 }
 0x1fa   : > { %2553 = vst [vmem:[%s4210_s6 + $0xb0] sm:$0xff] %v2489_v52  ;;  %v2096_v12 = vpop.f32.mrf.mxu1  ;;  %v2295_v43 = vpop.f32.mrf.mxu0  ;;  %v2686_v46 = vmul.f32 %v2489_v52, %v2489_v52 }
 0x1fb   : > { %v2745_v63 = vadd.f32 %v2744_v30, %v2682_v33  ;;  %2551 = vst [vmem:[%s4210_s6 + $0xa0] sm:$0xff] %v2487_v4  ;;  %v2613_v15 = vadd.f32 %v2612_v45, %v2486_v14  ;;  %v2296_v2 = vadd.f32 %v2295_v43, %v4143_v10  ;;  %v2490_v6 = vmax.f32 %v2304_v32, 0.0 }
 0x1fc   : > { %v4281_v55 = vpop.f32.mrf.mxu1  ;;  %v3202_v54 = vpop.f32.mrf.mxu0  ;;  %v2684_v48 = vmul.f32 %v2487_v4, %v2487_v4 }
 0x1fd   : > { %v2614_v22 = vadd.f32 %v2613_v15, %v2487_v4  ;;  %v2746_v13 = vadd.f32 %v2745_v63, %v2683_v62  ;;  %v2488_v40 = vmax.f32 %v2296_v2, 0.0  ;;  %2554 = vst [vmem:[%s4210_s6 + $0xb8] sm:$0xff] %v2490_v6  ;;  %v2317_v53 = vadd.f32 %v3202_v54, %v4173_v1 }
 0x1fe   : > { %v2101_v51 = vpop.f32.mrf.mxu1  ;;  %v2308_v18 = vpop.f32.mrf.mxu0  ;;  %v1755_v1 = vadd.f32 %v3962_v49, %v4098_v3  ;;  %v2687_v32 = vmul.f32 %v2490_v6, %v2490_v6 }
 0x1ff   : > { %v2747_v50 = vadd.f32 %v2746_v13, %v2684_v48  ;;  %2552 = vst [vmem:[%s4210_s6 + $0xa8] sm:$0xff] %v2488_v40  ;;  %v2615_v39 = vadd.f32 %v2614_v22, %v2488_v40  ;;  %v2685_v14 = vmul.f32 %v2488_v40, %v2488_v40  ;;  %v2309_v10 = vadd.f32 %v2308_v18, %v4161_v26 }
 0x200   : > { %v2493_v61 = vmax.f32 %v2317_v53, 0.0  ;;  %v4287_v17 = vpop.f32.mrf.mxu1  ;;  %v3203_v47 = vpop.f32.mrf.mxu0  ;;  %v1758_v22 = vadd.f32 %v3962_v49, %v4105_v20 }
 0x201   : > { %v2616_v31 = vadd.f32 %v2615_v39, %v2489_v52  ;;  %v2748_v56 = vadd.f32 %v2747_v50, %v2685_v14  ;;  %v2491_v33 = vmax.f32 %v2309_v10, 0.0  ;;  %v2320_v45 = vadd.f32 %v3203_v47, %v4179_v0 }
 0x202   : > { %2557 = vst [vmem:[%s4210_s6 + $0xd0] sm:$0xff] %v2493_v61  ;;  %v2104_v30 = vpop.f32.mrf.mxu1  ;;  %v2311_v4 = vpop.f32.mrf.mxu0  ;;  %v2044_v52 = vadd.f32 %v4195_v21, %v1755_v1  ;;  %v2047_v51 = vadd.f32 %v4199_v5, %v1758_v22  ;;  %v2690_v14 = vmul.f32 %v2493_v61, %v2493_v61 }
 0x203   : > { %v2749_v12 = vadd.f32 %v2748_v56, %v2686_v46  ;;  %2555 = vst [vmem:[%s4210_s6 + $0xc0] sm:$0xff] %v2491_v33  ;;  %v2617_v26 = vadd.f32 %v2616_v31, %v2490_v6  ;;  %v2312_v43 = vadd.f32 %v2311_v4, %v4167_v44  ;;  %v2494_v62 = vmax.f32 %v2320_v45, 0.0 }
 0x204   : > { %v4296_v63 = vpop.f32.mrf.mxu1  ;;  %v3206_v15 = vpop.f32.mrf.mxu0  ;;  %v2688_v2 = vmul.f32 %v2491_v33, %v2491_v33  ;;  %v1771_v46 = vadd.f32 %v3962_v49, %v4123_v29 }
 0x205   : > { %v2618_v3 = vadd.f32 %v2617_v26, %v2491_v33  ;;  %v2750_v54 = vadd.f32 %v2749_v12, %v2687_v32  ;;  %v2492_v0 = vmax.f32 %v2312_v43, 0.0  ;;  %2558 = vst [vmem:[%s4210_s6 + $0xd8] sm:$0xff] %v2494_v62  ;;  %v2333_v48 = vadd.f32 %v3206_v15, %v2044_v52 }
 0x206   : > { %v2109_v13 = vpop.f32.mrf.mxu1  ;;  %v2324_v6 = vpop.f32.mrf.mxu0  ;;  %v2060_v30 = vadd.f32 %v4221_v27, %v1771_v46  ;;  %v1774_v52 = vadd.f32 %v3962_v49, %v4129_v57 }
 0x207   : > { %v2751_v40 = vadd.f32 %v2750_v54, %v2688_v2  ;;  %2556 = vst [vmem:[%s4210_s6 + $0xc8] sm:$0xff] %v2492_v0  ;;  %v2619_v44 = vadd.f32 %v2618_v3, %v2492_v0  ;;  %v2689_v21 = vmul.f32 %v2492_v0, %v2492_v0  ;;  %v2325_v53 = vadd.f32 %v2324_v6, %v4185_v9 }
 0x208   : > { %v2497_v18 = vmax.f32 %v2333_v48, 0.0  ;;  %v4304_v50 = vpop.f32.mrf.mxu1  ;;  %v3207_v39 = vpop.f32.mrf.mxu0  ;;  %v2691_v9 = vmul.f32 %v2494_v62, %v2494_v62  ;;  %v2063_v0 = vadd.f32 %v4227_v58, %v1774_v52 }
 0x209   : > { %v2620_v20 = vadd.f32 %v2619_v44, %v2493_v61  ;;  %v2752_v10 = vadd.f32 %v2751_v40, %v2689_v21  ;;  %v2495_v47 = vmax.f32 %v2325_v53, 0.0  ;;  %v2336_v31 = vadd.f32 %v3207_v39, %v2047_v51  ;;  %v4325_v44 = vld [vmem:[%s4464_s2] ss:$0 sm:$0xff] }
 0x20a   : > { %2561 = vst [vmem:[%s4210_s6 + $0xf0] sm:$0xff] %v2497_v18  ;;  %v2112_v56 = vpop.f32.mrf.mxu1  ;;  %v2327_v33 = vpop.f32.mrf.mxu0  ;;  %v2694_v6 = vmul.f32 %v2497_v18, %v2497_v18  ;;  %v1779_v21 = vadd.f32 %v4325_v44, %v4135_v59 }
 0x20b   : > { %v2753_v1 = vadd.f32 %v2752_v10, %v2690_v14  ;;  %2559 = vst [vmem:[%s4210_s6 + $0xe0] sm:$0xff] %v2495_v47  ;;  %v2621_v5 = vadd.f32 %v2620_v20, %v2494_v62  ;;  %v2328_v45 = vadd.f32 %v2327_v33, %v4191_v19  ;;  %v2498_v61 = vmax.f32 %v2336_v31, 0.0 }
 0x20c   : > { %v4312_v4 = vpop.f32.mrf.mxu1  ;;  %v3210_v32 = vpop.f32.mrf.mxu0  ;;  %v2692_v29 = vmul.f32 %v2495_v47, %v2495_v47  ;;  %v2068_v10 = vadd.f32 %v4233_v36, %v1779_v21 }
 0x20d   : > { %v2622_v12 = vadd.f32 %v2621_v5, %v2495_v47  ;;  %v2754_v26 = vadd.f32 %v2753_v1, %v2691_v9  ;;  %v2496_v43 = vmax.f32 %v2328_v45, 0.0  ;;  %2562 = vst [vmem:[%s4210_s6 + $0xf8] sm:$0xff] %v2498_v61  ;;  %v2349_v15 = vadd.f32 %v3210_v32, %v2060_v30 }
 0x20e   : > { %v2117_v3 = vpop.f32.mrf.mxu1  ;;  %v2340_v62 = vpop.f32.mrf.mxu0  ;;  %v2695_v39 = vmul.f32 %v2498_v61, %v2498_v61  ;;  %v1782_v1 = vadd.f32 %v4325_v44, %v4141_v25  ;;  %v1790_v5 = vadd.f32 %v4325_v44, %v4153_v38 }
 0x20f   : > { %v2755_v2 = vadd.f32 %v2754_v26, %v2692_v29  ;;  %2560 = vst [vmem:[%s4210_s6 + $0xe8] sm:$0xff] %v2496_v43  ;;  %v2623_v19 = vadd.f32 %v2622_v12, %v2496_v43  ;;  %v2693_v27 = vmul.f32 %v2496_v43, %v2496_v43  ;;  %v2341_v54 = vadd.f32 %v2340_v62, %v4204_v42 }
 0x210   : > { %v2501_v22 = vmax.f32 %v2349_v15, 0.0  ;;  %v4320_v48 = vpop.f32.mrf.mxu1  ;;  %v3211_v13 = vpop.f32.mrf.mxu0  ;;  %v1787_v42 = vadd.f32 %v4325_v44, %v4147_v11  ;;  %v2071_v12 = vadd.f32 %v4239_v34, %v1782_v1  ;;  %v2079_v29 = vadd.f32 %v4251_v41, %v1790_v5  ;;  %v4489_v5 = vld [vmem:[#allocation19_spill] sm:$0xff] }
 0x211   : > { %v2624_v49 = vadd.f32 %v2623_v19, %v2497_v18  ;;  %v2756_v57 = vadd.f32 %v2755_v2, %v2693_v27  ;;  %v2499_v40 = vmax.f32 %v2341_v54, 0.0  ;;  %v2352_v58 = vadd.f32 %v3211_v13, %v2063_v0 }
 0x212   : > { %2565 = vst [vmem:[%s4210_s6 + $0x110] sm:$0xff] %v2501_v22  ;;  %v2120_v53 = vpop.f32.mrf.mxu1  ;;  %v2343_v51 = vpop.f32.mrf.mxu0  ;;  %v2076_v47 = vadd.f32 %v4245_v16, %v1787_v42  ;;  %v2698_v38 = vmul.f32 %v2501_v22, %v2501_v22  ;;  %v1795_v62 = vadd.f32 %v4325_v44, %v4159_v35  ;;  %v1803_v2 = vadd.f32 %v4325_v44, %v4171_v8 }
 0x213   : > { %v2757_v18 = vadd.f32 %v2756_v57, %v2694_v6  ;;  %2563 = vst [vmem:[%s4210_s6 + $0x100] sm:$0xff] %v2499_v40  ;;  %v2625_v14 = vadd.f32 %v2624_v49, %v2498_v61  ;;  %v2344_v20 = vadd.f32 %v2343_v51, %v4216_v60  ;;  %v2502_v59 = vmax.f32 %v2352_v58, 0.0  ;;  %v4488_v53 = vld [vmem:[#allocation18_spill] sm:$0xff] }
 0x214   : > { %v4336_v46 = vpop.f32.mrf.mxu1  ;;  %v3214_v11 = vpop.f32.mrf.mxu0  ;;  %v2696_v56 = vmul.f32 %v2499_v40, %v2499_v40  ;;  %v2092_v6 = vadd.f32 %v4269_v24, %v1803_v2  ;;  %v1798_v58 = vadd.f32 %v4325_v44, %v4165_v37  ;;  %v1806_v51 = vadd.f32 %v4325_v44, %v4488_v53 }
 0x215   : > { %v2626_v31 = vadd.f32 %v2625_v14, %v2499_v40  ;;  %v2758_v33 = vadd.f32 %v2757_v18, %v2695_v39  ;;  %v2500_v9 = vmax.f32 %v2344_v20, 0.0  ;;  %2566 = vst [vmem:[%s4210_s6 + $0x118] sm:$0xff] %v2502_v59  ;;  %v2365_v60 = vadd.f32 %v3214_v11, %v2076_v47 }
 0x216   : > { %v2125_v36 = vpop.f32.mrf.mxu1  ;;  %v2356_v45 = vpop.f32.mrf.mxu0  ;;  %v2699_v41 = vmul.f32 %v2502_v59, %v2502_v59  ;;  %v2087_v47 = vadd.f32 %v4263_v7, %v1798_v58 }
 0x217   : > { %v2759_v30 = vadd.f32 %v2758_v33, %v2696_v56  ;;  %2564 = vst [vmem:[%s4210_s6 + $0x108] sm:$0xff] %v2500_v9  ;;  %v2627_v16 = vadd.f32 %v2626_v31, %v2500_v9  ;;  %v2697_v61 = vmul.f32 %v2500_v9, %v2500_v9  ;;  %v2357_v32 = vadd.f32 %v2356_v45, %v2068_v10  ;;  %v4490_v36 = vld [vmem:[#allocation21_spill] sm:$0xff] }
 0x218   : > { %v2505_v26 = vmax.f32 %v2365_v60, 0.0  ;;  %v4346_v25 = vpop.f32.mrf.mxu1  ;;  %v3215_v43 = vpop.f32.mrf.mxu0  ;;  %v1811_v60 = vadd.f32 %v4325_v44, %v4489_v5  ;;  %v1819_v45 = vadd.f32 %v4325_v44, %v4490_v36 }
 0x219   : > { %v2628_v52 = vadd.f32 %v2627_v16, %v2501_v22  ;;  %v2760_v15 = vadd.f32 %v2759_v30, %v2697_v61  ;;  %v2503_v3 = vmax.f32 %v2357_v32, 0.0  ;;  %v2368_v19 = vadd.f32 %v3215_v43, %v2079_v29 }
 0x21a   : > { %2569 = vst [vmem:[%s4210_s6 + $0x130] sm:$0xff] %v2505_v26  ;;  %v2128_v34 = vpop.f32.mrf.mxu1  ;;  %v2359_v27 = vpop.f32.mrf.mxu0  ;;  %v2084_v22 = vadd.f32 %v4257_v28, %v1795_v62  ;;  %v2702_v56 = vmul.f32 %v2505_v26, %v2505_v26  ;;  %v2100_v29 = vadd.f32 %v4281_v55, %v1811_v60 }
 0x21b   : > { %v2761_v54 = vadd.f32 %v2760_v15, %v2698_v38  ;;  %2567 = vst [vmem:[%s4210_s6 + $0x120] sm:$0xff] %v2503_v3  ;;  %v2629_v0 = vadd.f32 %v2628_v52, %v2502_v59  ;;  %v2360_v13 = vadd.f32 %v2359_v27, %v2071_v12  ;;  %v2506_v49 = vmax.f32 %v2368_v19, 0.0  ;;  %v4491_v19 = vld [vmem:[#allocation20_spill] sm:$0xff]  ;;  %v4492_v27 = vld [vmem:[#allocation22_spill] sm:$0xff] }
 0x21c   : > { %v4356_v35 = vpop.f32.mrf.mxu1  ;;  %v3218_v57 = vpop.f32.mrf.mxu0  ;;  %v2700_v40 = vmul.f32 %v2503_v3, %v2503_v3  ;;  %v2095_v59 = vadd.f32 %v4275_v23, %v1806_v51  ;;  %v1814_v34 = vadd.f32 %v4325_v44, %v4491_v19 }
 0x21d   : > { %v2630_v8 = vadd.f32 %v2629_v0, %v2503_v3  ;;  %v2762_v21 = vadd.f32 %v2761_v54, %v2699_v41  ;;  %v2504_v42 = vmax.f32 %v2360_v13, 0.0  ;;  %2570 = vst [vmem:[%s4210_s6 + $0x138] sm:$0xff] %v2506_v49  ;;  %v2381_v39 = vadd.f32 %v3218_v57, %v2092_v6 }
 0x21e   : > { %v2133_v28 = vpop.f32.mrf.mxu1  ;;  %v2372_v18 = vpop.f32.mrf.mxu0  ;;  %v2703_v23 = vmul.f32 %v2506_v49, %v2506_v49  ;;  %v1822_v41 = vadd.f32 %v4325_v44, %v4492_v27  ;;  %v4497_v27 = vld [vmem:[#allocation6_spill] sm:$0xff] }
 0x21f   : > { %v2763_v14 = vadd.f32 %v2762_v21, %v2700_v40  ;;  %2568 = vst [vmem:[%s4210_s6 + $0x128] sm:$0xff] %v2504_v42  ;;  %v2631_v24 = vadd.f32 %v2630_v8, %v2504_v42  ;;  %v2701_v20 = vmul.f32 %v2504_v42, %v2504_v42  ;;  %v2373_v10 = vadd.f32 %v2372_v18, %v2084_v22  ;;  %v4494_v18 = vld [vmem:[#allocation4_spill] sm:$0xff] }
 0x220   : > { %v2509_v11 = vmax.f32 %v2381_v39, 0.0  ;;  %v4366_v37 = vpop.f32.mrf.mxu1  ;;  %v3219_v31 = vpop.f32.mrf.mxu0  ;;  %v2111_v57 = vadd.f32 %v4304_v50, %v1822_v41  ;;  %v4493_v39 = vld [vmem:[#allocation2_spill] sm:$0xff]  ;;  %v1843_v41 = vadd.f32 %v4325_v44, %v4497_v27 }
 0x221   : > { %v2632_v33 = vadd.f32 %v2631_v24, %v2505_v26  ;;  %v2764_v9 = vadd.f32 %v2763_v14, %v2701_v20  ;;  %v2507_v1 = vmax.f32 %v2373_v10, 0.0  ;;  %v2384_v30 = vadd.f32 %v3219_v31, %v2095_v59 }
 0x222   : > { %2573 = vst [vmem:[%s4210_s6 + $0x150] sm:$0xff] %v2509_v11  ;;  %v2136_v7 = vpop.f32.mrf.mxu1  ;;  %v2375_v16 = vpop.f32.mrf.mxu0  ;;  %v2108_v26 = vadd.f32 %v4296_v63, %v1819_v45  ;;  %v2706_v42 = vmul.f32 %v2509_v11, %v2509_v11  ;;  %v1827_v28 = vadd.f32 %v4325_v44, %v4493_v39  ;;  %v1835_v14 = vadd.f32 %v4325_v44, %v4494_v18  ;;  %v4495_v45 = vld [vmem:[#allocation3_spill] sm:$0xff] }
 0x223   : > { %v2765_v61 = vadd.f32 %v2764_v9, %v2702_v56  ;;  %2571 = vst [vmem:[%s4210_s6 + $0x140] sm:$0xff] %v2507_v1  ;;  %v2633_v32 = vadd.f32 %v2632_v33, %v2506_v49  ;;  %v2376_v12 = vadd.f32 %v2375_v16, %v2087_v47  ;;  %v2510_v43 = vmax.f32 %v2384_v30, 0.0  ;;  %v4496_v7 = vld [vmem:[#allocation5_spill] sm:$0xff] }
 0x224   : > { %v4376_v38 = vpop.f32.mrf.mxu1  ;;  %v3222_v52 = vpop.f32.mrf.mxu0  ;;  %v2704_v3 = vmul.f32 %v2507_v1, %v2507_v1  ;;  %v2103_v49 = vadd.f32 %v4287_v17, %v1814_v34  ;;  %v2124_v31 = vadd.f32 %v4336_v46, %v1835_v14  ;;  %v1830_v30 = vadd.f32 %v4325_v44, %v4495_v45  ;;  %v4500_v14 = vld [vmem:[#allocation9_spill] sm:$0xff]  ;;  %v4501_v45 = vld [vmem:[#allocation10_spill] sm:$0xff] }
 0x225   : > { %v2634_v15 = vadd.f32 %v2633_v32, %v2507_v1  ;;  %v2766_v62 = vadd.f32 %v2765_v61, %v2703_v23  ;;  %v2508_v2 = vmax.f32 %v2376_v12, 0.0  ;;  %2574 = vst [vmem:[%s4210_s6 + $0x158] sm:$0xff] %v2510_v43  ;;  %v2397_v54 = vadd.f32 %v3222_v52, %v2108_v26 }
 0x226   : > { %v2141_v55 = vpop.f32.mrf.mxu1  ;;  %v2388_v0 = vpop.f32.mrf.mxu0  ;;  %v2707_v50 = vmul.f32 %v2510_v43, %v2510_v43  ;;  %v1838_v16 = vadd.f32 %v4325_v44, %v4496_v7  ;;  %v2119_v26 = vadd.f32 %v4320_v48, %v1830_v30  ;;  %v1859_v30 = vadd.f32 %v4325_v44, %v4501_v45  ;;  %v4502_v7 = vld [vmem:[#allocation12_spill] sm:$0xff] }
 0x227   : > { %v2767_v13 = vadd.f32 %v2766_v62, %v2704_v3  ;;  %2572 = vst [vmem:[%s4210_s6 + $0x148] sm:$0xff] %v2508_v2  ;;  %v2635_v63 = vadd.f32 %v2634_v15, %v2508_v2  ;;  %v2705_v22 = vmul.f32 %v2508_v2, %v2508_v2  ;;  %v2389_v6 = vadd.f32 %v2388_v0, %v2100_v29 }
 0x228   : > { %v2513_v8 = vmax.f32 %v2397_v54, 0.0  ;;  %v4386_v40 = vpop.f32.mrf.mxu1  ;;  %v3223_v21 = vpop.f32.mrf.mxu0  ;;  %v4498_v54 = vld [vmem:[#allocation8_spill] sm:$0xff] }
 0x229   : > { %v2636_v58 = vadd.f32 %v2635_v63, %v2509_v11  ;;  %v2768_v53 = vadd.f32 %v2767_v13, %v2705_v22  ;;  %v2511_v51 = vmax.f32 %v2389_v6, 0.0  ;;  %v2400_v24 = vadd.f32 %v3223_v21, %v2111_v57 }
 0x22a   : > { %2577 = vst [vmem:[%s4210_s6 + $0x170] sm:$0xff] %v2513_v8  ;;  %v2144_v17 = vpop.f32.mrf.mxu1  ;;  %v2391_v20 = vpop.f32.mrf.mxu0  ;;  %v2116_v11 = vadd.f32 %v4312_v4, %v1827_v28  ;;  %v2710_v62 = vmul.f32 %v2513_v8, %v2513_v8  ;;  %v1851_v55 = vadd.f32 %v4325_v44, %v4498_v54  ;;  %v4499_v28 = vld [vmem:[#allocation7_spill] sm:$0xff] }
 0x22b   : > { %v2769_v10 = vadd.f32 %v2768_v53, %v2706_v42  ;;  %2575 = vst [vmem:[%s4210_s6 + $0x160] sm:$0xff] %v2511_v51  ;;  %v2637_v47 = vadd.f32 %v2636_v58, %v2510_v43  ;;  %v2392_v59 = vadd.f32 %v2391_v20, %v2103_v49  ;;  %v2514_v56 = vmax.f32 %v2400_v24, 0.0 }
 0x22c   : > { %v4396_v33 = vpop.f32.mrf.mxu1  ;;  %v3226_v9 = vpop.f32.mrf.mxu0  ;;  %v2708_v5 = vmul.f32 %v2511_v51, %v2511_v51  ;;  %v2127_v43 = vadd.f32 %v4346_v25, %v1838_v16  ;;  %v2132_v49 = vadd.f32 %v4356_v35, %v1843_v41  ;;  %v2140_v57 = vadd.f32 %v4376_v38, %v1851_v55  ;;  %v4504_v41 = vld [vmem:[#allocation13_spill] sm:$0xff] }
 0x22d   : > { %v2638_v1 = vadd.f32 %v2637_v47, %v2511_v51  ;;  %v2770_v60 = vadd.f32 %v2769_v10, %v2707_v50  ;;  %v2512_v36 = vmax.f32 %v2392_v59, 0.0  ;;  %2578 = vst [vmem:[%s4210_s6 + $0x178] sm:$0xff] %v2514_v56  ;;  %v2413_v23 = vadd.f32 %v3226_v9, %v2124_v31 }
 0x22e   : > { %v2149_v4 = vpop.f32.mrf.mxu1  ;;  %v2404_v61 = vpop.f32.mrf.mxu0  ;;  %v2711_v25 = vmul.f32 %v2514_v56, %v2514_v56  ;;  %v1846_v18 = vadd.f32 %v4325_v44, %v4499_v28  ;;  %v1854_v24 = vadd.f32 %v4325_v44, %v4500_v14  ;;  %v1867_v16 = vadd.f32 %v4325_v44, %v4502_v7 }
 0x22f   : > { %v2771_v32 = vadd.f32 %v2770_v60, %v2708_v5  ;;  %2576 = vst [vmem:[%s4210_s6 + $0x168] sm:$0xff] %v2512_v36  ;;  %v2639_v46 = vadd.f32 %v2638_v1, %v2512_v36  ;;  %v2709_v12 = vmul.f32 %v2512_v36, %v2512_v36  ;;  %v2405_v29 = vadd.f32 %v2404_v61, %v2116_v11 }
 0x230   : > { %v2517_v52 = vmax.f32 %v2413_v23, 0.0  ;;  %v4406_v15 = vpop.f32.mrf.mxu1  ;;  %v3227_v3 = vpop.f32.mrf.mxu0  ;;  %v2135_v59 = vadd.f32 %v4366_v37, %v1846_v18  ;;  %v2143_v11 = vadd.f32 %v4386_v40, %v1854_v24  ;;  %v1870_v54 = vadd.f32 %v4325_v44, %v4504_v41 }
 0x231   : > { %v2640_v2 = vadd.f32 %v2639_v46, %v2513_v8  ;;  %v2772_v19 = vadd.f32 %v2771_v32, %v2709_v12  ;;  %v2515_v34 = vmax.f32 %v2405_v29, 0.0  ;;  %v2416_v0 = vadd.f32 %v3227_v3, %v2127_v43 }
 0x232   : > { %2581 = vst [vmem:[%s4210_s6 + $0x190] sm:$0xff] %v2517_v52  ;;  %v2152_v48 = vpop.f32.mrf.mxu1  ;;  %v2407_v13 = vpop.f32.mrf.mxu0  ;;  %v2714_v1 = vmul.f32 %v2517_v52, %v2517_v52  ;;  %v2148_v12 = vadd.f32 %v4396_v33, %v1859_v30 }
 0x233   : > { %v2773_v63 = vadd.f32 %v2772_v19, %v2710_v62  ;;  %2579 = vst [vmem:[%s4210_s6 + $0x180] sm:$0xff] %v2515_v34  ;;  %v2641_v22 = vadd.f32 %v2640_v2, %v2514_v56  ;;  %v2408_v6 = vadd.f32 %v2407_v13, %v2119_v26  ;;  %v2518_v8 = vmax.f32 %v2416_v0, 0.0 }
 0x234   : > { %v2155_v21 = vpop.f32.mrf.mxu1  ;;  %v3230_v42 = vpop.f32.mrf.mxu0  ;;  %v2712_v53 = vmul.f32 %v2515_v34, %v2515_v34 }
 0x235   : > { %v2642_v58 = vadd.f32 %v2641_v22, %v2515_v34  ;;  %v2774_v51 = vadd.f32 %v2773_v63, %v2711_v25  ;;  %v2516_v39 = vmax.f32 %v2408_v6, 0.0  ;;  %2582 = vst [vmem:[%s4210_s6 + $0x198] sm:$0xff] %v2518_v8  ;;  %v2429_v17 = vadd.f32 %v3230_v42, %v2140_v57  ;;  %v4503_v34 = vld [vmem:[#allocation11_spill] sm:$0xff] }
 0x236   : > { %v2157_v20 = vpop.f32.mrf.mxu1  ;;  %v2420_v35 = vpop.f32.mrf.mxu0  ;;  %v2715_v61 = vmul.f32 %v2518_v8, %v2518_v8  ;;  %v2156_v29 = vadd.f32 %v2155_v21, %v1867_v16  ;;  %v1862_v27 = vadd.f32 %v4325_v44, %v4503_v34 }
 0x237   : > { %v2775_v50 = vadd.f32 %v2774_v51, %v2712_v53  ;;  %2580 = vst [vmem:[%s4210_s6 + $0x188] sm:$0xff] %v2516_v39  ;;  %v2643_v38 = vadd.f32 %v2642_v58, %v2516_v39  ;;  %v2713_v10 = vmul.f32 %v2516_v39, %v2516_v39  ;;  %v2421_v47 = vadd.f32 %v2420_v35, %v2132_v49  ;;  %v4505_v51 = vld [vmem:[#allocation16_spill] sm:$0xff]  ;;  %v4506_v35 = vld [vmem:[#allocation14_spill] sm:$0xff] }
 0x238   : > { %v2521_v31 = vmax.f32 %v2429_v17, 0.0  ;;  %v2158_v56 = vpop.f32.mrf.mxu1  ;;  %v3231_v9 = vpop.f32.mrf.mxu0  ;;  %v2151_v22 = vadd.f32 %v4406_v15, %v1862_v27  ;;  %v1883_v39 = vadd.f32 %v4325_v44, %v4505_v51 }
 0x239   : > { %v2644_v5 = vadd.f32 %v2643_v38, %v2517_v52  ;;  %v2776_v60 = vadd.f32 %v2775_v50, %v2713_v10  ;;  %v2519_v36 = vmax.f32 %v2421_v47, 0.0  ;;  %v2432_v23 = vadd.f32 %v3231_v9, %v2143_v11 }
 0x23a   : > { %2585 = vst [vmem:[%s4210_s6 + $0x1b0] sm:$0xff] %v2521_v31  ;;  %v2160_v4 = vpop.f32.mrf.mxu1  ;;  %v2423_v37 = vpop.f32.mrf.mxu0  ;;  %v2159_v6 = vadd.f32 %v2158_v56, %v1870_v54  ;;  %v2718_v21 = vmul.f32 %v2521_v31, %v2521_v31  ;;  %v1875_v50 = vadd.f32 %v4325_v44, %v4506_v35 }
 0x23b   : > { %v2777_v40 = vadd.f32 %v2776_v60, %v2714_v1  ;;  %2583 = vst [vmem:[%s4210_s6 + $0x1a0] sm:$0xff] %v2519_v36  ;;  %v2645_v32 = vadd.f32 %v2644_v5, %v2518_v8  ;;  %v2424_v46 = vadd.f32 %v2423_v37, %v2135_v59  ;;  %v2522_v26 = vmax.f32 %v2432_v23, 0.0  ;;  %v4507_v1 = vld [vmem:[#allocation17_spill] sm:$0xff]  ;;  %v4508_v4 = vld [vmem:[#allocation15_spill] sm:$0xff] }
 0x23c   : > { %v2163_v43 = vpop.f32.mrf.mxu1  ;;  %v3234_v52 = vpop.f32.mrf.mxu0  ;;  %v2716_v62 = vmul.f32 %v2519_v36, %v2519_v36  ;;  %v1886_v5 = vadd.f32 %v4325_v44, %v4507_v1  ;;  %v1878_v37 = vadd.f32 %v4325_v44, %v4508_v4 }
 0x23d   : > { %v2646_v3 = vadd.f32 %v2645_v32, %v2519_v36  ;;  %v2778_v2 = vadd.f32 %v2777_v40, %v2715_v61  ;;  %v2520_v19 = vmax.f32 %v2424_v46, 0.0  ;;  %2586 = vst [vmem:[%s4210_s6 + $0x1b8] sm:$0xff] %v2522_v26  ;;  %v2445_v55 = vadd.f32 %v3234_v52, %v2156_v29 }
 0x23e   : > { %v2165_v0 = vpop.f32.mrf.mxu1  ;;  %v2436_v48 = vpop.f32.mrf.mxu0  ;;  %v2719_v24 = vmul.f32 %v2522_v26, %v2522_v26  ;;  %v2164_v60 = vadd.f32 %v2163_v43, %v1875_v50 }
 0x23f   : > { %v2779_v33 = vadd.f32 %v2778_v2, %v2716_v62  ;;  %2584 = vst [vmem:[%s4210_s6 + $0x1a8] sm:$0xff] %v2520_v19  ;;  %v2647_v13 = vadd.f32 %v2646_v3, %v2520_v19  ;;  %v2717_v25 = vmul.f32 %v2520_v19, %v2520_v19  ;;  %v2437_v63 = vadd.f32 %v2436_v48, %v2148_v12 }
 0x240   : > { %v2525_v49 = vmax.f32 %v2445_v55, 0.0  ;;  %v2166_v57 = vpop.f32.mrf.mxu1  ;;  %v3235_v8 = vpop.f32.mrf.mxu0 }
 0x241   : > { %v2648_v42 = vadd.f32 %v2647_v13, %v2521_v31  ;;  %v2780_v58 = vadd.f32 %v2779_v33, %v2717_v25  ;;  %v2523_v53 = vmax.f32 %v2437_v63, 0.0  ;;  %v2448_v28 = vadd.f32 %v3235_v8, %v2159_v6 }
 0x242   : > { %2589 = vst [vmem:[%s4210_s6 + $0x1d0] sm:$0xff] %v2525_v49  ;;  %v2168_v18 = vpop.f32.mrf.mxu1  ;;  %v2439_v14 = vpop.f32.mrf.mxu0  ;;  %v2722_v61 = vmul.f32 %v2525_v49, %v2525_v49  ;;  %v2167_v52 = vadd.f32 %v2166_v57, %v1878_v37 }
 0x243   : > { %v2781_v17 = vadd.f32 %v2780_v58, %v2718_v21  ;;  %2587 = vst [vmem:[%s4210_s6 + $0x1c0] sm:$0xff] %v2523_v53  ;;  %v2649_v15 = vadd.f32 %v2648_v42, %v2522_v26  ;;  %v2440_v20 = vadd.f32 %v2439_v14, %v2151_v22  ;;  %v2720_v38 = vmul.f32 %v2523_v53, %v2523_v53 }
 0x244   : > { %v2526_v10 = vmax.f32 %v2448_v28, 0.0  ;;  %v2171_v47 = vpop.f32.mrf.mxu1  ;;  %v3238_v59 = vpop.f32.mrf.mxu0 }
 0x245   : > { %v2650_v11 = vadd.f32 %v2649_v15, %v2523_v53  ;;  %v2782_v31 = vadd.f32 %v2781_v17, %v2719_v24  ;;  %v2524_v56 = vmax.f32 %v2440_v20, 0.0  ;;  %v2172_v9 = vadd.f32 %v2171_v47, %v1883_v39 }
 0x246   : > { %2590 = vst [vmem:[%s4210_s6 + $0x1d8] sm:$0xff] %v2526_v10  ;;  %v2173_v36 = vpop.f32.mrf.mxu1  ;;  %v2452_v45 = vpop.f32.mrf.mxu0  ;;  %v2723_v19 = vmul.f32 %v2526_v10, %v2526_v10  ;;  %v2797_v39 = vlaneseq }
 0x247   : > { %v2783_v30 = vadd.f32 %v2782_v31, %v2720_v38  ;;  %2588 = vst [vmem:[%s4210_s6 + $0x1c8] sm:$0xff] %v2524_v56  ;;  %v2651_v7 = vadd.f32 %v2650_v11, %v2524_v56  ;;  %v2721_v16 = vmul.f32 %v2524_v56, %v2524_v56  ;;  %v2461_v23 = vadd.f32 %v3238_v59, %v2172_v9 }
 0x248   : > { %v2453_v40 = vadd.f32 %v2452_v45, %v2164_v60  ;;  %v2174_v32 = vpop.f32.mrf.mxu1  ;;  %v3239_v46 = vpop.f32.mrf.mxu0  ;;  %v2798_v17 = vshrl.u32 %v2797_v39, 7 }
 0x249   : > { %v2652_v12 = vadd.f32 %v2651_v7, %v2525_v49  ;;  %v2784_v29 = vadd.f32 %v2783_v30, %v2721_v16  ;;  %v2529_v26 = vmax.f32 %v2461_v23, 0.0  ;;  %v2175_v43 = vadd.f32 %v2174_v32, %v1886_v5 }
 0x24a   : > { %v2527_v3 = vmax.f32 %v2453_v40, 0.0  ;;  %v2176_v62 = vpop.f32.mrf.mxu1  ;;  %v2455_v2 = vpop.f32.mrf.mxu0  ;;  %vm2800_vm1 = vcmp.eq.s32.totalorder %v2798_v17, 1  ;;  %vm2799_vm2 = vcmp.eq.s32.totalorder %v2798_v17, 0 }
 0x24b   : > { %v2785_v34 = vadd.f32 %v2784_v29, %v2722_v61  ;;  %2593 = vst [vmem:[%s4210_s6 + $0x1f0] sm:$0xff] %v2529_v26  ;;  %v2653_v27 = vadd.f32 %v2652_v12, %v2526_v10  ;;  %v2464_v44 = vadd.f32 %v3239_v46, %v2175_v43  ;;  %v2456_v41 = vadd.f32 %v2455_v2, %v2167_v52 }
 0x24c   : > { %2591 = vst [vmem:[%s4210_s6 + $0x1e0] sm:$0xff] %v2527_v3  ;;  %v2724_v55 = vmul.f32 %v2527_v3, %v2527_v3  ;;  %v2726_v22 = vmul.f32 %v2529_v26, %v2529_v26 }
 0x24d   : > { %v2654_v54 = vadd.f32 %v2653_v27, %v2527_v3  ;;  %v2786_v0 = vadd.f32 %v2785_v34, %v2723_v19  ;;  %v2530_v48 = vmax.f32 %v2464_v44, 0.0  ;;  %v2528_v33 = vmax.f32 %v2456_v41, 0.0 }
 0x24f   : > { %v2787_v13 = vadd.f32 %v2786_v0, %v2724_v55  ;;  %2594 = vst [vmem:[%s4210_s6 + $0x1f8] sm:$0xff] %v2530_v48  ;;  %2592 = vst [vmem:[%s4210_s6 + $0x1e8] sm:$0xff] %v2528_v33  ;;  %v2655_v25 = vadd.f32 %v2654_v54, %v2528_v33  ;;  %v2725_v63 = vmul.f32 %v2528_v33, %v2528_v33 }
 0x250   : > { %v2727_v57 = vmul.f32 %v2530_v48, %v2530_v48 }
 0x251   : > { %v2656_v6 = vadd.f32 %v2655_v25, %v2529_v26  ;;  %v2788_v49 = vadd.f32 %v2787_v13, %v2725_v63 }
 0x253   : > { %v2657_v8 = vadd.f32 %v2656_v6, %v2530_v48  ;;  %v2789_v21 = vadd.f32 %v2788_v49, %v2726_v22 }
 0x255   : > { %v2658_v42 = vrot.slane %v2657_v8, 4  ;;  %v2790_v58 = vadd.f32 %v2789_v21, %v2727_v57 }
 0x257   : > { %v2659_v53 = vadd.f32 %v2658_v42, %v2657_v8  ;;  %v2791_v51 = vrot.slane %v2790_v58, 4 }
 0x259   : > { %v2660_v28 = vrot.slane %v2659_v53, 2  ;;  %v2792_v18 = vadd.f32 %v2791_v51, %v2790_v58 }
 0x25b   : > { %v2661_v14 = vadd.f32 %v2660_v28, %v2659_v53  ;;  %v2793_v24 = vrot.slane %v2792_v18, 2 }
 0x25d   : > { %v2794_v15 = vadd.f32 %v2793_v24, %v2792_v18  ;;  %v2662_v20 = vrot.slane %v2661_v14, 1 }
 0x25f   : > { %v2795_v35 = vrot.slane %v2794_v15, 1  ;;  %v2663_v38 = vadd.f32 %v2662_v20, %v2661_v14 }
 0x261   : > { %v2796_v50 = vadd.f32 %v2795_v35, %v2794_v15 }
 0x263   : > { %v2801_v10 = vsel %vm2800_vm1, %v2796_v50, 0.0 }
 0x264   : > { %v2802_v47 = vsel %vm2799_vm2, %v2663_v38, %v2801_v10 }
 0x265   : > { %2803 = vst [vmem:[%s214_s11] sm:$0xff] %v2802_v47 }
 0x266 PF: > { %s15_s15 = sadd.s32 1, %s3549_s15  }
 0x267   : > { %p12_p5 = scmp.ge.s32.totalorder %s15_s15, 4  }
 0x269   :  { %14 = sbr.rel (!%p12_p5) target bundleno = 1 (0x1), region = 74 }

// kernel: decoder_forward.17
= control target key start
LH: loop header
LB: loop body
LE: loop exit
PB: predicated region body
PF: predicated region fallthrough
CT: control target
= control target key end

     0   :  { %10 = vsyncpa [#allocation3], 0  ;;  %s2135_s0 = inlined_call_operand.vmem [shape: bf16[1024,32], index: 0, kind: input, shape index: {}]   ;;  %s2136_s1 = inlined_call_operand.vmem [shape: bf16[32,128], index: 1, kind: input, shape index: {}]   ;;  %s2137_s2 = inlined_call_operand.vmem [shape: f32[1,128], index: 2, kind: input, shape index: {}]   ;;  %s2138_s3 = inlined_call_operand.vmem [shape: f32[1024,128], index: 3, kind: output, shape index: {0}]   ;;  %s2139_s4 = inlined_call_operand.hbm [shape: f32[16,128], index: 4, kind: output, shape index: {1}]  }
   0x1   :  { %12 = vsyncpa [#allocation3 + $0x1], 0  ;;  %s1637_s15 = smov 0   ;;  %s1639_s16 = smov 0  }
   0x2   :  { %s1641_s17 = smov 0   ;;  %s1643_s18 = smov 0  }
   0x3 LB: > { %s1658_s19 = sadd.s32 4294967295, %s1609_s18   ;;  %s1290_s20 = sadd.s32 4294967294, %s1609_s18   ;;  %s1609_s18 = sphi %s1643_s18, %s2145_s18   ;;  %s1605_s17 = sphi %s1641_s17, %s2144_s17   ;;  %s1601_s16 = sphi %s1639_s16, %s2143_s16   ;;  %s1597_s15 = sphi %s1637_s15, %s2142_s15  }
   0x4   : > { %s1662_s21 = sadd.s32 1, %s1609_s18   ;;  %s119_s22 = sadd.s32 1, %s1605_s17 }
   0x5   : > { %s116_s23 = ssub.s32 %s1609_s18, %s1662_s21  ;;  %p129_p0 = scmp.ne.s32.totalorder %s1605_s17, %s1601_s16 }
   0x6   : > { %p117_p1 = scmp.eq.s32.totalorder %s116_s23, 0  ;;  %p130_p2 = scmp.eq.s32.totalorder %s1658_s19, 1 }
   0x7   : > { %p135_p3 = scmp.ne.s32.totalorder %s1601_s16, %s1597_s15  ;;  %p136_p4 = scmp.eq.s32.totalorder %s1290_s20, 1 }
   0x8   : > { %s1673_s24 = scalar_select %p117_p1, %s1605_s17, %s119_s22  }
   0x9   : > { %p1675_p5 = por %p130_p2, %p129_p0  ;;  %p1679_p6 = por %p136_p4, %p135_p3 }
   0xa   : > { %p1293_p7 = scmp.ge.s32.totalorder %s1609_s18, 1  ;;  %p169_p8 = scmp.lt.s32.totalorder %s1609_s18, 3 }
   0xc   : > { %p170_p9 = pnand %p1293_p7, %p169_p8 }
   0xd   : > { %s1295_s29 = sshll.u32 (!%p170_p9), %s1658_s19, 6  ;;  %s197_s22 = sand.u32 (!%p170_p9), 1, %s1601_s16  }
   0xe   : > { %173 = sbr.rel (%p170_p9) target bundleno = 387 (0x183), region = 32  ;;  %p201_p10 = scmp.lt.s32.totalorder (!%p170_p9), %s1295_s29, 127 }
   0xf   : > { %s1294_s23 = sshll.u32 (!%p170_p9), %s197_s22, 3  ;;  %s1367_s27 = sshll.u32 (!%p170_p9), %s1658_s19, 7 }
  0x10   : > { %s199_s28 = scalar_lea.vmem (!%p170_p9), [#allocation2], %s1294_s23  ;;  %s1189_s7 = scalar_lea.sflag (!%p170_p9), [#allocation3], %s197_s22 }
  0x11   : > { %s1611_s19 = smov (!%p170_p9), [#allocation2]  }
  0x13   : > { %v1515_v0 = vld [vmem:[%s2136_s1 + $0x8] sm:$0xff]   ;;  %v1516_v1 = vld [vmem:[%s2136_s1] sm:$0xff]   ;;  %s2147_s29 = smov (!%p201_p10, %s1295_s29), 127  ;;  %vm460_vm0 = vcmask 261120  }
  0x14   : > { %1404 = vmatprep.subr.bf16.mxu0 %v1515_v0  ;;  %1472 = vmatprep.subr.bf16.mxu1 %v1515_v0  ;;  %s1296_s6 = sshll.u32 %s2147_s29, 2  ;;  %v1767_v34 = vld [vmem:[%s2137_s2] ss:$0 sm:$0xff]  ;;  %s1298_s12 = sshll.u32 %s2147_s29, 3 }
  0x15   : > { %1405 = vmatpush3.bf16.msra.mxu0 %v1515_v0  ;;  %1474 = vmatpush3.bf16.msra.mxu1 %v1515_v0  ;;  %s1698_s9 = scalar_lea.vmem %s2135_s0, %s1296_s6  ;;  %s1774_s20 = scalar_lea.vmem %s2138_s3, %s1298_s12 }
  0x16   : > { %1406 = vmatprep.subr.bf16.mxu0 %v1516_v1  ;;  %1473 = vmatprep.subr.bf16.mxu1 %v1516_v1  ;;  %v1517_v2 = vld [vmem:[%s1698_s9] sm:$0xff]   ;;  %v1518_v3 = vld [vmem:[%s1698_s9 + $0x8] sm:$0xff]   ;;  %v1519_v4 = vld [vmem:[%s1698_s9 + $0x10] sm:$0xff]   ;;  %s1206_s29 = sshll.u32 %s199_s28, 4  ;;  %s2100_s6 = scalar_lea.hbm %s2139_s4, %s1367_s27  ;;  %s1207_s29 = int_to_ptr.vmem [resolvable:$true] %s1206_s29 }
  0x17   : > { %1408 = vmatprep.mubr.msk.bf16.mxu0 %vm460_vm0, %v1517_v2  ;;  %v1520_v5 = vld [vmem:[%s1698_s9 + $0x18] sm:$0xff]   ;;  %v1521_v6 = vld [vmem:[%s1698_s9 + $0x20] sm:$0xff]   ;;  %v1522_v7 = vld [vmem:[%s1698_s9 + $0x28] sm:$0xff]   ;;  %s1549_s8 = scalar_lea.vmem %s1207_s29, 128 }
  0x18   : > { %v1523_v8 = vld [vmem:[%s1698_s9 + $0x30] sm:$0xff]   ;;  %v1533_v9 = vld [vmem:[%s1698_s9 + $0x80] sm:$0xff]   ;;  %v1534_v10 = vld [vmem:[%s1698_s9 + $0x88] sm:$0xff]   ;;  %p1550_p11 = scmp.ne.s32.totalorder %s1207_s29, %s1549_s8 }
  0x19   : > { %1407 = vmatpush3.bf16.msra.mxu0 %v1516_v1  ;;  %1475 = vmatpush3.bf16.msra.mxu1 %v1516_v1  ;;  %v1535_v11 = vld [vmem:[%s1698_s9 + $0x90] sm:$0xff]   ;;  %v1524_v12 = vld [vmem:[%s1698_s9 + $0x38] sm:$0xff]   ;;  %v1525_v13 = vld [vmem:[%s1698_s9 + $0x40] sm:$0xff]  }
  0x1a   : > { %1440 = vmatprep.mubr.msk.bf16.mxu1 %vm460_vm0, %v1533_v9  ;;  %v1536_v14 = vld [vmem:[%s1698_s9 + $0x98] sm:$0xff]   ;;  %v1537_v15 = vld [vmem:[%s1698_s9 + $0xa0] sm:$0xff]   ;;  %v1526_v16 = vld [vmem:[%s1698_s9 + $0x48] sm:$0xff]   ;;  %p1551_p12 = pnand %p1550_p11, %p1675_p5 }
  0x1b   : > { %v1538_v17 = vld [vmem:[%s1698_s9 + $0xa8] sm:$0xff]   ;;  %v1527_v18 = vld [vmem:[%s1698_s9 + $0x50] sm:$0xff]   ;;  %v1528_v20 = vld [vmem:[%s1698_s9 + $0x58] sm:$0xff]  }
  0x1c   : > { %1409 = vmatmul.mubr.msk.bf16.vlgmr.msra.gmra.mxu0 %vm460_vm0, %v1518_v3  ;;  %1441 = vmatmul.mubr.msk.bf16.vlgmr.msra.gmra.mxu1 %vm460_vm0, %v1534_v10  ;;  %v1539_v19 = vld [vmem:[%s1698_s9 + $0xb0] sm:$0xff]   ;;  %v1540_v21 = vld [vmem:[%s1698_s9 + $0xb8] sm:$0xff]   ;;  %v1529_v22 = vld [vmem:[%s1698_s9 + $0x60] sm:$0xff]   ;;  %p1552_p13 = pneg %p1551_p12 }
  0x1d   : > { %1412 = vmatprep.mubr.msk.bf16.mxu0 %vm460_vm0, %v1519_v4  ;;  %1444 = vmatprep.mubr.msk.bf16.mxu1 %vm460_vm0, %v1535_v11  ;;  %v1541_v23 = vld [vmem:[%s1698_s9 + $0xc0] sm:$0xff]   ;;  %v1530_v24 = vld [vmem:[%s1698_s9 + $0x68] sm:$0xff]   ;;  %v1531_v26 = vld [vmem:[%s1698_s9 + $0x70] sm:$0xff]  }
  0x1e   : > { %v1542_v25 = vld [vmem:[%s1698_s9 + $0xc8] sm:$0xff]   ;;  %v1543_v27 = vld [vmem:[%s1698_s9 + $0xd0] sm:$0xff]   ;;  %v1532_v28 = vld [vmem:[%s1698_s9 + $0x78] sm:$0xff]  }
  0x1f   : > { %v1544_v29 = vld [vmem:[%s1698_s9 + $0xd8] sm:$0xff]   ;;  %v1545_v30 = vld [vmem:[%s1698_s9 + $0xe0] sm:$0xff]   ;;  %v1546_v31 = vld [vmem:[%s1698_s9 + $0xe8] sm:$0xff]  }
  0x20   : > { %v1547_v32 = vld [vmem:[%s1698_s9 + $0xf0] sm:$0xff]   ;;  %v1548_v33 = vld [vmem:[%s1698_s9 + $0xf8] sm:$0xff]   ;;  %s1553_s9 = sshll.u32 %s1611_s19, 4  ;;  %s1554_s9 = int_to_ptr.vmem [resolvable:$false] %s1553_s9 }
  0x21   : > { %s1555_s10 = scalar_lea.vmem %s1554_s9, 256  ;;  %p1556_p0 = scmp.lt.s32.totalorder %s1207_s29, %s1554_s9 }
  0x22   : > { %p1557_p1 = scmp.lt.s32.totalorder %s1555_s10, %s1549_s8 }
  0x24   : > { %1413 = vmatmul.mubr.msk.bf16.gmra.mxu0 %vm460_vm0, %v1520_v5  ;;  %1445 = vmatmul.mubr.msk.bf16.gmra.mxu1 %vm460_vm0, %v1536_v14  ;;  %p1558_p2 = por %p1557_p1, %p1556_p0 }
  0x25   : > { %1416 = vmatprep.mubr.msk.bf16.mxu0 %vm460_vm0, %v1521_v6  ;;  %1448 = vmatprep.mubr.msk.bf16.mxu1 %vm460_vm0, %v1537_v15 }
  0x26   : > { %p1559_p3 = pnand %p1558_p2, %p1552_p13 }
  0x2c   : > { %1417 = vmatmul.mubr.msk.bf16.gmra.mxu0 %vm460_vm0, %v1522_v7  ;;  %1449 = vmatmul.mubr.msk.bf16.gmra.mxu1 %vm460_vm0, %v1538_v17 }
  0x2d   : > { %1420 = vmatprep.mubr.msk.bf16.mxu0 %vm460_vm0, %v1523_v8  ;;  %1452 = vmatprep.mubr.msk.bf16.mxu1 %vm460_vm0, %v1539_v19 }
  0x34   : > { %1421 = vmatmul.mubr.msk.bf16.gmra.mxu0 %vm460_vm0, %v1524_v12  ;;  %1453 = vmatmul.mubr.msk.bf16.gmra.mxu1 %vm460_vm0, %v1540_v21 }
  0x35   : > { %1424 = vmatprep.mubr.msk.bf16.mxu0 %vm460_vm0, %v1525_v13  ;;  %1456 = vmatprep.mubr.msk.bf16.mxu1 %vm460_vm0, %v1541_v23 }
  0x3c   : > { %1425 = vmatmul.mubr.msk.bf16.gmra.mxu0 %vm460_vm0, %v1526_v16  ;;  %1457 = vmatmul.mubr.msk.bf16.gmra.mxu1 %vm460_vm0, %v1542_v25 }
  0x3d   : > { %1428 = vmatprep.mubr.msk.bf16.mxu0 %vm460_vm0, %v1527_v18  ;;  %1460 = vmatprep.mubr.msk.bf16.mxu1 %vm460_vm0, %v1543_v27 }
  0x44   : > { %1429 = vmatmul.mubr.msk.bf16.gmra.mxu0 %vm460_vm0, %v1528_v20  ;;  %1461 = vmatmul.mubr.msk.bf16.gmra.mxu1 %vm460_vm0, %v1544_v29 }
  0x45   : > { %1432 = vmatprep.mubr.msk.bf16.mxu0 %vm460_vm0, %v1529_v22  ;;  %1464 = vmatprep.mubr.msk.bf16.mxu1 %vm460_vm0, %v1545_v30 }
  0x4c   : > { %1433 = vmatmul.mubr.msk.bf16.gmra.mxu0 %vm460_vm0, %v1530_v24  ;;  %1465 = vmatmul.mubr.msk.bf16.gmra.mxu1 %vm460_vm0, %v1546_v31 }
  0x4d   : > { %1436 = vmatprep.mubr.msk.bf16.mxu0 %vm460_vm0, %v1531_v26  ;;  %1468 = vmatprep.mubr.msk.bf16.mxu1 %vm460_vm0, %v1547_v32 }
  0x54   : > { %1437 = vmatmul.mubr.msk.bf16.gmra.mxu0 %vm460_vm0, %v1532_v28  ;;  %1469 = vmatmul.mubr.msk.bf16.gmra.mxu1 %vm460_vm0, %v1548_v33 }
  0xdc   : > { %v1410_v35 = vpop.f32.mrf.mxu0  ;;  %v1442_v5 = vpop.f32.mrf.mxu1 }
  0xdd   : > { %v600_v36 = vadd.f32 %v1410_v35, %v1767_v34  ;;  %v728_v11 = vadd.f32 %v1442_v5, %v1767_v34 }
  0xde   : > { %v591_v37 = vpop.f32.mrf.mxu0  ;;  %v719_v12 = vpop.f32.mrf.mxu1 }
  0xdf   : > { %v848_v38 = vmax.f32 %v600_v36, 0.0  ;;  %v592_v39 = vadd.f32 %v1767_v34, %v591_v37  ;;  %v1794_v19 = vmax.f32 %v728_v11, 0.0  ;;  %v720_v20 = vadd.f32 %v1767_v34, %v719_v12 }
  0xe0   : > { %v1411_v40 = vpop.f32.mrf.mxu0  ;;  %v1443_v21 = vpop.f32.mrf.mxu1 }
  0xe1   : > { %912 = vst [vmem:[%s1774_s20 + $0x10] sm:$0xff] %v848_v38  ;;  %v846_v41 = vmax.f32 %v592_v39, 0.0  ;;  %v603_v42 = vadd.f32 %v1411_v40, %v1767_v34  ;;  %v1045_v56 = vmul.f32 %v848_v38, %v848_v38  ;;  %944 = vst [vmem:[%s1774_s20 + $0x110] sm:$0xff] %v1794_v19  ;;  %v1801_v29 = vmax.f32 %v720_v20, 0.0 }
  0xe2   : > { %v594_v43 = vpop.f32.mrf.mxu0  ;;  %v731_v30 = vadd.f32 %v1443_v21, %v1767_v34  ;;  %v722_v31 = vpop.f32.mrf.mxu1 }
  0xe3   : > { %910 = vst [vmem:[%s1774_s20] sm:$0xff] %v846_v41  ;;  %v849_v44 = vmax.f32 %v603_v42, 0.0  ;;  %v595_v45 = vadd.f32 %v1767_v34, %v594_v43  ;;  %v1043_v49 = vmul.f32 %v846_v41, %v846_v41  ;;  %942 = vst [vmem:[%s1774_s20 + $0x100] sm:$0xff] %v1801_v29  ;;  %v723_v39 = vadd.f32 %v1767_v34, %v722_v31 }
  0xe4   : > { %v1414_v46 = vpop.f32.mrf.mxu0  ;;  %v1446_v40 = vpop.f32.mrf.mxu1 }
  0xe5   : > { %913 = vst [vmem:[%s1774_s20 + $0x18] sm:$0xff] %v849_v44  ;;  %v847_v47 = vmax.f32 %v595_v45, 0.0  ;;  %v616_v48 = vadd.f32 %v1414_v46, %v1767_v34  ;;  %v1046_v62 = vmul.f32 %v849_v44, %v849_v44 }
  0xe6   : > { %v607_v50 = vpop.f32.mrf.mxu0 }
  0xe7   : > { %911 = vst [vmem:[%s1774_s20 + $0x8] sm:$0xff] %v847_v47  ;;  %v974_v51 = vadd.f32 %v847_v47, %v846_v41  ;;  %v1044_v52 = vmul.f32 %v847_v47, %v847_v47  ;;  %v852_v53 = vmax.f32 %v616_v48, 0.0  ;;  %v608_v54 = vadd.f32 %v1767_v34, %v607_v50 }
  0xe8   : > { %v1415_v55 = vpop.f32.mrf.mxu0  ;;  %v1815_v47 = vmax.f32 %v723_v39, 0.0  ;;  %v744_v48 = vadd.f32 %v1446_v40, %v1767_v34 }
  0xe9   : > { %v975_v57 = vadd.f32 %v974_v51, %v848_v38  ;;  %v1107_v58 = vadd.f32 %v1044_v52, %v1043_v49  ;;  %916 = vst [vmem:[%s1774_s20 + $0x30] sm:$0xff] %v852_v53  ;;  %v850_v59 = vmax.f32 %v608_v54, 0.0  ;;  %v619_v60 = vadd.f32 %v1415_v55, %v1767_v34  ;;  %v735_v49 = vpop.f32.mrf.mxu1 }
  0xea   : > { %v610_v61 = vpop.f32.mrf.mxu0  ;;  %v1049_v22 = vmul.f32 %v852_v53, %v852_v53  ;;  %v1808_v38 = vmax.f32 %v731_v30, 0.0  ;;  %943 = vst [vmem:[%s1774_s20 + $0x108] sm:$0xff] %v1815_v47 }
  0xeb   : > { %v1108_v63 = vadd.f32 %v1107_v58, %v1045_v56  ;;  %914 = vst [vmem:[%s1774_s20 + $0x20] sm:$0xff] %v850_v59  ;;  %v976_v0 = vadd.f32 %v975_v57, %v849_v44  ;;  %v611_v1 = vadd.f32 %v1767_v34, %v610_v61  ;;  %v1047_v2 = vmul.f32 %v850_v59, %v850_v59 }
  0xec   : > { %v853_v3 = vmax.f32 %v619_v60, 0.0  ;;  %v1418_v4 = vpop.f32.mrf.mxu0  ;;  %945 = vst [vmem:[%s1774_s20 + $0x118] sm:$0xff] %v1808_v38  ;;  %v1822_v57 = vmax.f32 %v744_v48, 0.0  ;;  %v736_v58 = vadd.f32 %v1767_v34, %v735_v49 }
  0xed   : > { %v977_v6 = vadd.f32 %v976_v0, %v850_v59  ;;  %v1109_v7 = vadd.f32 %v1108_v63, %v1046_v62  ;;  %v851_v8 = vmax.f32 %v611_v1, 0.0  ;;  %v632_v9 = vadd.f32 %v1418_v4, %v1767_v34  ;;  %v1447_v59 = vpop.f32.mrf.mxu1 }
  0xee   : > { %917 = vst [vmem:[%s1774_s20 + $0x38] sm:$0xff] %v853_v3  ;;  %v623_v10 = vpop.f32.mrf.mxu0  ;;  %v1050_v26 = vmul.f32 %v853_v3, %v853_v3  ;;  %948 = vst [vmem:[%s1774_s20 + $0x130] sm:$0xff] %v1822_v57  ;;  %v1829_v1 = vmax.f32 %v736_v58, 0.0 }
  0xef   : > { %v1110_v13 = vadd.f32 %v1109_v7, %v1047_v2  ;;  %915 = vst [vmem:[%s1774_s20 + $0x28] sm:$0xff] %v851_v8  ;;  %v978_v14 = vadd.f32 %v977_v6, %v851_v8  ;;  %v1048_v15 = vmul.f32 %v851_v8, %v851_v8  ;;  %v856_v16 = vmax.f32 %v632_v9, 0.0 }
  0xf0   : > { %v624_v17 = vadd.f32 %v1767_v34, %v623_v10  ;;  %v1419_v18 = vpop.f32.mrf.mxu0  ;;  %v747_v2 = vadd.f32 %v1447_v59, %v1767_v34  ;;  %946 = vst [vmem:[%s1774_s20 + $0x120] sm:$0xff] %v1829_v1 }
  0xf1   : > { %v979_v23 = vadd.f32 %v978_v14, %v852_v53  ;;  %v1111_v24 = vadd.f32 %v1110_v13, %v1048_v15  ;;  %920 = vst [vmem:[%s1774_s20 + $0x50] sm:$0xff] %v856_v16  ;;  %v635_v25 = vadd.f32 %v1419_v18, %v1767_v34  ;;  %v1053_v54 = vmul.f32 %v856_v16, %v856_v16 }
  0xf2   : > { %v854_v27 = vmax.f32 %v624_v17, 0.0  ;;  %v626_v28 = vpop.f32.mrf.mxu0  ;;  %v1836_v10 = vmax.f32 %v747_v2, 0.0 }
  0xf3   : > { %v1112_v32 = vadd.f32 %v1111_v24, %v1049_v22  ;;  %v980_v33 = vadd.f32 %v979_v23, %v853_v3  ;;  %v857_v35 = vmax.f32 %v635_v25, 0.0  ;;  %v627_v36 = vadd.f32 %v1767_v34, %v626_v28  ;;  %v738_v3 = vpop.f32.mrf.mxu1 }
  0xf4   : > { %918 = vst [vmem:[%s1774_s20 + $0x40] sm:$0xff] %v854_v27  ;;  %v1422_v37 = vpop.f32.mrf.mxu0  ;;  %v1051_v42 = vmul.f32 %v854_v27, %v854_v27  ;;  %v739_v11 = vadd.f32 %v1767_v34, %v738_v3  ;;  %949 = vst [vmem:[%s1774_s20 + $0x138] sm:$0xff] %v1836_v10 }
  0xf5   : > { %v981_v41 = vadd.f32 %v980_v33, %v854_v27  ;;  %v1113_v43 = vadd.f32 %v1112_v32, %v1050_v26  ;;  %921 = vst [vmem:[%s1774_s20 + $0x58] sm:$0xff] %v857_v35  ;;  %v855_v44 = vmax.f32 %v627_v36, 0.0  ;;  %v648_v45 = vadd.f32 %v1422_v37, %v1767_v34  ;;  %v1450_v12 = vpop.f32.mrf.mxu1 }
  0xf6   : > { %v639_v46 = vpop.f32.mrf.mxu0  ;;  %v1054_v4 = vmul.f32 %v857_v35, %v857_v35  ;;  %v1843_v20 = vmax.f32 %v739_v11, 0.0  ;;  %v760_v21 = vadd.f32 %v1450_v12, %v1767_v34 }
  0xf7   : > { %v1114_v50 = vadd.f32 %v1113_v43, %v1051_v42  ;;  %919 = vst [vmem:[%s1774_s20 + $0x48] sm:$0xff] %v855_v44  ;;  %v982_v51 = vadd.f32 %v981_v41, %v855_v44  ;;  %v1052_v52 = vmul.f32 %v855_v44, %v855_v44  ;;  %v640_v53 = vadd.f32 %v1767_v34, %v639_v46  ;;  %v751_v22 = vpop.f32.mrf.mxu1 }
  0xf8   : > { %v860_v55 = vmax.f32 %v648_v45, 0.0  ;;  %v1423_v56 = vpop.f32.mrf.mxu0  ;;  %v752_v26 = vadd.f32 %v1767_v34, %v751_v22  ;;  %947 = vst [vmem:[%s1774_s20 + $0x128] sm:$0xff] %v1843_v20  ;;  %v1851_v31 = vmax.f32 %v760_v21, 0.0 }
  0xf9   : > { %v983_v60 = vadd.f32 %v982_v51, %v856_v16  ;;  %v1115_v61 = vadd.f32 %v1114_v50, %v1052_v52  ;;  %v858_v62 = vmax.f32 %v640_v53, 0.0  ;;  %v651_v63 = vadd.f32 %v1423_v56, %v1767_v34  ;;  %v1451_v32 = vpop.f32.mrf.mxu1 }
  0xfa   : > { %924 = vst [vmem:[%s1774_s20 + $0x70] sm:$0xff] %v860_v55  ;;  %v642_v0 = vpop.f32.mrf.mxu0  ;;  %v1855_v36 = vmax.f32 %v752_v26, 0.0  ;;  %v1057_v37 = vmul.f32 %v860_v55, %v860_v55  ;;  %952 = vst [vmem:[%s1774_s20 + $0x150] sm:$0xff] %v1851_v31  ;;  %v763_v42 = vadd.f32 %v1451_v32, %v1767_v34 }
  0xfb   : > { %v1116_v5 = vadd.f32 %v1115_v61, %v1053_v54  ;;  %922 = vst [vmem:[%s1774_s20 + $0x60] sm:$0xff] %v858_v62  ;;  %v984_v6 = vadd.f32 %v983_v60, %v857_v35  ;;  %v861_v7 = vmax.f32 %v651_v63, 0.0  ;;  %v643_v8 = vadd.f32 %v1767_v34, %v642_v0  ;;  %v754_v43 = vpop.f32.mrf.mxu1 }
  0xfc   : > { %v1426_v9 = vpop.f32.mrf.mxu0  ;;  %v1055_v14 = vmul.f32 %v858_v62, %v858_v62  ;;  %950 = vst [vmem:[%s1774_s20 + $0x140] sm:$0xff] %v1855_v36  ;;  %v1864_v51 = vmax.f32 %v763_v42, 0.0  ;;  %v755_v52 = vadd.f32 %v1767_v34, %v754_v43 }
  0xfd   : > { %v985_v13 = vadd.f32 %v984_v6, %v858_v62  ;;  %v1117_v15 = vadd.f32 %v1116_v5, %v1054_v4  ;;  %925 = vst [vmem:[%s1774_s20 + $0x78] sm:$0xff] %v861_v7  ;;  %v664_v16 = vadd.f32 %v1426_v9, %v1767_v34  ;;  %v859_v17 = vmax.f32 %v643_v8, 0.0  ;;  %v1454_v53 = vpop.f32.mrf.mxu1 }
  0xfe   : > { %v655_v18 = vpop.f32.mrf.mxu0  ;;  %v1058_v44 = vmul.f32 %v861_v7, %v861_v7  ;;  %v776_v56 = vadd.f32 %v1454_v53, %v1767_v34  ;;  %953 = vst [vmem:[%s1774_s20 + $0x158] sm:$0xff] %v1864_v51  ;;  %v1872_v62 = vmax.f32 %v755_v52, 0.0 }
  0xff   : > { %v1118_v23 = vadd.f32 %v1117_v15, %v1055_v14  ;;  %v864_v24 = vmax.f32 %v664_v16, 0.0  ;;  %v656_v25 = vadd.f32 %v1767_v34, %v655_v18  ;;  %923 = vst [vmem:[%s1774_s20 + $0x68] sm:$0xff] %v859_v17  ;;  %v986_v27 = vadd.f32 %v985_v13, %v859_v17  ;;  %v767_v63 = vpop.f32.mrf.mxu1 }
 0x100   : > { %v1056_v28 = vmul.f32 %v859_v17, %v859_v17  ;;  %v1427_v30 = vpop.f32.mrf.mxu0  ;;  %v1876_v4 = vmax.f32 %v776_v56, 0.0  ;;  %951 = vst [vmem:[%s1774_s20 + $0x148] sm:$0xff] %v1872_v62  ;;  %v768_v8 = vadd.f32 %v1767_v34, %v767_v63 }
 0x101   : > { %928 = vst [vmem:[%s1774_s20 + $0x90] sm:$0xff] %v864_v24  ;;  %v862_v33 = vmax.f32 %v656_v25, 0.0  ;;  %v667_v35 = vadd.f32 %v1427_v30, %v1767_v34  ;;  %v987_v39 = vadd.f32 %v986_v27, %v860_v55  ;;  %v1455_v9 = vpop.f32.mrf.mxu1  ;;  %v1061_v11 = vmul.f32 %v864_v24, %v864_v24 }
 0x102   : > { %v1119_v40 = vadd.f32 %v1118_v23, %v1056_v28  ;;  %v658_v41 = vpop.f32.mrf.mxu0  ;;  %956 = vst [vmem:[%s1774_s20 + $0x170] sm:$0xff] %v1876_v4  ;;  %v1885_v17 = vmax.f32 %v768_v8, 0.0  ;;  %v779_v18 = vadd.f32 %v1455_v9, %v1767_v34 }
 0x103   : > { %926 = vst [vmem:[%s1774_s20 + $0x80] sm:$0xff] %v862_v33  ;;  %v865_v45 = vmax.f32 %v667_v35, 0.0  ;;  %v659_v46 = vadd.f32 %v1767_v34, %v658_v41  ;;  %v988_v49 = vadd.f32 %v987_v39, %v861_v7  ;;  %v1059_v59 = vmul.f32 %v862_v33, %v862_v33  ;;  %v770_v21 = vpop.f32.mrf.mxu1 }
 0x104   : > { %v1120_v48 = vadd.f32 %v1119_v40, %v1057_v37  ;;  %v1430_v50 = vpop.f32.mrf.mxu0  ;;  %v771_v25 = vadd.f32 %v1767_v34, %v770_v21  ;;  %954 = vst [vmem:[%s1774_s20 + $0x160] sm:$0xff] %v1885_v17  ;;  %v1893_v30 = vmax.f32 %v779_v18, 0.0 }
 0x105   : > { %929 = vst [vmem:[%s1774_s20 + $0x98] sm:$0xff] %v865_v45  ;;  %v863_v54 = vmax.f32 %v659_v46, 0.0  ;;  %v680_v55 = vadd.f32 %v1430_v50, %v1767_v34  ;;  %v989_v58 = vadd.f32 %v988_v49, %v862_v33  ;;  %v1062_v26 = vmul.f32 %v865_v45, %v865_v45  ;;  %v1458_v32 = vpop.f32.mrf.mxu1 }
 0x106   : > { %v1121_v60 = vadd.f32 %v1120_v48, %v1058_v44  ;;  %v671_v61 = vpop.f32.mrf.mxu0  ;;  %v1897_v37 = vmax.f32 %v771_v25, 0.0  ;;  %957 = vst [vmem:[%s1774_s20 + $0x178] sm:$0xff] %v1893_v30  ;;  %v792_v43 = vadd.f32 %v1458_v32, %v1767_v34 }
 0x107   : > { %927 = vst [vmem:[%s1774_s20 + $0x88] sm:$0xff] %v863_v54  ;;  %v1060_v0 = vmul.f32 %v863_v54, %v863_v54  ;;  %v868_v2 = vmax.f32 %v680_v55, 0.0  ;;  %v672_v3 = vadd.f32 %v1767_v34, %v671_v61  ;;  %v990_v6 = vadd.f32 %v989_v58, %v863_v54  ;;  %v783_v44 = vpop.f32.mrf.mxu1 }
 0x108   : > { %v1122_v5 = vadd.f32 %v1121_v60, %v1059_v59  ;;  %v1431_v7 = vpop.f32.mrf.mxu0  ;;  %955 = vst [vmem:[%s1774_s20 + $0x168] sm:$0xff] %v1897_v37  ;;  %v1906_v53 = vmax.f32 %v792_v43, 0.0  ;;  %v784_v54 = vadd.f32 %v1767_v34, %v783_v44 }
 0x109   : > { %932 = vst [vmem:[%s1774_s20 + $0xb0] sm:$0xff] %v868_v2  ;;  %v866_v12 = vmax.f32 %v672_v3, 0.0  ;;  %v683_v13 = vadd.f32 %v1431_v7, %v1767_v34  ;;  %v991_v14 = vadd.f32 %v990_v6, %v864_v24  ;;  %v1459_v55 = vpop.f32.mrf.mxu1  ;;  %v1065_v60 = vmul.f32 %v868_v2, %v868_v2 }
 0x10a   : > { %v1123_v15 = vadd.f32 %v1122_v5, %v1060_v0  ;;  %v674_v16 = vpop.f32.mrf.mxu0  ;;  %v795_v59 = vadd.f32 %v1459_v55, %v1767_v34  ;;  %960 = vst [vmem:[%s1774_s20 + $0x190] sm:$0xff] %v1906_v53  ;;  %v1914_v3 = vmax.f32 %v784_v54, 0.0 }
 0x10b   : > { %930 = vst [vmem:[%s1774_s20 + $0xa0] sm:$0xff] %v866_v12  ;;  %v869_v22 = vmax.f32 %v683_v13, 0.0  ;;  %v675_v23 = vadd.f32 %v1767_v34, %v674_v16  ;;  %v992_v28 = vadd.f32 %v991_v14, %v865_v45  ;;  %v1063_v40 = vmul.f32 %v866_v12, %v866_v12  ;;  %v786_v5 = vpop.f32.mrf.mxu1 }
 0x10c   : > { %v1124_v27 = vadd.f32 %v1123_v15, %v1061_v11  ;;  %v1434_v24 = vpop.f32.mrf.mxu0  ;;  %v1918_v8 = vmax.f32 %v795_v59, 0.0  ;;  %958 = vst [vmem:[%s1774_s20 + $0x180] sm:$0xff] %v1914_v3  ;;  %v787_v13 = vadd.f32 %v1767_v34, %v786_v5 }
 0x10d   : > { %933 = vst [vmem:[%s1774_s20 + $0xb8] sm:$0xff] %v869_v22  ;;  %v867_v33 = vmax.f32 %v675_v23, 0.0  ;;  %v696_v35 = vadd.f32 %v1434_v24, %v1767_v34  ;;  %v993_v39 = vadd.f32 %v992_v28, %v866_v12  ;;  %v1066_v9 = vmul.f32 %v869_v22, %v869_v22  ;;  %v1462_v14 = vpop.f32.mrf.mxu1 }
 0x10e   : > { %v1125_v41 = vadd.f32 %v1124_v27, %v1062_v26  ;;  %v687_v42 = vpop.f32.mrf.mxu0  ;;  %961 = vst [vmem:[%s1774_s20 + $0x198] sm:$0xff] %v1918_v8  ;;  %v808_v26 = vadd.f32 %v1462_v14, %v1767_v34 }
 0x10f   : > { %931 = vst [vmem:[%s1774_s20 + $0xa8] sm:$0xff] %v867_v33  ;;  %v1064_v45 = vmul.f32 %v867_v33, %v867_v33  ;;  %v872_v46 = vmax.f32 %v696_v35, 0.0  ;;  %v688_v48 = vadd.f32 %v1767_v34, %v687_v42  ;;  %v994_v50 = vadd.f32 %v993_v39, %v867_v33  ;;  %v799_v27 = vpop.f32.mrf.mxu1 }
 0x110   : > { %v1126_v49 = vadd.f32 %v1125_v41, %v1063_v40  ;;  %v1435_v52 = vpop.f32.mrf.mxu0  ;;  %v800_v33 = vadd.f32 %v1767_v34, %v799_v27  ;;  %v1935_v41 = vmax.f32 %v808_v26, 0.0 }
 0x111   : > { %936 = vst [vmem:[%s1774_s20 + $0xd0] sm:$0xff] %v872_v46  ;;  %v870_v56 = vmax.f32 %v688_v48, 0.0  ;;  %v699_v58 = vadd.f32 %v1435_v52, %v1767_v34  ;;  %v995_v61 = vadd.f32 %v994_v50, %v868_v2  ;;  %v1463_v42 = vpop.f32.mrf.mxu1  ;;  %v1069_v48 = vmul.f32 %v872_v46, %v872_v46 }
 0x112   : > { %v1127_v63 = vadd.f32 %v1126_v49, %v1064_v45  ;;  %v690_v0 = vpop.f32.mrf.mxu0  ;;  %v1939_v45 = vmax.f32 %v800_v33, 0.0  ;;  %964 = vst [vmem:[%s1774_s20 + $0x1b0] sm:$0xff] %v1935_v41  ;;  %v811_v54 = vadd.f32 %v1463_v42, %v1767_v34 }
 0x113   : > { %934 = vst [vmem:[%s1774_s20 + $0xc0] sm:$0xff] %v870_v56  ;;  %v873_v6 = vmax.f32 %v699_v58, 0.0  ;;  %v691_v7 = vadd.f32 %v1767_v34, %v690_v0  ;;  %v996_v12 = vadd.f32 %v995_v61, %v869_v22  ;;  %v1067_v15 = vmul.f32 %v870_v56, %v870_v56  ;;  %v802_v55 = vpop.f32.mrf.mxu1 }
 0x114   : > { %v1128_v11 = vadd.f32 %v1127_v63, %v1065_v60  ;;  %v1438_v2 = vpop.f32.mrf.mxu0  ;;  %v1927_v22 = vmax.f32 %v787_v13, 0.0  ;;  %962 = vst [vmem:[%s1774_s20 + $0x1a0] sm:$0xff] %v1939_v45  ;;  %v803_v63 = vadd.f32 %v1767_v34, %v802_v55 }
 0x115   : > { %937 = vst [vmem:[%s1774_s20 + $0xd8] sm:$0xff] %v873_v6  ;;  %v871_v16 = vmax.f32 %v691_v7, 0.0  ;;  %v712_v18 = vadd.f32 %v1438_v2, %v1767_v34  ;;  %v997_v21 = vadd.f32 %v996_v12, %v870_v56  ;;  %v1070_v56 = vmul.f32 %v873_v6, %v873_v6  ;;  %v1466_v0 = vpop.f32.mrf.mxu1 }
 0x116   : > { %v1129_v23 = vadd.f32 %v1128_v11, %v1066_v9  ;;  %v703_v25 = vpop.f32.mrf.mxu0  ;;  %959 = vst [vmem:[%s1774_s20 + $0x188] sm:$0xff] %v1927_v22  ;;  %v824_v7 = vadd.f32 %v1466_v0, %v1767_v34  ;;  %v1955_v2 = vmax.f32 %v803_v63, 0.0  ;;  %v1077_v63 = vmul.f32 %v1794_v19, %v1794_v19 }
 0x117   : > { %935 = vst [vmem:[%s1774_s20 + $0xc8] sm:$0xff] %v871_v16  ;;  %v1068_v28 = vmul.f32 %v871_v16, %v871_v16  ;;  %v876_v24 = vmax.f32 %v712_v18, 0.0  ;;  %v704_v32 = vadd.f32 %v1767_v34, %v703_v25  ;;  %v998_v39 = vadd.f32 %v997_v21, %v871_v16  ;;  %v815_v13 = vpop.f32.mrf.mxu1 }
 0x118   : > { %v1130_v35 = vadd.f32 %v1129_v23, %v1067_v15  ;;  %v1439_v40 = vpop.f32.mrf.mxu0  ;;  %v1958_v14 = vmax.f32 %v824_v7, 0.0  ;;  %v816_v15 = vadd.f32 %v1767_v34, %v815_v13  ;;  %963 = vst [vmem:[%s1774_s20 + $0x1a8] sm:$0xff] %v1955_v2 }
 0x119   : > { %940 = vst [vmem:[%s1774_s20 + $0xf0] sm:$0xff] %v876_v24  ;;  %v874_v43 = vmax.f32 %v704_v32, 0.0  ;;  %v715_v44 = vadd.f32 %v1439_v40, %v1767_v34  ;;  %v999_v49 = vadd.f32 %v998_v39, %v872_v46  ;;  %v1948_v46 = vmax.f32 %v811_v54, 0.0  ;;  %v1467_v21 = vpop.f32.mrf.mxu1 }
 0x11a   : > { %v1131_v50 = vadd.f32 %v1130_v35, %v1068_v28  ;;  %v706_v52 = vpop.f32.mrf.mxu0  ;;  %968 = vst [vmem:[%s1774_s20 + $0x1d0] sm:$0xff] %v1958_v14  ;;  %v1965_v23 = vmax.f32 %v816_v15, 0.0  ;;  %v827_v25 = vadd.f32 %v1467_v21, %v1767_v34  ;;  %v1073_v26 = vmul.f32 %v876_v24, %v876_v24 }
 0x11b   : > { %938 = vst [vmem:[%s1774_s20 + $0xe0] sm:$0xff] %v874_v43  ;;  %v877_v58 = vmax.f32 %v715_v44, 0.0  ;;  %v707_v59 = vadd.f32 %v1767_v34, %v706_v52  ;;  %v1000_v61 = vadd.f32 %v999_v49, %v873_v6  ;;  %v1071_v11 = vmul.f32 %v874_v43, %v874_v43  ;;  %965 = vst [vmem:[%s1774_s20 + $0x1b8] sm:$0xff] %v1948_v46  ;;  %v818_v32 = vpop.f32.mrf.mxu1 }
 0x11c   : > { %v1132_v60 = vadd.f32 %v1131_v50, %v1069_v48  ;;  %966 = vst [vmem:[%s1774_s20 + $0x1c0] sm:$0xff] %v1965_v23  ;;  %v1970_v33 = vmax.f32 %v827_v25, 0.0  ;;  %v819_v35 = vadd.f32 %v1767_v34, %v818_v32  ;;  %v1075_v48 = vmul.f32 %v1801_v29, %v1801_v29 }
 0x11d   : > { %941 = vst [vmem:[%s1774_s20 + $0xf8] sm:$0xff] %v877_v58  ;;  %v875_v5 = vmax.f32 %v707_v59, 0.0  ;;  %v1001_v9 = vadd.f32 %v1000_v61, %v874_v43  ;;  %v1074_v39 = vmul.f32 %v877_v58, %v877_v58  ;;  %v1470_v43 = vpop.f32.mrf.mxu1  ;;  %v1079_v15 = vmul.f32 %v1829_v1, %v1829_v1 }
 0x11e   : > { %v1133_v12 = vadd.f32 %v1132_v60, %v1070_v56  ;;  %969 = vst [vmem:[%s1774_s20 + $0x1d8] sm:$0xff] %v1970_v33  ;;  %v1975_v44 = vmax.f32 %v819_v35, 0.0  ;;  %v1080_v21 = vmul.f32 %v1843_v20, %v1843_v20  ;;  %v1083_v35 = vmul.f32 %v1855_v36, %v1855_v36 }
 0x11f   : > { %939 = vst [vmem:[%s1774_s20 + $0xe8] sm:$0xff] %v875_v5  ;;  %v1072_v6 = vmul.f32 %v875_v5, %v875_v5  ;;  %v1002_v18 = vadd.f32 %v1001_v9, %v875_v5  ;;  %v831_v52 = vpop.f32.mrf.mxu1 }
 0x120   : > { %v1134_v16 = vadd.f32 %v1133_v12, %v1071_v11  ;;  %967 = vst [vmem:[%s1774_s20 + $0x1c8] sm:$0xff] %v1975_v44  ;;  %v832_v55 = vadd.f32 %v1767_v34, %v831_v52  ;;  %v1078_v11 = vmul.f32 %v1808_v38, %v1808_v38 }
 0x121   : > { %v1003_v27 = vadd.f32 %v1002_v18, %v876_v24  ;;  %v840_v24 = vadd.f32 %v1470_v43, %v1767_v34  ;;  %v1471_v60 = vpop.f32.mrf.mxu1 }
 0x122   : > { %v1135_v28 = vadd.f32 %v1134_v16, %v1072_v6  ;;  %v843_v61 = vadd.f32 %v1471_v60, %v1767_v34 }
 0x123   : > { %v1004_v42 = vadd.f32 %v1003_v27, %v877_v58  ;;  %v1983_v54 = vmax.f32 %v840_v24, 0.0  ;;  %v1076_v58 = vmul.f32 %v1815_v47, %v1815_v47  ;;  %v834_v7 = vpop.f32.mrf.mxu1  ;;  %v1082_v27 = vmul.f32 %v1836_v10, %v1836_v10 }
 0x124   : > { %v1136_v40 = vadd.f32 %v1135_v28, %v1073_v26  ;;  %v835_v9 = vadd.f32 %v1767_v34, %v834_v7  ;;  %v1092_v7 = vmul.f32 %v1927_v22, %v1927_v22 }
 0x125   : > { %v1005_v49 = vadd.f32 %v1004_v42, %v1801_v29  ;;  %972 = vst [vmem:[%s1774_s20 + $0x1f0] sm:$0xff] %v1983_v54  ;;  %v1991_v29 = vmax.f32 %v832_v55, 0.0  ;;  %v1084_v42 = vmul.f32 %v1872_v62, %v1872_v62 }
 0x126   : > { %v1137_v50 = vadd.f32 %v1136_v40, %v1074_v39  ;;  %v2007_v6 = vmax.f32 %v835_v9, 0.0 }
 0x127   : > { %v1006_v56 = vadd.f32 %v1005_v49, %v1815_v47  ;;  %970 = vst [vmem:[%s1774_s20 + $0x1e0] sm:$0xff] %v1991_v29  ;;  %v1999_v47 = vmax.f32 %v843_v61, 0.0 }
 0x128   : > { %v1138_v59 = vadd.f32 %v1137_v50, %v1075_v48  ;;  %971 = vst [vmem:[%s1774_s20 + $0x1e8] sm:$0xff] %v2007_v6  ;;  %v1087_v50 = vmul.f32 %v1885_v17, %v1885_v17 }
 0x129   : > { %v1007_v0 = vadd.f32 %v1006_v56, %v1794_v19  ;;  %973 = vst [vmem:[%s1774_s20 + $0x1f8] sm:$0xff] %v1999_v47  ;;  %v1088_v56 = vmul.f32 %v1897_v37, %v1897_v37 }
 0x12a   : > { %v1139_v5 = vadd.f32 %v1138_v59, %v1076_v58 }
 0x12b   : > { %v1008_v13 = vadd.f32 %v1007_v0, %v1808_v38  ;;  %v1081_v38 = vmul.f32 %v1822_v57, %v1822_v57 }
 0x12c   : > { %v1140_v12 = vadd.f32 %v1139_v5, %v1077_v63  ;;  %v1091_v63 = vmul.f32 %v1914_v3, %v1914_v3 }
 0x12d   : > { %v1009_v19 = vadd.f32 %v1008_v13, %v1829_v1 }
 0x12e   : > { %v1141_v16 = vadd.f32 %v1140_v12, %v1078_v11 }
 0x12f   : > { %v1010_v34 = vadd.f32 %v1009_v19, %v1843_v20  ;;  %v1095_v19 = vmul.f32 %v1939_v45, %v1939_v45 }
 0x130   : > { %v1142_v18 = vadd.f32 %v1141_v16, %v1079_v15 }
 0x131   : > { %v1011_v25 = vadd.f32 %v1010_v34, %v1822_v57  ;;  %v1085_v57 = vmul.f32 %v1851_v31, %v1851_v31 }
 0x132   : > { %v1143_v26 = vadd.f32 %v1142_v18, %v1080_v21  ;;  %v1096_v18 = vmul.f32 %v1955_v2, %v1955_v2 }
 0x133   : > { %v1012_v1 = vadd.f32 %v1011_v25, %v1836_v10  ;;  %v1086_v10 = vmul.f32 %v1864_v51, %v1864_v51 }
 0x134   : > { %v1144_v28 = vadd.f32 %v1143_v26, %v1081_v38  ;;  %v1099_v26 = vmul.f32 %v1965_v23, %v1965_v23 }
 0x135   : > { %v1013_v32 = vadd.f32 %v1012_v1, %v1855_v36  ;;  %v1100_v1 = vmul.f32 %v1975_v44, %v1975_v44 }
 0x136   : > { %v1145_v39 = vadd.f32 %v1144_v28, %v1082_v27 }
 0x137   : > { %v1014_v20 = vadd.f32 %v1013_v32, %v1872_v62 }
 0x138   : > { %v1146_v40 = vadd.f32 %v1145_v39, %v1083_v35 }
 0x139   : > { %v1015_v43 = vadd.f32 %v1014_v20, %v1851_v31  ;;  %v1089_v31 = vmul.f32 %v1876_v4, %v1876_v4  ;;  %v1103_v20 = vmul.f32 %v1991_v29, %v1991_v29 }
 0x13a   : > { %v1147_v24 = vadd.f32 %v1146_v40, %v1084_v42 }
 0x13b   : > { %v1016_v49 = vadd.f32 %v1015_v43, %v1864_v51  ;;  %v1090_v51 = vmul.f32 %v1893_v30, %v1893_v30  ;;  %v1105_v43 = vmul.f32 %v1983_v54, %v1983_v54 }
 0x13c   : > { %v1148_v48 = vadd.f32 %v1147_v24, %v1085_v57 }
 0x13d   : > { %v1017_v36 = vadd.f32 %v1016_v49, %v1885_v17 }
 0x13e   : > { %v1149_v52 = vadd.f32 %v1148_v48, %v1086_v10 }
 0x13f   : > { %v1018_v62 = vadd.f32 %v1017_v36, %v1897_v37 }
 0x140   : > { %v1150_v55 = vadd.f32 %v1149_v52, %v1087_v50 }
 0x141   : > { %v1019_v58 = vadd.f32 %v1018_v62, %v1876_v4  ;;  %v1093_v4 = vmul.f32 %v1906_v53, %v1906_v53 }
 0x142   : > { %v1151_v59 = vadd.f32 %v1150_v55, %v1088_v56  ;;  %v1176_v55 = vlaneseq }
 0x143   : > { %v1020_v61 = vadd.f32 %v1019_v58, %v1893_v30  ;;  %v1094_v30 = vmul.f32 %v1918_v8, %v1918_v8 }
 0x144   : > { %v1152_v60 = vadd.f32 %v1151_v59, %v1089_v31 }
 0x145   : > { %v1021_v17 = vadd.f32 %v1020_v61, %v1914_v3 }
 0x146   : > { %v1153_v0 = vadd.f32 %v1152_v60, %v1090_v51 }
 0x147   : > { %v1022_v37 = vadd.f32 %v1021_v17, %v1927_v22 }
 0x148   : > { %v1154_v5 = vadd.f32 %v1153_v0, %v1091_v63 }
 0x149   : > { %v1023_v9 = vadd.f32 %v1022_v37, %v1906_v53  ;;  %v1097_v53 = vmul.f32 %v1935_v41, %v1935_v41 }
 0x14a   : > { %v1155_v11 = vadd.f32 %v1154_v5, %v1092_v7 }
 0x14b   : > { %v1024_v13 = vadd.f32 %v1023_v9, %v1918_v8  ;;  %v1098_v8 = vmul.f32 %v1948_v46, %v1948_v46 }
 0x14c   : > { %v1156_v12 = vadd.f32 %v1155_v11, %v1093_v4 }
 0x14d   : > { %v1025_v3 = vadd.f32 %v1024_v13, %v1939_v45 }
 0x14e   : > { %v1157_v15 = vadd.f32 %v1156_v12, %v1094_v30 }
 0x14f   : > { %v1026_v22 = vadd.f32 %v1025_v3, %v1955_v2 }
 0x150   : > { %v1158_v16 = vadd.f32 %v1157_v15, %v1095_v19 }
 0x151   : > { %v1027_v34 = vadd.f32 %v1026_v22, %v1935_v41  ;;  %v1101_v41 = vmul.f32 %v1958_v14, %v1958_v14 }
 0x152   : > { %v1159_v21 = vadd.f32 %v1158_v16, %v1096_v18 }
 0x153   : > { %v1028_v25 = vadd.f32 %v1027_v34, %v1948_v46  ;;  %v1102_v46 = vmul.f32 %v1970_v33, %v1970_v33 }
 0x154   : > { %v1160_v38 = vadd.f32 %v1159_v21, %v1097_v53 }
 0x155   : > { %v1029_v45 = vadd.f32 %v1028_v25, %v1965_v23 }
 0x156   : > { %v1161_v27 = vadd.f32 %v1160_v38, %v1098_v8 }
 0x157   : > { %v1030_v2 = vadd.f32 %v1029_v45, %v1975_v44 }
 0x158   : > { %v1162_v28 = vadd.f32 %v1161_v27, %v1099_v26 }
 0x159   : > { %v1031_v32 = vadd.f32 %v1030_v2, %v1958_v14  ;;  %v1104_v14 = vmul.f32 %v2007_v6, %v2007_v6 }
 0x15a   : > { %v1163_v35 = vadd.f32 %v1162_v28, %v1100_v1 }
 0x15b   : > { %v1032_v40 = vadd.f32 %v1031_v32, %v1970_v33  ;;  %v1106_v33 = vmul.f32 %v1999_v47, %v1999_v47 }
 0x15c   : > { %v1164_v39 = vadd.f32 %v1163_v35, %v1101_v41 }
 0x15d   : > { %v1033_v23 = vadd.f32 %v1032_v40, %v1991_v29 }
 0x15e   : > { %v1165_v42 = vadd.f32 %v1164_v39, %v1102_v46 }
 0x15f   : > { %v1034_v57 = vadd.f32 %v1033_v23, %v2007_v6 }
 0x160   : > { %v1166_v44 = vadd.f32 %v1165_v42, %v1103_v20 }
 0x161   : > { %v1035_v24 = vadd.f32 %v1034_v57, %v1983_v54  ;;  %v1177_v54 = vshrl.u32 %v1176_v55, 7 }
 0x162   : > { %v1167_v10 = vadd.f32 %v1166_v44, %v1104_v14 }
 0x163   : > { %v1036_v48 = vadd.f32 %v1035_v24, %v1999_v47  ;;  %vm1179_vm1 = vcmp.eq.s32.totalorder %v1177_v54, 1  ;;  %vm1178_vm2 = vcmp.eq.s32.totalorder %v1177_v54, 0 }
 0x164   : > { %v1168_v49 = vadd.f32 %v1167_v10, %v1105_v43 }
 0x165   : > { %v1037_v29 = vrot.slane %v1036_v48, 4 }
 0x166   : > { %v1169_v36 = vadd.f32 %v1168_v49, %v1106_v33 }
 0x167   : > { %v1038_v50 = vadd.f32 %v1037_v29, %v1036_v48 }
 0x168   : > { %v1170_v52 = vrot.slane %v1169_v36, 4 }
 0x169   : > { %v1039_v6 = vrot.slane %v1038_v50, 2 }
 0x16a   : > { %v1171_v62 = vadd.f32 %v1170_v52, %v1169_v36 }
 0x16b   : > { %v1040_v56 = vadd.f32 %v1039_v6, %v1038_v50 }
 0x16c   : > { %v1172_v31 = vrot.slane %v1171_v62, 2 }
 0x16d   : > { %v1041_v59 = vrot.slane %v1040_v56, 1 }
 0x16e   : > { %v1173_v58 = vadd.f32 %v1172_v31, %v1171_v62 }
 0x16f   : > { %v1042_v60 = vadd.f32 %v1041_v59, %v1040_v56 }
 0x170   : > { %v1174_v51 = vrot.slane %v1173_v58, 1 }
 0x172   : > { %v1175_v47 = vadd.f32 %v1174_v51, %v1173_v58 }
 0x174   : > { %v1180_v61 = vsel %vm1179_vm1, %v1175_v47, 0.0 }
 0x175   : > { %v1181_v17 = vsel %vm1178_vm2, %v1042_v60, %v1180_v61 }
 0x176   : > { %1182 = vst [vmem:[%s199_s28] sm:$0xff] %v1181_v17 }
 0x177   : > { %1562 = shalt.err (!%p1559_p3)
}
 0x178   : > { %s1563_s11 = scalar_lea.hbm %s2100_s6, 128  ;;  %s1567_s14 = scalar_lea.hbm %s2139_s4, 256 }
 0x179   : > { %p1564_p4 = scmp.ne.s32.totalorder %s2100_s6, %s1563_s11  ;;  %p1568_p9 = scmp.lt.s32.totalorder %s2100_s6, %s2139_s4 }
 0x17a   : > { %p1569_p10 = scmp.lt.s32.totalorder %s1567_s14, %s1563_s11 }
 0x17b   : > { %p1565_p7 = pnand %p1564_p4, %p1675_p5 }
 0x17c   : > { %p1570_p11 = por %p1569_p10, %p1568_p9 }
 0x17d   : > { %p1566_p8 = pneg %p1565_p7 }
 0x17f   : > { %p1571_p12 = pnand %p1570_p11, %p1566_p8 }
 0x181   : > { %1574 = shalt.err (!%p1571_p12)
}
 0x182   : > { %1476 = dma.vmem_to_hbm [thread:$0]  (%p1675_p5), %s1207_s29, 128, %s2100_s6, %s1189_s7  }
 0x183 PF: > { %p1482_p13 = scmp.ge.s32.totalorder %s1609_s18, 2  ;;  %s1226_s23 = sand.u32 1, %s1597_s15  }
 0x184   : > { %s1227_s27 = scalar_lea.sflag [#allocation3], %s1226_s23 }
 0x185   : > { %p1479_p0 = pnand %p1482_p13, %p1679_p6 }
 0x187   : > { %p1480_p1 = pneg %p1479_p0 }
 0x189   : > { %1592 = dma.done.wait (%p1480_p1), %s1227_s27, 128  }
 0x18a   : > { %1594 = vsyncadd (%p1480_p1), %s1227_s27, 4294967168  ;;  %p15_p2 = scmp.ge.s32.totalorder %s1662_s21, 4   ;;  %s2142_s15 = smov %s1601_s16 }
 0x18b   : > { %s2143_s16 = smov %s1605_s17  ;;  %s2144_s17 = smov %s1673_s24 }
 0x18c   : > { %s2145_s18 = smov %s1662_s21  ;;  %17 = sbr.rel (!%p15_p2) target bundleno = 3 (0x3), region = 79 }
 0x191   :  { %1232 = vsyncpa [#allocation3], 1 }
 0x192   :  { %1234 = vsyncpa [#allocation3 + $0x1], 1 }

// kernel: decoder_forward.16
= control target key start
LH: loop header
LB: loop body
LE: loop exit
PB: predicated region body
PF: predicated region fallthrough
CT: control target
= control target key end

     0   :  { %10 = vsyncpa [#allocation3], 0  ;;  %s2117_s0 = inlined_call_operand.vmem [shape: bf16[1024,16], index: 0, kind: input, shape index: {}]   ;;  %s2118_s1 = inlined_call_operand.vmem [shape: bf16[16,128], index: 1, kind: input, shape index: {}]   ;;  %s2119_s2 = inlined_call_operand.vmem [shape: f32[1,128], index: 2, kind: input, shape index: {}]   ;;  %s2120_s3 = inlined_call_operand.vmem [shape: f32[1024,128], index: 3, kind: output, shape index: {0}]   ;;  %s2121_s4 = inlined_call_operand.hbm [shape: f32[16,128], index: 4, kind: output, shape index: {1}]  }
   0x1   :  { %12 = vsyncpa [#allocation3 + $0x1], 0  ;;  %s1622_s15 = smov 0   ;;  %s1624_s16 = smov 0  }
   0x2   :  { %s1626_s17 = smov 0   ;;  %s1628_s18 = smov 0  }
   0x3 LB: > { %s1643_s19 = sadd.s32 4294967295, %s1594_s18   ;;  %s1282_s20 = sadd.s32 4294967294, %s1594_s18   ;;  %s1594_s18 = sphi %s1628_s18, %s2127_s18   ;;  %s1590_s17 = sphi %s1626_s17, %s2126_s17   ;;  %s1586_s16 = sphi %s1624_s16, %s2125_s16   ;;  %s1582_s15 = sphi %s1622_s15, %s2124_s15  }
   0x4   : > { %s1647_s21 = sadd.s32 1, %s1594_s18   ;;  %s119_s22 = sadd.s32 1, %s1590_s17 }
   0x5   : > { %s116_s23 = ssub.s32 %s1594_s18, %s1647_s21  ;;  %p129_p0 = scmp.ne.s32.totalorder %s1590_s17, %s1586_s16 }
   0x6   : > { %p117_p1 = scmp.eq.s32.totalorder %s116_s23, 0  ;;  %p130_p2 = scmp.eq.s32.totalorder %s1643_s19, 1 }
   0x7   : > { %p135_p3 = scmp.ne.s32.totalorder %s1586_s16, %s1582_s15  ;;  %p136_p4 = scmp.eq.s32.totalorder %s1282_s20, 1 }
   0x8   : > { %s1658_s24 = scalar_select %p117_p1, %s1590_s17, %s119_s22  }
   0x9   : > { %p1660_p5 = por %p130_p2, %p129_p0  ;;  %p1664_p6 = por %p136_p4, %p135_p3 }
   0xa   : > { %p1285_p7 = scmp.ge.s32.totalorder %s1594_s18, 1  ;;  %p169_p8 = scmp.lt.s32.totalorder %s1594_s18, 3 }
   0xc   : > { %p170_p9 = pnand %p1285_p7, %p169_p8 }
   0xd   : > { %s1287_s29 = sshll.u32 (!%p170_p9), %s1643_s19, 6  ;;  %s197_s14 = sand.u32 (!%p170_p9), 1, %s1586_s16  }
   0xe   : > { %173 = sbr.rel (%p170_p9) target bundleno = 383 (0x17f), region = 32  ;;  %p201_p10 = scmp.lt.s32.totalorder (!%p170_p9), %s1287_s29, 127 }
   0xf   : > { %s1286_s20 = sshll.u32 (!%p170_p9), %s197_s14, 3  ;;  %s1358_s22 = sshll.u32 (!%p170_p9), %s1643_s19, 7 }
  0x10   : > { %s199_s23 = scalar_lea.vmem (!%p170_p9), [#allocation2], %s1286_s20  ;;  %s1181_s5 = scalar_lea.sflag (!%p170_p9), [#allocation3], %s197_s14 }
  0x11   : > { %s1198_s27 = sshll.u32 (!%p170_p9), %s199_s23, 4  ;;  %s1596_s19 = smov (!%p170_p9), [#allocation2]   ;;  %s1199_s27 = int_to_ptr.vmem [resolvable:$true] %s1198_s27 }
  0x12   : > { %s1534_s6 = scalar_lea.vmem (!%p170_p9), %s1199_s27, 128 }
  0x13   : > { %v1501_v0 = vld [vmem:[%s2118_s1] sm:$0xff]   ;;  %s2129_s29 = smov (!%p201_p10, %s1287_s29), 127  ;;  %vm452_vm0 = vcmask 130048   ;;  %p1535_p11 = scmp.ne.s32.totalorder %s1199_s27, %s1534_s6 }
  0x14   : > { %1394 = vmatprep.subr.bf16.mxu0 %v1501_v0  ;;  %1460 = vmatprep.subr.bf16.mxu1 %v1501_v0  ;;  %s1288_s30 = sshll.u32 %s2129_s29, 2  ;;  %v1749_v33 = vld [vmem:[%s2119_s2] ss:$0 sm:$0xff]  ;;  %s1290_s10 = sshll.u32 %s2129_s29, 3 }
  0x15   : > { %1395 = vmatpush3.bf16.msra.mxu0 %v1501_v0  ;;  %1461 = vmatpush3.bf16.msra.mxu1 %v1501_v0  ;;  %s1680_s7 = scalar_lea.vmem %s2117_s0, %s1288_s30  ;;  %s1756_s13 = scalar_lea.vmem %s2120_s3, %s1290_s10 }
  0x16   : > { %v1502_v1 = vld [vmem:[%s1680_s7] sm:$0xff]   ;;  %v1503_v2 = vld [vmem:[%s1680_s7 + $0x8] sm:$0xff]   ;;  %v1504_v3 = vld [vmem:[%s1680_s7 + $0x10] sm:$0xff]   ;;  %s2082_s30 = scalar_lea.hbm %s2121_s4, %s1358_s22  ;;  %p1536_p12 = pnand %p1535_p11, %p1660_p5 }
  0x17   : > { %1396 = vmatprep.mubr.msk.bf16.mxu0 %vm452_vm0, %v1502_v1  ;;  %v1505_v4 = vld [vmem:[%s1680_s7 + $0x18] sm:$0xff]   ;;  %v1506_v5 = vld [vmem:[%s1680_s7 + $0x20] sm:$0xff]   ;;  %v1507_v6 = vld [vmem:[%s1680_s7 + $0x28] sm:$0xff]  }
  0x18   : > { %1397 = vmatmul.mubr.msk.bf16.vlgmr.msra.gmra.mxu0 %vm452_vm0, %v1503_v2  ;;  %v1508_v7 = vld [vmem:[%s1680_s7 + $0x30] sm:$0xff]   ;;  %v1518_v8 = vld [vmem:[%s1680_s7 + $0x80] sm:$0xff]   ;;  %v1519_v9 = vld [vmem:[%s1680_s7 + $0x88] sm:$0xff]   ;;  %p1537_p13 = pneg %p1536_p12 }
  0x19   : > { %1400 = vmatprep.mubr.msk.bf16.mxu0 %vm452_vm0, %v1504_v3  ;;  %1428 = vmatprep.mubr.msk.bf16.mxu1 %vm452_vm0, %v1518_v8  ;;  %v1520_v10 = vld [vmem:[%s1680_s7 + $0x90] sm:$0xff]   ;;  %v1509_v11 = vld [vmem:[%s1680_s7 + $0x38] sm:$0xff]   ;;  %v1510_v12 = vld [vmem:[%s1680_s7 + $0x40] sm:$0xff]  }
  0x1a   : > { %1429 = vmatmul.mubr.msk.bf16.vlgmr.msra.gmra.mxu1 %vm452_vm0, %v1519_v9  ;;  %v1521_v13 = vld [vmem:[%s1680_s7 + $0x98] sm:$0xff]   ;;  %v1522_v14 = vld [vmem:[%s1680_s7 + $0xa0] sm:$0xff]   ;;  %v1511_v15 = vld [vmem:[%s1680_s7 + $0x48] sm:$0xff]  }
  0x1b   : > { %1432 = vmatprep.mubr.msk.bf16.mxu1 %vm452_vm0, %v1520_v10  ;;  %v1523_v16 = vld [vmem:[%s1680_s7 + $0xa8] sm:$0xff]   ;;  %v1512_v17 = vld [vmem:[%s1680_s7 + $0x50] sm:$0xff]   ;;  %v1513_v19 = vld [vmem:[%s1680_s7 + $0x58] sm:$0xff]  }
  0x1c   : > { %v1524_v18 = vld [vmem:[%s1680_s7 + $0xb0] sm:$0xff]   ;;  %v1525_v20 = vld [vmem:[%s1680_s7 + $0xb8] sm:$0xff]   ;;  %v1514_v21 = vld [vmem:[%s1680_s7 + $0x60] sm:$0xff]  }
  0x1d   : > { %v1526_v22 = vld [vmem:[%s1680_s7 + $0xc0] sm:$0xff]   ;;  %v1515_v23 = vld [vmem:[%s1680_s7 + $0x68] sm:$0xff]   ;;  %v1516_v25 = vld [vmem:[%s1680_s7 + $0x70] sm:$0xff]  }
  0x1e   : > { %v1527_v24 = vld [vmem:[%s1680_s7 + $0xc8] sm:$0xff]   ;;  %v1528_v26 = vld [vmem:[%s1680_s7 + $0xd0] sm:$0xff]   ;;  %v1517_v27 = vld [vmem:[%s1680_s7 + $0x78] sm:$0xff]  }
  0x1f   : > { %v1529_v28 = vld [vmem:[%s1680_s7 + $0xd8] sm:$0xff]   ;;  %v1530_v29 = vld [vmem:[%s1680_s7 + $0xe0] sm:$0xff]   ;;  %v1531_v30 = vld [vmem:[%s1680_s7 + $0xe8] sm:$0xff]  }
  0x20   : > { %1401 = vmatmul.mubr.msk.bf16.gmra.mxu0 %vm452_vm0, %v1505_v4  ;;  %v1532_v31 = vld [vmem:[%s1680_s7 + $0xf0] sm:$0xff]   ;;  %v1533_v32 = vld [vmem:[%s1680_s7 + $0xf8] sm:$0xff]   ;;  %s1538_s7 = sshll.u32 %s1596_s19, 4  ;;  %s1539_s7 = int_to_ptr.vmem [resolvable:$false] %s1538_s7 }
  0x21   : > { %1404 = vmatprep.mubr.msk.bf16.mxu0 %vm452_vm0, %v1506_v5  ;;  %s1540_s8 = scalar_lea.vmem %s1539_s7, 256  ;;  %p1541_p0 = scmp.lt.s32.totalorder %s1199_s27, %s1539_s7 }
  0x22   : > { %1433 = vmatmul.mubr.msk.bf16.gmra.mxu1 %vm452_vm0, %v1521_v13  ;;  %p1542_p1 = scmp.lt.s32.totalorder %s1540_s8, %s1534_s6 }
  0x23   : > { %1436 = vmatprep.mubr.msk.bf16.mxu1 %vm452_vm0, %v1522_v14 }
  0x24   : > { %p1543_p2 = por %p1542_p1, %p1541_p0 }
  0x26   : > { %p1544_p3 = pnand %p1543_p2, %p1537_p13 }
  0x28   : > { %1405 = vmatmul.mubr.msk.bf16.gmra.mxu0 %vm452_vm0, %v1507_v6 }
  0x29   : > { %1408 = vmatprep.mubr.msk.bf16.mxu0 %vm452_vm0, %v1508_v7 }
  0x2a   : > { %1437 = vmatmul.mubr.msk.bf16.gmra.mxu1 %vm452_vm0, %v1523_v16 }
  0x2b   : > { %1440 = vmatprep.mubr.msk.bf16.mxu1 %vm452_vm0, %v1524_v18 }
  0x30   : > { %1409 = vmatmul.mubr.msk.bf16.gmra.mxu0 %vm452_vm0, %v1509_v11 }
  0x31   : > { %1412 = vmatprep.mubr.msk.bf16.mxu0 %vm452_vm0, %v1510_v12 }
  0x32   : > { %1441 = vmatmul.mubr.msk.bf16.gmra.mxu1 %vm452_vm0, %v1525_v20 }
  0x33   : > { %1444 = vmatprep.mubr.msk.bf16.mxu1 %vm452_vm0, %v1526_v22 }
  0x38   : > { %1413 = vmatmul.mubr.msk.bf16.gmra.mxu0 %vm452_vm0, %v1511_v15 }
  0x39   : > { %1416 = vmatprep.mubr.msk.bf16.mxu0 %vm452_vm0, %v1512_v17 }
  0x3a   : > { %1445 = vmatmul.mubr.msk.bf16.gmra.mxu1 %vm452_vm0, %v1527_v24 }
  0x3b   : > { %1448 = vmatprep.mubr.msk.bf16.mxu1 %vm452_vm0, %v1528_v26 }
  0x40   : > { %1417 = vmatmul.mubr.msk.bf16.gmra.mxu0 %vm452_vm0, %v1513_v19 }
  0x41   : > { %1420 = vmatprep.mubr.msk.bf16.mxu0 %vm452_vm0, %v1514_v21 }
  0x42   : > { %1449 = vmatmul.mubr.msk.bf16.gmra.mxu1 %vm452_vm0, %v1529_v28 }
  0x43   : > { %1452 = vmatprep.mubr.msk.bf16.mxu1 %vm452_vm0, %v1530_v29 }
  0x48   : > { %1421 = vmatmul.mubr.msk.bf16.gmra.mxu0 %vm452_vm0, %v1515_v23 }
  0x49   : > { %1424 = vmatprep.mubr.msk.bf16.mxu0 %vm452_vm0, %v1516_v25 }
  0x4a   : > { %1453 = vmatmul.mubr.msk.bf16.gmra.mxu1 %vm452_vm0, %v1531_v30 }
  0x4b   : > { %1456 = vmatprep.mubr.msk.bf16.mxu1 %vm452_vm0, %v1532_v31 }
  0x50   : > { %1425 = vmatmul.mubr.msk.bf16.gmra.mxu0 %vm452_vm0, %v1517_v27 }
  0x52   : > { %1457 = vmatmul.mubr.msk.bf16.gmra.mxu1 %vm452_vm0, %v1533_v32 }
  0xd8   : > { %v1398_v34 = vpop.f32.mrf.mxu0 }
  0xd9   : > { %v592_v35 = vadd.f32 %v1398_v34, %v1749_v33 }
  0xda   : > { %v583_v36 = vpop.f32.mrf.mxu0  ;;  %v1430_v4 = vpop.f32.mrf.mxu1 }
  0xdb   : > { %v840_v37 = vmax.f32 %v592_v35, 0.0  ;;  %v584_v38 = vadd.f32 %v1749_v33, %v583_v36  ;;  %v720_v10 = vadd.f32 %v1430_v4, %v1749_v33 }
  0xdc   : > { %v1399_v39 = vpop.f32.mrf.mxu0  ;;  %v711_v11 = vpop.f32.mrf.mxu1 }
  0xdd   : > { %904 = vst [vmem:[%s1756_s13 + $0x10] sm:$0xff] %v840_v37  ;;  %v838_v40 = vmax.f32 %v584_v38, 0.0  ;;  %v595_v41 = vadd.f32 %v1399_v39, %v1749_v33  ;;  %v1037_v55 = vmul.f32 %v840_v37, %v840_v37  ;;  %v1776_v18 = vmax.f32 %v720_v10, 0.0 }
  0xde   : > { %v586_v42 = vpop.f32.mrf.mxu0  ;;  %v712_v19 = vadd.f32 %v1749_v33, %v711_v11  ;;  %v1431_v20 = vpop.f32.mrf.mxu1 }
  0xdf   : > { %902 = vst [vmem:[%s1756_s13] sm:$0xff] %v838_v40  ;;  %v841_v43 = vmax.f32 %v595_v41, 0.0  ;;  %v587_v44 = vadd.f32 %v1749_v33, %v586_v42  ;;  %v1035_v48 = vmul.f32 %v838_v40, %v838_v40  ;;  %936 = vst [vmem:[%s1756_s13 + $0x110] sm:$0xff] %v1776_v18  ;;  %v723_v29 = vadd.f32 %v1431_v20, %v1749_v33 }
  0xe0   : > { %v1402_v45 = vpop.f32.mrf.mxu0  ;;  %v1783_v28 = vmax.f32 %v712_v19, 0.0  ;;  %v714_v30 = vpop.f32.mrf.mxu1 }
  0xe1   : > { %905 = vst [vmem:[%s1756_s13 + $0x18] sm:$0xff] %v841_v43  ;;  %v839_v46 = vmax.f32 %v587_v44, 0.0  ;;  %v608_v47 = vadd.f32 %v1402_v45, %v1749_v33  ;;  %v1038_v61 = vmul.f32 %v841_v43, %v841_v43  ;;  %v715_v38 = vadd.f32 %v1749_v33, %v714_v30 }
  0xe2   : > { %v599_v49 = vpop.f32.mrf.mxu0  ;;  %934 = vst [vmem:[%s1756_s13 + $0x100] sm:$0xff] %v1783_v28  ;;  %v1434_v39 = vpop.f32.mrf.mxu1 }
  0xe3   : > { %903 = vst [vmem:[%s1756_s13 + $0x8] sm:$0xff] %v839_v46  ;;  %v966_v50 = vadd.f32 %v839_v46, %v838_v40  ;;  %v1036_v51 = vmul.f32 %v839_v46, %v839_v46  ;;  %v844_v52 = vmax.f32 %v608_v47, 0.0  ;;  %v600_v53 = vadd.f32 %v1749_v33, %v599_v49 }
  0xe4   : > { %v1403_v54 = vpop.f32.mrf.mxu0  ;;  %v1797_v46 = vmax.f32 %v715_v38, 0.0  ;;  %v736_v47 = vadd.f32 %v1434_v39, %v1749_v33 }
  0xe5   : > { %v967_v56 = vadd.f32 %v966_v50, %v840_v37  ;;  %v1099_v57 = vadd.f32 %v1036_v51, %v1035_v48  ;;  %908 = vst [vmem:[%s1756_s13 + $0x30] sm:$0xff] %v844_v52  ;;  %v842_v58 = vmax.f32 %v600_v53, 0.0  ;;  %v611_v59 = vadd.f32 %v1403_v54, %v1749_v33  ;;  %v727_v48 = vpop.f32.mrf.mxu1 }
  0xe6   : > { %v602_v60 = vpop.f32.mrf.mxu0  ;;  %v1041_v21 = vmul.f32 %v844_v52, %v844_v52  ;;  %v1790_v37 = vmax.f32 %v723_v29, 0.0  ;;  %935 = vst [vmem:[%s1756_s13 + $0x108] sm:$0xff] %v1797_v46 }
  0xe7   : > { %v1100_v62 = vadd.f32 %v1099_v57, %v1037_v55  ;;  %906 = vst [vmem:[%s1756_s13 + $0x20] sm:$0xff] %v842_v58  ;;  %v968_v63 = vadd.f32 %v967_v56, %v841_v43  ;;  %v603_v0 = vadd.f32 %v1749_v33, %v602_v60  ;;  %v1039_v1 = vmul.f32 %v842_v58, %v842_v58 }
  0xe8   : > { %v845_v2 = vmax.f32 %v611_v59, 0.0  ;;  %v1406_v3 = vpop.f32.mrf.mxu0  ;;  %937 = vst [vmem:[%s1756_s13 + $0x118] sm:$0xff] %v1790_v37  ;;  %v1804_v56 = vmax.f32 %v736_v47, 0.0  ;;  %v728_v57 = vadd.f32 %v1749_v33, %v727_v48 }
  0xe9   : > { %v969_v5 = vadd.f32 %v968_v63, %v842_v58  ;;  %v1101_v6 = vadd.f32 %v1100_v62, %v1038_v61  ;;  %v843_v7 = vmax.f32 %v603_v0, 0.0  ;;  %v624_v8 = vadd.f32 %v1406_v3, %v1749_v33  ;;  %v1435_v58 = vpop.f32.mrf.mxu1 }
  0xea   : > { %909 = vst [vmem:[%s1756_s13 + $0x38] sm:$0xff] %v845_v2  ;;  %v615_v9 = vpop.f32.mrf.mxu0  ;;  %v1042_v25 = vmul.f32 %v845_v2, %v845_v2  ;;  %940 = vst [vmem:[%s1756_s13 + $0x130] sm:$0xff] %v1804_v56  ;;  %v1811_v0 = vmax.f32 %v728_v57, 0.0 }
  0xeb   : > { %v1102_v12 = vadd.f32 %v1101_v6, %v1039_v1  ;;  %907 = vst [vmem:[%s1756_s13 + $0x28] sm:$0xff] %v843_v7  ;;  %v970_v13 = vadd.f32 %v969_v5, %v843_v7  ;;  %v1040_v14 = vmul.f32 %v843_v7, %v843_v7  ;;  %v848_v15 = vmax.f32 %v624_v8, 0.0 }
  0xec   : > { %v616_v16 = vadd.f32 %v1749_v33, %v615_v9  ;;  %v1407_v17 = vpop.f32.mrf.mxu0  ;;  %v739_v1 = vadd.f32 %v1435_v58, %v1749_v33  ;;  %938 = vst [vmem:[%s1756_s13 + $0x120] sm:$0xff] %v1811_v0 }
  0xed   : > { %v971_v22 = vadd.f32 %v970_v13, %v844_v52  ;;  %v1103_v23 = vadd.f32 %v1102_v12, %v1040_v14  ;;  %912 = vst [vmem:[%s1756_s13 + $0x50] sm:$0xff] %v848_v15  ;;  %v627_v24 = vadd.f32 %v1407_v17, %v1749_v33  ;;  %v1045_v53 = vmul.f32 %v848_v15, %v848_v15 }
  0xee   : > { %v846_v26 = vmax.f32 %v616_v16, 0.0  ;;  %v618_v27 = vpop.f32.mrf.mxu0  ;;  %v1818_v9 = vmax.f32 %v739_v1, 0.0 }
  0xef   : > { %v1104_v31 = vadd.f32 %v1103_v23, %v1041_v21  ;;  %v972_v32 = vadd.f32 %v971_v22, %v845_v2  ;;  %v849_v34 = vmax.f32 %v627_v24, 0.0  ;;  %v619_v35 = vadd.f32 %v1749_v33, %v618_v27  ;;  %v730_v2 = vpop.f32.mrf.mxu1 }
  0xf0   : > { %910 = vst [vmem:[%s1756_s13 + $0x40] sm:$0xff] %v846_v26  ;;  %v1410_v36 = vpop.f32.mrf.mxu0  ;;  %v1043_v41 = vmul.f32 %v846_v26, %v846_v26  ;;  %v731_v10 = vadd.f32 %v1749_v33, %v730_v2  ;;  %941 = vst [vmem:[%s1756_s13 + $0x138] sm:$0xff] %v1818_v9 }
  0xf1   : > { %v973_v40 = vadd.f32 %v972_v32, %v846_v26  ;;  %v1105_v42 = vadd.f32 %v1104_v31, %v1042_v25  ;;  %913 = vst [vmem:[%s1756_s13 + $0x58] sm:$0xff] %v849_v34  ;;  %v847_v43 = vmax.f32 %v619_v35, 0.0  ;;  %v640_v44 = vadd.f32 %v1410_v36, %v1749_v33  ;;  %v1438_v11 = vpop.f32.mrf.mxu1 }
  0xf2   : > { %v631_v45 = vpop.f32.mrf.mxu0  ;;  %v1046_v3 = vmul.f32 %v849_v34, %v849_v34  ;;  %v1825_v19 = vmax.f32 %v731_v10, 0.0  ;;  %v752_v20 = vadd.f32 %v1438_v11, %v1749_v33 }
  0xf3   : > { %v1106_v49 = vadd.f32 %v1105_v42, %v1043_v41  ;;  %911 = vst [vmem:[%s1756_s13 + $0x48] sm:$0xff] %v847_v43  ;;  %v974_v50 = vadd.f32 %v973_v40, %v847_v43  ;;  %v1044_v51 = vmul.f32 %v847_v43, %v847_v43  ;;  %v632_v52 = vadd.f32 %v1749_v33, %v631_v45  ;;  %v743_v21 = vpop.f32.mrf.mxu1 }
  0xf4   : > { %v852_v54 = vmax.f32 %v640_v44, 0.0  ;;  %v1411_v55 = vpop.f32.mrf.mxu0  ;;  %v744_v25 = vadd.f32 %v1749_v33, %v743_v21  ;;  %939 = vst [vmem:[%s1756_s13 + $0x128] sm:$0xff] %v1825_v19  ;;  %v1833_v30 = vmax.f32 %v752_v20, 0.0 }
  0xf5   : > { %v975_v59 = vadd.f32 %v974_v50, %v848_v15  ;;  %v1107_v60 = vadd.f32 %v1106_v49, %v1044_v51  ;;  %v850_v61 = vmax.f32 %v632_v52, 0.0  ;;  %v643_v62 = vadd.f32 %v1411_v55, %v1749_v33  ;;  %v1439_v31 = vpop.f32.mrf.mxu1 }
  0xf6   : > { %916 = vst [vmem:[%s1756_s13 + $0x70] sm:$0xff] %v852_v54  ;;  %v634_v63 = vpop.f32.mrf.mxu0  ;;  %v1837_v35 = vmax.f32 %v744_v25, 0.0  ;;  %v1049_v36 = vmul.f32 %v852_v54, %v852_v54  ;;  %944 = vst [vmem:[%s1756_s13 + $0x150] sm:$0xff] %v1833_v30  ;;  %v755_v41 = vadd.f32 %v1439_v31, %v1749_v33 }
  0xf7   : > { %v1108_v4 = vadd.f32 %v1107_v60, %v1045_v53  ;;  %914 = vst [vmem:[%s1756_s13 + $0x60] sm:$0xff] %v850_v61  ;;  %v976_v5 = vadd.f32 %v975_v59, %v849_v34  ;;  %v853_v6 = vmax.f32 %v643_v62, 0.0  ;;  %v635_v7 = vadd.f32 %v1749_v33, %v634_v63  ;;  %v746_v42 = vpop.f32.mrf.mxu1 }
  0xf8   : > { %v1414_v8 = vpop.f32.mrf.mxu0  ;;  %v1047_v13 = vmul.f32 %v850_v61, %v850_v61  ;;  %942 = vst [vmem:[%s1756_s13 + $0x140] sm:$0xff] %v1837_v35  ;;  %v1846_v50 = vmax.f32 %v755_v41, 0.0  ;;  %v747_v51 = vadd.f32 %v1749_v33, %v746_v42 }
  0xf9   : > { %v977_v12 = vadd.f32 %v976_v5, %v850_v61  ;;  %v1109_v14 = vadd.f32 %v1108_v4, %v1046_v3  ;;  %917 = vst [vmem:[%s1756_s13 + $0x78] sm:$0xff] %v853_v6  ;;  %v656_v15 = vadd.f32 %v1414_v8, %v1749_v33  ;;  %v851_v16 = vmax.f32 %v635_v7, 0.0  ;;  %v1442_v52 = vpop.f32.mrf.mxu1 }
  0xfa   : > { %v647_v17 = vpop.f32.mrf.mxu0  ;;  %v1050_v43 = vmul.f32 %v853_v6, %v853_v6  ;;  %v768_v55 = vadd.f32 %v1442_v52, %v1749_v33  ;;  %945 = vst [vmem:[%s1756_s13 + $0x158] sm:$0xff] %v1846_v50  ;;  %v1854_v61 = vmax.f32 %v747_v51, 0.0 }
  0xfb   : > { %v1110_v22 = vadd.f32 %v1109_v14, %v1047_v13  ;;  %v856_v23 = vmax.f32 %v656_v15, 0.0  ;;  %v648_v24 = vadd.f32 %v1749_v33, %v647_v17  ;;  %915 = vst [vmem:[%s1756_s13 + $0x68] sm:$0xff] %v851_v16  ;;  %v978_v26 = vadd.f32 %v977_v12, %v851_v16  ;;  %v759_v62 = vpop.f32.mrf.mxu1 }
  0xfc   : > { %v1048_v27 = vmul.f32 %v851_v16, %v851_v16  ;;  %v1415_v29 = vpop.f32.mrf.mxu0  ;;  %v1858_v3 = vmax.f32 %v768_v55, 0.0  ;;  %943 = vst [vmem:[%s1756_s13 + $0x148] sm:$0xff] %v1854_v61  ;;  %v760_v7 = vadd.f32 %v1749_v33, %v759_v62 }
  0xfd   : > { %920 = vst [vmem:[%s1756_s13 + $0x90] sm:$0xff] %v856_v23  ;;  %v854_v32 = vmax.f32 %v648_v24, 0.0  ;;  %v659_v34 = vadd.f32 %v1415_v29, %v1749_v33  ;;  %v979_v38 = vadd.f32 %v978_v26, %v852_v54  ;;  %v1443_v8 = vpop.f32.mrf.mxu1  ;;  %v1053_v10 = vmul.f32 %v856_v23, %v856_v23 }
  0xfe   : > { %v1111_v39 = vadd.f32 %v1110_v22, %v1048_v27  ;;  %v650_v40 = vpop.f32.mrf.mxu0  ;;  %948 = vst [vmem:[%s1756_s13 + $0x170] sm:$0xff] %v1858_v3  ;;  %v1867_v16 = vmax.f32 %v760_v7, 0.0  ;;  %v771_v17 = vadd.f32 %v1443_v8, %v1749_v33 }
  0xff   : > { %918 = vst [vmem:[%s1756_s13 + $0x80] sm:$0xff] %v854_v32  ;;  %v857_v44 = vmax.f32 %v659_v34, 0.0  ;;  %v651_v45 = vadd.f32 %v1749_v33, %v650_v40  ;;  %v980_v48 = vadd.f32 %v979_v38, %v853_v6  ;;  %v1051_v58 = vmul.f32 %v854_v32, %v854_v32  ;;  %v762_v20 = vpop.f32.mrf.mxu1 }
 0x100   : > { %v1112_v47 = vadd.f32 %v1111_v39, %v1049_v36  ;;  %v1418_v49 = vpop.f32.mrf.mxu0  ;;  %v763_v24 = vadd.f32 %v1749_v33, %v762_v20  ;;  %946 = vst [vmem:[%s1756_s13 + $0x160] sm:$0xff] %v1867_v16  ;;  %v1875_v29 = vmax.f32 %v771_v17, 0.0 }
 0x101   : > { %921 = vst [vmem:[%s1756_s13 + $0x98] sm:$0xff] %v857_v44  ;;  %v855_v53 = vmax.f32 %v651_v45, 0.0  ;;  %v672_v54 = vadd.f32 %v1418_v49, %v1749_v33  ;;  %v981_v57 = vadd.f32 %v980_v48, %v854_v32  ;;  %v1054_v25 = vmul.f32 %v857_v44, %v857_v44  ;;  %v1446_v31 = vpop.f32.mrf.mxu1 }
 0x102   : > { %v1113_v59 = vadd.f32 %v1112_v47, %v1050_v43  ;;  %v663_v60 = vpop.f32.mrf.mxu0  ;;  %v1879_v36 = vmax.f32 %v763_v24, 0.0  ;;  %949 = vst [vmem:[%s1756_s13 + $0x178] sm:$0xff] %v1875_v29  ;;  %v784_v42 = vadd.f32 %v1446_v31, %v1749_v33 }
 0x103   : > { %919 = vst [vmem:[%s1756_s13 + $0x88] sm:$0xff] %v855_v53  ;;  %v1052_v63 = vmul.f32 %v855_v53, %v855_v53  ;;  %v860_v1 = vmax.f32 %v672_v54, 0.0  ;;  %v664_v2 = vadd.f32 %v1749_v33, %v663_v60  ;;  %v982_v5 = vadd.f32 %v981_v57, %v855_v53  ;;  %v775_v43 = vpop.f32.mrf.mxu1 }
 0x104   : > { %v1114_v4 = vadd.f32 %v1113_v59, %v1051_v58  ;;  %v1419_v6 = vpop.f32.mrf.mxu0  ;;  %947 = vst [vmem:[%s1756_s13 + $0x168] sm:$0xff] %v1879_v36  ;;  %v1888_v52 = vmax.f32 %v784_v42, 0.0  ;;  %v776_v53 = vadd.f32 %v1749_v33, %v775_v43 }
 0x105   : > { %924 = vst [vmem:[%s1756_s13 + $0xb0] sm:$0xff] %v860_v1  ;;  %v858_v11 = vmax.f32 %v664_v2, 0.0  ;;  %v675_v12 = vadd.f32 %v1419_v6, %v1749_v33  ;;  %v983_v13 = vadd.f32 %v982_v5, %v856_v23  ;;  %v1447_v54 = vpop.f32.mrf.mxu1  ;;  %v1057_v59 = vmul.f32 %v860_v1, %v860_v1 }
 0x106   : > { %v1115_v14 = vadd.f32 %v1114_v4, %v1052_v63  ;;  %v666_v15 = vpop.f32.mrf.mxu0  ;;  %v787_v58 = vadd.f32 %v1447_v54, %v1749_v33  ;;  %952 = vst [vmem:[%s1756_s13 + $0x190] sm:$0xff] %v1888_v52  ;;  %v1896_v2 = vmax.f32 %v776_v53, 0.0 }
 0x107   : > { %922 = vst [vmem:[%s1756_s13 + $0xa0] sm:$0xff] %v858_v11  ;;  %v861_v21 = vmax.f32 %v675_v12, 0.0  ;;  %v667_v22 = vadd.f32 %v1749_v33, %v666_v15  ;;  %v984_v27 = vadd.f32 %v983_v13, %v857_v44  ;;  %v1055_v39 = vmul.f32 %v858_v11, %v858_v11  ;;  %v778_v4 = vpop.f32.mrf.mxu1 }
 0x108   : > { %v1116_v26 = vadd.f32 %v1115_v14, %v1053_v10  ;;  %v1422_v23 = vpop.f32.mrf.mxu0  ;;  %v1900_v7 = vmax.f32 %v787_v58, 0.0  ;;  %950 = vst [vmem:[%s1756_s13 + $0x180] sm:$0xff] %v1896_v2  ;;  %v779_v12 = vadd.f32 %v1749_v33, %v778_v4 }
 0x109   : > { %925 = vst [vmem:[%s1756_s13 + $0xb8] sm:$0xff] %v861_v21  ;;  %v859_v32 = vmax.f32 %v667_v22, 0.0  ;;  %v688_v34 = vadd.f32 %v1422_v23, %v1749_v33  ;;  %v985_v38 = vadd.f32 %v984_v27, %v858_v11  ;;  %v1058_v8 = vmul.f32 %v861_v21, %v861_v21  ;;  %v1450_v13 = vpop.f32.mrf.mxu1 }
 0x10a   : > { %v1117_v40 = vadd.f32 %v1116_v26, %v1054_v25  ;;  %v679_v41 = vpop.f32.mrf.mxu0  ;;  %953 = vst [vmem:[%s1756_s13 + $0x198] sm:$0xff] %v1900_v7  ;;  %v800_v25 = vadd.f32 %v1450_v13, %v1749_v33 }
 0x10b   : > { %923 = vst [vmem:[%s1756_s13 + $0xa8] sm:$0xff] %v859_v32  ;;  %v1056_v44 = vmul.f32 %v859_v32, %v859_v32  ;;  %v864_v45 = vmax.f32 %v688_v34, 0.0  ;;  %v680_v47 = vadd.f32 %v1749_v33, %v679_v41  ;;  %v986_v49 = vadd.f32 %v985_v38, %v859_v32  ;;  %v791_v26 = vpop.f32.mrf.mxu1 }
 0x10c   : > { %v1118_v48 = vadd.f32 %v1117_v40, %v1055_v39  ;;  %v1423_v51 = vpop.f32.mrf.mxu0  ;;  %v792_v32 = vadd.f32 %v1749_v33, %v791_v26  ;;  %v1917_v40 = vmax.f32 %v800_v25, 0.0 }
 0x10d   : > { %928 = vst [vmem:[%s1756_s13 + $0xd0] sm:$0xff] %v864_v45  ;;  %v862_v55 = vmax.f32 %v680_v47, 0.0  ;;  %v691_v57 = vadd.f32 %v1423_v51, %v1749_v33  ;;  %v987_v60 = vadd.f32 %v986_v49, %v860_v1  ;;  %v1451_v41 = vpop.f32.mrf.mxu1  ;;  %v1061_v47 = vmul.f32 %v864_v45, %v864_v45 }
 0x10e   : > { %v1119_v62 = vadd.f32 %v1118_v48, %v1056_v44  ;;  %v682_v63 = vpop.f32.mrf.mxu0  ;;  %v1921_v44 = vmax.f32 %v792_v32, 0.0  ;;  %956 = vst [vmem:[%s1756_s13 + $0x1b0] sm:$0xff] %v1917_v40  ;;  %v803_v53 = vadd.f32 %v1451_v41, %v1749_v33 }
 0x10f   : > { %926 = vst [vmem:[%s1756_s13 + $0xc0] sm:$0xff] %v862_v55  ;;  %v865_v5 = vmax.f32 %v691_v57, 0.0  ;;  %v683_v6 = vadd.f32 %v1749_v33, %v682_v63  ;;  %v988_v11 = vadd.f32 %v987_v60, %v861_v21  ;;  %v1059_v14 = vmul.f32 %v862_v55, %v862_v55  ;;  %v794_v54 = vpop.f32.mrf.mxu1 }
 0x110   : > { %v1120_v10 = vadd.f32 %v1119_v62, %v1057_v59  ;;  %v1426_v1 = vpop.f32.mrf.mxu0  ;;  %v1909_v21 = vmax.f32 %v779_v12, 0.0  ;;  %954 = vst [vmem:[%s1756_s13 + $0x1a0] sm:$0xff] %v1921_v44  ;;  %v795_v62 = vadd.f32 %v1749_v33, %v794_v54 }
 0x111   : > { %929 = vst [vmem:[%s1756_s13 + $0xd8] sm:$0xff] %v865_v5  ;;  %v863_v15 = vmax.f32 %v683_v6, 0.0  ;;  %v704_v17 = vadd.f32 %v1426_v1, %v1749_v33  ;;  %v989_v20 = vadd.f32 %v988_v11, %v862_v55  ;;  %v1062_v55 = vmul.f32 %v865_v5, %v865_v5  ;;  %v1454_v63 = vpop.f32.mrf.mxu1 }
 0x112   : > { %v1121_v22 = vadd.f32 %v1120_v10, %v1058_v8  ;;  %v695_v24 = vpop.f32.mrf.mxu0  ;;  %951 = vst [vmem:[%s1756_s13 + $0x188] sm:$0xff] %v1909_v21  ;;  %v816_v6 = vadd.f32 %v1454_v63, %v1749_v33  ;;  %v1937_v1 = vmax.f32 %v795_v62, 0.0  ;;  %v1069_v62 = vmul.f32 %v1776_v18, %v1776_v18 }
 0x113   : > { %927 = vst [vmem:[%s1756_s13 + $0xc8] sm:$0xff] %v863_v15  ;;  %v1060_v27 = vmul.f32 %v863_v15, %v863_v15  ;;  %v868_v23 = vmax.f32 %v704_v17, 0.0  ;;  %v696_v31 = vadd.f32 %v1749_v33, %v695_v24  ;;  %v990_v38 = vadd.f32 %v989_v20, %v863_v15  ;;  %v807_v12 = vpop.f32.mrf.mxu1 }
 0x114   : > { %v1122_v34 = vadd.f32 %v1121_v22, %v1059_v14  ;;  %v1427_v39 = vpop.f32.mrf.mxu0  ;;  %v1940_v13 = vmax.f32 %v816_v6, 0.0  ;;  %v808_v14 = vadd.f32 %v1749_v33, %v807_v12  ;;  %955 = vst [vmem:[%s1756_s13 + $0x1a8] sm:$0xff] %v1937_v1 }
 0x115   : > { %932 = vst [vmem:[%s1756_s13 + $0xf0] sm:$0xff] %v868_v23  ;;  %v866_v42 = vmax.f32 %v696_v31, 0.0  ;;  %v707_v43 = vadd.f32 %v1427_v39, %v1749_v33  ;;  %v991_v48 = vadd.f32 %v990_v38, %v864_v45  ;;  %v1930_v45 = vmax.f32 %v803_v53, 0.0  ;;  %v1455_v20 = vpop.f32.mrf.mxu1 }
 0x116   : > { %v1123_v49 = vadd.f32 %v1122_v34, %v1060_v27  ;;  %v698_v51 = vpop.f32.mrf.mxu0  ;;  %960 = vst [vmem:[%s1756_s13 + $0x1d0] sm:$0xff] %v1940_v13  ;;  %v1947_v22 = vmax.f32 %v808_v14, 0.0  ;;  %v819_v24 = vadd.f32 %v1455_v20, %v1749_v33  ;;  %v1065_v25 = vmul.f32 %v868_v23, %v868_v23 }
 0x117   : > { %930 = vst [vmem:[%s1756_s13 + $0xe0] sm:$0xff] %v866_v42  ;;  %v869_v57 = vmax.f32 %v707_v43, 0.0  ;;  %v699_v58 = vadd.f32 %v1749_v33, %v698_v51  ;;  %v992_v60 = vadd.f32 %v991_v48, %v865_v5  ;;  %v1063_v10 = vmul.f32 %v866_v42, %v866_v42  ;;  %957 = vst [vmem:[%s1756_s13 + $0x1b8] sm:$0xff] %v1930_v45  ;;  %v810_v31 = vpop.f32.mrf.mxu1 }
 0x118   : > { %v1124_v59 = vadd.f32 %v1123_v49, %v1061_v47  ;;  %958 = vst [vmem:[%s1756_s13 + $0x1c0] sm:$0xff] %v1947_v22  ;;  %v1952_v32 = vmax.f32 %v819_v24, 0.0  ;;  %v811_v34 = vadd.f32 %v1749_v33, %v810_v31  ;;  %v1067_v47 = vmul.f32 %v1783_v28, %v1783_v28 }
 0x119   : > { %933 = vst [vmem:[%s1756_s13 + $0xf8] sm:$0xff] %v869_v57  ;;  %v867_v4 = vmax.f32 %v699_v58, 0.0  ;;  %v993_v8 = vadd.f32 %v992_v60, %v866_v42  ;;  %v1066_v38 = vmul.f32 %v869_v57, %v869_v57  ;;  %v1458_v42 = vpop.f32.mrf.mxu1  ;;  %v1071_v14 = vmul.f32 %v1811_v0, %v1811_v0 }
 0x11a   : > { %v1125_v11 = vadd.f32 %v1124_v59, %v1062_v55  ;;  %961 = vst [vmem:[%s1756_s13 + $0x1d8] sm:$0xff] %v1952_v32  ;;  %v1957_v43 = vmax.f32 %v811_v34, 0.0  ;;  %v1072_v20 = vmul.f32 %v1825_v19, %v1825_v19  ;;  %v1075_v34 = vmul.f32 %v1837_v35, %v1837_v35 }
 0x11b   : > { %931 = vst [vmem:[%s1756_s13 + $0xe8] sm:$0xff] %v867_v4  ;;  %v1064_v5 = vmul.f32 %v867_v4, %v867_v4  ;;  %v994_v17 = vadd.f32 %v993_v8, %v867_v4  ;;  %v823_v51 = vpop.f32.mrf.mxu1 }
 0x11c   : > { %v1126_v15 = vadd.f32 %v1125_v11, %v1063_v10  ;;  %959 = vst [vmem:[%s1756_s13 + $0x1c8] sm:$0xff] %v1957_v43  ;;  %v824_v54 = vadd.f32 %v1749_v33, %v823_v51  ;;  %v1070_v10 = vmul.f32 %v1790_v37, %v1790_v37 }
 0x11d   : > { %v995_v26 = vadd.f32 %v994_v17, %v868_v23  ;;  %v832_v23 = vadd.f32 %v1458_v42, %v1749_v33  ;;  %v1459_v59 = vpop.f32.mrf.mxu1 }
 0x11e   : > { %v1127_v27 = vadd.f32 %v1126_v15, %v1064_v5  ;;  %v835_v60 = vadd.f32 %v1459_v59, %v1749_v33 }
 0x11f   : > { %v996_v41 = vadd.f32 %v995_v26, %v869_v57  ;;  %v1965_v53 = vmax.f32 %v832_v23, 0.0  ;;  %v1068_v57 = vmul.f32 %v1797_v46, %v1797_v46  ;;  %v826_v6 = vpop.f32.mrf.mxu1  ;;  %v1074_v26 = vmul.f32 %v1818_v9, %v1818_v9 }
 0x120   : > { %v1128_v39 = vadd.f32 %v1127_v27, %v1065_v25  ;;  %v827_v8 = vadd.f32 %v1749_v33, %v826_v6  ;;  %v1084_v6 = vmul.f32 %v1909_v21, %v1909_v21 }
 0x121   : > { %v997_v48 = vadd.f32 %v996_v41, %v1783_v28  ;;  %964 = vst [vmem:[%s1756_s13 + $0x1f0] sm:$0xff] %v1965_v53  ;;  %v1973_v28 = vmax.f32 %v824_v54, 0.0  ;;  %v1076_v41 = vmul.f32 %v1854_v61, %v1854_v61 }
 0x122   : > { %v1129_v49 = vadd.f32 %v1128_v39, %v1066_v38  ;;  %v1989_v5 = vmax.f32 %v827_v8, 0.0 }
 0x123   : > { %v998_v55 = vadd.f32 %v997_v48, %v1797_v46  ;;  %962 = vst [vmem:[%s1756_s13 + $0x1e0] sm:$0xff] %v1973_v28  ;;  %v1981_v46 = vmax.f32 %v835_v60, 0.0 }
 0x124   : > { %v1130_v58 = vadd.f32 %v1129_v49, %v1067_v47  ;;  %963 = vst [vmem:[%s1756_s13 + $0x1e8] sm:$0xff] %v1989_v5  ;;  %v1079_v49 = vmul.f32 %v1867_v16, %v1867_v16 }
 0x125   : > { %v999_v63 = vadd.f32 %v998_v55, %v1776_v18  ;;  %965 = vst [vmem:[%s1756_s13 + $0x1f8] sm:$0xff] %v1981_v46  ;;  %v1080_v55 = vmul.f32 %v1879_v36, %v1879_v36 }
 0x126   : > { %v1131_v4 = vadd.f32 %v1130_v58, %v1068_v57 }
 0x127   : > { %v1000_v12 = vadd.f32 %v999_v63, %v1790_v37  ;;  %v1073_v37 = vmul.f32 %v1804_v56, %v1804_v56 }
 0x128   : > { %v1132_v11 = vadd.f32 %v1131_v4, %v1069_v62  ;;  %v1083_v62 = vmul.f32 %v1896_v2, %v1896_v2 }
 0x129   : > { %v1001_v18 = vadd.f32 %v1000_v12, %v1811_v0 }
 0x12a   : > { %v1133_v15 = vadd.f32 %v1132_v11, %v1070_v10 }
 0x12b   : > { %v1002_v33 = vadd.f32 %v1001_v18, %v1825_v19  ;;  %v1087_v18 = vmul.f32 %v1921_v44, %v1921_v44 }
 0x12c   : > { %v1134_v17 = vadd.f32 %v1133_v15, %v1071_v14 }
 0x12d   : > { %v1003_v24 = vadd.f32 %v1002_v33, %v1804_v56  ;;  %v1077_v56 = vmul.f32 %v1833_v30, %v1833_v30 }
 0x12e   : > { %v1135_v25 = vadd.f32 %v1134_v17, %v1072_v20  ;;  %v1088_v17 = vmul.f32 %v1937_v1, %v1937_v1 }
 0x12f   : > { %v1004_v0 = vadd.f32 %v1003_v24, %v1818_v9  ;;  %v1078_v9 = vmul.f32 %v1846_v50, %v1846_v50 }
 0x130   : > { %v1136_v27 = vadd.f32 %v1135_v25, %v1073_v37  ;;  %v1091_v25 = vmul.f32 %v1947_v22, %v1947_v22 }
 0x131   : > { %v1005_v31 = vadd.f32 %v1004_v0, %v1837_v35  ;;  %v1092_v0 = vmul.f32 %v1957_v43, %v1957_v43 }
 0x132   : > { %v1137_v38 = vadd.f32 %v1136_v27, %v1074_v26 }
 0x133   : > { %v1006_v19 = vadd.f32 %v1005_v31, %v1854_v61 }
 0x134   : > { %v1138_v39 = vadd.f32 %v1137_v38, %v1075_v34 }
 0x135   : > { %v1007_v42 = vadd.f32 %v1006_v19, %v1833_v30  ;;  %v1081_v30 = vmul.f32 %v1858_v3, %v1858_v3  ;;  %v1095_v19 = vmul.f32 %v1973_v28, %v1973_v28 }
 0x136   : > { %v1139_v23 = vadd.f32 %v1138_v39, %v1076_v41 }
 0x137   : > { %v1008_v48 = vadd.f32 %v1007_v42, %v1846_v50  ;;  %v1082_v50 = vmul.f32 %v1875_v29, %v1875_v29  ;;  %v1097_v42 = vmul.f32 %v1965_v53, %v1965_v53 }
 0x138   : > { %v1140_v47 = vadd.f32 %v1139_v23, %v1077_v56 }
 0x139   : > { %v1009_v35 = vadd.f32 %v1008_v48, %v1867_v16 }
 0x13a   : > { %v1141_v51 = vadd.f32 %v1140_v47, %v1078_v9 }
 0x13b   : > { %v1010_v61 = vadd.f32 %v1009_v35, %v1879_v36 }
 0x13c   : > { %v1142_v54 = vadd.f32 %v1141_v51, %v1079_v49 }
 0x13d   : > { %v1011_v57 = vadd.f32 %v1010_v61, %v1858_v3  ;;  %v1085_v3 = vmul.f32 %v1888_v52, %v1888_v52 }
 0x13e   : > { %v1143_v58 = vadd.f32 %v1142_v54, %v1080_v55  ;;  %v1168_v54 = vlaneseq }
 0x13f   : > { %v1012_v60 = vadd.f32 %v1011_v57, %v1875_v29  ;;  %v1086_v29 = vmul.f32 %v1900_v7, %v1900_v7 }
 0x140   : > { %v1144_v59 = vadd.f32 %v1143_v58, %v1081_v30 }
 0x141   : > { %v1013_v16 = vadd.f32 %v1012_v60, %v1896_v2 }
 0x142   : > { %v1145_v63 = vadd.f32 %v1144_v59, %v1082_v50 }
 0x143   : > { %v1014_v36 = vadd.f32 %v1013_v16, %v1909_v21 }
 0x144   : > { %v1146_v4 = vadd.f32 %v1145_v63, %v1083_v62 }
 0x145   : > { %v1015_v8 = vadd.f32 %v1014_v36, %v1888_v52  ;;  %v1089_v52 = vmul.f32 %v1917_v40, %v1917_v40 }
 0x146   : > { %v1147_v10 = vadd.f32 %v1146_v4, %v1084_v6 }
 0x147   : > { %v1016_v12 = vadd.f32 %v1015_v8, %v1900_v7  ;;  %v1090_v7 = vmul.f32 %v1930_v45, %v1930_v45 }
 0x148   : > { %v1148_v11 = vadd.f32 %v1147_v10, %v1085_v3 }
 0x149   : > { %v1017_v2 = vadd.f32 %v1016_v12, %v1921_v44 }
 0x14a   : > { %v1149_v14 = vadd.f32 %v1148_v11, %v1086_v29 }
 0x14b   : > { %v1018_v21 = vadd.f32 %v1017_v2, %v1937_v1 }
 0x14c   : > { %v1150_v15 = vadd.f32 %v1149_v14, %v1087_v18 }
 0x14d   : > { %v1019_v33 = vadd.f32 %v1018_v21, %v1917_v40  ;;  %v1093_v40 = vmul.f32 %v1940_v13, %v1940_v13 }
 0x14e   : > { %v1151_v20 = vadd.f32 %v1150_v15, %v1088_v17 }
 0x14f   : > { %v1020_v24 = vadd.f32 %v1019_v33, %v1930_v45  ;;  %v1094_v45 = vmul.f32 %v1952_v32, %v1952_v32 }
 0x150   : > { %v1152_v37 = vadd.f32 %v1151_v20, %v1089_v52 }
 0x151   : > { %v1021_v44 = vadd.f32 %v1020_v24, %v1947_v22 }
 0x152   : > { %v1153_v26 = vadd.f32 %v1152_v37, %v1090_v7 }
 0x153   : > { %v1022_v1 = vadd.f32 %v1021_v44, %v1957_v43 }
 0x154   : > { %v1154_v27 = vadd.f32 %v1153_v26, %v1091_v25 }
 0x155   : > { %v1023_v31 = vadd.f32 %v1022_v1, %v1940_v13  ;;  %v1096_v13 = vmul.f32 %v1989_v5, %v1989_v5 }
 0x156   : > { %v1155_v34 = vadd.f32 %v1154_v27, %v1092_v0 }
 0x157   : > { %v1024_v39 = vadd.f32 %v1023_v31, %v1952_v32  ;;  %v1098_v32 = vmul.f32 %v1981_v46, %v1981_v46 }
 0x158   : > { %v1156_v38 = vadd.f32 %v1155_v34, %v1093_v40 }
 0x159   : > { %v1025_v22 = vadd.f32 %v1024_v39, %v1973_v28 }
 0x15a   : > { %v1157_v41 = vadd.f32 %v1156_v38, %v1094_v45 }
 0x15b   : > { %v1026_v56 = vadd.f32 %v1025_v22, %v1989_v5 }
 0x15c   : > { %v1158_v43 = vadd.f32 %v1157_v41, %v1095_v19 }
 0x15d   : > { %v1027_v23 = vadd.f32 %v1026_v56, %v1965_v53  ;;  %v1169_v53 = vshrl.u32 %v1168_v54, 7 }
 0x15e   : > { %v1159_v9 = vadd.f32 %v1158_v43, %v1096_v13 }
 0x15f   : > { %v1028_v47 = vadd.f32 %v1027_v23, %v1981_v46  ;;  %vm1171_vm1 = vcmp.eq.s32.totalorder %v1169_v53, 1  ;;  %vm1170_vm2 = vcmp.eq.s32.totalorder %v1169_v53, 0 }
 0x160   : > { %v1160_v48 = vadd.f32 %v1159_v9, %v1097_v42 }
 0x161   : > { %v1029_v28 = vrot.slane %v1028_v47, 4 }
 0x162   : > { %v1161_v35 = vadd.f32 %v1160_v48, %v1098_v32 }
 0x163   : > { %v1030_v49 = vadd.f32 %v1029_v28, %v1028_v47 }
 0x164   : > { %v1162_v51 = vrot.slane %v1161_v35, 4 }
 0x165   : > { %v1031_v5 = vrot.slane %v1030_v49, 2 }
 0x166   : > { %v1163_v61 = vadd.f32 %v1162_v51, %v1161_v35 }
 0x167   : > { %v1032_v55 = vadd.f32 %v1031_v5, %v1030_v49 }
 0x168   : > { %v1164_v30 = vrot.slane %v1163_v61, 2 }
 0x169   : > { %v1033_v58 = vrot.slane %v1032_v55, 1 }
 0x16a   : > { %v1165_v57 = vadd.f32 %v1164_v30, %v1163_v61 }
 0x16b   : > { %v1034_v59 = vadd.f32 %v1033_v58, %v1032_v55 }
 0x16c   : > { %v1166_v50 = vrot.slane %v1165_v57, 1 }
 0x16e   : > { %v1167_v46 = vadd.f32 %v1166_v50, %v1165_v57 }
 0x170   : > { %v1172_v60 = vsel %vm1171_vm1, %v1167_v46, 0.0 }
 0x171   : > { %v1173_v16 = vsel %vm1170_vm2, %v1034_v59, %v1172_v60 }
 0x172   : > { %1174 = vst [vmem:[%s199_s23] sm:$0xff] %v1173_v16 }
 0x173   : > { %1547 = shalt.err (!%p1544_p3)
}
 0x174   : > { %s1548_s9 = scalar_lea.hbm %s2082_s30, 128  ;;  %s1552_s12 = scalar_lea.hbm %s2121_s4, 256 }
 0x175   : > { %p1549_p4 = scmp.ne.s32.totalorder %s2082_s30, %s1548_s9  ;;  %p1553_p9 = scmp.lt.s32.totalorder %s2082_s30, %s2121_s4 }
 0x176   : > { %p1554_p10 = scmp.lt.s32.totalorder %s1552_s12, %s1548_s9 }
 0x177   : > { %p1550_p7 = pnand %p1549_p4, %p1660_p5 }
 0x178   : > { %p1555_p11 = por %p1554_p10, %p1553_p9 }
 0x179   : > { %p1551_p8 = pneg %p1550_p7 }
 0x17b   : > { %p1556_p12 = pnand %p1555_p11, %p1551_p8 }
 0x17d   : > { %1559 = shalt.err (!%p1556_p12)
}
 0x17e   : > { %1462 = dma.vmem_to_hbm [thread:$0]  (%p1660_p5), %s1199_s27, 128, %s2082_s30, %s1181_s5  }
 0x17f PF: > { %p1468_p13 = scmp.ge.s32.totalorder %s1594_s18, 2  ;;  %s1218_s20 = sand.u32 1, %s1582_s15  }
 0x180   : > { %s1219_s22 = scalar_lea.sflag [#allocation3], %s1218_s20 }
 0x181   : > { %p1465_p0 = pnand %p1468_p13, %p1664_p6 }
 0x183   : > { %p1466_p1 = pneg %p1465_p0 }
 0x185   : > { %1577 = dma.done.wait (%p1466_p1), %s1219_s22, 128  }
 0x186   : > { %1579 = vsyncadd (%p1466_p1), %s1219_s22, 4294967168  ;;  %p15_p2 = scmp.ge.s32.totalorder %s1647_s21, 4   ;;  %s2124_s15 = smov %s1586_s16 }
 0x187   : > { %s2125_s16 = smov %s1590_s17  ;;  %s2126_s17 = smov %s1658_s24 }
 0x188   : > { %s2127_s18 = smov %s1647_s21  ;;  %17 = sbr.rel (!%p15_p2) target bundleno = 3 (0x3), region = 79 }
 0x18d   :  { %1224 = vsyncpa [#allocation3], 1 }
 0x18e   :  { %1226 = vsyncpa [#allocation3 + $0x1], 1 }

// kernel: decoder_forward.19
= control target key start
LH: loop header
LB: loop body
LE: loop exit
PB: predicated region body
PF: predicated region fallthrough
CT: control target
= control target key end

     0   :  { %10 = vsyncpa [#allocation3], 0  ;;  %s2171_s0 = inlined_call_operand.vmem [shape: bf16[1024,64], index: 0, kind: input, shape index: {}]   ;;  %s2172_s1 = inlined_call_operand.vmem [shape: bf16[64,128], index: 1, kind: input, shape index: {}]   ;;  %s2173_s2 = inlined_call_operand.vmem [shape: f32[1,128], index: 2, kind: input, shape index: {}]   ;;  %s2174_s3 = inlined_call_operand.vmem [shape: f32[1024,128], index: 3, kind: output, shape index: {0}]   ;;  %s2175_s4 = inlined_call_operand.hbm [shape: f32[16,128], index: 4, kind: output, shape index: {1}]  }
   0x1   :  { %12 = vsyncpa [#allocation3 + $0x1], 0  ;;  %s1667_s15 = smov 0   ;;  %s1669_s16 = smov 0  }
   0x2   :  { %s1671_s17 = smov 0   ;;  %s1673_s18 = smov 0  }
   0x3 LB: > { %s1688_s19 = sadd.s32 4294967295, %s1639_s18   ;;  %s1306_s20 = sadd.s32 4294967294, %s1639_s18   ;;  %s1639_s18 = sphi %s1673_s18, %s2181_s18   ;;  %s1635_s17 = sphi %s1671_s17, %s2180_s17   ;;  %s1631_s16 = sphi %s1669_s16, %s2179_s16   ;;  %s1627_s15 = sphi %s1667_s15, %s2178_s15  }
   0x4   : > { %s1692_s21 = sadd.s32 1, %s1639_s18   ;;  %s119_s22 = sadd.s32 1, %s1635_s17 }
   0x5   : > { %s116_s23 = ssub.s32 %s1639_s18, %s1692_s21  ;;  %p129_p0 = scmp.ne.s32.totalorder %s1635_s17, %s1631_s16 }
   0x6   : > { %p117_p1 = scmp.eq.s32.totalorder %s116_s23, 0  ;;  %p130_p2 = scmp.eq.s32.totalorder %s1688_s19, 1 }
   0x7   : > { %p135_p3 = scmp.ne.s32.totalorder %s1631_s16, %s1627_s15  ;;  %p136_p4 = scmp.eq.s32.totalorder %s1306_s20, 1 }
   0x8   : > { %s1703_s24 = scalar_select %p117_p1, %s1635_s17, %s119_s22  }
   0x9   : > { %p1705_p5 = por %p130_p2, %p129_p0  ;;  %p1709_p6 = por %p136_p4, %p135_p3 }
   0xa   : > { %p1309_p7 = scmp.ge.s32.totalorder %s1639_s18, 1  ;;  %p169_p8 = scmp.lt.s32.totalorder %s1639_s18, 3 }
   0xc   : > { %p170_p9 = pnand %p1309_p7, %p169_p8 }
   0xd   : > { %s1311_s29 = sshll.u32 (!%p170_p9), %s1688_s19, 6  ;;  %s1385_s5 = sshll.u32 (!%p170_p9), %s1688_s19, 7 }
   0xe   : > { %173 = sbr.rel (%p170_p9) target bundleno = 395 (0x18b), region = 32  ;;  %p201_p10 = scmp.lt.s32.totalorder (!%p170_p9), %s1311_s29, 127 }
   0xf   : > { %s2136_s10 = scalar_lea.hbm (!%p170_p9), %s2175_s4, %s1385_s5  ;;  %s1641_s19 = smov (!%p170_p9), [#allocation2]  }
  0x10   : > { %s1583_s13 = sshll.u32 (!%p170_p9), %s1641_s19, 4  ;;  %s1584_s13 = int_to_ptr.vmem [resolvable:$false] %s1583_s13 }
  0x11   : > { %s1585_s14 = scalar_lea.vmem (!%p170_p9), %s1584_s13, 256 }
  0x13   : > { %v1543_v0 = vld [vmem:[%s2172_s1 + $0x18] sm:$0xff]   ;;  %v1544_v1 = vld [vmem:[%s2172_s1 + $0x10] sm:$0xff]   ;;  %s2183_s29 = smov (!%p201_p10, %s1311_s29), 127  ;;  %v1545_v2 = vld [vmem:[%s2172_s1 + $0x8] sm:$0xff]   ;;  %vm476_vm0 = vcmask 523264  }
  0x14   : > { %1424 = vmatprep.subr.bf16.mxu0 %v1543_v0  ;;  %1496 = vmatprep.subr.bf16.mxu1 %v1543_v0  ;;  %s1312_s8 = sshll.u32 %s2183_s29, 2  ;;  %v1546_v4 = vld [vmem:[%s2172_s1] sm:$0xff]   ;;  %s1314_s22 = sshll.u32 %s2183_s29, 3 }
  0x15   : > { %1425 = vmatpush3.bf16.msra.mxu0 %v1543_v0  ;;  %1500 = vmatpush3.bf16.msra.mxu1 %v1543_v0  ;;  %s1731_s11 = scalar_lea.vmem %s2171_s0, %s1312_s8  ;;  %v1803_v36 = vld [vmem:[%s2173_s2] ss:$0 sm:$0xff]  ;;  %s1810_s28 = scalar_lea.vmem %s2174_s3, %s1314_s22 }
  0x16   : > { %1426 = vmatprep.subr.bf16.mxu0 %v1544_v1  ;;  %1497 = vmatprep.subr.bf16.mxu1 %v1544_v1  ;;  %v1547_v3 = vld [vmem:[%s1731_s11] sm:$0xff]   ;;  %v1548_v5 = vld [vmem:[%s1731_s11 + $0x8] sm:$0xff]   ;;  %v1549_v6 = vld [vmem:[%s1731_s11 + $0x10] sm:$0xff]   ;;  %s197_s29 = sand.u32 1, %s1631_s16  }
  0x17   : > { %1432 = vmatprep.mubr.msk.bf16.mxu0 %vm476_vm0, %v1547_v3  ;;  %v1550_v7 = vld [vmem:[%s1731_s11 + $0x18] sm:$0xff]   ;;  %v1551_v8 = vld [vmem:[%s1731_s11 + $0x20] sm:$0xff]   ;;  %v1564_v10 = vld [vmem:[%s1731_s11 + $0x88] sm:$0xff]   ;;  %s1310_s30 = sshll.u32 %s197_s29, 3 }
  0x18   : > { %v1563_v9 = vld [vmem:[%s1731_s11 + $0x80] sm:$0xff]   ;;  %v1565_v11 = vld [vmem:[%s1731_s11 + $0x90] sm:$0xff]   ;;  %v1552_v12 = vld [vmem:[%s1731_s11 + $0x28] sm:$0xff]   ;;  %s199_s6 = scalar_lea.vmem [#allocation2], %s1310_s30 }
  0x19   : > { %1427 = vmatpush3.bf16.msra.mxu0 %v1544_v1  ;;  %1501 = vmatpush3.bf16.msra.mxu1 %v1544_v1  ;;  %v1553_v13 = vld [vmem:[%s1731_s11 + $0x30] sm:$0xff]   ;;  %v1566_v14 = vld [vmem:[%s1731_s11 + $0x98] sm:$0xff]   ;;  %v1567_v15 = vld [vmem:[%s1731_s11 + $0xa0] sm:$0xff]   ;;  %s1222_s7 = sshll.u32 %s199_s6, 4  ;;  %s1223_s7 = int_to_ptr.vmem [resolvable:$true] %s1222_s7 }
  0x1a   : > { %1428 = vmatprep.subr.bf16.mxu0 %v1545_v2  ;;  %1498 = vmatprep.subr.bf16.mxu1 %v1545_v2  ;;  %v1554_v16 = vld [vmem:[%s1731_s11 + $0x38] sm:$0xff]   ;;  %v1568_v17 = vld [vmem:[%s1731_s11 + $0xa8] sm:$0xff]   ;;  %v1555_v18 = vld [vmem:[%s1731_s11 + $0x40] sm:$0xff]   ;;  %s1579_s12 = scalar_lea.vmem %s1223_s7, 128  ;;  %p1586_p0 = scmp.lt.s32.totalorder %s1223_s7, %s1584_s13 }
  0x1b   : > { %1464 = vmatprep.mubr.msk.bf16.mxu1 %vm476_vm0, %v1563_v9  ;;  %v1569_v19 = vld [vmem:[%s1731_s11 + $0xb0] sm:$0xff]   ;;  %v1556_v20 = vld [vmem:[%s1731_s11 + $0x48] sm:$0xff]   ;;  %v1570_v21 = vld [vmem:[%s1731_s11 + $0xb8] sm:$0xff]   ;;  %p1580_p11 = scmp.ne.s32.totalorder %s1223_s7, %s1579_s12  ;;  %p1587_p1 = scmp.lt.s32.totalorder %s1585_s14, %s1579_s12 }
  0x1c   : > { %v1557_v22 = vld [vmem:[%s1731_s11 + $0x50] sm:$0xff]   ;;  %v1571_v23 = vld [vmem:[%s1731_s11 + $0xc0] sm:$0xff]   ;;  %v1558_v24 = vld [vmem:[%s1731_s11 + $0x58] sm:$0xff]  }
  0x1d   : > { %1429 = vmatpush3.bf16.msra.mxu0 %v1545_v2  ;;  %1502 = vmatpush3.bf16.msra.mxu1 %v1545_v2  ;;  %v1572_v25 = vld [vmem:[%s1731_s11 + $0xc8] sm:$0xff]   ;;  %v1559_v26 = vld [vmem:[%s1731_s11 + $0x60] sm:$0xff]   ;;  %v1573_v27 = vld [vmem:[%s1731_s11 + $0xd0] sm:$0xff]   ;;  %p1581_p12 = pnand %p1580_p11, %p1705_p5  ;;  %p1588_p2 = por %p1587_p1, %p1586_p0 }
  0x1e   : > { %1430 = vmatprep.subr.bf16.mxu0 %v1546_v4  ;;  %1499 = vmatprep.subr.bf16.mxu1 %v1546_v4  ;;  %v1560_v28 = vld [vmem:[%s1731_s11 + $0x68] sm:$0xff]   ;;  %v1574_v29 = vld [vmem:[%s1731_s11 + $0xd8] sm:$0xff]   ;;  %v1561_v30 = vld [vmem:[%s1731_s11 + $0x70] sm:$0xff]  }
  0x1f   : > { %v1575_v31 = vld [vmem:[%s1731_s11 + $0xe0] sm:$0xff]   ;;  %v1562_v32 = vld [vmem:[%s1731_s11 + $0x78] sm:$0xff]   ;;  %v1576_v33 = vld [vmem:[%s1731_s11 + $0xe8] sm:$0xff]   ;;  %p1582_p13 = pneg %p1581_p12 }
  0x20   : > { %v1577_v34 = vld [vmem:[%s1731_s11 + $0xf0] sm:$0xff]   ;;  %v1578_v35 = vld [vmem:[%s1731_s11 + $0xf8] sm:$0xff]   ;;  %s1205_s11 = scalar_lea.sflag [#allocation3], %s197_s29 }
  0x21   : > { %1431 = vmatpush3.bf16.msra.mxu0 %v1546_v4  ;;  %1503 = vmatpush3.bf16.msra.mxu1 %v1546_v4  ;;  %p1589_p3 = pnand %p1588_p2, %p1582_p13 }
  0x24   : > { %1433 = vmatmul.mubr.msk.bf16.vlgmr.msra.gmra.mxu0 %vm476_vm0, %v1548_v5  ;;  %1465 = vmatmul.mubr.msk.bf16.vlgmr.msra.gmra.mxu1 %vm476_vm0, %v1564_v10 }
  0x25   : > { %1436 = vmatprep.mubr.msk.bf16.mxu0 %vm476_vm0, %v1549_v6  ;;  %1468 = vmatprep.mubr.msk.bf16.mxu1 %vm476_vm0, %v1565_v11 }
  0x2c   : > { %1437 = vmatmul.mubr.msk.bf16.gmra.mxu0 %vm476_vm0, %v1550_v7  ;;  %1469 = vmatmul.mubr.msk.bf16.gmra.mxu1 %vm476_vm0, %v1566_v14 }
  0x2d   : > { %1440 = vmatprep.mubr.msk.bf16.mxu0 %vm476_vm0, %v1551_v8  ;;  %1472 = vmatprep.mubr.msk.bf16.mxu1 %vm476_vm0, %v1567_v15 }
  0x34   : > { %1441 = vmatmul.mubr.msk.bf16.gmra.mxu0 %vm476_vm0, %v1552_v12  ;;  %1473 = vmatmul.mubr.msk.bf16.gmra.mxu1 %vm476_vm0, %v1568_v17 }
  0x35   : > { %1444 = vmatprep.mubr.msk.bf16.mxu0 %vm476_vm0, %v1553_v13  ;;  %1476 = vmatprep.mubr.msk.bf16.mxu1 %vm476_vm0, %v1569_v19 }
  0x3c   : > { %1445 = vmatmul.mubr.msk.bf16.gmra.mxu0 %vm476_vm0, %v1554_v16  ;;  %1477 = vmatmul.mubr.msk.bf16.gmra.mxu1 %vm476_vm0, %v1570_v21 }
  0x3d   : > { %1448 = vmatprep.mubr.msk.bf16.mxu0 %vm476_vm0, %v1555_v18  ;;  %1480 = vmatprep.mubr.msk.bf16.mxu1 %vm476_vm0, %v1571_v23 }
  0x44   : > { %1449 = vmatmul.mubr.msk.bf16.gmra.mxu0 %vm476_vm0, %v1556_v20  ;;  %1481 = vmatmul.mubr.msk.bf16.gmra.mxu1 %vm476_vm0, %v1572_v25 }
  0x45   : > { %1452 = vmatprep.mubr.msk.bf16.mxu0 %vm476_vm0, %v1557_v22  ;;  %1484 = vmatprep.mubr.msk.bf16.mxu1 %vm476_vm0, %v1573_v27 }
  0x4c   : > { %1453 = vmatmul.mubr.msk.bf16.gmra.mxu0 %vm476_vm0, %v1558_v24  ;;  %1485 = vmatmul.mubr.msk.bf16.gmra.mxu1 %vm476_vm0, %v1574_v29 }
  0x4d   : > { %1456 = vmatprep.mubr.msk.bf16.mxu0 %vm476_vm0, %v1559_v26  ;;  %1488 = vmatprep.mubr.msk.bf16.mxu1 %vm476_vm0, %v1575_v31 }
  0x54   : > { %1457 = vmatmul.mubr.msk.bf16.gmra.mxu0 %vm476_vm0, %v1560_v28  ;;  %1489 = vmatmul.mubr.msk.bf16.gmra.mxu1 %vm476_vm0, %v1576_v33 }
  0x55   : > { %1460 = vmatprep.mubr.msk.bf16.mxu0 %vm476_vm0, %v1561_v30  ;;  %1492 = vmatprep.mubr.msk.bf16.mxu1 %vm476_vm0, %v1577_v34 }
  0x5c   : > { %1461 = vmatmul.mubr.msk.bf16.gmra.mxu0 %vm476_vm0, %v1562_v32  ;;  %1493 = vmatmul.mubr.msk.bf16.gmra.mxu1 %vm476_vm0, %v1578_v35 }
  0xe4   : > { %v1434_v37 = vpop.f32.mrf.mxu0  ;;  %v1466_v49 = vpop.f32.mrf.mxu1 }
  0xe5   : > { %v616_v38 = vadd.f32 %v1434_v37, %v1803_v36  ;;  %v744_v52 = vadd.f32 %v1466_v49, %v1803_v36 }
  0xe6   : > { %v607_v39 = vpop.f32.mrf.mxu0  ;;  %v735_v55 = vpop.f32.mrf.mxu1 }
  0xe7   : > { %v864_v40 = vmax.f32 %v616_v38, 0.0  ;;  %v608_v41 = vadd.f32 %v1803_v36, %v607_v39  ;;  %v1822_v61 = vmax.f32 %v744_v52, 0.0  ;;  %v736_v62 = vadd.f32 %v1803_v36, %v735_v55 }
  0xe8   : > { %v1435_v42 = vpop.f32.mrf.mxu0  ;;  %v1467_v63 = vpop.f32.mrf.mxu1 }
  0xe9   : > { %928 = vst [vmem:[%s1810_s28 + $0x10] sm:$0xff] %v864_v40  ;;  %v862_v43 = vmax.f32 %v608_v41, 0.0  ;;  %v619_v44 = vadd.f32 %v1435_v42, %v1803_v36  ;;  %v1061_v0 = vmul.f32 %v864_v40, %v864_v40  ;;  %960 = vst [vmem:[%s1810_s28 + $0x110] sm:$0xff] %v1822_v61  ;;  %v1829_v6 = vmax.f32 %v736_v62, 0.0 }
  0xea   : > { %v610_v45 = vpop.f32.mrf.mxu0  ;;  %v747_v7 = vadd.f32 %v1467_v63, %v1803_v36  ;;  %v738_v8 = vpop.f32.mrf.mxu1 }
  0xeb   : > { %926 = vst [vmem:[%s1810_s28] sm:$0xff] %v862_v43  ;;  %v865_v46 = vmax.f32 %v619_v44, 0.0  ;;  %v611_v47 = vadd.f32 %v1803_v36, %v610_v45  ;;  %v1059_v53 = vmul.f32 %v862_v43, %v862_v43  ;;  %958 = vst [vmem:[%s1810_s28 + $0x100] sm:$0xff] %v1829_v6  ;;  %v739_v17 = vadd.f32 %v1803_v36, %v738_v8 }
  0xec   : > { %v1438_v48 = vpop.f32.mrf.mxu0  ;;  %v1836_v16 = vmax.f32 %v747_v7, 0.0  ;;  %v1470_v18 = vpop.f32.mrf.mxu1 }
  0xed   : > { %929 = vst [vmem:[%s1810_s28 + $0x18] sm:$0xff] %v865_v46  ;;  %v863_v50 = vmax.f32 %v611_v47, 0.0  ;;  %v632_v51 = vadd.f32 %v1438_v48, %v1803_v36  ;;  %v1062_v9 = vmul.f32 %v865_v46, %v865_v46  ;;  %v1843_v24 = vmax.f32 %v739_v17, 0.0 }
  0xee   : > { %v623_v54 = vpop.f32.mrf.mxu0  ;;  %961 = vst [vmem:[%s1810_s28 + $0x118] sm:$0xff] %v1836_v16  ;;  %v760_v25 = vadd.f32 %v1470_v18, %v1803_v36  ;;  %v751_v26 = vpop.f32.mrf.mxu1 }
  0xef   : > { %927 = vst [vmem:[%s1810_s28 + $0x8] sm:$0xff] %v863_v50  ;;  %v990_v56 = vadd.f32 %v863_v50, %v862_v43  ;;  %v1060_v57 = vmul.f32 %v863_v50, %v863_v50  ;;  %v868_v58 = vmax.f32 %v632_v51, 0.0  ;;  %v624_v59 = vadd.f32 %v1803_v36, %v623_v54  ;;  %959 = vst [vmem:[%s1810_s28 + $0x108] sm:$0xff] %v1843_v24 }
  0xf0   : > { %v1439_v60 = vpop.f32.mrf.mxu0  ;;  %v1850_v33 = vmax.f32 %v760_v25, 0.0  ;;  %v752_v34 = vadd.f32 %v1803_v36, %v751_v26  ;;  %v1471_v35 = vpop.f32.mrf.mxu1 }
  0xf1   : > { %v991_v1 = vadd.f32 %v990_v56, %v864_v40  ;;  %v1123_v2 = vadd.f32 %v1060_v57, %v1059_v53  ;;  %932 = vst [vmem:[%s1810_s28 + $0x30] sm:$0xff] %v868_v58  ;;  %v866_v3 = vmax.f32 %v624_v59, 0.0  ;;  %v635_v4 = vadd.f32 %v1439_v60, %v1803_v36 }
  0xf2   : > { %v626_v5 = vpop.f32.mrf.mxu0  ;;  %v1065_v37 = vmul.f32 %v868_v58, %v868_v58  ;;  %964 = vst [vmem:[%s1810_s28 + $0x130] sm:$0xff] %v1850_v33  ;;  %v1857_v44 = vmax.f32 %v752_v34, 0.0  ;;  %v763_v45 = vadd.f32 %v1471_v35, %v1803_v36 }
  0xf3   : > { %v1124_v10 = vadd.f32 %v1123_v2, %v1061_v0  ;;  %930 = vst [vmem:[%s1810_s28 + $0x20] sm:$0xff] %v866_v3  ;;  %v992_v11 = vadd.f32 %v991_v1, %v865_v46  ;;  %v627_v12 = vadd.f32 %v1803_v36, %v626_v5  ;;  %v1063_v13 = vmul.f32 %v866_v3, %v866_v3  ;;  %v754_v46 = vpop.f32.mrf.mxu1 }
  0xf4   : > { %v869_v14 = vmax.f32 %v635_v4, 0.0  ;;  %v1442_v15 = vpop.f32.mrf.mxu0  ;;  %962 = vst [vmem:[%s1810_s28 + $0x120] sm:$0xff] %v1857_v44  ;;  %v1864_v52 = vmax.f32 %v763_v45, 0.0  ;;  %v755_v53 = vadd.f32 %v1803_v36, %v754_v46 }
  0xf5   : > { %v993_v19 = vadd.f32 %v992_v11, %v866_v3  ;;  %v1125_v20 = vadd.f32 %v1124_v10, %v1062_v9  ;;  %v867_v21 = vmax.f32 %v627_v12, 0.0  ;;  %v648_v22 = vadd.f32 %v1442_v15, %v1803_v36  ;;  %v1474_v54 = vpop.f32.mrf.mxu1 }
  0xf6   : > { %933 = vst [vmem:[%s1810_s28 + $0x38] sm:$0xff] %v869_v14  ;;  %v639_v23 = vpop.f32.mrf.mxu0  ;;  %v1066_v41 = vmul.f32 %v869_v14, %v869_v14  ;;  %965 = vst [vmem:[%s1810_s28 + $0x138] sm:$0xff] %v1864_v52  ;;  %v1871_v62 = vmax.f32 %v755_v53, 0.0  ;;  %v776_v63 = vadd.f32 %v1474_v54, %v1803_v36 }
  0xf7   : > { %v1126_v27 = vadd.f32 %v1125_v20, %v1063_v13  ;;  %931 = vst [vmem:[%s1810_s28 + $0x28] sm:$0xff] %v867_v21  ;;  %v994_v28 = vadd.f32 %v993_v19, %v867_v21  ;;  %v1064_v29 = vmul.f32 %v867_v21, %v867_v21  ;;  %v872_v30 = vmax.f32 %v648_v22, 0.0  ;;  %v767_v0 = vpop.f32.mrf.mxu1 }
  0xf8   : > { %v640_v31 = vadd.f32 %v1803_v36, %v639_v23  ;;  %v1443_v32 = vpop.f32.mrf.mxu0  ;;  %963 = vst [vmem:[%s1810_s28 + $0x128] sm:$0xff] %v1871_v62  ;;  %v1878_v9 = vmax.f32 %v776_v63, 0.0  ;;  %v768_v10 = vadd.f32 %v1803_v36, %v767_v0 }
  0xf9   : > { %v995_v38 = vadd.f32 %v994_v28, %v868_v58  ;;  %v1127_v39 = vadd.f32 %v1126_v27, %v1064_v29  ;;  %936 = vst [vmem:[%s1810_s28 + $0x50] sm:$0xff] %v872_v30  ;;  %v651_v40 = vadd.f32 %v1443_v32, %v1803_v36  ;;  %v1069_v5 = vmul.f32 %v872_v30, %v872_v30  ;;  %v1475_v11 = vpop.f32.mrf.mxu1 }
  0xfa   : > { %v870_v42 = vmax.f32 %v640_v31, 0.0  ;;  %v642_v43 = vpop.f32.mrf.mxu0  ;;  %968 = vst [vmem:[%s1810_s28 + $0x150] sm:$0xff] %v1878_v9  ;;  %v1885_v18 = vmax.f32 %v768_v10, 0.0  ;;  %v779_v19 = vadd.f32 %v1475_v11, %v1803_v36 }
  0xfb   : > { %v1128_v47 = vadd.f32 %v1127_v39, %v1065_v37  ;;  %v996_v48 = vadd.f32 %v995_v38, %v869_v14  ;;  %v873_v49 = vmax.f32 %v651_v40, 0.0  ;;  %v643_v50 = vadd.f32 %v1803_v36, %v642_v43  ;;  %v770_v20 = vpop.f32.mrf.mxu1 }
  0xfc   : > { %934 = vst [vmem:[%s1810_s28 + $0x40] sm:$0xff] %v870_v42  ;;  %v1446_v51 = vpop.f32.mrf.mxu0  ;;  %v1067_v56 = vmul.f32 %v870_v42, %v870_v42  ;;  %966 = vst [vmem:[%s1810_s28 + $0x140] sm:$0xff] %v1885_v18  ;;  %v1892_v28 = vmax.f32 %v779_v19, 0.0  ;;  %v771_v29 = vadd.f32 %v1803_v36, %v770_v20 }
  0xfd   : > { %v997_v55 = vadd.f32 %v996_v48, %v870_v42  ;;  %v1129_v57 = vadd.f32 %v1128_v47, %v1066_v41  ;;  %937 = vst [vmem:[%s1810_s28 + $0x58] sm:$0xff] %v873_v49  ;;  %v871_v58 = vmax.f32 %v643_v50, 0.0  ;;  %v664_v59 = vadd.f32 %v1446_v51, %v1803_v36 }
  0xfe   : > { %v655_v60 = vpop.f32.mrf.mxu0  ;;  %v1070_v21 = vmul.f32 %v873_v49, %v873_v49  ;;  %969 = vst [vmem:[%s1810_s28 + $0x158] sm:$0xff] %v1892_v28  ;;  %v1899_v39 = vmax.f32 %v771_v29, 0.0 }
  0xff   : > { %v1130_v1 = vadd.f32 %v1129_v57, %v1067_v56  ;;  %935 = vst [vmem:[%s1810_s28 + $0x48] sm:$0xff] %v871_v58  ;;  %v998_v2 = vadd.f32 %v997_v55, %v871_v58  ;;  %v1068_v3 = vmul.f32 %v871_v58, %v871_v58  ;;  %v656_v4 = vadd.f32 %v1803_v36, %v655_v60 }
 0x100   : > { %v876_v7 = vmax.f32 %v664_v59, 0.0  ;;  %v1447_v8 = vpop.f32.mrf.mxu0  ;;  %967 = vst [vmem:[%s1810_s28 + $0x148] sm:$0xff] %v1899_v39 }
 0x101   : > { %v999_v12 = vadd.f32 %v998_v2, %v872_v30  ;;  %v1131_v13 = vadd.f32 %v1130_v1, %v1068_v3  ;;  %v874_v14 = vmax.f32 %v656_v4, 0.0  ;;  %v667_v15 = vadd.f32 %v1447_v8, %v1803_v36  ;;  %v1478_v30 = vpop.f32.mrf.mxu1 }
 0x102   : > { %940 = vst [vmem:[%s1810_s28 + $0x70] sm:$0xff] %v876_v7  ;;  %v658_v17 = vpop.f32.mrf.mxu0  ;;  %v792_v40 = vadd.f32 %v1478_v30, %v1803_v36  ;;  %v1073_v56 = vmul.f32 %v876_v7, %v876_v7 }
 0x103   : > { %v1132_v22 = vadd.f32 %v1131_v13, %v1069_v5  ;;  %938 = vst [vmem:[%s1810_s28 + $0x60] sm:$0xff] %v874_v14  ;;  %v1000_v23 = vadd.f32 %v999_v12, %v873_v49  ;;  %v877_v25 = vmax.f32 %v667_v15, 0.0  ;;  %v659_v26 = vadd.f32 %v1803_v36, %v658_v17  ;;  %v783_v41 = vpop.f32.mrf.mxu1 }
 0x104   : > { %v1450_v27 = vpop.f32.mrf.mxu0  ;;  %v1071_v32 = vmul.f32 %v874_v14, %v874_v14  ;;  %v784_v46 = vadd.f32 %v1803_v36, %v783_v41  ;;  %v1907_v50 = vmax.f32 %v792_v40, 0.0 }
 0x105   : > { %v1001_v31 = vadd.f32 %v1000_v23, %v874_v14  ;;  %v1133_v34 = vadd.f32 %v1132_v22, %v1070_v21  ;;  %941 = vst [vmem:[%s1810_s28 + $0x78] sm:$0xff] %v877_v25  ;;  %v680_v35 = vadd.f32 %v1450_v27, %v1803_v36  ;;  %v875_v37 = vmax.f32 %v659_v26, 0.0  ;;  %v1479_v51 = vpop.f32.mrf.mxu1 }
 0x106   : > { %v671_v38 = vpop.f32.mrf.mxu0  ;;  %v1911_v55 = vmax.f32 %v784_v46, 0.0  ;;  %972 = vst [vmem:[%s1810_s28 + $0x170] sm:$0xff] %v1907_v50  ;;  %v795_v60 = vadd.f32 %v1479_v51, %v1803_v36  ;;  %v1074_v0 = vmul.f32 %v877_v25, %v877_v25 }
 0x107   : > { %v1134_v42 = vadd.f32 %v1133_v34, %v1071_v32  ;;  %v880_v43 = vmax.f32 %v680_v35, 0.0  ;;  %v672_v45 = vadd.f32 %v1803_v36, %v671_v38  ;;  %939 = vst [vmem:[%s1810_s28 + $0x68] sm:$0xff] %v875_v37  ;;  %v1002_v47 = vadd.f32 %v1001_v31, %v875_v37  ;;  %v786_v63 = vpop.f32.mrf.mxu1 }
 0x108   : > { %v1072_v48 = vmul.f32 %v875_v37, %v875_v37  ;;  %v1451_v49 = vpop.f32.mrf.mxu0  ;;  %970 = vst [vmem:[%s1810_s28 + $0x160] sm:$0xff] %v1911_v55  ;;  %v787_v8 = vadd.f32 %v1803_v36, %v786_v63 }
 0x109   : > { %944 = vst [vmem:[%s1810_s28 + $0x90] sm:$0xff] %v880_v43  ;;  %v878_v53 = vmax.f32 %v672_v45, 0.0  ;;  %v683_v54 = vadd.f32 %v1451_v49, %v1803_v36  ;;  %v1003_v57 = vadd.f32 %v1002_v47, %v876_v7  ;;  %v1920_v7 = vmax.f32 %v795_v60, 0.0  ;;  %v1482_v10 = vpop.f32.mrf.mxu1 }
 0x10a   : > { %v1135_v58 = vadd.f32 %v1134_v42, %v1072_v48  ;;  %v674_v59 = vpop.f32.mrf.mxu0  ;;  %v808_v13 = vadd.f32 %v1482_v10, %v1803_v36  ;;  %v1928_v20 = vmax.f32 %v787_v8, 0.0  ;;  %v1077_v34 = vmul.f32 %v880_v43, %v880_v43 }
 0x10b   : > { %942 = vst [vmem:[%s1810_s28 + $0x80] sm:$0xff] %v878_v53  ;;  %v881_v1 = vmax.f32 %v683_v54, 0.0  ;;  %v675_v2 = vadd.f32 %v1803_v36, %v674_v59  ;;  %v1004_v4 = vadd.f32 %v1003_v57, %v877_v25  ;;  %v1075_v15 = vmul.f32 %v878_v53, %v878_v53  ;;  %973 = vst [vmem:[%s1810_s28 + $0x178] sm:$0xff] %v1920_v7  ;;  %v799_v21 = vpop.f32.mrf.mxu1 }
 0x10c   : > { %v1136_v3 = vadd.f32 %v1135_v58, %v1073_v56  ;;  %v1454_v5 = vpop.f32.mrf.mxu0  ;;  %v1932_v26 = vmax.f32 %v808_v13, 0.0  ;;  %971 = vst [vmem:[%s1810_s28 + $0x168] sm:$0xff] %v1928_v20  ;;  %v800_v31 = vadd.f32 %v1803_v36, %v799_v21 }
 0x10d   : > { %945 = vst [vmem:[%s1810_s28 + $0x98] sm:$0xff] %v881_v1  ;;  %v879_v11 = vmax.f32 %v675_v2, 0.0  ;;  %v696_v12 = vadd.f32 %v1454_v5, %v1803_v36  ;;  %v1005_v14 = vadd.f32 %v1004_v4, %v878_v53  ;;  %v1483_v32 = vpop.f32.mrf.mxu1  ;;  %v1078_v51 = vmul.f32 %v881_v1, %v881_v1 }
 0x10e   : > { %v1137_v17 = vadd.f32 %v1136_v3, %v1074_v0  ;;  %v687_v19 = vpop.f32.mrf.mxu0  ;;  %976 = vst [vmem:[%s1810_s28 + $0x190] sm:$0xff] %v1932_v26  ;;  %v1941_v42 = vmax.f32 %v800_v31, 0.0  ;;  %v811_v45 = vadd.f32 %v1483_v32, %v1803_v36 }
 0x10f   : > { %943 = vst [vmem:[%s1810_s28 + $0x88] sm:$0xff] %v879_v11  ;;  %v1076_v22 = vmul.f32 %v879_v11, %v879_v11  ;;  %v884_v23 = vmax.f32 %v696_v12, 0.0  ;;  %v688_v25 = vadd.f32 %v1803_v36, %v687_v19  ;;  %v1006_v29 = vadd.f32 %v1005_v14, %v879_v11  ;;  %v802_v46 = vpop.f32.mrf.mxu1 }
 0x110   : > { %v1138_v27 = vadd.f32 %v1137_v17, %v1075_v15  ;;  %v1455_v30 = vpop.f32.mrf.mxu0  ;;  %v803_v49 = vadd.f32 %v1803_v36, %v802_v46  ;;  %974 = vst [vmem:[%s1810_s28 + $0x180] sm:$0xff] %v1941_v42  ;;  %v1949_v56 = vmax.f32 %v811_v45, 0.0 }
 0x111   : > { %948 = vst [vmem:[%s1810_s28 + $0xb0] sm:$0xff] %v884_v23  ;;  %v882_v35 = vmax.f32 %v688_v25, 0.0  ;;  %v699_v37 = vadd.f32 %v1455_v30, %v1803_v36  ;;  %v1007_v38 = vadd.f32 %v1006_v29, %v880_v43  ;;  %v1486_v57 = vpop.f32.mrf.mxu1  ;;  %v1081_v25 = vmul.f32 %v884_v23, %v884_v23 }
 0x112   : > { %v1139_v40 = vadd.f32 %v1138_v27, %v1076_v22  ;;  %v690_v41 = vpop.f32.mrf.mxu0  ;;  %v1953_v60 = vmax.f32 %v803_v49, 0.0  ;;  %977 = vst [vmem:[%s1810_s28 + $0x198] sm:$0xff] %v1949_v56 }
 0x113   : > { %946 = vst [vmem:[%s1810_s28 + $0xa0] sm:$0xff] %v882_v35  ;;  %v885_v47 = vmax.f32 %v699_v37, 0.0  ;;  %v691_v48 = vadd.f32 %v1803_v36, %v690_v41  ;;  %v1008_v54 = vadd.f32 %v1007_v38, %v881_v1  ;;  %v1079_v0 = vmul.f32 %v882_v35, %v882_v35  ;;  %v815_v4 = vpop.f32.mrf.mxu1 }
 0x114   : > { %v1140_v53 = vadd.f32 %v1139_v40, %v1077_v34  ;;  %v1458_v43 = vpop.f32.mrf.mxu0  ;;  %v824_v1 = vadd.f32 %v1486_v57, %v1803_v36  ;;  %975 = vst [vmem:[%s1810_s28 + $0x188] sm:$0xff] %v1953_v60  ;;  %v816_v15 = vadd.f32 %v1803_v36, %v815_v4 }
 0x115   : > { %949 = vst [vmem:[%s1810_s28 + $0xb8] sm:$0xff] %v885_v47  ;;  %v883_v58 = vmax.f32 %v691_v48, 0.0  ;;  %v712_v59 = vadd.f32 %v1458_v43, %v1803_v36  ;;  %v1009_v63 = vadd.f32 %v1008_v54, %v882_v35  ;;  %v1487_v17 = vpop.f32.mrf.mxu1  ;;  %v1082_v38 = vmul.f32 %v885_v47, %v885_v47 }
 0x116   : > { %v1141_v2 = vadd.f32 %v1140_v53, %v1078_v51  ;;  %v703_v3 = vpop.f32.mrf.mxu0  ;;  %v1962_v14 = vmax.f32 %v824_v1, 0.0  ;;  %v827_v22 = vadd.f32 %v1487_v17, %v1803_v36  ;;  %v1970_v31 = vmax.f32 %v816_v15, 0.0 }
 0x117   : > { %947 = vst [vmem:[%s1810_s28 + $0xa8] sm:$0xff] %v883_v58  ;;  %v1080_v5 = vmul.f32 %v883_v58, %v883_v58  ;;  %v888_v8 = vmax.f32 %v712_v59, 0.0  ;;  %v704_v10 = vadd.f32 %v1803_v36, %v703_v3  ;;  %v1010_v12 = vadd.f32 %v1009_v63, %v883_v58  ;;  %v818_v32 = vpop.f32.mrf.mxu1 }
 0x118   : > { %v1142_v11 = vadd.f32 %v1141_v2, %v1079_v0  ;;  %v1459_v13 = vpop.f32.mrf.mxu0  ;;  %980 = vst [vmem:[%s1810_s28 + $0x1b0] sm:$0xff] %v1962_v14  ;;  %v1974_v37 = vmax.f32 %v827_v22, 0.0  ;;  %978 = vst [vmem:[%s1810_s28 + $0x1a0] sm:$0xff] %v1970_v31  ;;  %v819_v45 = vadd.f32 %v1803_v36, %v818_v32 }
 0x119   : > { %952 = vst [vmem:[%s1810_s28 + $0xd0] sm:$0xff] %v888_v8  ;;  %v886_v19 = vmax.f32 %v704_v10, 0.0  ;;  %v715_v21 = vadd.f32 %v1459_v13, %v1803_v36  ;;  %v1011_v27 = vadd.f32 %v1010_v12, %v884_v23  ;;  %v1490_v46 = vpop.f32.mrf.mxu1  ;;  %v1085_v15 = vmul.f32 %v888_v8, %v888_v8 }
 0x11a   : > { %v1143_v29 = vadd.f32 %v1142_v11, %v1080_v5  ;;  %v706_v30 = vpop.f32.mrf.mxu0  ;;  %981 = vst [vmem:[%s1810_s28 + $0x1b8] sm:$0xff] %v1974_v37  ;;  %v840_v57 = vadd.f32 %v1490_v46, %v1803_v36 }
 0x11b   : > { %950 = vst [vmem:[%s1810_s28 + $0xc0] sm:$0xff] %v886_v19  ;;  %v889_v34 = vmax.f32 %v715_v21, 0.0  ;;  %v707_v35 = vadd.f32 %v1803_v36, %v706_v30  ;;  %v1012_v41 = vadd.f32 %v1011_v27, %v885_v47  ;;  %v1083_v48 = vmul.f32 %v886_v19, %v886_v19  ;;  %v831_v58 = vpop.f32.mrf.mxu1 }
 0x11c   : > { %v1144_v40 = vadd.f32 %v1143_v29, %v1081_v25  ;;  %v1462_v23 = vpop.f32.mrf.mxu0  ;;  %v1983_v47 = vmax.f32 %v819_v45, 0.0  ;;  %v832_v2 = vadd.f32 %v1803_v36, %v831_v58  ;;  %v1991_v5 = vmax.f32 %v840_v57, 0.0 }
 0x11d   : > { %953 = vst [vmem:[%s1810_s28 + $0xd8] sm:$0xff] %v889_v34  ;;  %v887_v49 = vmax.f32 %v707_v35, 0.0  ;;  %v728_v51 = vadd.f32 %v1462_v23, %v1803_v36  ;;  %v1013_v53 = vadd.f32 %v1012_v41, %v886_v19  ;;  %v1491_v10 = vpop.f32.mrf.mxu1  ;;  %v1086_v27 = vmul.f32 %v889_v34, %v889_v34 }
 0x11e   : > { %v1145_v54 = vadd.f32 %v1144_v40, %v1082_v38  ;;  %v719_v43 = vpop.f32.mrf.mxu0  ;;  %979 = vst [vmem:[%s1810_s28 + $0x1a8] sm:$0xff] %v1983_v47  ;;  %v1995_v13 = vmax.f32 %v832_v2, 0.0  ;;  %984 = vst [vmem:[%s1810_s28 + $0x1d0] sm:$0xff] %v1991_v5  ;;  %v843_v22 = vadd.f32 %v1491_v10, %v1803_v36 }
 0x11f   : > { %951 = vst [vmem:[%s1810_s28 + $0xc8] sm:$0xff] %v887_v49  ;;  %v1084_v59 = vmul.f32 %v887_v49, %v887_v49  ;;  %v892_v63 = vmax.f32 %v728_v51, 0.0  ;;  %v720_v0 = vadd.f32 %v1803_v36, %v719_v43  ;;  %v1014_v1 = vadd.f32 %v1013_v53, %v887_v49  ;;  %v834_v25 = vpop.f32.mrf.mxu1 }
 0x120   : > { %v1146_v3 = vadd.f32 %v1145_v54, %v1083_v48  ;;  %v1463_v4 = vpop.f32.mrf.mxu0  ;;  %982 = vst [vmem:[%s1810_s28 + $0x1c0] sm:$0xff] %v1995_v13  ;;  %v835_v38 = vadd.f32 %v1803_v36, %v834_v25 }
 0x121   : > { %956 = vst [vmem:[%s1810_s28 + $0xf0] sm:$0xff] %v892_v63  ;;  %v890_v11 = vmax.f32 %v720_v0, 0.0  ;;  %v731_v12 = vadd.f32 %v1463_v4, %v1803_v36  ;;  %v1015_v17 = vadd.f32 %v1014_v1, %v888_v8  ;;  %v2004_v8 = vmax.f32 %v843_v22, 0.0  ;;  %v1494_v40 = vpop.f32.mrf.mxu1 }
 0x122   : > { %v1147_v19 = vadd.f32 %v1146_v3, %v1084_v59  ;;  %v722_v21 = vpop.f32.mrf.mxu0  ;;  %v856_v23 = vadd.f32 %v1494_v40, %v1803_v36  ;;  %v2011_v49 = vmax.f32 %v835_v38, 0.0  ;;  %v1089_v2 = vmul.f32 %v892_v63, %v892_v63 }
 0x123   : > { %954 = vst [vmem:[%s1810_s28 + $0xe0] sm:$0xff] %v890_v11  ;;  %v893_v29 = vmax.f32 %v731_v12, 0.0  ;;  %v723_v30 = vadd.f32 %v1803_v36, %v722_v21  ;;  %v1016_v35 = vadd.f32 %v1015_v17, %v889_v34  ;;  %v1087_v46 = vmul.f32 %v890_v11, %v890_v11  ;;  %985 = vst [vmem:[%s1810_s28 + $0x1d8] sm:$0xff] %v2004_v8  ;;  %v847_v51 = vpop.f32.mrf.mxu1 }
 0x124   : > { %v1148_v32 = vadd.f32 %v1147_v19, %v1085_v15  ;;  %v2014_v53 = vmax.f32 %v856_v23, 0.0  ;;  %v848_v54 = vadd.f32 %v1803_v36, %v847_v51  ;;  %983 = vst [vmem:[%s1810_s28 + $0x1c8] sm:$0xff] %v2011_v49  ;;  %v1091_v21 = vmul.f32 %v1829_v6, %v1829_v6 }
 0x125   : > { %957 = vst [vmem:[%s1810_s28 + $0xf8] sm:$0xff] %v893_v29  ;;  %v891_v41 = vmax.f32 %v723_v30, 0.0  ;;  %v1017_v45 = vadd.f32 %v1016_v35, %v890_v11  ;;  %v1495_v58 = vpop.f32.mrf.mxu1  ;;  %v1090_v12 = vmul.f32 %v893_v29, %v893_v29  ;;  %v1094_v35 = vmul.f32 %v1836_v16, %v1836_v16 }
 0x126   : > { %v1149_v48 = vadd.f32 %v1148_v32, %v1086_v27  ;;  %988 = vst [vmem:[%s1810_s28 + $0x1f0] sm:$0xff] %v2014_v53  ;;  %v2021_v59 = vmax.f32 %v848_v54, 0.0  ;;  %v859_v0 = vadd.f32 %v1495_v58, %v1803_v36 }
 0x127   : > { %955 = vst [vmem:[%s1810_s28 + $0xe8] sm:$0xff] %v891_v41  ;;  %v1088_v34 = vmul.f32 %v891_v41, %v891_v41  ;;  %v1018_v57 = vadd.f32 %v1017_v45, %v891_v41  ;;  %v850_v4 = vpop.f32.mrf.mxu1  ;;  %v1095_v41 = vmul.f32 %v1857_v44, %v1857_v44 }
 0x128   : > { %v1150_v43 = vadd.f32 %v1149_v48, %v1087_v46  ;;  %986 = vst [vmem:[%s1810_s28 + $0x1e0] sm:$0xff] %v2021_v59  ;;  %v2026_v10 = vmax.f32 %v859_v0, 0.0  ;;  %v851_v11 = vadd.f32 %v1803_v36, %v850_v4  ;;  %v1092_v36 = vmul.f32 %v1843_v24, %v1843_v24 }
 0x129   : > { %v1019_v3 = vadd.f32 %v1018_v57, %v892_v63  ;;  %v1096_v46 = vmul.f32 %v1871_v62, %v1871_v62  ;;  %v1100_v0 = vmul.f32 %v1899_v39, %v1899_v39 }
 0x12a   : > { %v1151_v1 = vadd.f32 %v1150_v43, %v1088_v34  ;;  %989 = vst [vmem:[%s1810_s28 + $0x1f8] sm:$0xff] %v2026_v10  ;;  %v2031_v19 = vmax.f32 %v851_v11, 0.0  ;;  %v1099_v43 = vmul.f32 %v1885_v18, %v1885_v18  ;;  %v1103_v11 = vmul.f32 %v1911_v55, %v1911_v55 }
 0x12b   : > { %v1020_v17 = vadd.f32 %v1019_v3, %v893_v29  ;;  %v1093_v29 = vmul.f32 %v1822_v61, %v1822_v61 }
 0x12c   : > { %v1152_v15 = vadd.f32 %v1151_v1, %v1089_v2  ;;  %987 = vst [vmem:[%s1810_s28 + $0x1e8] sm:$0xff] %v2031_v19 }
 0x12d   : > { %v1021_v63 = vadd.f32 %v1020_v17, %v1829_v6  ;;  %v1104_v17 = vmul.f32 %v1928_v20, %v1928_v20 }
 0x12e   : > { %v1153_v22 = vadd.f32 %v1152_v15, %v1090_v12 }
 0x12f   : > { %v1022_v25 = vadd.f32 %v1021_v63, %v1843_v24 }
 0x130   : > { %v1154_v27 = vadd.f32 %v1153_v22, %v1091_v21 }
 0x131   : > { %v1023_v30 = vadd.f32 %v1022_v25, %v1822_v61  ;;  %v1097_v61 = vmul.f32 %v1850_v33, %v1850_v33 }
 0x132   : > { %v1155_v32 = vadd.f32 %v1154_v27, %v1092_v36  ;;  %v1107_v36 = vmul.f32 %v1941_v42, %v1941_v42 }
 0x133   : > { %v1024_v6 = vadd.f32 %v1023_v30, %v1836_v16  ;;  %v1098_v16 = vmul.f32 %v1864_v52, %v1864_v52  ;;  %v1108_v30 = vmul.f32 %v1953_v60, %v1953_v60 }
 0x134   : > { %v1156_v38 = vadd.f32 %v1155_v32, %v1093_v29 }
 0x135   : > { %v1025_v40 = vadd.f32 %v1024_v6, %v1857_v44 }
 0x136   : > { %v1157_v23 = vadd.f32 %v1156_v38, %v1094_v35 }
 0x137   : > { %v1026_v45 = vadd.f32 %v1025_v40, %v1871_v62  ;;  %v1111_v40 = vmul.f32 %v1970_v31, %v1970_v31 }
 0x138   : > { %v1158_v24 = vadd.f32 %v1157_v23, %v1095_v41 }
 0x139   : > { %v1027_v48 = vadd.f32 %v1026_v45, %v1850_v33  ;;  %v1101_v33 = vmul.f32 %v1878_v9, %v1878_v9 }
 0x13a   : > { %v1159_v51 = vadd.f32 %v1158_v24, %v1096_v46  ;;  %v1112_v24 = vmul.f32 %v1983_v47, %v1983_v47 }
 0x13b   : > { %v1028_v54 = vadd.f32 %v1027_v48, %v1864_v52  ;;  %v1102_v52 = vmul.f32 %v1892_v28, %v1892_v28 }
 0x13c   : > { %v1160_v34 = vadd.f32 %v1159_v51, %v1097_v61  ;;  %v1115_v51 = vmul.f32 %v1995_v13, %v1995_v13 }
 0x13d   : > { %v1029_v44 = vadd.f32 %v1028_v54, %v1885_v18  ;;  %v1116_v54 = vmul.f32 %v2011_v49, %v2011_v49 }
 0x13e   : > { %v1161_v57 = vadd.f32 %v1160_v34, %v1098_v16 }
 0x13f   : > { %v1030_v62 = vadd.f32 %v1029_v44, %v1899_v39 }
 0x140   : > { %v1162_v58 = vadd.f32 %v1161_v57, %v1099_v43 }
 0x141   : > { %v1031_v2 = vadd.f32 %v1030_v62, %v1878_v9  ;;  %v1105_v9 = vmul.f32 %v1907_v50, %v1907_v50  ;;  %v1119_v62 = vmul.f32 %v2021_v59, %v2021_v59 }
 0x142   : > { %v1163_v3 = vadd.f32 %v1162_v58, %v1100_v0 }
 0x143   : > { %v1032_v4 = vadd.f32 %v1031_v2, %v1892_v28  ;;  %v1106_v28 = vmul.f32 %v1920_v7, %v1920_v7  ;;  %v1121_v2 = vmul.f32 %v2014_v53, %v2014_v53 }
 0x144   : > { %v1164_v1 = vadd.f32 %v1163_v3, %v1101_v33 }
 0x145   : > { %v1033_v18 = vadd.f32 %v1032_v4, %v1911_v55 }
 0x146   : > { %v1165_v12 = vadd.f32 %v1164_v1, %v1102_v52 }
 0x147   : > { %v1034_v39 = vadd.f32 %v1033_v18, %v1928_v20 }
 0x148   : > { %v1166_v15 = vadd.f32 %v1165_v12, %v1103_v11 }
 0x149   : > { %v1035_v21 = vadd.f32 %v1034_v39, %v1907_v50  ;;  %v1109_v50 = vmul.f32 %v1932_v26, %v1932_v26 }
 0x14a   : > { %v1167_v63 = vadd.f32 %v1166_v15, %v1104_v17  ;;  %v1192_v15 = vlaneseq }
 0x14b   : > { %v1036_v25 = vadd.f32 %v1035_v21, %v1920_v7  ;;  %v1110_v7 = vmul.f32 %v1949_v56, %v1949_v56 }
 0x14c   : > { %v1168_v22 = vadd.f32 %v1167_v63, %v1105_v9 }
 0x14d   : > { %v1037_v55 = vadd.f32 %v1036_v25, %v1941_v42 }
 0x14e   : > { %v1169_v27 = vadd.f32 %v1168_v22, %v1106_v28 }
 0x14f   : > { %v1038_v20 = vadd.f32 %v1037_v55, %v1953_v60 }
 0x150   : > { %v1170_v29 = vadd.f32 %v1169_v27, %v1107_v36 }
 0x151   : > { %v1039_v32 = vadd.f32 %v1038_v20, %v1932_v26  ;;  %v1113_v26 = vmul.f32 %v1962_v14, %v1962_v14 }
 0x152   : > { %v1171_v35 = vadd.f32 %v1170_v29, %v1108_v30 }
 0x153   : > { %v1040_v6 = vadd.f32 %v1039_v32, %v1949_v56  ;;  %v1114_v56 = vmul.f32 %v1974_v37, %v1974_v37 }
 0x154   : > { %v1172_v38 = vadd.f32 %v1171_v35, %v1109_v50 }
 0x155   : > { %v1041_v42 = vadd.f32 %v1040_v6, %v1970_v31 }
 0x156   : > { %v1173_v41 = vadd.f32 %v1172_v38, %v1110_v7 }
 0x157   : > { %v1042_v60 = vadd.f32 %v1041_v42, %v1983_v47 }
 0x158   : > { %v1174_v23 = vadd.f32 %v1173_v41, %v1111_v40 }
 0x159   : > { %v1043_v45 = vadd.f32 %v1042_v60, %v1962_v14  ;;  %v1117_v14 = vmul.f32 %v1991_v5, %v1991_v5 }
 0x15a   : > { %v1175_v46 = vadd.f32 %v1174_v23, %v1112_v24 }
 0x15b   : > { %v1044_v48 = vadd.f32 %v1043_v45, %v1974_v37  ;;  %v1118_v37 = vmul.f32 %v2004_v8, %v2004_v8 }
 0x15c   : > { %v1176_v61 = vadd.f32 %v1175_v46, %v1113_v26 }
 0x15d   : > { %v1045_v31 = vadd.f32 %v1044_v48, %v1995_v13 }
 0x15e   : > { %v1177_v16 = vadd.f32 %v1176_v61, %v1114_v56 }
 0x15f   : > { %v1046_v47 = vadd.f32 %v1045_v31, %v2011_v49 }
 0x160   : > { %v1178_v34 = vadd.f32 %v1177_v16, %v1115_v51 }
 0x161   : > { %v1047_v44 = vadd.f32 %v1046_v47, %v1991_v5  ;;  %v1120_v5 = vmul.f32 %v2031_v19, %v2031_v19 }
 0x162   : > { %v1179_v43 = vadd.f32 %v1178_v34, %v1116_v54 }
 0x163   : > { %v1048_v58 = vadd.f32 %v1047_v44, %v2004_v8  ;;  %v1122_v8 = vmul.f32 %v2026_v10, %v2026_v10 }
 0x164   : > { %v1180_v57 = vadd.f32 %v1179_v43, %v1117_v14 }
 0x165   : > { %v1049_v13 = vadd.f32 %v1048_v58, %v2021_v59 }
 0x166   : > { %v1181_v0 = vadd.f32 %v1180_v57, %v1118_v37 }
 0x167   : > { %v1050_v33 = vadd.f32 %v1049_v13, %v2031_v19 }
 0x168   : > { %v1182_v49 = vadd.f32 %v1181_v0, %v1119_v62 }
 0x169   : > { %v1051_v3 = vadd.f32 %v1050_v33, %v2014_v53  ;;  %v1193_v53 = vshrl.u32 %v1192_v15, 7 }
 0x16a   : > { %v1183_v52 = vadd.f32 %v1182_v49, %v1120_v5 }
 0x16b   : > { %v1052_v1 = vadd.f32 %v1051_v3, %v2026_v10  ;;  %vm1195_vm1 = vcmp.eq.s32.totalorder %v1193_v53, 1  ;;  %vm1194_vm2 = vcmp.eq.s32.totalorder %v1193_v53, 0 }
 0x16c   : > { %v1184_v4 = vadd.f32 %v1183_v52, %v1121_v2 }
 0x16d   : > { %v1053_v59 = vrot.slane %v1052_v1, 4 }
 0x16e   : > { %v1185_v18 = vadd.f32 %v1184_v4, %v1122_v8 }
 0x16f   : > { %v1054_v11 = vadd.f32 %v1053_v59, %v1052_v1 }
 0x170   : > { %v1186_v12 = vrot.slane %v1185_v18, 4 }
 0x171   : > { %v1055_v19 = vrot.slane %v1054_v11, 2 }
 0x172   : > { %v1187_v39 = vadd.f32 %v1186_v12, %v1185_v18 }
 0x173   : > { %v1056_v17 = vadd.f32 %v1055_v19, %v1054_v11 }
 0x174   : > { %v1188_v9 = vrot.slane %v1187_v39, 2 }
 0x175   : > { %v1057_v63 = vrot.slane %v1056_v17, 1 }
 0x176   : > { %v1189_v21 = vadd.f32 %v1188_v9, %v1187_v39 }
 0x177   : > { %v1058_v22 = vadd.f32 %v1057_v63, %v1056_v17 }
 0x178   : > { %v1190_v28 = vrot.slane %v1189_v21, 1 }
 0x17a   : > { %v1191_v10 = vadd.f32 %v1190_v28, %v1189_v21 }
 0x17c   : > { %v1196_v25 = vsel %vm1195_vm1, %v1191_v10, 0.0 }
 0x17d   : > { %v1197_v55 = vsel %vm1194_vm2, %v1058_v22, %v1196_v25 }
 0x17e   : > { %1198 = vst [vmem:[%s199_s6] sm:$0xff] %v1197_v55 }
 0x17f   : > { %1592 = shalt.err (!%p1589_p3)
}
 0x180   : > { %s1593_s20 = scalar_lea.hbm %s2136_s10, 128  ;;  %s1597_s27 = scalar_lea.hbm %s2175_s4, 256 }
 0x181   : > { %p1594_p4 = scmp.ne.s32.totalorder %s2136_s10, %s1593_s20  ;;  %p1598_p9 = scmp.lt.s32.totalorder %s2136_s10, %s2175_s4 }
 0x182   : > { %p1599_p10 = scmp.lt.s32.totalorder %s1597_s27, %s1593_s20 }
 0x183   : > { %p1595_p7 = pnand %p1594_p4, %p1705_p5 }
 0x184   : > { %p1600_p11 = por %p1599_p10, %p1598_p9 }
 0x185   : > { %p1596_p8 = pneg %p1595_p7 }
 0x187   : > { %p1601_p12 = pnand %p1600_p11, %p1596_p8 }
 0x189   : > { %1604 = shalt.err (!%p1601_p12)
}
 0x18a   : > { %1504 = dma.vmem_to_hbm [thread:$0]  (%p1705_p5), %s1223_s7, 128, %s2136_s10, %s1205_s11  }
 0x18b PF: > { %p1510_p13 = scmp.ge.s32.totalorder %s1639_s18, 2  ;;  %s1242_s30 = sand.u32 1, %s1627_s15  }
 0x18c   : > { %s1243_s5 = scalar_lea.sflag [#allocation3], %s1242_s30 }
 0x18d   : > { %p1507_p0 = pnand %p1510_p13, %p1709_p6 }
 0x18f   : > { %p1508_p1 = pneg %p1507_p0 }
 0x191   : > { %1622 = dma.done.wait (%p1508_p1), %s1243_s5, 128  }
 0x192   : > { %1624 = vsyncadd (%p1508_p1), %s1243_s5, 4294967168  ;;  %p15_p2 = scmp.ge.s32.totalorder %s1692_s21, 4   ;;  %s2178_s15 = smov %s1631_s16 }
 0x193   : > { %s2179_s16 = smov %s1635_s17  ;;  %s2180_s17 = smov %s1703_s24 }
 0x194   : > { %s2181_s18 = smov %s1692_s21  ;;  %17 = sbr.rel (!%p15_p2) target bundleno = 3 (0x3), region = 79 }
 0x199   :  { %1248 = vsyncpa [#allocation3], 1 }
 0x19a   :  { %1250 = vsyncpa [#allocation3 + $0x1], 1 }

</bundles_post_ra>
